<compile_context>
chip_gen: v7x
topology: tpu7x:2x2x1
jax: 0.10.0
libtpu: 0.0.40
codegen_flags: <defaults>
</compile_context>

<pallas_src>
import functools

import jax
import jax.numpy as jnp
from jax.experimental import pallas as pl
from jax.experimental.pallas import tpu as pltpu


def _silu(x):
    return x * jax.nn.sigmoid(x)


# ----------------------------- Pallas kernels ------------------------------

def _conv1_time_silu_kernel(x_ref, w_ref, b_ref, t_ref, wt_ref, bt_ref, o_ref, *, H, W):
    """h = SiLU(conv3x3(x) + b1) + (SiLU(t_emb[n]) @ Wt + bt); one image per grid step.

    x_ref : (1, H+2, W+2, Cin)  zero-padded channels-last input tile
    w_ref : (9, Cin, Cout)      conv taps, index kh*3+kw
    t_ref : (N, T)              raw time embedding (time MLP fused here; no HBM `tadd`)
    o_ref : (1, H, W, Cout)
    """
    cin = x_ref.shape[-1]
    cout = o_ref.shape[-1]
    xv = x_ref[0]                                            # (H+2, W+2, Cin)

    # In-kernel patch assembly: 9 shifted-slice taps, accumulated on the MXU in f32.
    acc = jnp.zeros((H * W, cout), jnp.float32)
    for kh in range(3):
        for kw in range(3):
            tap = xv[kh:kh + H, kw:kw + W, :].reshape(H * W, cin)
            acc = acc + jnp.dot(tap, w_ref[kh * 3 + kw],
                                preferred_element_type=jnp.float32)
    h = _silu(acc + b_ref[...])

    # Fused time-embedding MLP (f32); select this image's row with a one-hot reduce.
    tall = jnp.dot(_silu(t_ref[...].astype(jnp.float32)), wt_ref[...],
                   preferred_element_type=jnp.float32) + bt_ref[...]        # (N, Cout)
    sel = jax.lax.broadcasted_iota(jnp.int32, tall.shape, 0) == pl.program_id(0)
    tproj = jnp.sum(jnp.where(sel, tall, 0.0), axis=0, keepdims=True)       # (1, Cout)

    o_ref[...] = (h + tproj).reshape(1, H, W, cout).astype(o_ref.dtype)


def _conv2_silu_skip_kernel(h_ref, w2_ref, b2_ref, x_ref, ws_ref, bs_ref, o_ref, *, H, W):
    """out = SiLU(conv3x3(h) + b2) + (x @ Wskip + bskip); one image per grid step."""
    cmid = h_ref.shape[-1]
    cin = x_ref.shape[-1]
    cout = o_ref.shape[-1]
    hv = h_ref[0]                                            # (H+2, W+2, Cmid)

    acc = jnp.zeros((H * W, cout), jnp.float32)
    for kh in range(3):
        for kw in range(3):
            tap = hv[kh:kh + H, kw:kw + W, :].reshape(H * W, cmid)
            acc = acc + jnp.dot(tap, w2_ref[kh * 3 + kw],
                                preferred_element_type=jnp.float32)
    h = _silu(acc + b2_ref[...])

    # 1x1 skip conv issued back-to-back in the same kernel (no extra HBM round trip).
    xrows = x_ref[0].reshape(H * W, cin)
    skip = jnp.dot(xrows, ws_ref[...], preferred_element_type=jnp.float32) + bs_ref[...]

    o_ref[...] = (h + skip).reshape(1, H, W, cout).astype(o_ref.dtype)


def _downsample_kernel(x_ref, w_ref, b_ref, o_ref, *, HO, WO):
    """4x4 stride-2 pad-1 conv on a parity-split tile; one image per grid step.

    x_ref : (1, 4*(HO+1), WO+1, C)   rows grouped as [parity pq][row i]; Xpq[i,j] = xpad[2i+p, 2j+q]
    w_ref : (16, C, Cout)            tap order ((p*2+q)*2 + a)*2 + b  <->  W[kh=2a+p, kw=2b+q]
    o_ref : (1, HO, WO, Cout)
    """
    c = x_ref.shape[-1]
    cout = o_ref.shape[-1]
    hp = HO + 1
    xv = x_ref[0]

    acc = jnp.zeros((HO * WO, cout), jnp.float32)
    for pq in range(4):
        for a in range(2):
            for b in range(2):
                tap = xv[pq * hp + a: pq * hp + a + HO, b:b + WO, :].reshape(HO * WO, c)
                acc = acc + jnp.dot(tap, w_ref[(pq * 2 + a) * 2 + b],
                                    preferred_element_type=jnp.float32)

    o_ref[...] = (acc + b_ref[...]).reshape(1, HO, WO, cout).astype(o_ref.dtype)


# ------------------------------ weight prep --------------------------------

def _conv3_w(w_oihw, dt):
    # (O, I, 3, 3) -> (9, I, O), tap index kh*3+kw (matches kernel tap order).
    o, i, _, _ = w_oihw.shape
    return jnp.transpose(w_oihw, (2, 3, 1, 0)).reshape(9, i, o).astype(dt)


def _conv1x1_w(w_oihw, dt):
    o, i, _, _ = w_oihw.shape
    return jnp.transpose(w_oihw.reshape(o, i), (1, 0)).astype(dt)


def _conv4_w_taps(w_oihw, dt):
    # (O, I, 4, 4) -> (16, I, O); flat index ((p*2+q)*2+a)*2+b holds W[kh=2a+p, kw=2b+q].
    wt = jnp.transpose(w_oihw, (2, 3, 1, 0))                 # (kh, kw, I, O)
    taps = [wt[2 * a + p, 2 * b + q]
            for p in range(2) for q in range(2) for a in range(2) for b in range(2)]
    return jnp.stack(taps, axis=0).astype(dt)


# ------------------------------ JAX glue -----------------------------------

def _resblock_apply(x, t_emb, p, cdt):
    n, h, w, cin = x.shape
    cout = p["b1"].shape[0]
    par = pltpu.CompilerParams(dimension_semantics=("parallel",))

    xpad = jnp.pad(x, ((0, 0), (1, 1), (1, 1), (0, 0)))      # cheap 1-px halo, no im2col
    w1 = _conv3_w(p["w1"], cdt)
    b1 = p["b1"].reshape(1, cout).astype(jnp.float32)
    wt = p["wt"].astype(jnp.float32)
    bt = p["bt"].reshape(1, cout).astype(jnp.float32)

    h1 = pl.pallas_call(
        functools.partial(_conv1_time_silu_kernel, H=h, W=w),
        out_shape=jax.ShapeDtypeStruct((n, h, w, cout), cdt),
        grid=(n,),
        in_specs=[
            pl.BlockSpec((1, h + 2, w + 2, cin), lambda i: (i, 0, 0, 0)),
            pl.BlockSpec((9, cin, cout), lambda i: (0, 0, 0)),
            pl.BlockSpec((1, cout), lambda i: (0, 0)),
            pl.BlockSpec((n, t_emb.shape[1]), lambda i: (0, 0)),
            pl.BlockSpec((t_emb.shape[1], cout), lambda i: (0, 0)),
            pl.BlockSpec((1, cout), lambda i: (0, 0)),
        ],
        out_specs=pl.BlockSpec((1, h, w, cout), lambda i: (i, 0, 0, 0)),
        compiler_params=par,
    )(xpad, w1, b1, t_emb.astype(jnp.float32), wt, bt)

    h1pad = jnp.pad(h1, ((0, 0), (1, 1), (1, 1), (0, 0)))
    w2 = _conv3_w(p["w2"], cdt)
    b2 = p["b2"].reshape(1, cout).astype(jnp.float32)
    ws = _conv1x1_w(p["wskip"], cdt)
    bs = p["bskip"].reshape(1, cout).astype(jnp.float32)

    out = pl.pallas_call(
        functools.partial(_conv2_silu_skip_kernel, H=h, W=w),
        out_shape=jax.ShapeDtypeStruct((n, h, w, cout), cdt),
        grid=(n,),
        in_specs=[
            pl.BlockSpec((1, h + 2, w + 2, cout), lambda i: (i, 0, 0, 0)),
            pl.BlockSpec((9, cout, cout), lambda i: (0, 0, 0)),
            pl.BlockSpec((1, cout), lambda i: (0, 0)),
            pl.BlockSpec((1, h, w, cin), lambda i: (i, 0, 0, 0)),
            pl.BlockSpec((cin, cout), lambda i: (0, 0)),
            pl.BlockSpec((1, cout), lambda i: (0, 0)),
        ],
        out_specs=pl.BlockSpec((1, h, w, cout), lambda i: (i, 0, 0, 0)),
        compiler_params=par,
    )(h1pad, w2, b2, x, ws, bs)
    return out


def _downsample_apply(x, p, cdt):
    n, h, w, c = x.shape
    cout = p["bd"].shape[0]
    ho, wo = h // 2, w // 2

    xpad = jnp.pad(x, ((0, 0), (1, 1), (1, 1), (0, 0)))
    # Parity split (space-to-depth): Xpq[i, j] = xpad[2i+p, 2j+q]; rows grouped [pq][i].
    xps = xpad.reshape(n, ho + 1, 2, wo + 1, 2, c)
    xps = jnp.transpose(xps, (0, 2, 4, 1, 3, 5)).reshape(n, 4 * (ho + 1), wo + 1, c)

    wd = _conv4_w_taps(p["wd"], cdt)
    bd = p["bd"].reshape(1, cout).astype(jnp.float32)

    return pl.pallas_call(
        functools.partial(_downsample_kernel, HO=ho, WO=wo),
        out_shape=jax.ShapeDtypeStruct((n, ho, wo, cout), cdt),
        grid=(n,),
        in_specs=[
            pl.BlockSpec((1, 4 * (ho + 1), wo + 1, c), lambda i: (i, 0, 0, 0)),
            pl.BlockSpec((16, c, cout), lambda i: (0, 0, 0)),
            pl.BlockSpec((1, cout), lambda i: (0, 0)),
        ],
        out_specs=pl.BlockSpec((1, ho, wo, cout), lambda i: (i, 0, 0, 0)),
        compiler_params=pltpu.CompilerParams(dimension_semantics=("parallel",)),
    )(xps, wd, bd)


def down_block_forward(params, x_nchw, t_emb, *, compute_dtype=jnp.float32):
    """Matches DownBlock.forward: returns (downsampled x, skip), both NCHW float32.

    compute_dtype=jnp.bfloat16 stores activations / matmul operands in bf16 (f32 MXU
    accumulation, f32 bias/SiLU math) to halve DMA bytes and double MXU throughput.
    """
    x = jnp.transpose(x_nchw, (0, 2, 3, 1)).astype(compute_dtype)   # NCHW -> NHWC
    for p in params["resblocks"]:
        x = _resblock_apply(x, t_emb, p, compute_dtype)
    # TODO(synk): use_attention=True path (get_attention) not implemented; default attn=None.
    skip = x
    xd = _downsample_apply(x, params["downsample"], compute_dtype)
    return (jnp.transpose(xd, (0, 3, 1, 2)).astype(jnp.float32),
            jnp.transpose(skip, (0, 3, 1, 2)).astype(jnp.float32))


# -------------------------- params & pure-JAX reference --------------------

def init_down_block_params(key, in_ch, out_ch, time_emb_dim, num_layers=1):
    def nrm(k, shape, scale=0.1):
        return (scale * jax.random.normal(k, shape)).astype(jnp.float32)

    keys = iter(jax.random.split(key, num_layers * 8 + 2))
    params = {"resblocks": []}
    for i in range(num_layers):
        cin = in_ch if i == 0 else out_ch
        params["resblocks"].append({
            "w1": nrm(next(keys), (out_ch, cin, 3, 3)),
            "b1": nrm(next(keys), (out_ch,)),
            "wt": nrm(next(keys), (time_emb_dim, out_ch)),
            "bt": nrm(next(keys), (out_ch,)),
            "w2": nrm(next(keys), (out_ch, out_ch, 3, 3)),
            "b2": nrm(next(keys), (out_ch,)),
            "wskip": nrm(next(keys), (out_ch, cin, 1, 1)),
            "bskip": nrm(next(keys), (out_ch,)),
        })
    params["downsample"] = {
        "wd": nrm(next(keys), (out_ch, out_ch, 4, 4)),
        "bd": nrm(next(keys), (out_ch,)),
    }
    return params


def _ref_conv(x, w, b, stride, pad):
    y = jax.lax.conv_general_dilated(
        x, w, (stride, stride), [(pad, pad), (pad, pad)],
        dimension_numbers=("NCHW", "OIHW", "NCHW"))
    return y + b[None, :, None, None]


def ref_down_block(params, x, t_emb):
    silu = lambda v: v * jax.nn.sigmoid(v)
    for p in params["resblocks"]:
        h = silu(_ref_conv(x, p["w1"], p["b1"], 1, 1))
        tproj = silu(t_emb) @ p["wt"] + p["bt"]
        h = h + tproj[:, :, None, None]
        h = silu(_ref_conv(h, p["w2"], p["b2"], 1, 1))
        x = h + _ref_conv(x, p["wskip"], p["bskip"], 1, 0)
    skip = x
    xd = _ref_conv(x, params["downsample"]["wd"], params["downsample"]["bd"], 2, 1)
    return xd, skip


# ----------------------------------- main -----------------------------------

if __name__ == "__main__":
    N, in_ch, out_ch, H, W, T = 2, 4, 8, 16, 16, 32
    num_layers = 2   # exercises both cin=in_ch (layer 0) and cin=out_ch (layer 1) paths

    key = jax.random.PRNGKey(0)
    kp, kx, kt = jax.random.split(key, 3)
    params = init_down_block_params(kp, in_ch, out_ch, T, num_layers)
    x = jax.random.normal(kx, (N, in_ch, H, W), jnp.float32)
    t_emb = jax.random.normal(kt, (N, T), jnp.float32)

    xd_ref, skip_ref = ref_down_block(params, x, t_emb)

    # exact f32 path
    fwd = jax.jit(functools.partial(down_block_forward, compute_dtype=jnp.float32))
    x_down, skip = fwd(params, x, t_emb)
    jax.block_until_ready((x_down, skip))
    assert x_down.shape == (N, out_ch, H // 2, W // 2), x_down.shape
    assert skip.shape == (N, out_ch, H, W), skip.shape
    assert float(jnp.max(jnp.abs(x_down - xd_ref))) < 1e-3
    assert float(jnp.max(jnp.abs(skip - skip_ref))) < 1e-3

    # bf16 matmul-operand path (perf mode): f32 accumulation, looser tolerance
    fwd_bf16 = jax.jit(functools.partial(down_block_forward, compute_dtype=jnp.bfloat16))
    x_down_b, skip_b = fwd_bf16(params, x, t_emb)
    jax.block_until_ready((x_down_b, skip_b))
    assert float(jnp.max(jnp.abs(x_down_b - xd_ref))) < 1e-1
    assert float(jnp.max(jnp.abs(skip_b - skip_ref))) < 1e-1

    print("KERNEL_OK")
</pallas_src>

<mosaic_0001>
module attributes {stable_mosaic.version = 11 : i64} {
  func.func @_conv1_time_silu_kernel(%arg0: i32, %arg1: memref<1x18x18x4xf32, #tpu.memory_space<vmem>>, %arg2: memref<9x4x8xf32, #tpu.memory_space<vmem>>, %arg3: memref<1x8xf32, #tpu.memory_space<vmem>>, %arg4: memref<2x32xf32, #tpu.memory_space<vmem>>, %arg5: memref<32x8xf32, #tpu.memory_space<vmem>>, %arg6: memref<1x8xf32, #tpu.memory_space<vmem>>, %arg7: memref<1x16x16x8xf32, #tpu.memory_space<vmem>>) attributes {dimension_semantics = [#tpu.dimension_semantics<parallel>], iteration_bounds = array<i64: 2>, scalar_prefetch = 0 : i64, scratch_operands = 0 : i64, tpu.core_type = #tpu.core_type<tc>, window_params = [{transform_indices = @transform_0, window_bounds = array<i64: 1, 18, 18, 4>}, {pipeline_mode = #tpu.pipeline_mode<synchronous>, transform_indices = @transform_1, window_bounds = array<i64: 9, 4, 8>}, {pipeline_mode = #tpu.pipeline_mode<synchronous>, transform_indices = @transform_2, window_bounds = array<i64: 1, 8>}, {pipeline_mode = #tpu.pipeline_mode<synchronous>, transform_indices = @transform_3, window_bounds = array<i64: 2, 32>}, {pipeline_mode = #tpu.pipeline_mode<synchronous>, transform_indices = @transform_4, window_bounds = array<i64: 32, 8>}, {pipeline_mode = #tpu.pipeline_mode<synchronous>, transform_indices = @transform_5, window_bounds = array<i64: 1, 8>}, {transform_indices = @transform_6, window_bounds = array<i64: 1, 16, 16, 8>}]} {
    %c0 = arith.constant 0 : index
    %c0_0 = arith.constant 0 : index
    %c0_1 = arith.constant 0 : index
    %c0_2 = arith.constant 0 : index
    %0 = vector.load %arg1[%c0, %c0_0, %c0_1, %c0_2] : memref<1x18x18x4xf32, #tpu.memory_space<vmem>>, vector<1x18x18x4xf32>
    %1 = vector.shape_cast %0 : vector<1x18x18x4xf32> to vector<18x18x4xf32>
    %cst = arith.constant 0.000000e+00 : f32
    %2 = vector.broadcast %cst : f32 to vector<256x8xf32>
    %3 = vector.extract_strided_slice %1 {offsets = [0, 0, 0], sizes = [16, 16, 4], strides = [1, 1, 1]} : vector<18x18x4xf32> to vector<16x16x4xf32>
    %4 = vector.shape_cast %3 : vector<16x16x4xf32> to vector<256x4xf32>
    %c0_3 = arith.constant 0 : index
    %c0_4 = arith.constant 0 : index
    %c0_5 = arith.constant 0 : index
    %5 = vector.load %arg2[%c0_3, %c0_4, %c0_5] : memref<9x4x8xf32, #tpu.memory_space<vmem>>, vector<1x4x8xf32>
    %6 = vector.shape_cast %5 : vector<1x4x8xf32> to vector<4x8xf32>
    %cst_6 = arith.constant dense<0.000000e+00> : vector<256x8xf32>
    %7 = tpu.matmul %4, %6, %cst_6 {dimension_numbers = #tpu.dot_dimension_numbers<[1], [0], [0], [1], [0, 0, 1, 1], [], []>} : vector<256x4xf32>, vector<4x8xf32>, vector<256x8xf32> -> vector<256x8xf32>
    %8 = arith.addf %2, %7 : vector<256x8xf32>
    %9 = vector.extract_strided_slice %1 {offsets = [0, 1, 0], sizes = [16, 16, 4], strides = [1, 1, 1]} : vector<18x18x4xf32> to vector<16x16x4xf32>
    %10 = vector.shape_cast %9 : vector<16x16x4xf32> to vector<256x4xf32>
    %c1 = arith.constant 1 : index
    %c0_7 = arith.constant 0 : index
    %c0_8 = arith.constant 0 : index
    %11 = vector.load %arg2[%c1, %c0_7, %c0_8] : memref<9x4x8xf32, #tpu.memory_space<vmem>>, vector<1x4x8xf32>
    %12 = vector.shape_cast %11 : vector<1x4x8xf32> to vector<4x8xf32>
    %cst_9 = arith.constant dense<0.000000e+00> : vector<256x8xf32>
    %13 = tpu.matmul %10, %12, %cst_9 {dimension_numbers = #tpu.dot_dimension_numbers<[1], [0], [0], [1], [0, 0, 1, 1], [], []>} : vector<256x4xf32>, vector<4x8xf32>, vector<256x8xf32> -> vector<256x8xf32>
    %14 = arith.addf %8, %13 : vector<256x8xf32>
    %15 = vector.extract_strided_slice %1 {offsets = [0, 2, 0], sizes = [16, 16, 4], strides = [1, 1, 1]} : vector<18x18x4xf32> to vector<16x16x4xf32>
    %16 = vector.shape_cast %15 : vector<16x16x4xf32> to vector<256x4xf32>
    %c2 = arith.constant 2 : index
    %c0_10 = arith.constant 0 : index
    %c0_11 = arith.constant 0 : index
    %17 = vector.load %arg2[%c2, %c0_10, %c0_11] : memref<9x4x8xf32, #tpu.memory_space<vmem>>, vector<1x4x8xf32>
    %18 = vector.shape_cast %17 : vector<1x4x8xf32> to vector<4x8xf32>
    %cst_12 = arith.constant dense<0.000000e+00> : vector<256x8xf32>
    %19 = tpu.matmul %16, %18, %cst_12 {dimension_numbers = #tpu.dot_dimension_numbers<[1], [0], [0], [1], [0, 0, 1, 1], [], []>} : vector<256x4xf32>, vector<4x8xf32>, vector<256x8xf32> -> vector<256x8xf32>
    %20 = arith.addf %14, %19 : vector<256x8xf32>
    %21 = vector.extract_strided_slice %1 {offsets = [1, 0, 0], sizes = [16, 16, 4], strides = [1, 1, 1]} : vector<18x18x4xf32> to vector<16x16x4xf32>
    %22 = vector.shape_cast %21 : vector<16x16x4xf32> to vector<256x4xf32>
    %c3 = arith.constant 3 : index
    %c0_13 = arith.constant 0 : index
    %c0_14 = arith.constant 0 : index
    %23 = vector.load %arg2[%c3, %c0_13, %c0_14] : memref<9x4x8xf32, #tpu.memory_space<vmem>>, vector<1x4x8xf32>
    %24 = vector.shape_cast %23 : vector<1x4x8xf32> to vector<4x8xf32>
    %cst_15 = arith.constant dense<0.000000e+00> : vector<256x8xf32>
    %25 = tpu.matmul %22, %24, %cst_15 {dimension_numbers = #tpu.dot_dimension_numbers<[1], [0], [0], [1], [0, 0, 1, 1], [], []>} : vector<256x4xf32>, vector<4x8xf32>, vector<256x8xf32> -> vector<256x8xf32>
    %26 = arith.addf %20, %25 : vector<256x8xf32>
    %27 = vector.extract_strided_slice %1 {offsets = [1, 1, 0], sizes = [16, 16, 4], strides = [1, 1, 1]} : vector<18x18x4xf32> to vector<16x16x4xf32>
    %28 = vector.shape_cast %27 : vector<16x16x4xf32> to vector<256x4xf32>
    %c4 = arith.constant 4 : index
    %c0_16 = arith.constant 0 : index
    %c0_17 = arith.constant 0 : index
    %29 = vector.load %arg2[%c4, %c0_16, %c0_17] : memref<9x4x8xf32, #tpu.memory_space<vmem>>, vector<1x4x8xf32>
    %30 = vector.shape_cast %29 : vector<1x4x8xf32> to vector<4x8xf32>
    %cst_18 = arith.constant dense<0.000000e+00> : vector<256x8xf32>
    %31 = tpu.matmul %28, %30, %cst_18 {dimension_numbers = #tpu.dot_dimension_numbers<[1], [0], [0], [1], [0, 0, 1, 1], [], []>} : vector<256x4xf32>, vector<4x8xf32>, vector<256x8xf32> -> vector<256x8xf32>
    %32 = arith.addf %26, %31 : vector<256x8xf32>
    %33 = vector.extract_strided_slice %1 {offsets = [1, 2, 0], sizes = [16, 16, 4], strides = [1, 1, 1]} : vector<18x18x4xf32> to vector<16x16x4xf32>
    %34 = vector.shape_cast %33 : vector<16x16x4xf32> to vector<256x4xf32>
    %c5 = arith.constant 5 : index
    %c0_19 = arith.constant 0 : index
    %c0_20 = arith.constant 0 : index
    %35 = vector.load %arg2[%c5, %c0_19, %c0_20] : memref<9x4x8xf32, #tpu.memory_space<vmem>>, vector<1x4x8xf32>
    %36 = vector.shape_cast %35 : vector<1x4x8xf32> to vector<4x8xf32>
    %cst_21 = arith.constant dense<0.000000e+00> : vector<256x8xf32>
    %37 = tpu.matmul %34, %36, %cst_21 {dimension_numbers = #tpu.dot_dimension_numbers<[1], [0], [0], [1], [0, 0, 1, 1], [], []>} : vector<256x4xf32>, vector<4x8xf32>, vector<256x8xf32> -> vector<256x8xf32>
    %38 = arith.addf %32, %37 : vector<256x8xf32>
    %39 = vector.extract_strided_slice %1 {offsets = [2, 0, 0], sizes = [16, 16, 4], strides = [1, 1, 1]} : vector<18x18x4xf32> to vector<16x16x4xf32>
    %40 = vector.shape_cast %39 : vector<16x16x4xf32> to vector<256x4xf32>
    %c6 = arith.constant 6 : index
    %c0_22 = arith.constant 0 : index
    %c0_23 = arith.constant 0 : index
    %41 = vector.load %arg2[%c6, %c0_22, %c0_23] : memref<9x4x8xf32, #tpu.memory_space<vmem>>, vector<1x4x8xf32>
    %42 = vector.shape_cast %41 : vector<1x4x8xf32> to vector<4x8xf32>
    %cst_24 = arith.constant dense<0.000000e+00> : vector<256x8xf32>
    %43 = tpu.matmul %40, %42, %cst_24 {dimension_numbers = #tpu.dot_dimension_numbers<[1], [0], [0], [1], [0, 0, 1, 1], [], []>} : vector<256x4xf32>, vector<4x8xf32>, vector<256x8xf32> -> vector<256x8xf32>
    %44 = arith.addf %38, %43 : vector<256x8xf32>
    %45 = vector.extract_strided_slice %1 {offsets = [2, 1, 0], sizes = [16, 16, 4], strides = [1, 1, 1]} : vector<18x18x4xf32> to vector<16x16x4xf32>
    %46 = vector.shape_cast %45 : vector<16x16x4xf32> to vector<256x4xf32>
    %c7 = arith.constant 7 : index
    %c0_25 = arith.constant 0 : index
    %c0_26 = arith.constant 0 : index
    %47 = vector.load %arg2[%c7, %c0_25, %c0_26] : memref<9x4x8xf32, #tpu.memory_space<vmem>>, vector<1x4x8xf32>
    %48 = vector.shape_cast %47 : vector<1x4x8xf32> to vector<4x8xf32>
    %cst_27 = arith.constant dense<0.000000e+00> : vector<256x8xf32>
    %49 = tpu.matmul %46, %48, %cst_27 {dimension_numbers = #tpu.dot_dimension_numbers<[1], [0], [0], [1], [0, 0, 1, 1], [], []>} : vector<256x4xf32>, vector<4x8xf32>, vector<256x8xf32> -> vector<256x8xf32>
    %50 = arith.addf %44, %49 : vector<256x8xf32>
    %51 = vector.extract_strided_slice %1 {offsets = [2, 2, 0], sizes = [16, 16, 4], strides = [1, 1, 1]} : vector<18x18x4xf32> to vector<16x16x4xf32>
    %52 = vector.shape_cast %51 : vector<16x16x4xf32> to vector<256x4xf32>
    %c8 = arith.constant 8 : index
    %c0_28 = arith.constant 0 : index
    %c0_29 = arith.constant 0 : index
    %53 = vector.load %arg2[%c8, %c0_28, %c0_29] : memref<9x4x8xf32, #tpu.memory_space<vmem>>, vector<1x4x8xf32>
    %54 = vector.shape_cast %53 : vector<1x4x8xf32> to vector<4x8xf32>
    %cst_30 = arith.constant dense<0.000000e+00> : vector<256x8xf32>
    %55 = tpu.matmul %52, %54, %cst_30 {dimension_numbers = #tpu.dot_dimension_numbers<[1], [0], [0], [1], [0, 0, 1, 1], [], []>} : vector<256x4xf32>, vector<4x8xf32>, vector<256x8xf32> -> vector<256x8xf32>
    %56 = arith.addf %50, %55 : vector<256x8xf32>
    %c0_31 = arith.constant 0 : index
    %c0_32 = arith.constant 0 : index
    %57 = vector.load %arg3[%c0_31, %c0_32] : memref<1x8xf32, #tpu.memory_space<vmem>>, vector<1x8xf32>
    %58 = vector.broadcast %57 : vector<1x8xf32> to vector<256x8xf32>
    %59 = arith.addf %56, %58 : vector<256x8xf32>
    %60 = arith.negf %59 : vector<256x8xf32>
    %61 = math.exp %60 : vector<256x8xf32>
    %cst_33 = arith.constant 1.000000e+00 : f32
    %62 = vector.broadcast %cst_33 : f32 to vector<256x8xf32>
    %63 = arith.addf %62, %61 : vector<256x8xf32>
    %64 = arith.divf %62, %63 : vector<256x8xf32>
    %65 = arith.mulf %59, %64 : vector<256x8xf32>
    %c0_34 = arith.constant 0 : index
    %c0_35 = arith.constant 0 : index
    %66 = vector.load %arg4[%c0_34, %c0_35] : memref<2x32xf32, #tpu.memory_space<vmem>>, vector<2x32xf32>
    %67 = arith.negf %66 : vector<2x32xf32>
    %68 = math.exp %67 : vector<2x32xf32>
    %cst_36 = arith.constant 1.000000e+00 : f32
    %69 = vector.broadcast %cst_36 : f32 to vector<2x32xf32>
    %70 = arith.addf %69, %68 : vector<2x32xf32>
    %71 = arith.divf %69, %70 : vector<2x32xf32>
    %72 = arith.mulf %66, %71 : vector<2x32xf32>
    %c0_37 = arith.constant 0 : index
    %c0_38 = arith.constant 0 : index
    %73 = vector.load %arg5[%c0_37, %c0_38] : memref<32x8xf32, #tpu.memory_space<vmem>>, vector<32x8xf32>
    %cst_39 = arith.constant dense<0.000000e+00> : vector<2x8xf32>
    %74 = tpu.matmul %72, %73, %cst_39 {dimension_numbers = #tpu.dot_dimension_numbers<[1], [0], [0], [1], [0, 0, 1, 1], [], []>} : vector<2x32xf32>, vector<32x8xf32>, vector<2x8xf32> -> vector<2x8xf32>
    %c0_40 = arith.constant 0 : index
    %c0_41 = arith.constant 0 : index
    %75 = vector.load %arg6[%c0_40, %c0_41] : memref<1x8xf32, #tpu.memory_space<vmem>>, vector<1x8xf32>
    %76 = vector.broadcast %75 : vector<1x8xf32> to vector<2x8xf32>
    %77 = arith.addf %74, %76 : vector<2x8xf32>
    %78 = tpu.iota {dimensions = array<i32: 0>} : vector<2x8xi32>
    %79 = vector.broadcast %arg0 : i32 to vector<2x8xi32>
    %80 = arith.cmpi eq, %78, %79 : vector<2x8xi32>
    %cst_42 = arith.constant 0.000000e+00 : f32
    %81 = vector.broadcast %cst_42 : f32 to vector<2x8xf32>
    %82 = arith.select %80, %77, %81 : vector<2x8xi1>, vector<2x8xf32>
    %cst_43 = arith.constant dense<0.000000e+00> : vector<8xf32>
    %83 = vector.multi_reduction <add>, %82, %cst_43 [0] : vector<2x8xf32> to vector<8xf32>
    %84 = vector.shape_cast %83 : vector<8xf32> to vector<1x8xf32>
    %85 = vector.broadcast %84 : vector<1x8xf32> to vector<256x8xf32>
    %86 = arith.addf %65, %85 : vector<256x8xf32>
    %87 = vector.shape_cast %86 : vector<256x8xf32> to vector<1x16x16x8xf32>
    %c0_44 = arith.constant 0 : index
    %c0_45 = arith.constant 0 : index
    %c0_46 = arith.constant 0 : index
    %c0_47 = arith.constant 0 : index
    %88 = vector.load %arg7[%c0_44, %c0_45, %c0_46, %c0_47] : memref<1x16x16x8xf32, #tpu.memory_space<vmem>>, vector<1x16x16x8xf32>
    tpu.vector_store %arg7[%c0_44, %c0_45, %c0_46, %c0_47], %87 {strides = array<i32>} : memref<1x16x16x8xf32, #tpu.memory_space<vmem>>, vector<1x16x16x8xf32>,
    return
  }
  func.func @transform_0(%arg0: i32) -> (i32, i32, i32, i32) {
    %c0_i32 = arith.constant 0 : i32
    %c0_i32_0 = arith.constant 0 : i32
    %c0_i32_1 = arith.constant 0 : i32
    %c0_i32_2 = arith.constant 0 : i32
    return %arg0, %c0_i32, %c0_i32_0, %c0_i32_1 : i32, i32, i32, i32
  }
  func.func @transform_1(%arg0: i32) -> (i32, i32, i32) {
    %c0_i32 = arith.constant 0 : i32
    %c0_i32_0 = arith.constant 0 : i32
    %c0_i32_1 = arith.constant 0 : i32
    %c0_i32_2 = arith.constant 0 : i32
    return %c0_i32, %c0_i32_0, %c0_i32_1 : i32, i32, i32
  }
  func.func @transform_2(%arg0: i32) -> (i32, i32) {
    %c0_i32 = arith.constant 0 : i32
    %c0_i32_0 = arith.constant 0 : i32
    %c0_i32_1 = arith.constant 0 : i32
    return %c0_i32, %c0_i32_0 : i32, i32
  }
  func.func @transform_3(%arg0: i32) -> (i32, i32) {
    %c0_i32 = arith.constant 0 : i32
    %c0_i32_0 = arith.constant 0 : i32
    %c0_i32_1 = arith.constant 0 : i32
    return %c0_i32, %c0_i32_0 : i32, i32
  }
  func.func @transform_4(%arg0: i32) -> (i32, i32) {
    %c0_i32 = arith.constant 0 : i32
    %c0_i32_0 = arith.constant 0 : i32
    %c0_i32_1 = arith.constant 0 : i32
    return %c0_i32, %c0_i32_0 : i32, i32
  }
  func.func @transform_5(%arg0: i32) -> (i32, i32) {
    %c0_i32 = arith.constant 0 : i32
    %c0_i32_0 = arith.constant 0 : i32
    %c0_i32_1 = arith.constant 0 : i32
    return %c0_i32, %c0_i32_0 : i32, i32
  }
  func.func @transform_6(%arg0: i32) -> (i32, i32, i32, i32) {
    %c0_i32 = arith.constant 0 : i32
    %c0_i32_0 = arith.constant 0 : i32
    %c0_i32_1 = arith.constant 0 : i32
    %c0_i32_2 = arith.constant 0 : i32
    return %arg0, %c0_i32, %c0_i32_0, %c0_i32_1 : i32, i32, i32, i32
  }
}

module attributes {stable_mosaic.version = 11 : i64} {
  func.func @_conv2_silu_skip_kernel(%arg0: i32, %arg1: memref<1x18x18x8xf32, #tpu.memory_space<vmem>>, %arg2: memref<9x8x8xf32, #tpu.memory_space<vmem>>, %arg3: memref<1x8xf32, #tpu.memory_space<vmem>>, %arg4: memref<1x16x16x4xf32, #tpu.memory_space<vmem>>, %arg5: memref<4x8xf32, #tpu.memory_space<vmem>>, %arg6: memref<1x8xf32, #tpu.memory_space<vmem>>, %arg7: memref<1x16x16x8xf32, #tpu.memory_space<vmem>>) attributes {dimension_semantics = [#tpu.dimension_semantics<parallel>], iteration_bounds = array<i64: 2>, scalar_prefetch = 0 : i64, scratch_operands = 0 : i64, tpu.core_type = #tpu.core_type<tc>, window_params = [{transform_indices = @transform_0, window_bounds = array<i64: 1, 18, 18, 8>}, {pipeline_mode = #tpu.pipeline_mode<synchronous>, transform_indices = @transform_1, window_bounds = array<i64: 9, 8, 8>}, {pipeline_mode = #tpu.pipeline_mode<synchronous>, transform_indices = @transform_2, window_bounds = array<i64: 1, 8>}, {transform_indices = @transform_3, window_bounds = array<i64: 1, 16, 16, 4>}, {pipeline_mode = #tpu.pipeline_mode<synchronous>, transform_indices = @transform_4, window_bounds = array<i64: 4, 8>}, {pipeline_mode = #tpu.pipeline_mode<synchronous>, transform_indices = @transform_5, window_bounds = array<i64: 1, 8>}, {transform_indices = @transform_6, window_bounds = array<i64: 1, 16, 16, 8>}]} {
    %c0 = arith.constant 0 : index
    %c0_0 = arith.constant 0 : index
    %c0_1 = arith.constant 0 : index
    %c0_2 = arith.constant 0 : index
    %0 = vector.load %arg1[%c0, %c0_0, %c0_1, %c0_2] : memref<1x18x18x8xf32, #tpu.memory_space<vmem>>, vector<1x18x18x8xf32>
    %1 = vector.shape_cast %0 : vector<1x18x18x8xf32> to vector<18x18x8xf32>
    %cst = arith.constant 0.000000e+00 : f32
    %2 = vector.broadcast %cst : f32 to vector<256x8xf32>
    %3 = vector.extract_strided_slice %1 {offsets = [0, 0, 0], sizes = [16, 16, 8], strides = [1, 1, 1]} : vector<18x18x8xf32> to vector<16x16x8xf32>
    %4 = vector.shape_cast %3 : vector<16x16x8xf32> to vector<256x8xf32>
    %c0_3 = arith.constant 0 : index
    %c0_4 = arith.constant 0 : index
    %c0_5 = arith.constant 0 : index
    %5 = vector.load %arg2[%c0_3, %c0_4, %c0_5] : memref<9x8x8xf32, #tpu.memory_space<vmem>>, vector<1x8x8xf32>
    %6 = vector.shape_cast %5 : vector<1x8x8xf32> to vector<8x8xf32>
    %cst_6 = arith.constant dense<0.000000e+00> : vector<256x8xf32>
    %7 = tpu.matmul %4, %6, %cst_6 {dimension_numbers = #tpu.dot_dimension_numbers<[1], [0], [0], [1], [0, 0, 1, 1], [], []>} : vector<256x8xf32>, vector<8x8xf32>, vector<256x8xf32> -> vector<256x8xf32>
    %8 = arith.addf %2, %7 : vector<256x8xf32>
    %9 = vector.extract_strided_slice %1 {offsets = [0, 1, 0], sizes = [16, 16, 8], strides = [1, 1, 1]} : vector<18x18x8xf32> to vector<16x16x8xf32>
    %10 = vector.shape_cast %9 : vector<16x16x8xf32> to vector<256x8xf32>
    %c1 = arith.constant 1 : index
    %c0_7 = arith.constant 0 : index
    %c0_8 = arith.constant 0 : index
    %11 = vector.load %arg2[%c1, %c0_7, %c0_8] : memref<9x8x8xf32, #tpu.memory_space<vmem>>, vector<1x8x8xf32>
    %12 = vector.shape_cast %11 : vector<1x8x8xf32> to vector<8x8xf32>
    %cst_9 = arith.constant dense<0.000000e+00> : vector<256x8xf32>
    %13 = tpu.matmul %10, %12, %cst_9 {dimension_numbers = #tpu.dot_dimension_numbers<[1], [0], [0], [1], [0, 0, 1, 1], [], []>} : vector<256x8xf32>, vector<8x8xf32>, vector<256x8xf32> -> vector<256x8xf32>
    %14 = arith.addf %8, %13 : vector<256x8xf32>
    %15 = vector.extract_strided_slice %1 {offsets = [0, 2, 0], sizes = [16, 16, 8], strides = [1, 1, 1]} : vector<18x18x8xf32> to vector<16x16x8xf32>
    %16 = vector.shape_cast %15 : vector<16x16x8xf32> to vector<256x8xf32>
    %c2 = arith.constant 2 : index
    %c0_10 = arith.constant 0 : index
    %c0_11 = arith.constant 0 : index
    %17 = vector.load %arg2[%c2, %c0_10, %c0_11] : memref<9x8x8xf32, #tpu.memory_space<vmem>>, vector<1x8x8xf32>
    %18 = vector.shape_cast %17 : vector<1x8x8xf32> to vector<8x8xf32>
    %cst_12 = arith.constant dense<0.000000e+00> : vector<256x8xf32>
    %19 = tpu.matmul %16, %18, %cst_12 {dimension_numbers = #tpu.dot_dimension_numbers<[1], [0], [0], [1], [0, 0, 1, 1], [], []>} : vector<256x8xf32>, vector<8x8xf32>, vector<256x8xf32> -> vector<256x8xf32>
    %20 = arith.addf %14, %19 : vector<256x8xf32>
    %21 = vector.extract_strided_slice %1 {offsets = [1, 0, 0], sizes = [16, 16, 8], strides = [1, 1, 1]} : vector<18x18x8xf32> to vector<16x16x8xf32>
    %22 = vector.shape_cast %21 : vector<16x16x8xf32> to vector<256x8xf32>
    %c3 = arith.constant 3 : index
    %c0_13 = arith.constant 0 : index
    %c0_14 = arith.constant 0 : index
    %23 = vector.load %arg2[%c3, %c0_13, %c0_14] : memref<9x8x8xf32, #tpu.memory_space<vmem>>, vector<1x8x8xf32>
    %24 = vector.shape_cast %23 : vector<1x8x8xf32> to vector<8x8xf32>
    %cst_15 = arith.constant dense<0.000000e+00> : vector<256x8xf32>
    %25 = tpu.matmul %22, %24, %cst_15 {dimension_numbers = #tpu.dot_dimension_numbers<[1], [0], [0], [1], [0, 0, 1, 1], [], []>} : vector<256x8xf32>, vector<8x8xf32>, vector<256x8xf32> -> vector<256x8xf32>
    %26 = arith.addf %20, %25 : vector<256x8xf32>
    %27 = vector.extract_strided_slice %1 {offsets = [1, 1, 0], sizes = [16, 16, 8], strides = [1, 1, 1]} : vector<18x18x8xf32> to vector<16x16x8xf32>
    %28 = vector.shape_cast %27 : vector<16x16x8xf32> to vector<256x8xf32>
    %c4 = arith.constant 4 : index
    %c0_16 = arith.constant 0 : index
    %c0_17 = arith.constant 0 : index
    %29 = vector.load %arg2[%c4, %c0_16, %c0_17] : memref<9x8x8xf32, #tpu.memory_space<vmem>>, vector<1x8x8xf32>
    %30 = vector.shape_cast %29 : vector<1x8x8xf32> to vector<8x8xf32>
    %cst_18 = arith.constant dense<0.000000e+00> : vector<256x8xf32>
    %31 = tpu.matmul %28, %30, %cst_18 {dimension_numbers = #tpu.dot_dimension_numbers<[1], [0], [0], [1], [0, 0, 1, 1], [], []>} : vector<256x8xf32>, vector<8x8xf32>, vector<256x8xf32> -> vector<256x8xf32>
    %32 = arith.addf %26, %31 : vector<256x8xf32>
    %33 = vector.extract_strided_slice %1 {offsets = [1, 2, 0], sizes = [16, 16, 8], strides = [1, 1, 1]} : vector<18x18x8xf32> to vector<16x16x8xf32>
    %34 = vector.shape_cast %33 : vector<16x16x8xf32> to vector<256x8xf32>
    %c5 = arith.constant 5 : index
    %c0_19 = arith.constant 0 : index
    %c0_20 = arith.constant 0 : index
    %35 = vector.load %arg2[%c5, %c0_19, %c0_20] : memref<9x8x8xf32, #tpu.memory_space<vmem>>, vector<1x8x8xf32>
    %36 = vector.shape_cast %35 : vector<1x8x8xf32> to vector<8x8xf32>
    %cst_21 = arith.constant dense<0.000000e+00> : vector<256x8xf32>
    %37 = tpu.matmul %34, %36, %cst_21 {dimension_numbers = #tpu.dot_dimension_numbers<[1], [0], [0], [1], [0, 0, 1, 1], [], []>} : vector<256x8xf32>, vector<8x8xf32>, vector<256x8xf32> -> vector<256x8xf32>
    %38 = arith.addf %32, %37 : vector<256x8xf32>
    %39 = vector.extract_strided_slice %1 {offsets = [2, 0, 0], sizes = [16, 16, 8], strides = [1, 1, 1]} : vector<18x18x8xf32> to vector<16x16x8xf32>
    %40 = vector.shape_cast %39 : vector<16x16x8xf32> to vector<256x8xf32>
    %c6 = arith.constant 6 : index
    %c0_22 = arith.constant 0 : index
    %c0_23 = arith.constant 0 : index
    %41 = vector.load %arg2[%c6, %c0_22, %c0_23] : memref<9x8x8xf32, #tpu.memory_space<vmem>>, vector<1x8x8xf32>
    %42 = vector.shape_cast %41 : vector<1x8x8xf32> to vector<8x8xf32>
    %cst_24 = arith.constant dense<0.000000e+00> : vector<256x8xf32>
    %43 = tpu.matmul %40, %42, %cst_24 {dimension_numbers = #tpu.dot_dimension_numbers<[1], [0], [0], [1], [0, 0, 1, 1], [], []>} : vector<256x8xf32>, vector<8x8xf32>, vector<256x8xf32> -> vector<256x8xf32>
    %44 = arith.addf %38, %43 : vector<256x8xf32>
    %45 = vector.extract_strided_slice %1 {offsets = [2, 1, 0], sizes = [16, 16, 8], strides = [1, 1, 1]} : vector<18x18x8xf32> to vector<16x16x8xf32>
    %46 = vector.shape_cast %45 : vector<16x16x8xf32> to vector<256x8xf32>
    %c7 = arith.constant 7 : index
    %c0_25 = arith.constant 0 : index
    %c0_26 = arith.constant 0 : index
    %47 = vector.load %arg2[%c7, %c0_25, %c0_26] : memref<9x8x8xf32, #tpu.memory_space<vmem>>, vector<1x8x8xf32>
    %48 = vector.shape_cast %47 : vector<1x8x8xf32> to vector<8x8xf32>
    %cst_27 = arith.constant dense<0.000000e+00> : vector<256x8xf32>
    %49 = tpu.matmul %46, %48, %cst_27 {dimension_numbers = #tpu.dot_dimension_numbers<[1], [0], [0], [1], [0, 0, 1, 1], [], []>} : vector<256x8xf32>, vector<8x8xf32>, vector<256x8xf32> -> vector<256x8xf32>
    %50 = arith.addf %44, %49 : vector<256x8xf32>
    %51 = vector.extract_strided_slice %1 {offsets = [2, 2, 0], sizes = [16, 16, 8], strides = [1, 1, 1]} : vector<18x18x8xf32> to vector<16x16x8xf32>
    %52 = vector.shape_cast %51 : vector<16x16x8xf32> to vector<256x8xf32>
    %c8 = arith.constant 8 : index
    %c0_28 = arith.constant 0 : index
    %c0_29 = arith.constant 0 : index
    %53 = vector.load %arg2[%c8, %c0_28, %c0_29] : memref<9x8x8xf32, #tpu.memory_space<vmem>>, vector<1x8x8xf32>
    %54 = vector.shape_cast %53 : vector<1x8x8xf32> to vector<8x8xf32>
    %cst_30 = arith.constant dense<0.000000e+00> : vector<256x8xf32>
    %55 = tpu.matmul %52, %54, %cst_30 {dimension_numbers = #tpu.dot_dimension_numbers<[1], [0], [0], [1], [0, 0, 1, 1], [], []>} : vector<256x8xf32>, vector<8x8xf32>, vector<256x8xf32> -> vector<256x8xf32>
    %56 = arith.addf %50, %55 : vector<256x8xf32>
    %c0_31 = arith.constant 0 : index
    %c0_32 = arith.constant 0 : index
    %57 = vector.load %arg3[%c0_31, %c0_32] : memref<1x8xf32, #tpu.memory_space<vmem>>, vector<1x8xf32>
    %58 = vector.broadcast %57 : vector<1x8xf32> to vector<256x8xf32>
    %59 = arith.addf %56, %58 : vector<256x8xf32>
    %60 = arith.negf %59 : vector<256x8xf32>
    %61 = math.exp %60 : vector<256x8xf32>
    %cst_33 = arith.constant 1.000000e+00 : f32
    %62 = vector.broadcast %cst_33 : f32 to vector<256x8xf32>
    %63 = arith.addf %62, %61 : vector<256x8xf32>
    %64 = arith.divf %62, %63 : vector<256x8xf32>
    %65 = arith.mulf %59, %64 : vector<256x8xf32>
    %c0_34 = arith.constant 0 : index
    %c0_35 = arith.constant 0 : index
    %c0_36 = arith.constant 0 : index
    %c0_37 = arith.constant 0 : index
    %66 = vector.load %arg4[%c0_34, %c0_35, %c0_36, %c0_37] : memref<1x16x16x4xf32, #tpu.memory_space<vmem>>, vector<1x16x16x4xf32>
    %67 = vector.shape_cast %66 : vector<1x16x16x4xf32> to vector<16x16x4xf32>
    %68 = vector.shape_cast %67 : vector<16x16x4xf32> to vector<256x4xf32>
    %c0_38 = arith.constant 0 : index
    %c0_39 = arith.constant 0 : index
    %69 = vector.load %arg5[%c0_38, %c0_39] : memref<4x8xf32, #tpu.memory_space<vmem>>, vector<4x8xf32>
    %cst_40 = arith.constant dense<0.000000e+00> : vector<256x8xf32>
    %70 = tpu.matmul %68, %69, %cst_40 {dimension_numbers = #tpu.dot_dimension_numbers<[1], [0], [0], [1], [0, 0, 1, 1], [], []>} : vector<256x4xf32>, vector<4x8xf32>, vector<256x8xf32> -> vector<256x8xf32>
    %c0_41 = arith.constant 0 : index
    %c0_42 = arith.constant 0 : index
    %71 = vector.load %arg6[%c0_41, %c0_42] : memref<1x8xf32, #tpu.memory_space<vmem>>, vector<1x8xf32>
    %72 = vector.broadcast %71 : vector<1x8xf32> to vector<256x8xf32>
    %73 = arith.addf %70, %72 : vector<256x8xf32>
    %74 = arith.addf %65, %73 : vector<256x8xf32>
    %75 = vector.shape_cast %74 : vector<256x8xf32> to vector<1x16x16x8xf32>
    %c0_43 = arith.constant 0 : index
    %c0_44 = arith.constant 0 : index
    %c0_45 = arith.constant 0 : index
    %c0_46 = arith.constant 0 : index
    %76 = vector.load %arg7[%c0_43, %c0_44, %c0_45, %c0_46] : memref<1x16x16x8xf32, #tpu.memory_space<vmem>>, vector<1x16x16x8xf32>
    tpu.vector_store %arg7[%c0_43, %c0_44, %c0_45, %c0_46], %75 {strides = array<i32>} : memref<1x16x16x8xf32, #tpu.memory_space<vmem>>, vector<1x16x16x8xf32>,
    return
  }
  func.func @transform_0(%arg0: i32) -> (i32, i32, i32, i32) {
    %c0_i32 = arith.constant 0 : i32
    %c0_i32_0 = arith.constant 0 : i32
    %c0_i32_1 = arith.constant 0 : i32
    %c0_i32_2 = arith.constant 0 : i32
    return %arg0, %c0_i32, %c0_i32_0, %c0_i32_1 : i32, i32, i32, i32
  }
  func.func @transform_1(%arg0: i32) -> (i32, i32, i32) {
    %c0_i32 = arith.constant 0 : i32
    %c0_i32_0 = arith.constant 0 : i32
    %c0_i32_1 = arith.constant 0 : i32
    %c0_i32_2 = arith.constant 0 : i32
    return %c0_i32, %c0_i32_0, %c0_i32_1 : i32, i32, i32
  }
  func.func @transform_2(%arg0: i32) -> (i32, i32) {
    %c0_i32 = arith.constant 0 : i32
    %c0_i32_0 = arith.constant 0 : i32
    %c0_i32_1 = arith.constant 0 : i32
    return %c0_i32, %c0_i32_0 : i32, i32
  }
  func.func @transform_3(%arg0: i32) -> (i32, i32, i32, i32) {
    %c0_i32 = arith.constant 0 : i32
    %c0_i32_0 = arith.constant 0 : i32
    %c0_i32_1 = arith.constant 0 : i32
    %c0_i32_2 = arith.constant 0 : i32
    return %arg0, %c0_i32, %c0_i32_0, %c0_i32_1 : i32, i32, i32, i32
  }
  func.func @transform_4(%arg0: i32) -> (i32, i32) {
    %c0_i32 = arith.constant 0 : i32
    %c0_i32_0 = arith.constant 0 : i32
    %c0_i32_1 = arith.constant 0 : i32
    return %c0_i32, %c0_i32_0 : i32, i32
  }
  func.func @transform_5(%arg0: i32) -> (i32, i32) {
    %c0_i32 = arith.constant 0 : i32
    %c0_i32_0 = arith.constant 0 : i32
    %c0_i32_1 = arith.constant 0 : i32
    return %c0_i32, %c0_i32_0 : i32, i32
  }
  func.func @transform_6(%arg0: i32) -> (i32, i32, i32, i32) {
    %c0_i32 = arith.constant 0 : i32
    %c0_i32_0 = arith.constant 0 : i32
    %c0_i32_1 = arith.constant 0 : i32
    %c0_i32_2 = arith.constant 0 : i32
    return %arg0, %c0_i32, %c0_i32_0, %c0_i32_1 : i32, i32, i32, i32
  }
}

module attributes {stable_mosaic.version = 11 : i64} {
  func.func @_conv1_time_silu_kernel(%arg0: i32, %arg1: memref<1x18x18x8xf32, #tpu.memory_space<vmem>>, %arg2: memref<9x8x8xf32, #tpu.memory_space<vmem>>, %arg3: memref<1x8xf32, #tpu.memory_space<vmem>>, %arg4: memref<2x32xf32, #tpu.memory_space<vmem>>, %arg5: memref<32x8xf32, #tpu.memory_space<vmem>>, %arg6: memref<1x8xf32, #tpu.memory_space<vmem>>, %arg7: memref<1x16x16x8xf32, #tpu.memory_space<vmem>>) attributes {dimension_semantics = [#tpu.dimension_semantics<parallel>], iteration_bounds = array<i64: 2>, scalar_prefetch = 0 : i64, scratch_operands = 0 : i64, tpu.core_type = #tpu.core_type<tc>, window_params = [{transform_indices = @transform_0, window_bounds = array<i64: 1, 18, 18, 8>}, {pipeline_mode = #tpu.pipeline_mode<synchronous>, transform_indices = @transform_1, window_bounds = array<i64: 9, 8, 8>}, {pipeline_mode = #tpu.pipeline_mode<synchronous>, transform_indices = @transform_2, window_bounds = array<i64: 1, 8>}, {pipeline_mode = #tpu.pipeline_mode<synchronous>, transform_indices = @transform_3, window_bounds = array<i64: 2, 32>}, {pipeline_mode = #tpu.pipeline_mode<synchronous>, transform_indices = @transform_4, window_bounds = array<i64: 32, 8>}, {pipeline_mode = #tpu.pipeline_mode<synchronous>, transform_indices = @transform_5, window_bounds = array<i64: 1, 8>}, {transform_indices = @transform_6, window_bounds = array<i64: 1, 16, 16, 8>}]} {
    %c0 = arith.constant 0 : index
    %c0_0 = arith.constant 0 : index
    %c0_1 = arith.constant 0 : index
    %c0_2 = arith.constant 0 : index
    %0 = vector.load %arg1[%c0, %c0_0, %c0_1, %c0_2] : memref<1x18x18x8xf32, #tpu.memory_space<vmem>>, vector<1x18x18x8xf32>
    %1 = vector.shape_cast %0 : vector<1x18x18x8xf32> to vector<18x18x8xf32>
    %cst = arith.constant 0.000000e+00 : f32
    %2 = vector.broadcast %cst : f32 to vector<256x8xf32>
    %3 = vector.extract_strided_slice %1 {offsets = [0, 0, 0], sizes = [16, 16, 8], strides = [1, 1, 1]} : vector<18x18x8xf32> to vector<16x16x8xf32>
    %4 = vector.shape_cast %3 : vector<16x16x8xf32> to vector<256x8xf32>
    %c0_3 = arith.constant 0 : index
    %c0_4 = arith.constant 0 : index
    %c0_5 = arith.constant 0 : index
    %5 = vector.load %arg2[%c0_3, %c0_4, %c0_5] : memref<9x8x8xf32, #tpu.memory_space<vmem>>, vector<1x8x8xf32>
    %6 = vector.shape_cast %5 : vector<1x8x8xf32> to vector<8x8xf32>
    %cst_6 = arith.constant dense<0.000000e+00> : vector<256x8xf32>
    %7 = tpu.matmul %4, %6, %cst_6 {dimension_numbers = #tpu.dot_dimension_numbers<[1], [0], [0], [1], [0, 0, 1, 1], [], []>} : vector<256x8xf32>, vector<8x8xf32>, vector<256x8xf32> -> vector<256x8xf32>
    %8 = arith.addf %2, %7 : vector<256x8xf32>
    %9 = vector.extract_strided_slice %1 {offsets = [0, 1, 0], sizes = [16, 16, 8], strides = [1, 1, 1]} : vector<18x18x8xf32> to vector<16x16x8xf32>
    %10 = vector.shape_cast %9 : vector<16x16x8xf32> to vector<256x8xf32>
    %c1 = arith.constant 1 : index
    %c0_7 = arith.constant 0 : index
    %c0_8 = arith.constant 0 : index
    %11 = vector.load %arg2[%c1, %c0_7, %c0_8] : memref<9x8x8xf32, #tpu.memory_space<vmem>>, vector<1x8x8xf32>
    %12 = vector.shape_cast %11 : vector<1x8x8xf32> to vector<8x8xf32>
    %cst_9 = arith.constant dense<0.000000e+00> : vector<256x8xf32>
    %13 = tpu.matmul %10, %12, %cst_9 {dimension_numbers = #tpu.dot_dimension_numbers<[1], [0], [0], [1], [0, 0, 1, 1], [], []>} : vector<256x8xf32>, vector<8x8xf32>, vector<256x8xf32> -> vector<256x8xf32>
    %14 = arith.addf %8, %13 : vector<256x8xf32>
    %15 = vector.extract_strided_slice %1 {offsets = [0, 2, 0], sizes = [16, 16, 8], strides = [1, 1, 1]} : vector<18x18x8xf32> to vector<16x16x8xf32>
    %16 = vector.shape_cast %15 : vector<16x16x8xf32> to vector<256x8xf32>
    %c2 = arith.constant 2 : index
    %c0_10 = arith.constant 0 : index
    %c0_11 = arith.constant 0 : index
    %17 = vector.load %arg2[%c2, %c0_10, %c0_11] : memref<9x8x8xf32, #tpu.memory_space<vmem>>, vector<1x8x8xf32>
    %18 = vector.shape_cast %17 : vector<1x8x8xf32> to vector<8x8xf32>
    %cst_12 = arith.constant dense<0.000000e+00> : vector<256x8xf32>
    %19 = tpu.matmul %16, %18, %cst_12 {dimension_numbers = #tpu.dot_dimension_numbers<[1], [0], [0], [1], [0, 0, 1, 1], [], []>} : vector<256x8xf32>, vector<8x8xf32>, vector<256x8xf32> -> vector<256x8xf32>
    %20 = arith.addf %14, %19 : vector<256x8xf32>
    %21 = vector.extract_strided_slice %1 {offsets = [1, 0, 0], sizes = [16, 16, 8], strides = [1, 1, 1]} : vector<18x18x8xf32> to vector<16x16x8xf32>
    %22 = vector.shape_cast %21 : vector<16x16x8xf32> to vector<256x8xf32>
    %c3 = arith.constant 3 : index
    %c0_13 = arith.constant 0 : index
    %c0_14 = arith.constant 0 : index
    %23 = vector.load %arg2[%c3, %c0_13, %c0_14] : memref<9x8x8xf32, #tpu.memory_space<vmem>>, vector<1x8x8xf32>
    %24 = vector.shape_cast %23 : vector<1x8x8xf32> to vector<8x8xf32>
    %cst_15 = arith.constant dense<0.000000e+00> : vector<256x8xf32>
    %25 = tpu.matmul %22, %24, %cst_15 {dimension_numbers = #tpu.dot_dimension_numbers<[1], [0], [0], [1], [0, 0, 1, 1], [], []>} : vector<256x8xf32>, vector<8x8xf32>, vector<256x8xf32> -> vector<256x8xf32>
    %26 = arith.addf %20, %25 : vector<256x8xf32>
    %27 = vector.extract_strided_slice %1 {offsets = [1, 1, 0], sizes = [16, 16, 8], strides = [1, 1, 1]} : vector<18x18x8xf32> to vector<16x16x8xf32>
    %28 = vector.shape_cast %27 : vector<16x16x8xf32> to vector<256x8xf32>
    %c4 = arith.constant 4 : index
    %c0_16 = arith.constant 0 : index
    %c0_17 = arith.constant 0 : index
    %29 = vector.load %arg2[%c4, %c0_16, %c0_17] : memref<9x8x8xf32, #tpu.memory_space<vmem>>, vector<1x8x8xf32>
    %30 = vector.shape_cast %29 : vector<1x8x8xf32> to vector<8x8xf32>
    %cst_18 = arith.constant dense<0.000000e+00> : vector<256x8xf32>
    %31 = tpu.matmul %28, %30, %cst_18 {dimension_numbers = #tpu.dot_dimension_numbers<[1], [0], [0], [1], [0, 0, 1, 1], [], []>} : vector<256x8xf32>, vector<8x8xf32>, vector<256x8xf32> -> vector<256x8xf32>
    %32 = arith.addf %26, %31 : vector<256x8xf32>
    %33 = vector.extract_strided_slice %1 {offsets = [1, 2, 0], sizes = [16, 16, 8], strides = [1, 1, 1]} : vector<18x18x8xf32> to vector<16x16x8xf32>
    %34 = vector.shape_cast %33 : vector<16x16x8xf32> to vector<256x8xf32>
    %c5 = arith.constant 5 : index
    %c0_19 = arith.constant 0 : index
    %c0_20 = arith.constant 0 : index
    %35 = vector.load %arg2[%c5, %c0_19, %c0_20] : memref<9x8x8xf32, #tpu.memory_space<vmem>>, vector<1x8x8xf32>
    %36 = vector.shape_cast %35 : vector<1x8x8xf32> to vector<8x8xf32>
    %cst_21 = arith.constant dense<0.000000e+00> : vector<256x8xf32>
    %37 = tpu.matmul %34, %36, %cst_21 {dimension_numbers = #tpu.dot_dimension_numbers<[1], [0], [0], [1], [0, 0, 1, 1], [], []>} : vector<256x8xf32>, vector<8x8xf32>, vector<256x8xf32> -> vector<256x8xf32>
    %38 = arith.addf %32, %37 : vector<256x8xf32>
    %39 = vector.extract_strided_slice %1 {offsets = [2, 0, 0], sizes = [16, 16, 8], strides = [1, 1, 1]} : vector<18x18x8xf32> to vector<16x16x8xf32>
    %40 = vector.shape_cast %39 : vector<16x16x8xf32> to vector<256x8xf32>
    %c6 = arith.constant 6 : index
    %c0_22 = arith.constant 0 : index
    %c0_23 = arith.constant 0 : index
    %41 = vector.load %arg2[%c6, %c0_22, %c0_23] : memref<9x8x8xf32, #tpu.memory_space<vmem>>, vector<1x8x8xf32>
    %42 = vector.shape_cast %41 : vector<1x8x8xf32> to vector<8x8xf32>
    %cst_24 = arith.constant dense<0.000000e+00> : vector<256x8xf32>
    %43 = tpu.matmul %40, %42, %cst_24 {dimension_numbers = #tpu.dot_dimension_numbers<[1], [0], [0], [1], [0, 0, 1, 1], [], []>} : vector<256x8xf32>, vector<8x8xf32>, vector<256x8xf32> -> vector<256x8xf32>
    %44 = arith.addf %38, %43 : vector<256x8xf32>
    %45 = vector.extract_strided_slice %1 {offsets = [2, 1, 0], sizes = [16, 16, 8], strides = [1, 1, 1]} : vector<18x18x8xf32> to vector<16x16x8xf32>
    %46 = vector.shape_cast %45 : vector<16x16x8xf32> to vector<256x8xf32>
    %c7 = arith.constant 7 : index
    %c0_25 = arith.constant 0 : index
    %c0_26 = arith.constant 0 : index
    %47 = vector.load %arg2[%c7, %c0_25, %c0_26] : memref<9x8x8xf32, #tpu.memory_space<vmem>>, vector<1x8x8xf32>
    %48 = vector.shape_cast %47 : vector<1x8x8xf32> to vector<8x8xf32>
    %cst_27 = arith.constant dense<0.000000e+00> : vector<256x8xf32>
    %49 = tpu.matmul %46, %48, %cst_27 {dimension_numbers = #tpu.dot_dimension_numbers<[1], [0], [0], [1], [0, 0, 1, 1], [], []>} : vector<256x8xf32>, vector<8x8xf32>, vector<256x8xf32> -> vector<256x8xf32>
    %50 = arith.addf %44, %49 : vector<256x8xf32>
    %51 = vector.extract_strided_slice %1 {offsets = [2, 2, 0], sizes = [16, 16, 8], strides = [1, 1, 1]} : vector<18x18x8xf32> to vector<16x16x8xf32>
    %52 = vector.shape_cast %51 : vector<16x16x8xf32> to vector<256x8xf32>
    %c8 = arith.constant 8 : index
    %c0_28 = arith.constant 0 : index
    %c0_29 = arith.constant 0 : index
    %53 = vector.load %arg2[%c8, %c0_28, %c0_29] : memref<9x8x8xf32, #tpu.memory_space<vmem>>, vector<1x8x8xf32>
    %54 = vector.shape_cast %53 : vector<1x8x8xf32> to vector<8x8xf32>
    %cst_30 = arith.constant dense<0.000000e+00> : vector<256x8xf32>
    %55 = tpu.matmul %52, %54, %cst_30 {dimension_numbers = #tpu.dot_dimension_numbers<[1], [0], [0], [1], [0, 0, 1, 1], [], []>} : vector<256x8xf32>, vector<8x8xf32>, vector<256x8xf32> -> vector<256x8xf32>
    %56 = arith.addf %50, %55 : vector<256x8xf32>
    %c0_31 = arith.constant 0 : index
    %c0_32 = arith.constant 0 : index
    %57 = vector.load %arg3[%c0_31, %c0_32] : memref<1x8xf32, #tpu.memory_space<vmem>>, vector<1x8xf32>
    %58 = vector.broadcast %57 : vector<1x8xf32> to vector<256x8xf32>
    %59 = arith.addf %56, %58 : vector<256x8xf32>
    %60 = arith.negf %59 : vector<256x8xf32>
    %61 = math.exp %60 : vector<256x8xf32>
    %cst_33 = arith.constant 1.000000e+00 : f32
    %62 = vector.broadcast %cst_33 : f32 to vector<256x8xf32>
    %63 = arith.addf %62, %61 : vector<256x8xf32>
    %64 = arith.divf %62, %63 : vector<256x8xf32>
    %65 = arith.mulf %59, %64 : vector<256x8xf32>
    %c0_34 = arith.constant 0 : index
    %c0_35 = arith.constant 0 : index
    %66 = vector.load %arg4[%c0_34, %c0_35] : memref<2x32xf32, #tpu.memory_space<vmem>>, vector<2x32xf32>
    %67 = arith.negf %66 : vector<2x32xf32>
    %68 = math.exp %67 : vector<2x32xf32>
    %cst_36 = arith.constant 1.000000e+00 : f32
    %69 = vector.broadcast %cst_36 : f32 to vector<2x32xf32>
    %70 = arith.addf %69, %68 : vector<2x32xf32>
    %71 = arith.divf %69, %70 : vector<2x32xf32>
    %72 = arith.mulf %66, %71 : vector<2x32xf32>
    %c0_37 = arith.constant 0 : index
    %c0_38 = arith.constant 0 : index
    %73 = vector.load %arg5[%c0_37, %c0_38] : memref<32x8xf32, #tpu.memory_space<vmem>>, vector<32x8xf32>
    %cst_39 = arith.constant dense<0.000000e+00> : vector<2x8xf32>
    %74 = tpu.matmul %72, %73, %cst_39 {dimension_numbers = #tpu.dot_dimension_numbers<[1], [0], [0], [1], [0, 0, 1, 1], [], []>} : vector<2x32xf32>, vector<32x8xf32>, vector<2x8xf32> -> vector<2x8xf32>
    %c0_40 = arith.constant 0 : index
    %c0_41 = arith.constant 0 : index
    %75 = vector.load %arg6[%c0_40, %c0_41] : memref<1x8xf32, #tpu.memory_space<vmem>>, vector<1x8xf32>
    %76 = vector.broadcast %75 : vector<1x8xf32> to vector<2x8xf32>
    %77 = arith.addf %74, %76 : vector<2x8xf32>
    %78 = tpu.iota {dimensions = array<i32: 0>} : vector<2x8xi32>
    %79 = vector.broadcast %arg0 : i32 to vector<2x8xi32>
    %80 = arith.cmpi eq, %78, %79 : vector<2x8xi32>
    %cst_42 = arith.constant 0.000000e+00 : f32
    %81 = vector.broadcast %cst_42 : f32 to vector<2x8xf32>
    %82 = arith.select %80, %77, %81 : vector<2x8xi1>, vector<2x8xf32>
    %cst_43 = arith.constant dense<0.000000e+00> : vector<8xf32>
    %83 = vector.multi_reduction <add>, %82, %cst_43 [0] : vector<2x8xf32> to vector<8xf32>
    %84 = vector.shape_cast %83 : vector<8xf32> to vector<1x8xf32>
    %85 = vector.broadcast %84 : vector<1x8xf32> to vector<256x8xf32>
    %86 = arith.addf %65, %85 : vector<256x8xf32>
    %87 = vector.shape_cast %86 : vector<256x8xf32> to vector<1x16x16x8xf32>
    %c0_44 = arith.constant 0 : index
    %c0_45 = arith.constant 0 : index
    %c0_46 = arith.constant 0 : index
    %c0_47 = arith.constant 0 : index
    %88 = vector.load %arg7[%c0_44, %c0_45, %c0_46, %c0_47] : memref<1x16x16x8xf32, #tpu.memory_space<vmem>>, vector<1x16x16x8xf32>
    tpu.vector_store %arg7[%c0_44, %c0_45, %c0_46, %c0_47], %87 {strides = array<i32>} : memref<1x16x16x8xf32, #tpu.memory_space<vmem>>, vector<1x16x16x8xf32>,
    return
  }
  func.func @transform_0(%arg0: i32) -> (i32, i32, i32, i32) {
    %c0_i32 = arith.constant 0 : i32
    %c0_i32_0 = arith.constant 0 : i32
    %c0_i32_1 = arith.constant 0 : i32
    %c0_i32_2 = arith.constant 0 : i32
    return %arg0, %c0_i32, %c0_i32_0, %c0_i32_1 : i32, i32, i32, i32
  }
  func.func @transform_1(%arg0: i32) -> (i32, i32, i32) {
    %c0_i32 = arith.constant 0 : i32
    %c0_i32_0 = arith.constant 0 : i32
    %c0_i32_1 = arith.constant 0 : i32
    %c0_i32_2 = arith.constant 0 : i32
    return %c0_i32, %c0_i32_0, %c0_i32_1 : i32, i32, i32
  }
  func.func @transform_2(%arg0: i32) -> (i32, i32) {
    %c0_i32 = arith.constant 0 : i32
    %c0_i32_0 = arith.constant 0 : i32
    %c0_i32_1 = arith.constant 0 : i32
    return %c0_i32, %c0_i32_0 : i32, i32
  }
  func.func @transform_3(%arg0: i32) -> (i32, i32) {
    %c0_i32 = arith.constant 0 : i32
    %c0_i32_0 = arith.constant 0 : i32
    %c0_i32_1 = arith.constant 0 : i32
    return %c0_i32, %c0_i32_0 : i32, i32
  }
  func.func @transform_4(%arg0: i32) -> (i32, i32) {
    %c0_i32 = arith.constant 0 : i32
    %c0_i32_0 = arith.constant 0 : i32
    %c0_i32_1 = arith.constant 0 : i32
    return %c0_i32, %c0_i32_0 : i32, i32
  }
  func.func @transform_5(%arg0: i32) -> (i32, i32) {
    %c0_i32 = arith.constant 0 : i32
    %c0_i32_0 = arith.constant 0 : i32
    %c0_i32_1 = arith.constant 0 : i32
    return %c0_i32, %c0_i32_0 : i32, i32
  }
  func.func @transform_6(%arg0: i32) -> (i32, i32, i32, i32) {
    %c0_i32 = arith.constant 0 : i32
    %c0_i32_0 = arith.constant 0 : i32
    %c0_i32_1 = arith.constant 0 : i32
    %c0_i32_2 = arith.constant 0 : i32
    return %arg0, %c0_i32, %c0_i32_0, %c0_i32_1 : i32, i32, i32, i32
  }
}

module attributes {stable_mosaic.version = 11 : i64} {
  func.func @_conv2_silu_skip_kernel(%arg0: i32, %arg1: memref<1x18x18x8xf32, #tpu.memory_space<vmem>>, %arg2: memref<9x8x8xf32, #tpu.memory_space<vmem>>, %arg3: memref<1x8xf32, #tpu.memory_space<vmem>>, %arg4: memref<1x16x16x8xf32, #tpu.memory_space<vmem>>, %arg5: memref<8x8xf32, #tpu.memory_space<vmem>>, %arg6: memref<1x8xf32, #tpu.memory_space<vmem>>, %arg7: memref<1x16x16x8xf32, #tpu.memory_space<vmem>>) attributes {dimension_semantics = [#tpu.dimension_semantics<parallel>], iteration_bounds = array<i64: 2>, scalar_prefetch = 0 : i64, scratch_operands = 0 : i64, tpu.core_type = #tpu.core_type<tc>, window_params = [{transform_indices = @transform_0, window_bounds = array<i64: 1, 18, 18, 8>}, {pipeline_mode = #tpu.pipeline_mode<synchronous>, transform_indices = @transform_1, window_bounds = array<i64: 9, 8, 8>}, {pipeline_mode = #tpu.pipeline_mode<synchronous>, transform_indices = @transform_2, window_bounds = array<i64: 1, 8>}, {transform_indices = @transform_3, window_bounds = array<i64: 1, 16, 16, 8>}, {pipeline_mode = #tpu.pipeline_mode<synchronous>, transform_indices = @transform_4, window_bounds = array<i64: 8, 8>}, {pipeline_mode = #tpu.pipeline_mode<synchronous>, transform_indices = @transform_5, window_bounds = array<i64: 1, 8>}, {transform_indices = @transform_6, window_bounds = array<i64: 1, 16, 16, 8>}]} {
    %c0 = arith.constant 0 : index
    %c0_0 = arith.constant 0 : index
    %c0_1 = arith.constant 0 : index
    %c0_2 = arith.constant 0 : index
    %0 = vector.load %arg1[%c0, %c0_0, %c0_1, %c0_2] : memref<1x18x18x8xf32, #tpu.memory_space<vmem>>, vector<1x18x18x8xf32>
    %1 = vector.shape_cast %0 : vector<1x18x18x8xf32> to vector<18x18x8xf32>
    %cst = arith.constant 0.000000e+00 : f32
    %2 = vector.broadcast %cst : f32 to vector<256x8xf32>
    %3 = vector.extract_strided_slice %1 {offsets = [0, 0, 0], sizes = [16, 16, 8], strides = [1, 1, 1]} : vector<18x18x8xf32> to vector<16x16x8xf32>
    %4 = vector.shape_cast %3 : vector<16x16x8xf32> to vector<256x8xf32>
    %c0_3 = arith.constant 0 : index
    %c0_4 = arith.constant 0 : index
    %c0_5 = arith.constant 0 : index
    %5 = vector.load %arg2[%c0_3, %c0_4, %c0_5] : memref<9x8x8xf32, #tpu.memory_space<vmem>>, vector<1x8x8xf32>
    %6 = vector.shape_cast %5 : vector<1x8x8xf32> to vector<8x8xf32>
    %cst_6 = arith.constant dense<0.000000e+00> : vector<256x8xf32>
    %7 = tpu.matmul %4, %6, %cst_6 {dimension_numbers = #tpu.dot_dimension_numbers<[1], [0], [0], [1], [0, 0, 1, 1], [], []>} : vector<256x8xf32>, vector<8x8xf32>, vector<256x8xf32> -> vector<256x8xf32>
    %8 = arith.addf %2, %7 : vector<256x8xf32>
    %9 = vector.extract_strided_slice %1 {offsets = [0, 1, 0], sizes = [16, 16, 8], strides = [1, 1, 1]} : vector<18x18x8xf32> to vector<16x16x8xf32>
    %10 = vector.shape_cast %9 : vector<16x16x8xf32> to vector<256x8xf32>
    %c1 = arith.constant 1 : index
    %c0_7 = arith.constant 0 : index
    %c0_8 = arith.constant 0 : index
    %11 = vector.load %arg2[%c1, %c0_7, %c0_8] : memref<9x8x8xf32, #tpu.memory_space<vmem>>, vector<1x8x8xf32>
    %12 = vector.shape_cast %11 : vector<1x8x8xf32> to vector<8x8xf32>
    %cst_9 = arith.constant dense<0.000000e+00> : vector<256x8xf32>
    %13 = tpu.matmul %10, %12, %cst_9 {dimension_numbers = #tpu.dot_dimension_numbers<[1], [0], [0], [1], [0, 0, 1, 1], [], []>} : vector<256x8xf32>, vector<8x8xf32>, vector<256x8xf32> -> vector<256x8xf32>
    %14 = arith.addf %8, %13 : vector<256x8xf32>
    %15 = vector.extract_strided_slice %1 {offsets = [0, 2, 0], sizes = [16, 16, 8], strides = [1, 1, 1]} : vector<18x18x8xf32> to vector<16x16x8xf32>
    %16 = vector.shape_cast %15 : vector<16x16x8xf32> to vector<256x8xf32>
    %c2 = arith.constant 2 : index
    %c0_10 = arith.constant 0 : index
    %c0_11 = arith.constant 0 : index
    %17 = vector.load %arg2[%c2, %c0_10, %c0_11] : memref<9x8x8xf32, #tpu.memory_space<vmem>>, vector<1x8x8xf32>
    %18 = vector.shape_cast %17 : vector<1x8x8xf32> to vector<8x8xf32>
    %cst_12 = arith.constant dense<0.000000e+00> : vector<256x8xf32>
    %19 = tpu.matmul %16, %18, %cst_12 {dimension_numbers = #tpu.dot_dimension_numbers<[1], [0], [0], [1], [0, 0, 1, 1], [], []>} : vector<256x8xf32>, vector<8x8xf32>, vector<256x8xf32> -> vector<256x8xf32>
    %20 = arith.addf %14, %19 : vector<256x8xf32>
    %21 = vector.extract_strided_slice %1 {offsets = [1, 0, 0], sizes = [16, 16, 8], strides = [1, 1, 1]} : vector<18x18x8xf32> to vector<16x16x8xf32>
    %22 = vector.shape_cast %21 : vector<16x16x8xf32> to vector<256x8xf32>
    %c3 = arith.constant 3 : index
    %c0_13 = arith.constant 0 : index
    %c0_14 = arith.constant 0 : index
    %23 = vector.load %arg2[%c3, %c0_13, %c0_14] : memref<9x8x8xf32, #tpu.memory_space<vmem>>, vector<1x8x8xf32>
    %24 = vector.shape_cast %23 : vector<1x8x8xf32> to vector<8x8xf32>
    %cst_15 = arith.constant dense<0.000000e+00> : vector<256x8xf32>
    %25 = tpu.matmul %22, %24, %cst_15 {dimension_numbers = #tpu.dot_dimension_numbers<[1], [0], [0], [1], [0, 0, 1, 1], [], []>} : vector<256x8xf32>, vector<8x8xf32>, vector<256x8xf32> -> vector<256x8xf32>
    %26 = arith.addf %20, %25 : vector<256x8xf32>
    %27 = vector.extract_strided_slice %1 {offsets = [1, 1, 0], sizes = [16, 16, 8], strides = [1, 1, 1]} : vector<18x18x8xf32> to vector<16x16x8xf32>
    %28 = vector.shape_cast %27 : vector<16x16x8xf32> to vector<256x8xf32>
    %c4 = arith.constant 4 : index
    %c0_16 = arith.constant 0 : index
    %c0_17 = arith.constant 0 : index
    %29 = vector.load %arg2[%c4, %c0_16, %c0_17] : memref<9x8x8xf32, #tpu.memory_space<vmem>>, vector<1x8x8xf32>
    %30 = vector.shape_cast %29 : vector<1x8x8xf32> to vector<8x8xf32>
    %cst_18 = arith.constant dense<0.000000e+00> : vector<256x8xf32>
    %31 = tpu.matmul %28, %30, %cst_18 {dimension_numbers = #tpu.dot_dimension_numbers<[1], [0], [0], [1], [0, 0, 1, 1], [], []>} : vector<256x8xf32>, vector<8x8xf32>, vector<256x8xf32> -> vector<256x8xf32>
    %32 = arith.addf %26, %31 : vector<256x8xf32>
    %33 = vector.extract_strided_slice %1 {offsets = [1, 2, 0], sizes = [16, 16, 8], strides = [1, 1, 1]} : vector<18x18x8xf32> to vector<16x16x8xf32>
    %34 = vector.shape_cast %33 : vector<16x16x8xf32> to vector<256x8xf32>
    %c5 = arith.constant 5 : index
    %c0_19 = arith.constant 0 : index
    %c0_20 = arith.constant 0 : index
    %35 = vector.load %arg2[%c5, %c0_19, %c0_20] : memref<9x8x8xf32, #tpu.memory_space<vmem>>, vector<1x8x8xf32>
    %36 = vector.shape_cast %35 : vector<1x8x8xf32> to vector<8x8xf32>
    %cst_21 = arith.constant dense<0.000000e+00> : vector<256x8xf32>
    %37 = tpu.matmul %34, %36, %cst_21 {dimension_numbers = #tpu.dot_dimension_numbers<[1], [0], [0], [1], [0, 0, 1, 1], [], []>} : vector<256x8xf32>, vector<8x8xf32>, vector<256x8xf32> -> vector<256x8xf32>
    %38 = arith.addf %32, %37 : vector<256x8xf32>
    %39 = vector.extract_strided_slice %1 {offsets = [2, 0, 0], sizes = [16, 16, 8], strides = [1, 1, 1]} : vector<18x18x8xf32> to vector<16x16x8xf32>
    %40 = vector.shape_cast %39 : vector<16x16x8xf32> to vector<256x8xf32>
    %c6 = arith.constant 6 : index
    %c0_22 = arith.constant 0 : index
    %c0_23 = arith.constant 0 : index
    %41 = vector.load %arg2[%c6, %c0_22, %c0_23] : memref<9x8x8xf32, #tpu.memory_space<vmem>>, vector<1x8x8xf32>
    %42 = vector.shape_cast %41 : vector<1x8x8xf32> to vector<8x8xf32>
    %cst_24 = arith.constant dense<0.000000e+00> : vector<256x8xf32>
    %43 = tpu.matmul %40, %42, %cst_24 {dimension_numbers = #tpu.dot_dimension_numbers<[1], [0], [0], [1], [0, 0, 1, 1], [], []>} : vector<256x8xf32>, vector<8x8xf32>, vector<256x8xf32> -> vector<256x8xf32>
    %44 = arith.addf %38, %43 : vector<256x8xf32>
    %45 = vector.extract_strided_slice %1 {offsets = [2, 1, 0], sizes = [16, 16, 8], strides = [1, 1, 1]} : vector<18x18x8xf32> to vector<16x16x8xf32>
    %46 = vector.shape_cast %45 : vector<16x16x8xf32> to vector<256x8xf32>
    %c7 = arith.constant 7 : index
    %c0_25 = arith.constant 0 : index
    %c0_26 = arith.constant 0 : index
    %47 = vector.load %arg2[%c7, %c0_25, %c0_26] : memref<9x8x8xf32, #tpu.memory_space<vmem>>, vector<1x8x8xf32>
    %48 = vector.shape_cast %47 : vector<1x8x8xf32> to vector<8x8xf32>
    %cst_27 = arith.constant dense<0.000000e+00> : vector<256x8xf32>
    %49 = tpu.matmul %46, %48, %cst_27 {dimension_numbers = #tpu.dot_dimension_numbers<[1], [0], [0], [1], [0, 0, 1, 1], [], []>} : vector<256x8xf32>, vector<8x8xf32>, vector<256x8xf32> -> vector<256x8xf32>
    %50 = arith.addf %44, %49 : vector<256x8xf32>
    %51 = vector.extract_strided_slice %1 {offsets = [2, 2, 0], sizes = [16, 16, 8], strides = [1, 1, 1]} : vector<18x18x8xf32> to vector<16x16x8xf32>
    %52 = vector.shape_cast %51 : vector<16x16x8xf32> to vector<256x8xf32>
    %c8 = arith.constant 8 : index
    %c0_28 = arith.constant 0 : index
    %c0_29 = arith.constant 0 : index
    %53 = vector.load %arg2[%c8, %c0_28, %c0_29] : memref<9x8x8xf32, #tpu.memory_space<vmem>>, vector<1x8x8xf32>
    %54 = vector.shape_cast %53 : vector<1x8x8xf32> to vector<8x8xf32>
    %cst_30 = arith.constant dense<0.000000e+00> : vector<256x8xf32>
    %55 = tpu.matmul %52, %54, %cst_30 {dimension_numbers = #tpu.dot_dimension_numbers<[1], [0], [0], [1], [0, 0, 1, 1], [], []>} : vector<256x8xf32>, vector<8x8xf32>, vector<256x8xf32> -> vector<256x8xf32>
    %56 = arith.addf %50, %55 : vector<256x8xf32>
    %c0_31 = arith.constant 0 : index
    %c0_32 = arith.constant 0 : index
    %57 = vector.load %arg3[%c0_31, %c0_32] : memref<1x8xf32, #tpu.memory_space<vmem>>, vector<1x8xf32>
    %58 = vector.broadcast %57 : vector<1x8xf32> to vector<256x8xf32>
    %59 = arith.addf %56, %58 : vector<256x8xf32>
    %60 = arith.negf %59 : vector<256x8xf32>
    %61 = math.exp %60 : vector<256x8xf32>
    %cst_33 = arith.constant 1.000000e+00 : f32
    %62 = vector.broadcast %cst_33 : f32 to vector<256x8xf32>
    %63 = arith.addf %62, %61 : vector<256x8xf32>
    %64 = arith.divf %62, %63 : vector<256x8xf32>
    %65 = arith.mulf %59, %64 : vector<256x8xf32>
    %c0_34 = arith.constant 0 : index
    %c0_35 = arith.constant 0 : index
    %c0_36 = arith.constant 0 : index
    %c0_37 = arith.constant 0 : index
    %66 = vector.load %arg4[%c0_34, %c0_35, %c0_36, %c0_37] : memref<1x16x16x8xf32, #tpu.memory_space<vmem>>, vector<1x16x16x8xf32>
    %67 = vector.shape_cast %66 : vector<1x16x16x8xf32> to vector<16x16x8xf32>
    %68 = vector.shape_cast %67 : vector<16x16x8xf32> to vector<256x8xf32>
    %c0_38 = arith.constant 0 : index
    %c0_39 = arith.constant 0 : index
    %69 = vector.load %arg5[%c0_38, %c0_39] : memref<8x8xf32, #tpu.memory_space<vmem>>, vector<8x8xf32>
    %cst_40 = arith.constant dense<0.000000e+00> : vector<256x8xf32>
    %70 = tpu.matmul %68, %69, %cst_40 {dimension_numbers = #tpu.dot_dimension_numbers<[1], [0], [0], [1], [0, 0, 1, 1], [], []>} : vector<256x8xf32>, vector<8x8xf32>, vector<256x8xf32> -> vector<256x8xf32>
    %c0_41 = arith.constant 0 : index
    %c0_42 = arith.constant 0 : index
    %71 = vector.load %arg6[%c0_41, %c0_42] : memref<1x8xf32, #tpu.memory_space<vmem>>, vector<1x8xf32>
    %72 = vector.broadcast %71 : vector<1x8xf32> to vector<256x8xf32>
    %73 = arith.addf %70, %72 : vector<256x8xf32>
    %74 = arith.addf %65, %73 : vector<256x8xf32>
    %75 = vector.shape_cast %74 : vector<256x8xf32> to vector<1x16x16x8xf32>
    %c0_43 = arith.constant 0 : index
    %c0_44 = arith.constant 0 : index
    %c0_45 = arith.constant 0 : index
    %c0_46 = arith.constant 0 : index
    %76 = vector.load %arg7[%c0_43, %c0_44, %c0_45, %c0_46] : memref<1x16x16x8xf32, #tpu.memory_space<vmem>>, vector<1x16x16x8xf32>
    tpu.vector_store %arg7[%c0_43, %c0_44, %c0_45, %c0_46], %75 {strides = array<i32>} : memref<1x16x16x8xf32, #tpu.memory_space<vmem>>, vector<1x16x16x8xf32>,
    return
  }
  func.func @transform_0(%arg0: i32) -> (i32, i32, i32, i32) {
    %c0_i32 = arith.constant 0 : i32
    %c0_i32_0 = arith.constant 0 : i32
    %c0_i32_1 = arith.constant 0 : i32
    %c0_i32_2 = arith.constant 0 : i32
    return %arg0, %c0_i32, %c0_i32_0, %c0_i32_1 : i32, i32, i32, i32
  }
  func.func @transform_1(%arg0: i32) -> (i32, i32, i32) {
    %c0_i32 = arith.constant 0 : i32
    %c0_i32_0 = arith.constant 0 : i32
    %c0_i32_1 = arith.constant 0 : i32
    %c0_i32_2 = arith.constant 0 : i32
    return %c0_i32, %c0_i32_0, %c0_i32_1 : i32, i32, i32
  }
  func.func @transform_2(%arg0: i32) -> (i32, i32) {
    %c0_i32 = arith.constant 0 : i32
    %c0_i32_0 = arith.constant 0 : i32
    %c0_i32_1 = arith.constant 0 : i32
    return %c0_i32, %c0_i32_0 : i32, i32
  }
  func.func @transform_3(%arg0: i32) -> (i32, i32, i32, i32) {
    %c0_i32 = arith.constant 0 : i32
    %c0_i32_0 = arith.constant 0 : i32
    %c0_i32_1 = arith.constant 0 : i32
    %c0_i32_2 = arith.constant 0 : i32
    return %arg0, %c0_i32, %c0_i32_0, %c0_i32_1 : i32, i32, i32, i32
  }
  func.func @transform_4(%arg0: i32) -> (i32, i32) {
    %c0_i32 = arith.constant 0 : i32
    %c0_i32_0 = arith.constant 0 : i32
    %c0_i32_1 = arith.constant 0 : i32
    return %c0_i32, %c0_i32_0 : i32, i32
  }
  func.func @transform_5(%arg0: i32) -> (i32, i32) {
    %c0_i32 = arith.constant 0 : i32
    %c0_i32_0 = arith.constant 0 : i32
    %c0_i32_1 = arith.constant 0 : i32
    return %c0_i32, %c0_i32_0 : i32, i32
  }
  func.func @transform_6(%arg0: i32) -> (i32, i32, i32, i32) {
    %c0_i32 = arith.constant 0 : i32
    %c0_i32_0 = arith.constant 0 : i32
    %c0_i32_1 = arith.constant 0 : i32
    %c0_i32_2 = arith.constant 0 : i32
    return %arg0, %c0_i32, %c0_i32_0, %c0_i32_1 : i32, i32, i32, i32
  }
}

module attributes {stable_mosaic.version = 11 : i64} {
  func.func @_downsample_kernel(%arg0: i32, %arg1: memref<1x36x9x8xf32, #tpu.memory_space<vmem>>, %arg2: memref<16x8x8xf32, #tpu.memory_space<vmem>>, %arg3: memref<1x8xf32, #tpu.memory_space<vmem>>, %arg4: memref<1x8x8x8xf32, #tpu.memory_space<vmem>>) attributes {dimension_semantics = [#tpu.dimension_semantics<parallel>], iteration_bounds = array<i64: 2>, scalar_prefetch = 0 : i64, scratch_operands = 0 : i64, tpu.core_type = #tpu.core_type<tc>, window_params = [{transform_indices = @transform_0, window_bounds = array<i64: 1, 36, 9, 8>}, {pipeline_mode = #tpu.pipeline_mode<synchronous>, transform_indices = @transform_1, window_bounds = array<i64: 16, 8, 8>}, {pipeline_mode = #tpu.pipeline_mode<synchronous>, transform_indices = @transform_2, window_bounds = array<i64: 1, 8>}, {transform_indices = @transform_3, window_bounds = array<i64: 1, 8, 8, 8>}]} {
    %c0 = arith.constant 0 : index
    %c0_0 = arith.constant 0 : index
    %c0_1 = arith.constant 0 : index
    %c0_2 = arith.constant 0 : index
    %0 = vector.load %arg1[%c0, %c0_0, %c0_1, %c0_2] : memref<1x36x9x8xf32, #tpu.memory_space<vmem>>, vector<1x36x9x8xf32>
    %1 = vector.shape_cast %0 : vector<1x36x9x8xf32> to vector<36x9x8xf32>
    %cst = arith.constant 0.000000e+00 : f32
    %2 = vector.broadcast %cst : f32 to vector<64x8xf32>
    %3 = vector.extract_strided_slice %1 {offsets = [0, 0, 0], sizes = [8, 8, 8], strides = [1, 1, 1]} : vector<36x9x8xf32> to vector<8x8x8xf32>
    %4 = vector.shape_cast %3 : vector<8x8x8xf32> to vector<64x8xf32>
    %c0_3 = arith.constant 0 : index
    %c0_4 = arith.constant 0 : index
    %c0_5 = arith.constant 0 : index
    %5 = vector.load %arg2[%c0_3, %c0_4, %c0_5] : memref<16x8x8xf32, #tpu.memory_space<vmem>>, vector<1x8x8xf32>
    %6 = vector.shape_cast %5 : vector<1x8x8xf32> to vector<8x8xf32>
    %cst_6 = arith.constant dense<0.000000e+00> : vector<64x8xf32>
    %7 = tpu.matmul %4, %6, %cst_6 {dimension_numbers = #tpu.dot_dimension_numbers<[1], [0], [0], [1], [0, 0, 1, 1], [], []>} : vector<64x8xf32>, vector<8x8xf32>, vector<64x8xf32> -> vector<64x8xf32>
    %8 = arith.addf %2, %7 : vector<64x8xf32>
    %9 = vector.extract_strided_slice %1 {offsets = [0, 1, 0], sizes = [8, 8, 8], strides = [1, 1, 1]} : vector<36x9x8xf32> to vector<8x8x8xf32>
    %10 = vector.shape_cast %9 : vector<8x8x8xf32> to vector<64x8xf32>
    %c1 = arith.constant 1 : index
    %c0_7 = arith.constant 0 : index
    %c0_8 = arith.constant 0 : index
    %11 = vector.load %arg2[%c1, %c0_7, %c0_8] : memref<16x8x8xf32, #tpu.memory_space<vmem>>, vector<1x8x8xf32>
    %12 = vector.shape_cast %11 : vector<1x8x8xf32> to vector<8x8xf32>
    %cst_9 = arith.constant dense<0.000000e+00> : vector<64x8xf32>
    %13 = tpu.matmul %10, %12, %cst_9 {dimension_numbers = #tpu.dot_dimension_numbers<[1], [0], [0], [1], [0, 0, 1, 1], [], []>} : vector<64x8xf32>, vector<8x8xf32>, vector<64x8xf32> -> vector<64x8xf32>
    %14 = arith.addf %8, %13 : vector<64x8xf32>
    %15 = vector.extract_strided_slice %1 {offsets = [1, 0, 0], sizes = [8, 8, 8], strides = [1, 1, 1]} : vector<36x9x8xf32> to vector<8x8x8xf32>
    %16 = vector.shape_cast %15 : vector<8x8x8xf32> to vector<64x8xf32>
    %c2 = arith.constant 2 : index
    %c0_10 = arith.constant 0 : index
    %c0_11 = arith.constant 0 : index
    %17 = vector.load %arg2[%c2, %c0_10, %c0_11] : memref<16x8x8xf32, #tpu.memory_space<vmem>>, vector<1x8x8xf32>
    %18 = vector.shape_cast %17 : vector<1x8x8xf32> to vector<8x8xf32>
    %cst_12 = arith.constant dense<0.000000e+00> : vector<64x8xf32>
    %19 = tpu.matmul %16, %18, %cst_12 {dimension_numbers = #tpu.dot_dimension_numbers<[1], [0], [0], [1], [0, 0, 1, 1], [], []>} : vector<64x8xf32>, vector<8x8xf32>, vector<64x8xf32> -> vector<64x8xf32>
    %20 = arith.addf %14, %19 : vector<64x8xf32>
    %21 = vector.extract_strided_slice %1 {offsets = [1, 1, 0], sizes = [8, 8, 8], strides = [1, 1, 1]} : vector<36x9x8xf32> to vector<8x8x8xf32>
    %22 = vector.shape_cast %21 : vector<8x8x8xf32> to vector<64x8xf32>
    %c3 = arith.constant 3 : index
    %c0_13 = arith.constant 0 : index
    %c0_14 = arith.constant 0 : index
    %23 = vector.load %arg2[%c3, %c0_13, %c0_14] : memref<16x8x8xf32, #tpu.memory_space<vmem>>, vector<1x8x8xf32>
    %24 = vector.shape_cast %23 : vector<1x8x8xf32> to vector<8x8xf32>
    %cst_15 = arith.constant dense<0.000000e+00> : vector<64x8xf32>
    %25 = tpu.matmul %22, %24, %cst_15 {dimension_numbers = #tpu.dot_dimension_numbers<[1], [0], [0], [1], [0, 0, 1, 1], [], []>} : vector<64x8xf32>, vector<8x8xf32>, vector<64x8xf32> -> vector<64x8xf32>
    %26 = arith.addf %20, %25 : vector<64x8xf32>
    %27 = vector.extract_strided_slice %1 {offsets = [9, 0, 0], sizes = [8, 8, 8], strides = [1, 1, 1]} : vector<36x9x8xf32> to vector<8x8x8xf32>
    %28 = vector.shape_cast %27 : vector<8x8x8xf32> to vector<64x8xf32>
    %c4 = arith.constant 4 : index
    %c0_16 = arith.constant 0 : index
    %c0_17 = arith.constant 0 : index
    %29 = vector.load %arg2[%c4, %c0_16, %c0_17] : memref<16x8x8xf32, #tpu.memory_space<vmem>>, vector<1x8x8xf32>
    %30 = vector.shape_cast %29 : vector<1x8x8xf32> to vector<8x8xf32>
    %cst_18 = arith.constant dense<0.000000e+00> : vector<64x8xf32>
    %31 = tpu.matmul %28, %30, %cst_18 {dimension_numbers = #tpu.dot_dimension_numbers<[1], [0], [0], [1], [0, 0, 1, 1], [], []>} : vector<64x8xf32>, vector<8x8xf32>, vector<64x8xf32> -> vector<64x8xf32>
    %32 = arith.addf %26, %31 : vector<64x8xf32>
    %33 = vector.extract_strided_slice %1 {offsets = [9, 1, 0], sizes = [8, 8, 8], strides = [1, 1, 1]} : vector<36x9x8xf32> to vector<8x8x8xf32>
    %34 = vector.shape_cast %33 : vector<8x8x8xf32> to vector<64x8xf32>
    %c5 = arith.constant 5 : index
    %c0_19 = arith.constant 0 : index
    %c0_20 = arith.constant 0 : index
    %35 = vector.load %arg2[%c5, %c0_19, %c0_20] : memref<16x8x8xf32, #tpu.memory_space<vmem>>, vector<1x8x8xf32>
    %36 = vector.shape_cast %35 : vector<1x8x8xf32> to vector<8x8xf32>
    %cst_21 = arith.constant dense<0.000000e+00> : vector<64x8xf32>
    %37 = tpu.matmul %34, %36, %cst_21 {dimension_numbers = #tpu.dot_dimension_numbers<[1], [0], [0], [1], [0, 0, 1, 1], [], []>} : vector<64x8xf32>, vector<8x8xf32>, vector<64x8xf32> -> vector<64x8xf32>
    %38 = arith.addf %32, %37 : vector<64x8xf32>
    %39 = vector.extract_strided_slice %1 {offsets = [10, 0, 0], sizes = [8, 8, 8], strides = [1, 1, 1]} : vector<36x9x8xf32> to vector<8x8x8xf32>
    %40 = vector.shape_cast %39 : vector<8x8x8xf32> to vector<64x8xf32>
    %c6 = arith.constant 6 : index
    %c0_22 = arith.constant 0 : index
    %c0_23 = arith.constant 0 : index
    %41 = vector.load %arg2[%c6, %c0_22, %c0_23] : memref<16x8x8xf32, #tpu.memory_space<vmem>>, vector<1x8x8xf32>
    %42 = vector.shape_cast %41 : vector<1x8x8xf32> to vector<8x8xf32>
    %cst_24 = arith.constant dense<0.000000e+00> : vector<64x8xf32>
    %43 = tpu.matmul %40, %42, %cst_24 {dimension_numbers = #tpu.dot_dimension_numbers<[1], [0], [0], [1], [0, 0, 1, 1], [], []>} : vector<64x8xf32>, vector<8x8xf32>, vector<64x8xf32> -> vector<64x8xf32>
    %44 = arith.addf %38, %43 : vector<64x8xf32>
    %45 = vector.extract_strided_slice %1 {offsets = [10, 1, 0], sizes = [8, 8, 8], strides = [1, 1, 1]} : vector<36x9x8xf32> to vector<8x8x8xf32>
    %46 = vector.shape_cast %45 : vector<8x8x8xf32> to vector<64x8xf32>
    %c7 = arith.constant 7 : index
    %c0_25 = arith.constant 0 : index
    %c0_26 = arith.constant 0 : index
    %47 = vector.load %arg2[%c7, %c0_25, %c0_26] : memref<16x8x8xf32, #tpu.memory_space<vmem>>, vector<1x8x8xf32>
    %48 = vector.shape_cast %47 : vector<1x8x8xf32> to vector<8x8xf32>
    %cst_27 = arith.constant dense<0.000000e+00> : vector<64x8xf32>
    %49 = tpu.matmul %46, %48, %cst_27 {dimension_numbers = #tpu.dot_dimension_numbers<[1], [0], [0], [1], [0, 0, 1, 1], [], []>} : vector<64x8xf32>, vector<8x8xf32>, vector<64x8xf32> -> vector<64x8xf32>
    %50 = arith.addf %44, %49 : vector<64x8xf32>
    %51 = vector.extract_strided_slice %1 {offsets = [18, 0, 0], sizes = [8, 8, 8], strides = [1, 1, 1]} : vector<36x9x8xf32> to vector<8x8x8xf32>
    %52 = vector.shape_cast %51 : vector<8x8x8xf32> to vector<64x8xf32>
    %c8 = arith.constant 8 : index
    %c0_28 = arith.constant 0 : index
    %c0_29 = arith.constant 0 : index
    %53 = vector.load %arg2[%c8, %c0_28, %c0_29] : memref<16x8x8xf32, #tpu.memory_space<vmem>>, vector<1x8x8xf32>
    %54 = vector.shape_cast %53 : vector<1x8x8xf32> to vector<8x8xf32>
    %cst_30 = arith.constant dense<0.000000e+00> : vector<64x8xf32>
    %55 = tpu.matmul %52, %54, %cst_30 {dimension_numbers = #tpu.dot_dimension_numbers<[1], [0], [0], [1], [0, 0, 1, 1], [], []>} : vector<64x8xf32>, vector<8x8xf32>, vector<64x8xf32> -> vector<64x8xf32>
    %56 = arith.addf %50, %55 : vector<64x8xf32>
    %57 = vector.extract_strided_slice %1 {offsets = [18, 1, 0], sizes = [8, 8, 8], strides = [1, 1, 1]} : vector<36x9x8xf32> to vector<8x8x8xf32>
    %58 = vector.shape_cast %57 : vector<8x8x8xf32> to vector<64x8xf32>
    %c9 = arith.constant 9 : index
    %c0_31 = arith.constant 0 : index
    %c0_32 = arith.constant 0 : index
    %59 = vector.load %arg2[%c9, %c0_31, %c0_32] : memref<16x8x8xf32, #tpu.memory_space<vmem>>, vector<1x8x8xf32>
    %60 = vector.shape_cast %59 : vector<1x8x8xf32> to vector<8x8xf32>
    %cst_33 = arith.constant dense<0.000000e+00> : vector<64x8xf32>
    %61 = tpu.matmul %58, %60, %cst_33 {dimension_numbers = #tpu.dot_dimension_numbers<[1], [0], [0], [1], [0, 0, 1, 1], [], []>} : vector<64x8xf32>, vector<8x8xf32>, vector<64x8xf32> -> vector<64x8xf32>
    %62 = arith.addf %56, %61 : vector<64x8xf32>
    %63 = vector.extract_strided_slice %1 {offsets = [19, 0, 0], sizes = [8, 8, 8], strides = [1, 1, 1]} : vector<36x9x8xf32> to vector<8x8x8xf32>
    %64 = vector.shape_cast %63 : vector<8x8x8xf32> to vector<64x8xf32>
    %c10 = arith.constant 10 : index
    %c0_34 = arith.constant 0 : index
    %c0_35 = arith.constant 0 : index
    %65 = vector.load %arg2[%c10, %c0_34, %c0_35] : memref<16x8x8xf32, #tpu.memory_space<vmem>>, vector<1x8x8xf32>
    %66 = vector.shape_cast %65 : vector<1x8x8xf32> to vector<8x8xf32>
    %cst_36 = arith.constant dense<0.000000e+00> : vector<64x8xf32>
    %67 = tpu.matmul %64, %66, %cst_36 {dimension_numbers = #tpu.dot_dimension_numbers<[1], [0], [0], [1], [0, 0, 1, 1], [], []>} : vector<64x8xf32>, vector<8x8xf32>, vector<64x8xf32> -> vector<64x8xf32>
    %68 = arith.addf %62, %67 : vector<64x8xf32>
    %69 = vector.extract_strided_slice %1 {offsets = [19, 1, 0], sizes = [8, 8, 8], strides = [1, 1, 1]} : vector<36x9x8xf32> to vector<8x8x8xf32>
    %70 = vector.shape_cast %69 : vector<8x8x8xf32> to vector<64x8xf32>
    %c11 = arith.constant 11 : index
    %c0_37 = arith.constant 0 : index
    %c0_38 = arith.constant 0 : index
    %71 = vector.load %arg2[%c11, %c0_37, %c0_38] : memref<16x8x8xf32, #tpu.memory_space<vmem>>, vector<1x8x8xf32>
    %72 = vector.shape_cast %71 : vector<1x8x8xf32> to vector<8x8xf32>
    %cst_39 = arith.constant dense<0.000000e+00> : vector<64x8xf32>
    %73 = tpu.matmul %70, %72, %cst_39 {dimension_numbers = #tpu.dot_dimension_numbers<[1], [0], [0], [1], [0, 0, 1, 1], [], []>} : vector<64x8xf32>, vector<8x8xf32>, vector<64x8xf32> -> vector<64x8xf32>
    %74 = arith.addf %68, %73 : vector<64x8xf32>
    %75 = vector.extract_strided_slice %1 {offsets = [27, 0, 0], sizes = [8, 8, 8], strides = [1, 1, 1]} : vector<36x9x8xf32> to vector<8x8x8xf32>
    %76 = vector.shape_cast %75 : vector<8x8x8xf32> to vector<64x8xf32>
    %c12 = arith.constant 12 : index
    %c0_40 = arith.constant 0 : index
    %c0_41 = arith.constant 0 : index
    %77 = vector.load %arg2[%c12, %c0_40, %c0_41] : memref<16x8x8xf32, #tpu.memory_space<vmem>>, vector<1x8x8xf32>
    %78 = vector.shape_cast %77 : vector<1x8x8xf32> to vector<8x8xf32>
    %cst_42 = arith.constant dense<0.000000e+00> : vector<64x8xf32>
    %79 = tpu.matmul %76, %78, %cst_42 {dimension_numbers = #tpu.dot_dimension_numbers<[1], [0], [0], [1], [0, 0, 1, 1], [], []>} : vector<64x8xf32>, vector<8x8xf32>, vector<64x8xf32> -> vector<64x8xf32>
    %80 = arith.addf %74, %79 : vector<64x8xf32>
    %81 = vector.extract_strided_slice %1 {offsets = [27, 1, 0], sizes = [8, 8, 8], strides = [1, 1, 1]} : vector<36x9x8xf32> to vector<8x8x8xf32>
    %82 = vector.shape_cast %81 : vector<8x8x8xf32> to vector<64x8xf32>
    %c13 = arith.constant 13 : index
    %c0_43 = arith.constant 0 : index
    %c0_44 = arith.constant 0 : index
    %83 = vector.load %arg2[%c13, %c0_43, %c0_44] : memref<16x8x8xf32, #tpu.memory_space<vmem>>, vector<1x8x8xf32>
    %84 = vector.shape_cast %83 : vector<1x8x8xf32> to vector<8x8xf32>
    %cst_45 = arith.constant dense<0.000000e+00> : vector<64x8xf32>
    %85 = tpu.matmul %82, %84, %cst_45 {dimension_numbers = #tpu.dot_dimension_numbers<[1], [0], [0], [1], [0, 0, 1, 1], [], []>} : vector<64x8xf32>, vector<8x8xf32>, vector<64x8xf32> -> vector<64x8xf32>
    %86 = arith.addf %80, %85 : vector<64x8xf32>
    %87 = vector.extract_strided_slice %1 {offsets = [28, 0, 0], sizes = [8, 8, 8], strides = [1, 1, 1]} : vector<36x9x8xf32> to vector<8x8x8xf32>
    %88 = vector.shape_cast %87 : vector<8x8x8xf32> to vector<64x8xf32>
    %c14 = arith.constant 14 : index
    %c0_46 = arith.constant 0 : index
    %c0_47 = arith.constant 0 : index
    %89 = vector.load %arg2[%c14, %c0_46, %c0_47] : memref<16x8x8xf32, #tpu.memory_space<vmem>>, vector<1x8x8xf32>
    %90 = vector.shape_cast %89 : vector<1x8x8xf32> to vector<8x8xf32>
    %cst_48 = arith.constant dense<0.000000e+00> : vector<64x8xf32>
    %91 = tpu.matmul %88, %90, %cst_48 {dimension_numbers = #tpu.dot_dimension_numbers<[1], [0], [0], [1], [0, 0, 1, 1], [], []>} : vector<64x8xf32>, vector<8x8xf32>, vector<64x8xf32> -> vector<64x8xf32>
    %92 = arith.addf %86, %91 : vector<64x8xf32>
    %93 = vector.extract_strided_slice %1 {offsets = [28, 1, 0], sizes = [8, 8, 8], strides = [1, 1, 1]} : vector<36x9x8xf32> to vector<8x8x8xf32>
    %94 = vector.shape_cast %93 : vector<8x8x8xf32> to vector<64x8xf32>
    %c15 = arith.constant 15 : index
    %c0_49 = arith.constant 0 : index
    %c0_50 = arith.constant 0 : index
    %95 = vector.load %arg2[%c15, %c0_49, %c0_50] : memref<16x8x8xf32, #tpu.memory_space<vmem>>, vector<1x8x8xf32>
    %96 = vector.shape_cast %95 : vector<1x8x8xf32> to vector<8x8xf32>
    %cst_51 = arith.constant dense<0.000000e+00> : vector<64x8xf32>
    %97 = tpu.matmul %94, %96, %cst_51 {dimension_numbers = #tpu.dot_dimension_numbers<[1], [0], [0], [1], [0, 0, 1, 1], [], []>} : vector<64x8xf32>, vector<8x8xf32>, vector<64x8xf32> -> vector<64x8xf32>
    %98 = arith.addf %92, %97 : vector<64x8xf32>
    %c0_52 = arith.constant 0 : index
    %c0_53 = arith.constant 0 : index
    %99 = vector.load %arg3[%c0_52, %c0_53] : memref<1x8xf32, #tpu.memory_space<vmem>>, vector<1x8xf32>
    %100 = vector.broadcast %99 : vector<1x8xf32> to vector<64x8xf32>
    %101 = arith.addf %98, %100 : vector<64x8xf32>
    %102 = vector.shape_cast %101 : vector<64x8xf32> to vector<1x8x8x8xf32>
    %c0_54 = arith.constant 0 : index
    %c0_55 = arith.constant 0 : index
    %c0_56 = arith.constant 0 : index
    %c0_57 = arith.constant 0 : index
    %103 = vector.load %arg4[%c0_54, %c0_55, %c0_56, %c0_57] : memref<1x8x8x8xf32, #tpu.memory_space<vmem>>, vector<1x8x8x8xf32>
    tpu.vector_store %arg4[%c0_54, %c0_55, %c0_56, %c0_57], %102 {strides = array<i32>} : memref<1x8x8x8xf32, #tpu.memory_space<vmem>>, vector<1x8x8x8xf32>,
    return
  }
  func.func @transform_0(%arg0: i32) -> (i32, i32, i32, i32) {
    %c0_i32 = arith.constant 0 : i32
    %c0_i32_0 = arith.constant 0 : i32
    %c0_i32_1 = arith.constant 0 : i32
    %c0_i32_2 = arith.constant 0 : i32
    return %arg0, %c0_i32, %c0_i32_0, %c0_i32_1 : i32, i32, i32, i32
  }
  func.func @transform_1(%arg0: i32) -> (i32, i32, i32) {
    %c0_i32 = arith.constant 0 : i32
    %c0_i32_0 = arith.constant 0 : i32
    %c0_i32_1 = arith.constant 0 : i32
    %c0_i32_2 = arith.constant 0 : i32
    return %c0_i32, %c0_i32_0, %c0_i32_1 : i32, i32, i32
  }
  func.func @transform_2(%arg0: i32) -> (i32, i32) {
    %c0_i32 = arith.constant 0 : i32
    %c0_i32_0 = arith.constant 0 : i32
    %c0_i32_1 = arith.constant 0 : i32
    return %c0_i32, %c0_i32_0 : i32, i32
  }
  func.func @transform_3(%arg0: i32) -> (i32, i32, i32, i32) {
    %c0_i32 = arith.constant 0 : i32
    %c0_i32_0 = arith.constant 0 : i32
    %c0_i32_1 = arith.constant 0 : i32
    %c0_i32_2 = arith.constant 0 : i32
    return %arg0, %c0_i32, %c0_i32_0, %c0_i32_1 : i32, i32, i32, i32
  }
}

</mosaic_0001>

<bundles_post_ra>
// kernel: down_block_forward.5
= control target key start
LH: loop header
LB: loop body
LE: loop exit
PB: predicated region body
PF: predicated region fallthrough
CT: control target
= control target key end

     0   :  { %s5111_s21 = smov 0   ;;  %s6627_s0 = inlined_call_operand.vmem [shape: f32[2,18,18,4], index: 0, kind: input, shape index: {}]   ;;  %s6628_s1 = inlined_call_operand.vmem [shape: f32[9,4,8], index: 1, kind: input, shape index: {}]   ;;  %s6629_s2 = inlined_call_operand.vmem [shape: f32[1,8], index: 2, kind: input, shape index: {}]   ;;  %s6630_s3 = inlined_call_operand.vmem [shape: f32[2,32], index: 3, kind: input, shape index: {}]   ;;  %s6631_s4 = inlined_call_operand.vmem [shape: f32[32,8], index: 4, kind: input, shape index: {}]   ;;  %s6632_s5 = inlined_call_operand.vmem [shape: f32[1,8], index: 5, kind: input, shape index: {}]   ;;  %s6633_s6 = inlined_call_operand.vmem [shape: f32[2,16,16,8], index: 6, kind: output, shape index: {}]  }
   0x1 LB: > { %s5117_s22 = sadd.s32 4294967295, %s5071_s21   ;;  %p3546_p0 = scmp.ge.s32.totalorder %s5071_s21, 1  ;;  %s5071_s21 = sphi %s5111_s21, %s16_s21  }
   0x2   : > { %p212_p1 = scmp.lt.s32.totalorder %s5071_s21, 3 }
   0x4   : > { %p213_p2 = pnand %p3546_p0, %p212_p1 }
   0x6   : > { %216 = sbr.rel (%p213_p2) target bundleno = 566 (0x236), region = 44 }
   0xd   : > { %vm503_vm0 = vcmask 1043456   ;;  %v5124_v0 = vld [vmem:[%s6628_s1 + $0x10] sm:$0xf]  ;;  %v3550_v1 = vld [vmem:[%s6628_s1 + $0x4] sm:$0xf]  ;;  %p242_p3 = scmp.lt.s32.totalorder %s5117_s22, 1 }
   0xe   : > { %4396 = vmatprep.subr.msk.mxu0 %vm503_vm0, %v5124_v0  ;;  %4196 = vmatprep.subr.msk.mxu1 %vm503_vm0, %v3550_v1  ;;  %v3719_v2 = vld [vmem:[%s6628_s1 + $0x14] sm:$0xf]  ;;  %v306_v3 = vld [vmem:[%s6628_s1] sm:$0xf]  ;;  %vm355_vm1 = vcmask 1046528   ;;  %vm438_vm2 = vcmask 31744  }
   0xf   : > { %4397 = vmatpush3.msk.msra.mxu0 %vm503_vm0, %v5124_v0  ;;  %4197 = vmatpush3.msk.msra.mxu1 %vm503_vm0, %v3550_v1  ;;  %s5143_s7 = scalar_select %p242_p3, %s5117_s22, 1  ;;  %v5216_v33 = vld [vmem:[%s6628_s1 + $0x18] sm:$0xf]  ;;  %v5226_v35 = vld [vmem:[%s6628_s1 + $0x8] sm:$0xf]  ;;  %vm1024_vm3 = vcmask 1045504  }
  0x10   : > { %4446 = vmatprep.subr.msk.mxu0 %vm503_vm0, %v3719_v2  ;;  %4246 = vmatprep.subr.msk.mxu1 %vm503_vm0, %v306_v3  ;;  %vm5074_vm4 = vmmov 0   ;;  %vm3335_vm5 = vcmask 261120   ;;  %vm3414_vm7 = vcmask 58368   ;;  %vm3454_vm8 = vcmask 64512  }
  0x11   : > { %s4921_s8 = smul.u32 432, %s5143_s7  ;;  %s3893_s14 = sshll.u32 %s5143_s7, 8 }
  0x12   : > { %s6506_s16 = scalar_lea.vmem %s6633_s6, %s3893_s14 }
  0x13   : > { %s5151_s11 = scalar_lea.vmem %s6627_s0, %s4921_s8 }
  0x14   : > { %v5154_v4 = vld [vmem:[%s5151_s11] sm:$0xff]  ;;  %v5157_v5 = vld [vmem:[%s5151_s11 + $0x8] sm:$0xff]  ;;  %v5160_v6 = vld [vmem:[%s5151_s11 + $0x18] sm:$0xff] }
  0x15   : > { %6705 = vst [vmem:[#allocation2_spill] sm:$0xff] %v5160_v6  ;;  %v356_v7 = vrot.slane %v5154_v4, 1  ;;  %v357_v8 = vrot.slane %v5157_v5, 1  ;;  %v5165_v9 = vld [vmem:[%s5151_s11 + $0x20] sm:$0xff]  ;;  %v361_v10 = vrot.slane %v5160_v6, 1  ;;  %v5177_v15 = vld [vmem:[%s5151_s11 + $0x30] sm:$0xff] }
  0x16   : > { %6706 = vst [vmem:[#allocation3_spill] sm:$0xff] %v5165_v9  ;;  %v5169_v11 = vld [vmem:[%s5151_s11 + $0x10] sm:$0x3]  ;;  %v362_v12 = vrot.slane %v5165_v9, 1  ;;  %v5174_v14 = vld [vmem:[%s5151_s11 + $0x28] sm:$0x3] }
  0x17   : > { %v359_v13 = vrot.slane %v5169_v11, 1  ;;  %v358_v16 = vsel %vm355_vm1, %v356_v7, %v357_v8  ;;  %v364_v17 = vrot.slane %v5174_v14, 1  ;;  %v5182_v18 = vld [vmem:[%s5151_s11 + $0x38] sm:$0xff]  ;;  %v366_v19 = vrot.slane %v5177_v15, 1  ;;  %v5186_v20 = vld [vmem:[%s5151_s11 + $0x40] sm:$0x3] }
  0x18   : > { %4198 = vmatprep.mubr.msk.f32.mxu1 %vm438_vm2, %v358_v16  ;;  %v363_v21 = vsel %vm355_vm1, %v361_v10, %v362_v12  ;;  %v367_v23 = vrot.slane %v5182_v18, 1  ;;  %v369_v24 = vrot.slane %v5186_v20, 1  ;;  %v5194_v25 = vld [vmem:[%s5151_s11 + $0x48] sm:$0xff]  ;;  %v5197_v26 = vld [vmem:[%s5151_s11 + $0x50] sm:$0xff]  ;;  %v5200_v27 = vld [vmem:[%s5151_s11 + $0x58] sm:$0x3] }
  0x19   : > { %v360_v22 = vsel %vm355_vm1, %v357_v8, %v359_v13  ;;  %4398 = vmatprep.mubr.msk.f32.mxu0 %vm438_vm2, %v363_v21  ;;  %v365_v28 = vsel %vm355_vm1, %v362_v12, %v364_v17  ;;  %v371_v29 = vrot.slane %v5194_v25, 1  ;;  %v372_v30 = vrot.slane %v5197_v26, 1  ;;  %v5208_v31 = vld [vmem:[%s5151_s11 + $0x60] sm:$0xff]  ;;  %v5211_v32 = vld [vmem:[%s5151_s11 + $0x68] sm:$0xff]  ;;  %v5242_v41 = vld [vmem:[%s5151_s11 + $0x70] sm:$0x3] }
  0x1a   : > { %4199 = vmatmul.mubr.msk.f32.vlgmr.msra.gmra.mrb[0].mxu1 %vm438_vm2, %v360_v22  ;;  %4399 = vmatmul.mubr.msk.f32.vlgmr.msra.gmra.mrb[0].mxu0 %vm438_vm2, %v365_v28  ;;  %v5221_v34 = vsel %vm355_vm1, %v366_v19, %v367_v23  ;;  %v5232_v36 = vsel %vm355_vm1, %v367_v23, %v369_v24  ;;  %v374_v37 = vrot.slane %v5200_v27, 1  ;;  %v376_v39 = vrot.slane %v5208_v31, 1  ;;  %v5248_v42 = vld [vmem:[%s5151_s11 + $0x78] sm:$0xff]  ;;  %v5251_v43 = vld [vmem:[%s5151_s11 + $0x80] sm:$0xff]  ;;  %v5271_v49 = vld [vmem:[%s5151_s11 + $0x88] sm:$0x3] }
  0x1b   : > { %4201 = vmatprep.mubr.msk.f32.mxu1 %vm438_vm2, %v363_v21  ;;  %6707 = vst [vmem:[#allocation4_spill] sm:$0xff] %v5221_v34  ;;  %4447 = vmatpush3.msk.msra.mxu0 %vm503_vm0, %v3719_v2  ;;  %6708 = vst [vmem:[#allocation5_spill] sm:$0xff] %v5232_v36  ;;  %v5236_v38 = vsel %vm355_vm1, %v371_v29, %v372_v30  ;;  %v377_v40 = vrot.slane %v5211_v32, 1  ;;  %v379_v45 = vrot.slane %v5242_v41, 1  ;;  %v381_v47 = vrot.slane %v5248_v42, 1  ;;  %v5276_v50 = vld [vmem:[%s5151_s11 + $0x90] sm:$0xff] }
  0x1c   : > { %4401 = vmatprep.mubr.msk.f32.mxu0 %vm438_vm2, %v5221_v34  ;;  %6709 = vst [vmem:[#allocation6_spill] sm:$0xff] %v5236_v38  ;;  %4247 = vmatpush3.msk.msra.mxu1 %vm503_vm0, %v306_v3  ;;  %v5262_v44 = vsel %vm355_vm1, %v372_v30, %v374_v37  ;;  %v382_v48 = vrot.slane %v5251_v43, 1  ;;  %v5279_v51 = vld [vmem:[%s5151_s11 + $0x98] sm:$0xff]  ;;  %v384_v53 = vrot.slane %v5271_v49, 1  ;;  %v386_v55 = vrot.slane %v5276_v50, 1  ;;  %v5302_v58 = vld [vmem:[%s5151_s11 + $0xa8] sm:$0xff] }
  0x1d   : > { %4496 = vmatprep.subr.msk.mxu0 %vm503_vm0, %v5216_v33  ;;  %4296 = vmatprep.subr.msk.mxu1 %vm503_vm0, %v5226_v35  ;;  %6710 = vst [vmem:[#allocation7_spill] sm:$0xff] %v5262_v44  ;;  %v5266_v46 = vsel %vm355_vm1, %v376_v39, %v377_v40  ;;  %v5288_v52 = vsel %vm355_vm1, %v377_v40, %v379_v45  ;;  %v387_v56 = vrot.slane %v5279_v51, 1  ;;  %v5297_v57 = vld [vmem:[%s5151_s11 + $0xa0] sm:$0x3]  ;;  %v5305_v59 = vld [vmem:[%s5151_s11 + $0xb0] sm:$0xff]  ;;  %v391_v63 = vrot.slane %v5302_v58, 1 }
  0x1e   : > { %4202 = vmatmul.mubr.msk.f32.gmra.mrb[2].mxu1 %vm438_vm2, %v365_v28  ;;  %4402 = vmatmul.mubr.msk.f32.gmra.mrb[2].mxu0 %vm438_vm2, %v5232_v36  ;;  %6711 = vst [vmem:[#allocation8_spill] sm:$0xff] %v5266_v46  ;;  %6712 = vst [vmem:[#allocation9_spill] sm:$0xff] %v5288_v52  ;;  %v5292_v54 = vsel %vm355_vm1, %v381_v47, %v382_v48  ;;  %v5314_v60 = vsel %vm355_vm1, %v382_v48, %v384_v53  ;;  %v389_v61 = vrot.slane %v5297_v57, 1  ;;  %v5323_v2 = vld [vmem:[%s5151_s11 + $0xb8] sm:$0x3]  ;;  %v5328_v3 = vld [vmem:[%s5151_s11 + $0xc0] sm:$0xff] }
  0x1f   : > { %4204 = vmatprep.mubr.msk.f32.mxu1 %vm438_vm2, %v5221_v34  ;;  %4404 = vmatprep.mubr.msk.f32.mxu0 %vm438_vm2, %v5236_v38  ;;  %6713 = vst [vmem:[#allocation10_spill] sm:$0xff] %v5292_v54  ;;  %6714 = vst [vmem:[#allocation11_spill] sm:$0xff] %v5314_v60  ;;  %v5318_v62 = vsel %vm355_vm1, %v386_v55, %v387_v56  ;;  %v392_v1 = vrot.slane %v5305_v59, 1  ;;  %v5331_v7 = vld [vmem:[%s5151_s11 + $0xc8] sm:$0xff]  ;;  %v394_v10 = vrot.slane %v5323_v2, 1  ;;  %v396_v13 = vrot.slane %v5328_v3, 1 }
  0x20   : > { %6715 = vst [vmem:[#allocation12_spill] sm:$0xff] %v5318_v62  ;;  %v5340_v8 = vsel %vm355_vm1, %v387_v56, %v389_v61  ;;  %v397_v16 = vrot.slane %v5331_v7, 1  ;;  %v5349_v17 = vld [vmem:[%s5151_s11 + $0xd0] sm:$0x3]  ;;  %v5354_v19 = vld [vmem:[%s5151_s11 + $0xd8] sm:$0xff]  ;;  %v5357_v21 = vld [vmem:[%s5151_s11 + $0xe0] sm:$0xff] }
  0x21   : > { %6716 = vst [vmem:[#allocation13_spill] sm:$0xff] %v5340_v8  ;;  %v5344_v12 = vsel %vm355_vm1, %v391_v63, %v392_v1  ;;  %v5366_v22 = vsel %vm355_vm1, %v392_v1, %v394_v10  ;;  %v399_v23 = vrot.slane %v5349_v17, 1  ;;  %v401_v28 = vrot.slane %v5354_v19, 1  ;;  %v5375_v30 = vld [vmem:[%s5151_s11 + $0xe8] sm:$0x3]  ;;  %v5395_v48 = vld [vmem:[%s5151_s11 + $0xf0] sm:$0xff] }
  0x22   : > { %4205 = vmatmul.mubr.msk.f32.gmra.mrb[4].mxu1 %vm438_vm2, %v5232_v36  ;;  %4405 = vmatmul.mubr.msk.f32.gmra.mrb[4].mxu0 %vm438_vm2, %v5262_v44  ;;  %6717 = vst [vmem:[#allocation14_spill] sm:$0xff] %v5344_v12  ;;  %6718 = vst [vmem:[#allocation15_spill] sm:$0xff] %v5366_v22  ;;  %v5370_v24 = vsel %vm355_vm1, %v396_v13, %v397_v16  ;;  %v402_v29 = vrot.slane %v5357_v21, 1  ;;  %v404_v39 = vrot.slane %v5375_v30, 1  ;;  %v1030_v45 = vrot.slane %v5160_v6, 2  ;;  %v5398_v53 = vld [vmem:[%s5151_s11 + $0xf8] sm:$0xff] }
  0x23   : > { %4207 = vmatprep.mubr.msk.f32.mxu1 %vm438_vm2, %v5236_v38  ;;  %4407 = vmatprep.mubr.msk.f32.mxu0 %vm438_vm2, %v5266_v46  ;;  %6719 = vst [vmem:[#allocation16_spill] sm:$0xff] %v5370_v24  ;;  %v5386_v37 = vsel %vm355_vm1, %v397_v16, %v399_v23  ;;  %v1031_v47 = vrot.slane %v5165_v9, 2  ;;  %v1033_v55 = vrot.slane %v5174_v14, 2  ;;  %v406_v61 = vrot.slane %v5395_v48, 1  ;;  %v5415_v1 = vld [vmem:[%s5151_s11 + $0x100] sm:$0x3] }
  0x24   : > { %6720 = vst [vmem:[#allocation17_spill] sm:$0xff] %v5386_v37  ;;  %v5390_v40 = vsel %vm355_vm1, %v401_v28, %v402_v29  ;;  %v5410_v56 = vsel %vm355_vm1, %v402_v29, %v404_v39  ;;  %v407_v63 = vrot.slane %v5398_v53, 1  ;;  %v1035_v10 = vrot.slane %v5177_v15, 2  ;;  %v5423_v16 = vld [vmem:[%s5151_s11 + $0x108] sm:$0xff]  ;;  %v5426_v23 = vld [vmem:[%s5151_s11 + $0x110] sm:$0xff] }
  0x25   : > { %6721 = vst [vmem:[#allocation18_spill] sm:$0xff] %v5390_v40  ;;  %6722 = vst [vmem:[#allocation19_spill] sm:$0xff] %v5410_v56  ;;  %v5418_v14 = vsel %vm1024_vm3, %v1030_v45, %v1031_v47  ;;  %v1036_v13 = vrot.slane %v5182_v18, 2  ;;  %v5435_v28 = vsel %vm1024_vm3, %v1031_v47, %v1033_v55  ;;  %v409_v29 = vrot.slane %v5415_v1, 1  ;;  %v5526_v38 = vld [vmem:[%s5151_s11 + $0x148] sm:$0x3] }
  0x26   : > { %4208 = vmatmul.mubr.msk.f32.gmra.mrb[6].mxu1 %vm438_vm2, %v5262_v44  ;;  %4408 = vmatmul.mubr.msk.f32.gmra.mrb[6].mxu0 %vm438_vm2, %v5288_v52  ;;  %v5441_v39 = vsel %vm355_vm1, %v406_v61, %v407_v63  ;;  %v1038_v45 = vrot.slane %v5186_v20, 2  ;;  %v1040_v47 = vrot.slane %v5194_v25, 2  ;;  %v1041_v55 = vrot.slane %v5197_v26, 2  ;;  %v5458_v61 = vld [vmem:[%s5151_s11 + $0x128] sm:$0xff]  ;;  %v5465_v20 = vld [vmem:[%s6628_s1 + $0x1c] sm:$0xf] }
  0x27   : > { %4210 = vmatprep.mubr.msk.f32.mxu1 %vm438_vm2, %v5266_v46  ;;  %4410 = vmatprep.mubr.msk.f32.mxu0 %vm438_vm2, %v5292_v54  ;;  %6723 = vst [vmem:[#allocation20_spill] sm:$0xff] %v5441_v39  ;;  %v1048_v46 = vrot.slane %v5242_v41, 2  ;;  %v1053_v36 = vrot.slane %v5271_v49, 2  ;;  %v1055_v49 = vrot.slane %v5276_v50, 2 }
  0x2a   : > { %4211 = vmatmul.mubr.msk.f32.gmra.mrb[8].mxu1 %vm438_vm2, %v5288_v52  ;;  %4411 = vmatmul.mubr.msk.f32.gmra.mrb[8].mxu0 %vm438_vm2, %v5314_v60  ;;  %v5497_v52 = vld [vmem:[%s5151_s11 + $0x138] sm:$0xff] }
  0x2b   : > { %4213 = vmatprep.mubr.msk.f32.mxu1 %vm438_vm2, %v5292_v54  ;;  %4413 = vmatprep.mubr.msk.f32.mxu0 %vm438_vm2, %v5318_v62  ;;  %v1046_v54 = vrot.slane %v5211_v32, 2  ;;  %v421_v44 = vrot.slane %v5497_v52, 1 }
  0x2d   : > { %v5553_v34 = vsel %vm1024_vm3, %v1046_v54, %v1048_v46  ;;  %v5572_v46 = vld [vmem:[%s5151_s11 + $0x170] sm:$0xff] }
  0x2e   : > { %4214 = vmatmul.mubr.msk.f32.gmra.mrb[10].mxu1 %vm438_vm2, %v5314_v60  ;;  %4414 = vmatmul.mubr.msk.f32.gmra.mrb[10].mxu0 %vm438_vm2, %v5340_v8  ;;  %6734 = vst [vmem:[#allocation31_spill] sm:$0xff] %v5553_v34 }
  0x2f   : > { %4216 = vmatprep.mubr.msk.f32.mxu1 %vm438_vm2, %v5318_v62  ;;  %4416 = vmatprep.mubr.msk.f32.mxu0 %vm438_vm2, %v5344_v12  ;;  %v5481_v62 = vsel %vm1024_vm3, %v1036_v13, %v1038_v45 }
  0x30   : > { %6726 = vst [vmem:[#allocation23_spill] sm:$0xff] %v5481_v62 }
  0x32   : > { %4217 = vmatmul.mubr.msk.f32.gmra.mrb[12].mxu1 %vm438_vm2, %v5340_v8  ;;  %4417 = vmatmul.mubr.msk.f32.gmra.mrb[12].mxu0 %vm438_vm2, %v5366_v22 }
  0x33   : > { %4219 = vmatprep.mubr.msk.f32.mxu1 %vm438_vm2, %v5344_v12  ;;  %4419 = vmatprep.mubr.msk.f32.mxu0 %vm438_vm2, %v5370_v24  ;;  %v5455_v12 = vld [vmem:[%s5151_s11 + $0x120] sm:$0xff] }
  0x36   : > { %4220 = vmatmul.mubr.msk.f32.gmra.mrb[14].mxu1 %vm438_vm2, %v5366_v22  ;;  %4420 = vmatmul.mubr.msk.f32.gmra.mrb[14].mxu0 %vm438_vm2, %v5386_v37  ;;  %v5447_v22 = vld [vmem:[%s5151_s11 + $0x118] sm:$0x3] }
  0x37   : > { %4222 = vmatprep.mubr.msk.f32.mxu1 %vm438_vm2, %v5370_v24  ;;  %4422 = vmatprep.mubr.msk.f32.mxu0 %vm438_vm2, %v5390_v40  ;;  %v412_v24 = vrot.slane %v5426_v23, 1  ;;  %v414_v8 = vrot.slane %v5447_v22, 1 }
  0x3a   : > { %4223 = vmatmul.mubr.msk.f32.gmra.mrb[16].mxu1 %vm438_vm2, %v5386_v37  ;;  %4423 = vmatmul.mubr.msk.f32.gmra.mrb[16].mxu0 %vm438_vm2, %v5410_v56  ;;  %v411_v37 = vrot.slane %v5423_v16, 1 }
  0x3b   : > { %4225 = vmatprep.mubr.msk.f32.mxu1 %vm438_vm2, %v5390_v40  ;;  %4448 = vmatprep.mubr.msk.f32.mxu0 %vm438_vm2, %v5418_v14  ;;  %v5450_v40 = vsel %vm1024_vm3, %v1035_v10, %v1036_v13  ;;  %v5472_v10 = vsel %vm355_vm1, %v407_v63, %v409_v29  ;;  %v417_v63 = vrot.slane %v5458_v61, 1  ;;  %v5489_v29 = vld [vmem:[%s5151_s11 + $0x130] sm:$0x3]  ;;  %v5500_v13 = vld [vmem:[%s5151_s11 + $0x140] sm:$0xff] }
  0x3c   : > { %6724 = vst [vmem:[#allocation21_spill] sm:$0xff] %v5450_v40  ;;  %6725 = vst [vmem:[#allocation22_spill] sm:$0xff] %v5472_v10  ;;  %v5484_v60 = vsel %vm355_vm1, %v411_v37, %v412_v24  ;;  %v5511_v37 = vsel %vm355_vm1, %v412_v24, %v414_v8  ;;  %v1050_v24 = vrot.slane %v5248_v42, 2 }
  0x3d   : > { %6727 = vst [vmem:[#allocation24_spill] sm:$0xff] %v5484_v60  ;;  %6729 = vst [vmem:[#allocation26_spill] sm:$0xff] %v5511_v37 }
  0x3e   : > { %4226 = vmatmul.mubr.msk.f32.gmra.mrb[18].mxu1 %vm438_vm2, %v5410_v56  ;;  %4449 = vmatmul.mubr.msk.f32.vlgmr.msra.gmra.mrb[0].mxu0 %vm438_vm2, %v5435_v28  ;;  %v1043_v56 = vrot.slane %v5200_v27, 2  ;;  %v5492_v27 = vsel %vm1024_vm3, %v1040_v47, %v1041_v55  ;;  %v419_v47 = vrot.slane %v5489_v29, 1 }
  0x3f   : > { %4228 = vmatprep.mubr.msk.f32.mxu1 %vm438_vm2, %v5441_v39  ;;  %4497 = vmatpush3.msk.msra.mxu0 %vm503_vm0, %v5216_v33  ;;  %v416_v39 = vrot.slane %v5455_v12, 1  ;;  %6728 = vst [vmem:[#allocation25_spill] sm:$0xff] %v5492_v27  ;;  %v1045_v33 = vrot.slane %v5208_v31, 2 }
  0x40   : > { %4451 = vmatprep.mubr.msk.f32.mxu0 %vm438_vm2, %v5450_v40  ;;  %4546 = vmatprep.subr.msk.mxu0 %vm503_vm0, %v5465_v20  ;;  %v5514_v45 = vsel %vm1024_vm3, %v1041_v55, %v1043_v56  ;;  %v1051_v56 = vrot.slane %v5251_v43, 2  ;;  %v5534_v55 = vld [vmem:[%s5151_s11 + $0x150] sm:$0xff]  ;;  %v5546_v41 = vsel %vm355_vm1, %v417_v63, %v419_v47  ;;  %v1056_v47 = vrot.slane %v5279_v51, 2  ;;  %v5596_v40 = vld [vmem:[%s5151_s11 + $0x178] sm:$0x3] }
  0x41   : > { %6730 = vst [vmem:[#allocation27_spill] sm:$0xff] %v5514_v45  ;;  %v5529_v8 = vsel %vm1024_vm3, %v1045_v33, %v1046_v54  ;;  %6733 = vst [vmem:[#allocation30_spill] sm:$0xff] %v5546_v41  ;;  %v424_v33 = vrot.slane %v5526_v38, 1 }
  0x42   : > { %4229 = vmatmul.mubr.msk.f32.gmra.mrb[20].mxu1 %vm438_vm2, %v5472_v10  ;;  %4452 = vmatmul.mubr.msk.f32.gmra.mrb[2].mxu0 %vm438_vm2, %v5481_v62  ;;  %v5520_v10 = vsel %vm355_vm1, %v416_v39, %v417_v63  ;;  %6732 = vst [vmem:[#allocation29_spill] sm:$0xff] %v5529_v8  ;;  %v5537_v39 = vld [vmem:[%s5151_s11 + $0x158] sm:$0xff]  ;;  %v5564_v63 = vsel %vm1024_vm3, %v1050_v24, %v1051_v56 }
  0x43   : > { %4231 = vmatprep.mubr.msk.f32.mxu1 %vm438_vm2, %v5484_v60  ;;  %4454 = vmatprep.mubr.msk.f32.mxu0 %vm438_vm2, %v5492_v27  ;;  %6731 = vst [vmem:[#allocation28_spill] sm:$0xff] %v5520_v10  ;;  %v422_v60 = vrot.slane %v5500_v13, 1  ;;  %v5561_v27 = vld [vmem:[%s5151_s11 + $0x160] sm:$0x3]  ;;  %v5584_v54 = vsel %vm1024_vm3, %v1051_v56, %v1053_v36  ;;  %v1060_v36 = vrot.slane %v5302_v58, 2  ;;  %v1061_v56 = vrot.slane %v5305_v59, 2 }
  0x44   : > { %6737 = vst [vmem:[#allocation34_spill] sm:$0xff] %v5584_v54  ;;  %v429_v24 = vrot.slane %v5561_v27, 1 }
  0x46   : > { %4232 = vmatmul.mubr.msk.f32.gmra.mrb[22].mxu1 %vm438_vm2, %v5511_v37  ;;  %4455 = vmatmul.mubr.msk.f32.gmra.mrb[4].mxu0 %vm438_vm2, %v5514_v45  ;;  %v5556_v37 = vsel %vm355_vm1, %v421_v44, %v422_v60  ;;  %v426_v45 = vrot.slane %v5534_v55, 1  ;;  %v5581_v44 = vsel %vm355_vm1, %v422_v60, %v424_v33  ;;  %v5599_v60 = vsel %vm1024_vm3, %v1055_v49, %v1056_v47 }
  0x47   : > { %4234 = vmatprep.mubr.msk.f32.mxu1 %vm438_vm2, %v5520_v10  ;;  %4457 = vmatprep.mubr.msk.f32.mxu0 %vm438_vm2, %v5529_v8  ;;  %6735 = vst [vmem:[#allocation32_spill] sm:$0xff] %v5556_v37  ;;  %v427_v10 = vrot.slane %v5537_v39, 1  ;;  %v5569_v8 = vld [vmem:[%s5151_s11 + $0x168] sm:$0xff]  ;;  %6736 = vst [vmem:[#allocation33_spill] sm:$0xff] %v5581_v44 }
  0x49   : > { %v5590_v62 = vsel %vm355_vm1, %v426_v45, %v427_v10  ;;  %v434_v45 = vrot.slane %v5596_v40, 1 }
  0x4a   : > { %4235 = vmatmul.mubr.msk.f32.gmra.mrb[24].mxu1 %vm438_vm2, %v5546_v41  ;;  %4458 = vmatmul.mubr.msk.f32.gmra.mrb[6].mxu0 %vm438_vm2, %v5553_v34  ;;  %6738 = vst [vmem:[#allocation35_spill] sm:$0xff] %v5590_v62  ;;  %v1058_v41 = vrot.slane %v5297_v57, 2  ;;  %v431_v34 = vrot.slane %v5569_v8, 1  ;;  %v5610_v57 = vsel %vm355_vm1, %v427_v10, %v429_v24  ;;  %v1066_v10 = vrot.slane %v5331_v7, 2 }
  0x4b   : > { %4237 = vmatprep.mubr.msk.f32.mxu1 %vm438_vm2, %v5556_v37  ;;  %4460 = vmatprep.mubr.msk.f32.mxu0 %vm438_vm2, %v5564_v63  ;;  %v432_v37 = vrot.slane %v5572_v46, 1  ;;  %6739 = vst [vmem:[#allocation36_spill] sm:$0xff] %v5610_v57  ;;  %v1070_v24 = vrot.slane %v5354_v19, 2 }
  0x4c   : > { %v5616_v33 = vsel %vm1024_vm3, %v1056_v47, %v1058_v41  ;;  %v1068_v41 = vrot.slane %v5349_v17, 2 }
  0x4d   : > { %v5619_v49 = vsel %vm355_vm1, %v431_v34, %v432_v37  ;;  %v5634_v34 = vsel %vm355_vm1, %v432_v37, %v434_v45  ;;  %v5669_v45 = vld [vmem:[%s6628_s1 + $0xc] sm:$0xf] }
  0x4e   : > { %4238 = vmatmul.mubr.msk.f32.gmra.mrb[26].mxu1 %vm438_vm2, %v5581_v44  ;;  %4461 = vmatmul.mubr.msk.f32.gmra.mrb[8].mxu0 %vm438_vm2, %v5584_v54  ;;  %6740 = vst [vmem:[#allocation37_spill] sm:$0xff] %v5619_v49  ;;  %v1063_v44 = vrot.slane %v5323_v2, 2  ;;  %v5623_v54 = vsel %vm1024_vm3, %v1060_v36, %v1061_v56  ;;  %6741 = vst [vmem:[#allocation38_spill] sm:$0xff] %v5634_v34  ;;  %v1071_v36 = vrot.slane %v5357_v21, 2 }
  0x4f   : > { %4240 = vmatprep.mubr.msk.f32.mxu1 %vm438_vm2, %v5590_v62  ;;  %4463 = vmatprep.mubr.msk.f32.mxu0 %vm438_vm2, %v5599_v60  ;;  %v1065_v62 = vrot.slane %v5328_v3, 2  ;;  %v5656_v17 = vsel %vm1024_vm3, %v1066_v10, %v1068_v41 }
  0x50   : > { %v5639_v2 = vsel %vm1024_vm3, %v1061_v56, %v1063_v44  ;;  %v5660_v37 = vsel %vm1024_vm3, %v1070_v24, %v1071_v36  ;;  %v1075_v44 = vrot.slane %v5395_v48, 2  ;;  %v1076_v56 = vrot.slane %v5398_v53, 2 }
  0x51   : > { %v5643_v47 = vsel %vm1024_vm3, %v1065_v62, %v1066_v10  ;;  %v1073_v62 = vrot.slane %v5375_v30, 2  ;;  %v1078_v10 = vrot.slane %v5415_v1, 2  ;;  %v1080_v24 = vrot.slane %v5423_v16, 2 }
  0x52   : > { %4241 = vmatmul.mubr.msk.f32.gmra.mrb[28].mxu1 %vm438_vm2, %v5610_v57  ;;  %4464 = vmatmul.mubr.msk.f32.gmra.mrb[10].mxu0 %vm438_vm2, %v5616_v33  ;;  %v5684_v41 = vsel %vm1024_vm3, %v1075_v44, %v1076_v56  ;;  %v1083_v1 = vrot.slane %v5447_v22, 2  ;;  %v1086_v44 = vrot.slane %v5458_v61, 2  ;;  %v1096_v57 = vrot.slane %v5537_v39, 2 }
  0x53   : > { %4243 = vmatprep.mubr.msk.f32.mxu1 %vm438_vm2, %v5619_v49  ;;  %4466 = vmatprep.mubr.msk.f32.mxu0 %vm438_vm2, %v5623_v54  ;;  %v5678_v30 = vsel %vm1024_vm3, %v1071_v36, %v1073_v62  ;;  %v1085_v62 = vrot.slane %v5455_v12, 2  ;;  %v1091_v49 = vrot.slane %v5500_v13, 2 }
  0x56   : > { %4244 = vmatmul.mubr.msk.f32.gmra.mrb[30].mxu1 %vm438_vm2, %v5634_v34  ;;  %4467 = vmatmul.mubr.msk.f32.gmra.mrb[12].mxu0 %vm438_vm2, %v5639_v2  ;;  %v1081_v34 = vrot.slane %v5426_v23, 2 }
  0x57   : > { %4248 = vmatprep.mubr.msk.f32.mxu1 %vm438_vm2, %v5154_v4  ;;  %4469 = vmatprep.mubr.msk.f32.mxu0 %vm438_vm2, %v5643_v47 }
  0x58   : > { %v5703_v36 = vsel %vm1024_vm3, %v1080_v24, %v1081_v34  ;;  %v5716_v22 = vsel %vm1024_vm3, %v1081_v34, %v1083_v1  ;;  %v1090_v24 = vrot.slane %v5497_v52, 2  ;;  %v1093_v34 = vrot.slane %v5526_v38, 2 }
  0x59   : > { %6743 = vst [vmem:[#allocation40_spill] sm:$0xff] %v5703_v36 }
  0x5a   : > { %4249 = vmatmul.mubr.msk.f32.vlgmr.msra.gmra.mrb[0].mxu1 %vm438_vm2, %v5157_v5  ;;  %4470 = vmatmul.mubr.msk.f32.gmra.mrb[14].mxu0 %vm438_vm2, %v5656_v17  ;;  %v5737_v1 = vsel %vm1024_vm3, %v1090_v24, %v1091_v49  ;;  %v5750_v38 = vsel %vm1024_vm3, %v1091_v49, %v1093_v34  ;;  %v1100_v24 = vrot.slane %v5569_v8, 2  ;;  %v1103_v49 = vrot.slane %v5596_v40, 2 }
  0x5b   : > { %4251 = vmatprep.mubr.msk.f32.mxu1 %vm438_vm2, %v5160_v6  ;;  %4472 = vmatprep.mubr.msk.f32.mxu0 %vm438_vm2, %v5660_v37  ;;  %6746 = vst [vmem:[#allocation43_spill] sm:$0xff] %v5737_v1  ;;  %v5761_v6 = vld [vmem:[%s5151_s11 + $0x180] sm:$0xff] }
  0x5c   : > { %4297 = vmatpush3.msk.msra.mxu1 %vm503_vm0, %v5226_v35  ;;  %v5699_v35 = vsel %vm1024_vm3, %v1076_v56, %v1078_v10  ;;  %v1088_v56 = vrot.slane %v5489_v29, 2  ;;  %v5720_v10 = vsel %vm1024_vm3, %v1085_v62, %v1086_v44  ;;  %v1095_v62 = vrot.slane %v5534_v55, 2 }
  0x5d   : > { %4346 = vmatprep.subr.msk.mxu1 %vm503_vm0, %v5669_v45  ;;  %6742 = vst [vmem:[#allocation39_spill] sm:$0xff] %v5699_v35  ;;  %6744 = vst [vmem:[#allocation41_spill] sm:$0xff] %v5720_v10 }
  0x5e   : > { %4252 = vmatmul.mubr.msk.f32.gmra.mrb[2].mxu1 %vm438_vm2, %v5165_v9  ;;  %4473 = vmatmul.mubr.msk.f32.gmra.mrb[16].mxu0 %vm438_vm2, %v5678_v30  ;;  %v5733_v29 = vsel %vm1024_vm3, %v1086_v44, %v1088_v56  ;;  %v1098_v44 = vrot.slane %v5561_v27, 2  ;;  %v5754_v56 = vsel %vm1024_vm3, %v1095_v62, %v1096_v57  ;;  %v1101_v9 = vrot.slane %v5572_v46, 2 }
  0x5f   : > { %4254 = vmatprep.mubr.msk.f32.mxu1 %vm438_vm2, %v5177_v15  ;;  %4475 = vmatprep.mubr.msk.f32.mxu0 %vm438_vm2, %v5684_v41  ;;  %6745 = vst [vmem:[#allocation42_spill] sm:$0xff] %v5733_v29  ;;  %6747 = vst [vmem:[#allocation44_spill] sm:$0xff] %v5754_v56  ;;  %v1971_v62 = vrot.slane %v5761_v6, 2 }
  0x60   : > { %v5773_v27 = vsel %vm1024_vm3, %v1096_v57, %v1098_v44  ;;  %v5777_v34 = vsel %vm1024_vm3, %v1100_v24, %v1101_v9  ;;  %v5793_v40 = vsel %vm1024_vm3, %v1101_v9, %v1103_v49  ;;  %v1026_v24 = vrot.slane %v5157_v5, 2  ;;  %v6753_v5 = vld [vmem:[#allocation21_spill] sm:$0xff] }
  0x61   : > { %6748 = vst [vmem:[#allocation45_spill] sm:$0xff] %v5773_v27  ;;  %6749 = vst [vmem:[#allocation46_spill] sm:$0xff] %v5777_v34  ;;  %v1028_v49 = vrot.slane %v5169_v11, 2  ;;  %v6754_v11 = vld [vmem:[#allocation23_spill] sm:$0xff] }
  0x62   : > { %4255 = vmatmul.mubr.msk.f32.gmra.mrb[4].mxu1 %vm438_vm2, %v5182_v18  ;;  %4476 = vmatmul.mubr.msk.f32.gmra.mrb[18].mxu0 %vm438_vm2, %v5699_v35  ;;  %6750 = vst [vmem:[#allocation47_spill] sm:$0xff] %v5793_v40 }
  0x63   : > { %4257 = vmatprep.mubr.msk.f32.mxu1 %vm438_vm2, %v5194_v25  ;;  %4478 = vmatprep.mubr.msk.f32.mxu0 %vm438_vm2, %v5703_v36 }
  0x66   : > { %4258 = vmatmul.mubr.msk.f32.gmra.mrb[6].mxu1 %vm438_vm2, %v5197_v26  ;;  %4479 = vmatmul.mubr.msk.f32.gmra.mrb[20].mxu0 %vm438_vm2, %v5716_v22 }
  0x67   : > { %4260 = vmatprep.mubr.msk.f32.mxu1 %vm438_vm2, %v5208_v31  ;;  %4481 = vmatprep.mubr.msk.f32.mxu0 %vm438_vm2, %v5720_v10  ;;  %v5782_v10 = vld [vmem:[%s5151_s11 + $0x190] sm:$0x3] }
  0x68   : > { %v1974_v57 = vrot.slane %v5782_v10, 2 }
  0x6a   : > { %4261 = vmatmul.mubr.msk.f32.gmra.mrb[8].mxu1 %vm438_vm2, %v5211_v32  ;;  %4482 = vmatmul.mubr.msk.f32.gmra.mrb[22].mxu0 %vm438_vm2, %v5733_v29  ;;  %v5764_v29 = vld [vmem:[%s5151_s11 + $0x188] sm:$0xff] }
  0x6b   : > { %4263 = vmatprep.mubr.msk.f32.mxu1 %vm438_vm2, %v5248_v42  ;;  %4484 = vmatprep.mubr.msk.f32.mxu0 %vm438_vm2, %v5737_v1  ;;  %v1972_v1 = vrot.slane %v5764_v29, 2 }
  0x6d   : > { %v5797_v44 = vsel %vm1024_vm3, %v1971_v62, %v1972_v1  ;;  %v5808_v9 = vsel %vm1024_vm3, %v1972_v1, %v1974_v57  ;;  %v5823_v1 = vld [vmem:[%s6628_s1 + $0x20] sm:$0xf]  ;;  %v6758_v57 = vld [vmem:[#allocation31_spill] sm:$0xff] }
  0x6e   : > { %4264 = vmatmul.mubr.msk.f32.gmra.mrb[10].mxu1 %vm438_vm2, %v5251_v43  ;;  %4485 = vmatmul.mubr.msk.f32.gmra.mrb[24].mxu0 %vm438_vm2, %v5750_v38  ;;  %6751 = vst [vmem:[#allocation48_spill] sm:$0xff] %v5797_v44  ;;  %6752 = vst [vmem:[#allocation49_spill] sm:$0xff] %v5808_v9 }
  0x6f   : > { %4266 = vmatprep.mubr.msk.f32.mxu1 %vm438_vm2, %v5276_v50  ;;  %4487 = vmatprep.mubr.msk.f32.mxu0 %vm438_vm2, %v5754_v56 }
  0x72   : > { %4267 = vmatmul.mubr.msk.f32.gmra.mrb[12].mxu1 %vm438_vm2, %v5279_v51  ;;  %4488 = vmatmul.mubr.msk.f32.gmra.mrb[26].mxu0 %vm438_vm2, %v5773_v27 }
  0x73   : > { %4269 = vmatprep.mubr.msk.f32.mxu1 %vm438_vm2, %v5302_v58  ;;  %4490 = vmatprep.mubr.msk.f32.mxu0 %vm438_vm2, %v5777_v34 }
  0x76   : > { %4270 = vmatmul.mubr.msk.f32.gmra.mrb[14].mxu1 %vm438_vm2, %v5305_v59  ;;  %4491 = vmatmul.mubr.msk.f32.gmra.mrb[28].mxu0 %vm438_vm2, %v5793_v40 }
  0x77   : > { %4272 = vmatprep.mubr.msk.f32.mxu1 %vm438_vm2, %v5328_v3  ;;  %4493 = vmatprep.mubr.msk.f32.mxu0 %vm438_vm2, %v5797_v44  ;;  %v6763_v44 = vld [vmem:[#allocation7_spill] sm:$0xff] }
  0x7a   : > { %4273 = vmatmul.mubr.msk.f32.gmra.mrb[16].mxu1 %vm438_vm2, %v5331_v7  ;;  %4494 = vmatmul.mubr.msk.f32.gmra.mrb[30].mxu0 %vm438_vm2, %v5808_v9  ;;  %v6762_v9 = vld [vmem:[#allocation6_spill] sm:$0xff] }
  0x7b   : > { %4275 = vmatprep.mubr.msk.f32.mxu1 %vm438_vm2, %v5354_v19  ;;  %4498 = vmatprep.mubr.msk.f32.mxu0 %vm438_vm2, %v5177_v15 }
  0x7e   : > { %4276 = vmatmul.mubr.msk.f32.gmra.mrb[18].mxu1 %vm438_vm2, %v5357_v21  ;;  %4499 = vmatmul.mubr.msk.f32.vlgmr.msra.gmra.mrb[0].mxu0 %vm438_vm2, %v5182_v18 }
  0x7f   : > { %4278 = vmatprep.mubr.msk.f32.mxu1 %vm438_vm2, %v5395_v48  ;;  %4547 = vmatpush3.msk.msra.mxu0 %vm503_vm0, %v5465_v20  ;;  %v1025_v20 = vrot.slane %v5154_v4, 2  ;;  %v1029_v4 = vsel %vm1024_vm3, %v1026_v24, %v1028_v49  ;;  %v5958_v49 = vld [vmem:[%s5151_s11 + $0x1a0] sm:$0xff] }
  0x80   : > { %4501 = vmatprep.mubr.msk.f32.mxu0 %vm438_vm2, %v5194_v25  ;;  %4596 = vmatprep.subr.msk.mxu0 %vm503_vm0, %v5823_v1 }
  0x81   : > { %v1027_v62 = vsel %vm1024_vm3, %v1025_v20, %v1026_v24  ;;  %v6759_v20 = vld [vmem:[#allocation34_spill] sm:$0xff]  ;;  %v5947_v24 = vld [vmem:[%s5151_s11 + $0x198] sm:$0xff] }
  0x82   : > { %4279 = vmatmul.mubr.msk.f32.gmra.mrb[20].mxu1 %vm438_vm2, %v5398_v53  ;;  %4502 = vmatmul.mubr.msk.f32.gmra.mrb[2].mxu0 %vm438_vm2, %v5197_v26 }
  0x83   : > { %4281 = vmatprep.mubr.msk.f32.mxu1 %vm438_vm2, %v5423_v16  ;;  %4504 = vmatprep.mubr.msk.f32.mxu0 %vm438_vm2, %v5208_v31 }
  0x86   : > { %4282 = vmatmul.mubr.msk.f32.gmra.mrb[22].mxu1 %vm438_vm2, %v5426_v23  ;;  %4505 = vmatmul.mubr.msk.f32.gmra.mrb[4].mxu0 %vm438_vm2, %v5211_v32 }
  0x87   : > { %4284 = vmatprep.mubr.msk.f32.mxu1 %vm438_vm2, %v5455_v12  ;;  %4507 = vmatprep.mubr.msk.f32.mxu0 %vm438_vm2, %v5248_v42 }
  0x8a   : > { %4285 = vmatmul.mubr.msk.f32.gmra.mrb[24].mxu1 %vm438_vm2, %v5458_v61  ;;  %4508 = vmatmul.mubr.msk.f32.gmra.mrb[6].mxu0 %vm438_vm2, %v5251_v43 }
  0x8b   : > { %4287 = vmatprep.mubr.msk.f32.mxu1 %vm438_vm2, %v5497_v52  ;;  %4510 = vmatprep.mubr.msk.f32.mxu0 %vm438_vm2, %v5276_v50 }
  0x8e   : > { %4288 = vmatmul.mubr.msk.f32.gmra.mrb[26].mxu1 %vm438_vm2, %v5500_v13  ;;  %4511 = vmatmul.mubr.msk.f32.gmra.mrb[8].mxu0 %vm438_vm2, %v5279_v51 }
  0x8f   : > { %4290 = vmatprep.mubr.msk.f32.mxu1 %vm438_vm2, %v5534_v55  ;;  %4513 = vmatprep.mubr.msk.f32.mxu0 %vm438_vm2, %v5302_v58 }
  0x92   : > { %4291 = vmatmul.mubr.msk.f32.gmra.mrb[28].mxu1 %vm438_vm2, %v5537_v39  ;;  %4514 = vmatmul.mubr.msk.f32.gmra.mrb[10].mxu0 %vm438_vm2, %v5305_v59 }
  0x93   : > { %4293 = vmatprep.mubr.msk.f32.mxu1 %vm438_vm2, %v5569_v8  ;;  %4516 = vmatprep.mubr.msk.f32.mxu0 %vm438_vm2, %v5328_v3 }
  0x96   : > { %4294 = vmatmul.mubr.msk.f32.gmra.mrb[30].mxu1 %vm438_vm2, %v5572_v46  ;;  %4517 = vmatmul.mubr.msk.f32.gmra.mrb[12].mxu0 %vm438_vm2, %v5331_v7 }
  0x97   : > { %4298 = vmatprep.mubr.msk.f32.mxu1 %vm438_vm2, %v1027_v62  ;;  %4519 = vmatprep.mubr.msk.f32.mxu0 %vm438_vm2, %v5354_v19  ;;  %v6760_v62 = vld [vmem:[#allocation4_spill] sm:$0xff] }
  0x9a   : > { %4299 = vmatmul.mubr.msk.f32.vlgmr.msra.gmra.mrb[0].mxu1 %vm438_vm2, %v1029_v4  ;;  %4520 = vmatmul.mubr.msk.f32.gmra.mrb[14].mxu0 %vm438_vm2, %v5357_v21  ;;  %v6761_v4 = vld [vmem:[#allocation5_spill] sm:$0xff] }
  0x9b   : > { %4301 = vmatprep.mubr.msk.f32.mxu1 %vm438_vm2, %v5418_v14  ;;  %4522 = vmatprep.mubr.msk.f32.mxu0 %vm438_vm2, %v5395_v48  ;;  %v6755_v14 = vld [vmem:[#allocation25_spill] sm:$0xff] }
  0x9c   : > { %4347 = vmatpush3.msk.msra.mxu1 %vm503_vm0, %v5669_v45  ;;  %v6757_v45 = vld [vmem:[#allocation29_spill] sm:$0xff] }
  0x9d   : > { %4663 = vmatprep.subr.msk.mxu1 %vm503_vm0, %v5124_v0 }
  0x9e   : > { %4302 = vmatmul.mubr.msk.f32.gmra.mrb[2].mxu1 %vm438_vm2, %v5435_v28  ;;  %4523 = vmatmul.mubr.msk.f32.gmra.mrb[16].mxu0 %vm438_vm2, %v5398_v53  ;;  %v6756_v28 = vld [vmem:[#allocation27_spill] sm:$0xff] }
  0x9f   : > { %4304 = vmatprep.mubr.msk.f32.mxu1 %vm438_vm2, %v6753_v5  ;;  %4525 = vmatprep.mubr.msk.f32.mxu0 %vm438_vm2, %v5423_v16 }
  0xa2   : > { %4305 = vmatmul.mubr.msk.f32.gmra.mrb[4].mxu1 %vm438_vm2, %v6754_v11  ;;  %4526 = vmatmul.mubr.msk.f32.gmra.mrb[18].mxu0 %vm438_vm2, %v5426_v23 }
  0xa3   : > { %4307 = vmatprep.mubr.msk.f32.mxu1 %vm438_vm2, %v6755_v14  ;;  %4528 = vmatprep.mubr.msk.f32.mxu0 %vm438_vm2, %v5455_v12 }
  0xa6   : > { %4308 = vmatmul.mubr.msk.f32.gmra.mrb[6].mxu1 %vm438_vm2, %v6756_v28  ;;  %4529 = vmatmul.mubr.msk.f32.gmra.mrb[20].mxu0 %vm438_vm2, %v5458_v61 }
  0xa7   : > { %4310 = vmatprep.mubr.msk.f32.mxu1 %vm438_vm2, %v6757_v45  ;;  %4531 = vmatprep.mubr.msk.f32.mxu0 %vm438_vm2, %v5497_v52 }
  0xaa   : > { %4311 = vmatmul.mubr.msk.f32.gmra.mrb[8].mxu1 %vm438_vm2, %v6758_v57  ;;  %4532 = vmatmul.mubr.msk.f32.gmra.mrb[22].mxu0 %vm438_vm2, %v5500_v13 }
  0xab   : > { %4313 = vmatprep.mubr.msk.f32.mxu1 %vm438_vm2, %v5564_v63  ;;  %4534 = vmatprep.mubr.msk.f32.mxu0 %vm438_vm2, %v5534_v55 }
  0xae   : > { %4314 = vmatmul.mubr.msk.f32.gmra.mrb[10].mxu1 %vm438_vm2, %v6759_v20  ;;  %4535 = vmatmul.mubr.msk.f32.gmra.mrb[24].mxu0 %vm438_vm2, %v5537_v39 }
  0xaf   : > { %4316 = vmatprep.mubr.msk.f32.mxu1 %vm438_vm2, %v5599_v60  ;;  %4537 = vmatprep.mubr.msk.f32.mxu0 %vm438_vm2, %v5569_v8 }
  0xb2   : > { %4317 = vmatmul.mubr.msk.f32.gmra.mrb[12].mxu1 %vm438_vm2, %v5616_v33  ;;  %4538 = vmatmul.mubr.msk.f32.gmra.mrb[26].mxu0 %vm438_vm2, %v5572_v46 }
  0xb3   : > { %4319 = vmatprep.mubr.msk.f32.mxu1 %vm438_vm2, %v5623_v54  ;;  %4540 = vmatprep.mubr.msk.f32.mxu0 %vm438_vm2, %v5761_v6 }
  0xb6   : > { %4320 = vmatmul.mubr.msk.f32.gmra.mrb[14].mxu1 %vm438_vm2, %v5639_v2  ;;  %4541 = vmatmul.mubr.msk.f32.gmra.mrb[28].mxu0 %vm438_vm2, %v5764_v29 }
  0xb7   : > { %4322 = vmatprep.mubr.msk.f32.mxu1 %vm438_vm2, %v5643_v47  ;;  %4543 = vmatprep.mubr.msk.f32.mxu0 %vm438_vm2, %v5947_v24 }
  0xba   : > { %4323 = vmatmul.mubr.msk.f32.gmra.mrb[16].mxu1 %vm438_vm2, %v5656_v17  ;;  %4544 = vmatmul.mubr.msk.f32.gmra.mrb[30].mxu0 %vm438_vm2, %v5958_v49 }
  0xbb   : > { %4325 = vmatprep.mubr.msk.f32.mxu1 %vm438_vm2, %v5660_v37  ;;  %4548 = vmatprep.mubr.msk.f32.mxu0 %vm438_vm2, %v6760_v62  ;;  %v6764_v62 = vld [vmem:[#allocation8_spill] sm:$0xff] }
  0xbe   : > { %4326 = vmatmul.mubr.msk.f32.gmra.mrb[18].mxu1 %vm438_vm2, %v5678_v30  ;;  %4549 = vmatmul.mubr.msk.f32.vlgmr.msra.gmra.mrb[0].mxu0 %vm438_vm2, %v6761_v4  ;;  %v6765_v4 = vld [vmem:[#allocation9_spill] sm:$0xff] }
  0xbf   : > { %4328 = vmatprep.mubr.msk.f32.mxu1 %vm438_vm2, %v5684_v41  ;;  %4597 = vmatpush3.msk.msra.mxu0 %vm503_vm0, %v5823_v1  ;;  %v6766_v1 = vld [vmem:[#allocation41_spill] sm:$0xff] }
  0xc0   : > { %4551 = vmatprep.mubr.msk.f32.mxu0 %vm438_vm2, %v6762_v9  ;;  %v6767_v9 = vld [vmem:[#allocation10_spill] sm:$0xff] }
  0xc2   : > { %4329 = vmatmul.mubr.msk.f32.gmra.mrb[20].mxu1 %vm438_vm2, %v5699_v35  ;;  %4552 = vmatmul.mubr.msk.f32.gmra.mrb[2].mxu0 %vm438_vm2, %v6763_v44  ;;  %v6768_v35 = vld [vmem:[#allocation42_spill] sm:$0xff]  ;;  %v6769_v44 = vld [vmem:[#allocation11_spill] sm:$0xff] }
  0xc3   : > { %4331 = vmatprep.mubr.msk.f32.mxu1 %vm438_vm2, %v5703_v36  ;;  %4554 = vmatprep.mubr.msk.f32.mxu0 %vm438_vm2, %v6764_v62  ;;  %v6770_v36 = vld [vmem:[#allocation43_spill] sm:$0xff]  ;;  %v6771_v62 = vld [vmem:[#allocation12_spill] sm:$0xff] }
  0xc6   : > { %4332 = vmatmul.mubr.msk.f32.gmra.mrb[22].mxu1 %vm438_vm2, %v5716_v22  ;;  %4555 = vmatmul.mubr.msk.f32.gmra.mrb[4].mxu0 %vm438_vm2, %v6765_v4  ;;  %v6772_v4 = vld [vmem:[#allocation13_spill] sm:$0xff] }
  0xc7   : > { %4334 = vmatprep.mubr.msk.f32.mxu1 %vm438_vm2, %v6766_v1  ;;  %4557 = vmatprep.mubr.msk.f32.mxu0 %vm438_vm2, %v6767_v9  ;;  %v6773_v9 = vld [vmem:[#allocation14_spill] sm:$0xff] }
  0xca   : > { %4335 = vmatmul.mubr.msk.f32.gmra.mrb[24].mxu1 %vm438_vm2, %v6768_v35  ;;  %4558 = vmatmul.mubr.msk.f32.gmra.mrb[6].mxu0 %vm438_vm2, %v6769_v44  ;;  %v6774_v44 = vld [vmem:[#allocation15_spill] sm:$0xff] }
  0xcb   : > { %4337 = vmatprep.mubr.msk.f32.mxu1 %vm438_vm2, %v6770_v36  ;;  %4560 = vmatprep.mubr.msk.f32.mxu0 %vm438_vm2, %v6771_v62  ;;  %v6775_v62 = vld [vmem:[#allocation16_spill] sm:$0xff] }
  0xce   : > { %4338 = vmatmul.mubr.msk.f32.gmra.mrb[26].mxu1 %vm438_vm2, %v5750_v38  ;;  %4561 = vmatmul.mubr.msk.f32.gmra.mrb[8].mxu0 %vm438_vm2, %v6772_v4  ;;  %v6776_v4 = vld [vmem:[#allocation17_spill] sm:$0xff] }
  0xcf   : > { %4340 = vmatprep.mubr.msk.f32.mxu1 %vm438_vm2, %v5754_v56  ;;  %4563 = vmatprep.mubr.msk.f32.mxu0 %vm438_vm2, %v6773_v9  ;;  %v6777_v56 = vld [vmem:[#allocation2_spill] sm:$0xff] }
  0xd0   : > { %v6778_v9 = vld [vmem:[#allocation18_spill] sm:$0xff] }
  0xd2   : > { %4341 = vmatmul.mubr.msk.f32.gmra.mrb[28].mxu1 %vm438_vm2, %v5773_v27  ;;  %4564 = vmatmul.mubr.msk.f32.gmra.mrb[10].mxu0 %vm438_vm2, %v6774_v44  ;;  %v6779_v27 = vld [vmem:[#allocation3_spill] sm:$0xff] }
  0xd3   : > { %4343 = vmatprep.mubr.msk.f32.mxu1 %vm438_vm2, %v5777_v34  ;;  %4566 = vmatprep.mubr.msk.f32.mxu0 %vm438_vm2, %v6775_v62  ;;  %v6780_v44 = vld [vmem:[#allocation19_spill] sm:$0xff]  ;;  %v6781_v62 = vld [vmem:[#allocation20_spill] sm:$0xff] }
  0xd4   : > { %v6086_v34 = vld [vmem:[%s5151_s11 + $0x1a8] sm:$0x3] }
  0xd6   : > { %4344 = vmatmul.mubr.msk.f32.gmra.mrb[30].mxu1 %vm438_vm2, %v5793_v40  ;;  %4567 = vmatmul.mubr.msk.f32.gmra.mrb[12].mxu0 %vm438_vm2, %v6776_v4  ;;  %v6702_v4 = vmov 0.0|0.0  }
  0xd7   : > { %4348 = vmatprep.mubr.msk.f32.mxu1 %vm438_vm2, %v6777_v56  ;;  %4569 = vmatprep.mubr.msk.f32.mxu0 %vm438_vm2, %v6778_v9  ;;  %v6782_v56 = vld [vmem:[#allocation22_spill] sm:$0xff]  ;;  %v6790_v9 = vld [vmem:[#allocation36_spill] sm:$0xff] }
  0xda   : > { %4349 = vmatmul.mubr.msk.f32.vlgmr.msra.gmra.mrb[0].mxu1 %vm438_vm2, %v6779_v27  ;;  %4570 = vmatmul.mubr.msk.f32.gmra.mrb[14].mxu0 %vm438_vm2, %v6780_v44  ;;  %v6783_v27 = vld [vmem:[#allocation24_spill] sm:$0xff]  ;;  %v2511_v44 = vrot.slane %v5947_v24, 1 }
  0xdb   : > { %4351 = vmatprep.mubr.msk.f32.mxu1 %vm438_vm2, %v5177_v15  ;;  %4572 = vmatprep.mubr.msk.f32.mxu0 %vm438_vm2, %v6781_v62  ;;  %v6784_v15 = vld [vmem:[#allocation26_spill] sm:$0xff] }
  0xdc   : > { %4664 = vmatpush3.msk.msra.mxu1 %vm503_vm0, %v5124_v0  ;;  %v6785_v0 = vld [vmem:[#allocation28_spill] sm:$0xff] }
  0xdd   : > { %4657 = vmatprep.subr.bf16.mxu1 %v6702_v4  ;;  %v2512_v4 = vrot.slane %v5958_v49, 1 }
  0xde   : > { %4352 = vmatmul.mubr.msk.f32.gmra.mrb[2].mxu1 %vm438_vm2, %v5182_v18  ;;  %4573 = vmatmul.mubr.msk.f32.gmra.mrb[16].mxu0 %vm438_vm2, %v6782_v56  ;;  %v6786_v18 = vld [vmem:[#allocation30_spill] sm:$0xff] }
  0xdf   : > { %4354 = vmatprep.mubr.msk.f32.mxu1 %vm438_vm2, %v5194_v25  ;;  %4575 = vmatprep.mubr.msk.f32.mxu0 %vm438_vm2, %v6783_v27  ;;  %v6787_v25 = vld [vmem:[#allocation32_spill] sm:$0xff] }
  0xe2   : > { %4355 = vmatmul.mubr.msk.f32.gmra.mrb[4].mxu1 %vm438_vm2, %v5197_v26  ;;  %4576 = vmatmul.mubr.msk.f32.gmra.mrb[18].mxu0 %vm438_vm2, %v6784_v15  ;;  %v6788_v26 = vld [vmem:[#allocation33_spill] sm:$0xff] }
  0xe3   : > { %4357 = vmatprep.mubr.msk.f32.mxu1 %vm438_vm2, %v5208_v31  ;;  %4578 = vmatprep.mubr.msk.f32.mxu0 %vm438_vm2, %v6785_v0  ;;  %v6789_v31 = vld [vmem:[#allocation35_spill] sm:$0xff] }
  0xe6   : > { %4358 = vmatmul.mubr.msk.f32.gmra.mrb[6].mxu1 %vm438_vm2, %v5211_v32  ;;  %4579 = vmatmul.mubr.msk.f32.gmra.mrb[20].mxu0 %vm438_vm2, %v6786_v18  ;;  %v1700_v32 = vrot.slane %v5761_v6, 1 }
  0xe7   : > { %4360 = vmatprep.mubr.msk.f32.mxu1 %vm438_vm2, %v5248_v42  ;;  %4581 = vmatprep.mubr.msk.f32.mxu0 %vm438_vm2, %v6787_v25  ;;  %v1701_v42 = vrot.slane %v5764_v29, 1 }
  0xe9   : > { %v6083_v40 = vsel %vm355_vm1, %v1700_v32, %v1701_v42  ;;  %v2513_v32 = vsel %vm355_vm1, %v2511_v44, %v2512_v4 }
  0xea   : > { %4361 = vmatmul.mubr.msk.f32.gmra.mrb[8].mxu1 %vm438_vm2, %v5251_v43  ;;  %4582 = vmatmul.mubr.msk.f32.gmra.mrb[22].mxu0 %vm438_vm2, %v6788_v26  ;;  %v6791_v43 = vld [vmem:[#allocation37_spill] sm:$0xff] }
  0xeb   : > { %4363 = vmatprep.mubr.msk.f32.mxu1 %vm438_vm2, %v5276_v50  ;;  %4584 = vmatprep.mubr.msk.f32.mxu0 %vm438_vm2, %v6789_v31  ;;  %v1703_v50 = vrot.slane %v5782_v10, 1  ;;  %v2514_v10 = vrot.slane %v6086_v34, 1 }
  0xee   : > { %4364 = vmatmul.mubr.msk.f32.gmra.mrb[10].mxu1 %vm438_vm2, %v5279_v51  ;;  %4585 = vmatmul.mubr.msk.f32.gmra.mrb[24].mxu0 %vm438_vm2, %v6790_v9  ;;  %v6792_v51 = vld [vmem:[#allocation38_spill] sm:$0xff] }
  0xef   : > { %4366 = vmatprep.mubr.msk.f32.mxu1 %vm438_vm2, %v5302_v58  ;;  %4587 = vmatprep.mubr.msk.f32.mxu0 %vm438_vm2, %v6791_v43  ;;  %v6097_v58 = vsel %vm355_vm1, %v1701_v42, %v1703_v50 }
  0xf2   : > { %4367 = vmatmul.mubr.msk.f32.gmra.mrb[12].mxu1 %vm438_vm2, %v5305_v59  ;;  %4588 = vmatmul.mubr.msk.f32.gmra.mrb[26].mxu0 %vm438_vm2, %v6792_v51  ;;  %v2515_v59 = vsel %vm355_vm1, %v2512_v4, %v2514_v10 }
  0xf3   : > { %4369 = vmatprep.mubr.msk.f32.mxu1 %vm438_vm2, %v5328_v3  ;;  %4590 = vmatprep.mubr.msk.f32.mxu0 %vm438_vm2, %v6083_v40  ;;  %v3316_v3 = vld [vmem:[%s6630_s3] sm:$0x3] }
  0xf6   : > { %4370 = vmatmul.mubr.msk.f32.gmra.mrb[14].mxu1 %vm438_vm2, %v5331_v7  ;;  %4591 = vmatmul.mubr.msk.f32.gmra.mrb[28].mxu0 %vm438_vm2, %v6097_v58  ;;  %v3324_v7 = vld [vmem:[%s6631_s4] sm:$0xff] }
  0xf7   : > { %4372 = vmatprep.mubr.msk.f32.mxu1 %vm438_vm2, %v5354_v19  ;;  %4593 = vmatprep.mubr.msk.f32.mxu0 %vm438_vm2, %v2513_v32  ;;  %v3326_v19 = vld [vmem:[%s6631_s4 + $0x10] sm:$0xff] }
  0xfa   : > { %4373 = vmatmul.mubr.msk.f32.gmra.mrb[16].mxu1 %vm438_vm2, %v5357_v21  ;;  %4594 = vmatmul.mubr.msk.f32.gmra.mrb[30].mxu0 %vm438_vm2, %v2515_v59  ;;  %v3327_v21 = vld [vmem:[%s6631_s4 + $0x18] sm:$0xff] }
  0xfb   : > { %4375 = vmatprep.mubr.msk.f32.mxu1 %vm438_vm2, %v5395_v48  ;;  %4598 = vmatprep.mubr.msk.f32.mxu0 %vm438_vm2, %v6753_v5  ;;  %v4661_v48 = vpack.c.bf16 %v3327_v21, %v3326_v19 }
  0xfe   : > { %4376 = vmatmul.mubr.msk.f32.gmra.mrb[18].mxu1 %vm438_vm2, %v5398_v53  ;;  %4599 = vmatmul.mubr.msk.f32.vlgmr.msra.gmra.mrb[0].mxu0 %vm438_vm2, %v6754_v11  ;;  %v6793_v53 = vmov 0.0|0.0  }
  0xff   : > { %4378 = vmatprep.mubr.msk.f32.mxu1 %vm438_vm2, %v5423_v16  ;;  %4601 = vmatprep.mubr.msk.f32.mxu0 %vm438_vm2, %v6755_v14 }
 0x102   : > { %4379 = vmatmul.mubr.msk.f32.gmra.mrb[20].mxu1 %vm438_vm2, %v5426_v23  ;;  %4602 = vmatmul.mubr.msk.f32.gmra.mrb[2].mxu0 %vm438_vm2, %v6756_v28  ;;  %v6794_v23 = vld [vmem:[#allocation39_spill] sm:$0xff] }
 0x103   : > { %4381 = vmatprep.mubr.msk.f32.mxu1 %vm438_vm2, %v5455_v12  ;;  %4604 = vmatprep.mubr.msk.f32.mxu0 %vm438_vm2, %v6757_v45  ;;  %v3325_v12 = vld [vmem:[%s6631_s4 + $0x8] sm:$0xff] }
 0x106   : > { %4382 = vmatmul.mubr.msk.f32.gmra.mrb[22].mxu1 %vm438_vm2, %v5458_v61  ;;  %4605 = vmatmul.mubr.msk.f32.gmra.mrb[4].mxu0 %vm438_vm2, %v6758_v57  ;;  %v6795_v61 = vld [vmem:[#allocation40_spill] sm:$0xff] }
 0x107   : > { %4384 = vmatprep.mubr.msk.f32.mxu1 %vm438_vm2, %v5497_v52  ;;  %4607 = vmatprep.mubr.msk.f32.mxu0 %vm438_vm2, %v5564_v63  ;;  %v3888_v52 = vmul.f32 -1.442695, %v3316_v3  ;;  %v6798_v63 = vld [vmem:[#allocation46_spill] sm:$0xff] }
 0x109   : > { %4933 = vpow2.f32 %v3888_v52 }
 0x10a   : > { %4385 = vmatmul.mubr.msk.f32.gmra.mrb[24].mxu1 %vm438_vm2, %v5500_v13  ;;  %4608 = vmatmul.mubr.msk.f32.gmra.mrb[6].mxu0 %vm438_vm2, %v6759_v20 }
 0x10b   : > { %4387 = vmatprep.mubr.msk.f32.mxu1 %vm438_vm2, %v5534_v55  ;;  %4610 = vmatprep.mubr.msk.f32.mxu0 %vm438_vm2, %v5599_v60 }
 0x10e   : > { %4388 = vmatmul.mubr.msk.f32.gmra.mrb[26].mxu1 %vm438_vm2, %v5537_v39  ;;  %4611 = vmatmul.mubr.msk.f32.gmra.mrb[8].mxu0 %vm438_vm2, %v5616_v33  ;;  %v6797_v39 = vld [vmem:[#allocation45_spill] sm:$0xff]  ;;  %v6799_v33 = vld [vmem:[#allocation47_spill] sm:$0xff] }
 0x10f   : > { %4390 = vmatprep.mubr.msk.f32.mxu1 %vm438_vm2, %v5569_v8  ;;  %4613 = vmatprep.mubr.msk.f32.mxu0 %vm438_vm2, %v5623_v54  ;;  %v6796_v8 = vld [vmem:[#allocation44_spill] sm:$0xff]  ;;  %v2783_v54 = vrot.slane %v5958_v49, 2 }
 0x112   : > { %4391 = vmatmul.mubr.msk.f32.gmra.mrb[28].mxu1 %vm438_vm2, %v5572_v46  ;;  %4614 = vmatmul.mubr.msk.f32.gmra.mrb[10].mxu0 %vm438_vm2, %v5639_v2  ;;  %v2782_v46 = vrot.slane %v5947_v24, 2  ;;  %v5075_v2 = vmov 0.0  }
 0x113   : > { %4393 = vmatprep.mubr.msk.f32.mxu1 %vm438_vm2, %v5761_v6  ;;  %4616 = vmatprep.mubr.msk.f32.mxu0 %vm438_vm2, %v5643_v47  ;;  %v4658_v6 = vpack.c.bf16 %v3325_v12, %v3324_v7  ;;  %v4934_v16 = vpop.eup %4933  ;;  %v6800_v47 = vld [vmem:[#allocation48_spill] sm:$0xff] }
 0x114   : > { %v3320_v13 = vadd.f32 1.0, %v4934_v16 }
 0x116   : > { %4394 = vmatmul.mubr.msk.f32.gmra.mrb[30].mxu1 %vm438_vm2, %v5764_v29  ;;  %4617 = vmatmul.mubr.msk.f32.gmra.mrb[12].mxu0 %vm438_vm2, %v5656_v17  ;;  %4935 = vrcp.f32 %v3320_v13  ;;  %v2785_v17 = vrot.slane %v6086_v34, 2 }
 0x117   : > { %4425 = vmatprep.mubr.msk.f32.mxu1 %vm438_vm2, %v6781_v62  ;;  %4619 = vmatprep.mubr.msk.f32.mxu0 %vm438_vm2, %v5660_v37  ;;  %v2784_v37 = vsel %vm1024_vm3, %v2782_v46, %v2783_v54 }
 0x11a   : > { %4426 = vmatmul.mubr.msk.f32.vlgmr.msra.gmra.mrb[18].mxu1 %vm438_vm2, %v6782_v56  ;;  %4620 = vmatmul.mubr.msk.f32.gmra.mrb[14].mxu0 %vm438_vm2, %v5678_v30  ;;  %v6801_v30 = vld [vmem:[#allocation49_spill] sm:$0xff]  ;;  %v6268_v56 = vld [vmem:[%s6629_s2] ss:$0 sm:$0xff] }
 0x11b   : > { %4428 = vmatprep.mubr.msk.f32.mxu1 %vm438_vm2, %v6783_v27  ;;  %4622 = vmatprep.mubr.msk.f32.mxu0 %vm438_vm2, %v5684_v41  ;;  %v2786_v41 = vsel %vm1024_vm3, %v2783_v54, %v2785_v17 }
 0x11c   : > { %4659 = vmatpush3.bf16.msra.mxu1 %v4658_v6 }
 0x11d   : > { %4660 = vmatprep.subr.bf16.mxu1 %v6793_v53 }
 0x11e   : > { %4429 = vmatmul.mubr.msk.f32.gmra.mrb[20].mxu1 %vm438_vm2, %v6784_v15  ;;  %4623 = vmatmul.mubr.msk.f32.gmra.mrb[16].mxu0 %vm438_vm2, %v6794_v23 }
 0x11f   : > { %4431 = vmatprep.mubr.msk.f32.mxu1 %vm438_vm2, %v6785_v0  ;;  %4625 = vmatprep.mubr.msk.f32.mxu0 %vm438_vm2, %v6795_v61 }
 0x120   : > { %4662 = vmatpush3.bf16.msra.mxu1 %v4661_v48  ;;  %v4936_v55 = vpop.eup %4935 }
 0x121   : > { %v3323_v60 = vmul.f32 %v4936_v55, %v3316_v3 }
 0x122   : > { %4432 = vmatmul.mubr.msk.f32.gmra.mrb[22].mxu1 %vm438_vm2, %v6786_v18  ;;  %4626 = vmatmul.mubr.msk.f32.gmra.mrb[18].mxu0 %vm438_vm2, %v5716_v22 }
 0x123   : > { %4434 = vmatprep.mubr.msk.f32.mxu1 %vm438_vm2, %v6787_v25  ;;  %4628 = vmatprep.mubr.msk.f32.mxu0 %vm438_vm2, %v6766_v1 }
 0x126   : > { %4435 = vmatmul.mubr.msk.f32.gmra.mrb[24].mxu1 %vm438_vm2, %v6788_v26  ;;  %4629 = vmatmul.mubr.msk.f32.gmra.mrb[20].mxu0 %vm438_vm2, %v6768_v35 }
 0x127   : > { %4437 = vmatprep.mubr.msk.f32.mxu1 %vm438_vm2, %v6789_v31  ;;  %4631 = vmatprep.mubr.msk.f32.mxu0 %vm438_vm2, %v6770_v36 }
 0x12a   : > { %4438 = vmatmul.mubr.msk.f32.gmra.mrb[26].mxu1 %vm438_vm2, %v6790_v9  ;;  %4632 = vmatmul.mubr.msk.f32.gmra.mrb[22].mxu0 %vm438_vm2, %v5750_v38 }
 0x12b   : > { %4440 = vmatprep.mubr.msk.f32.mxu1 %vm438_vm2, %v6791_v43  ;;  %4634 = vmatprep.mubr.msk.f32.mxu0 %vm438_vm2, %v6796_v8 }
 0x12e   : > { %4441 = vmatmul.mubr.msk.f32.gmra.mrb[28].mxu1 %vm438_vm2, %v6792_v51  ;;  %4635 = vmatmul.mubr.msk.f32.gmra.mrb[24].mxu0 %vm438_vm2, %v6797_v39 }
 0x12f   : > { %4443 = vmatprep.mubr.msk.f32.mxu1 %vm438_vm2, %v6083_v40  ;;  %4637 = vmatprep.mubr.msk.f32.mxu0 %vm438_vm2, %v6798_v63 }
 0x132   : > { %4444 = vmatmul.mubr.msk.f32.gmra.mrb[30].mxu1 %vm438_vm2, %v6097_v58  ;;  %4638 = vmatmul.mubr.msk.f32.gmra.mrb[26].mxu0 %vm438_vm2, %v6799_v33 }
 0x133   : > { %4654 = vmatprep.mubr.msk.f32.mxu1 %vm5074_vm4, %v5075_v2  ;;  %4640 = vmatprep.mubr.msk.f32.mxu0 %vm438_vm2, %v6800_v47 }
 0x136   : > { %4655 = vmatmul.mubr.msk.f32.vlgmr.msra.gmra.mrb[32].mxu1 %vm3335_vm5, %v3323_v60  ;;  %4641 = vmatmul.mubr.msk.f32.gmra.mrb[28].mxu0 %vm438_vm2, %v6801_v30 }
 0x137   : > { %4643 = vmatprep.mubr.msk.f32.mxu0 %vm438_vm2, %v2784_v37 }
 0x13a   : > { %4644 = vmatmul.mubr.msk.f32.gmra.mrb[30].mxu0 %vm438_vm2, %v2786_v41 }
 0x1ad   : > { %v4350_v35 = vpop.f32.mrb[0].mxu1 }
 0x1ae   : > { %v1508_v36 = vpop.f32.mrb[1].mxu1 }
 0x1b1   : > { %v4353_v22 = vpop.f32.mrb[2].mxu1 }
 0x1b2   : > { %v1518_v29 = vpop.f32.mrb[3].mxu1 }
 0x1b5   : > { %v4356_v38 = vpop.f32.mrb[4].mxu1 }
 0x1b6   : > { %v1528_v40 = vpop.f32.mrb[5].mxu1 }
 0x1b9   : > { %v4359_v5 = vpop.f32.mrb[6].mxu1 }
 0x1ba   : > { %v1538_v34 = vpop.f32.mrb[7].mxu1 }
 0x1bd   : > { %v4362_v11 = vpop.f32.mrb[8].mxu1 }
 0x1be   : > { %v1548_v14 = vpop.f32.mrb[9].mxu1 }
 0x1c1   : > { %v4365_v28 = vpop.f32.mrb[10].mxu1 }
 0x1c2   : > { %v6251_v45 = vpop.f32.mrb[11].mxu1 }
 0x1c5   : > { %v6253_v57 = vpop.f32.mrb[12].mxu1 }
 0x1c6   : > { %v6255_v20 = vpop.f32.mrb[13].mxu1 }
 0x1c9   : > { %v6257_v24 = vpop.f32.mrb[14].mxu1 }
 0x1ca   : > { %v6259_v49 = vpop.f32.mrb[15].mxu1 }
 0x1cd   : > { %v6261_v1 = vpop.f32.mrb[16].mxu1 }
 0x1ce   : > { %v6263_v62 = vpop.f32.mrb[17].mxu1 }
 0x1d1   : > { %v4600_v4 = vpop.f32.mrb[0].mxu0 }
 0x1d2   : > { %v4665_v27 = vadd.f32 %v4600_v4, %v4350_v35  ;;  %v2862_v15 = vpop.f32.mrb[1].mxu0 }
 0x1d3   : > { %v4666_v0 = vadd.f32 %v2862_v15, %v1508_v36 }
 0x1d4   : > { %v6271_v18 = vadd.f32 %v4665_v27, %v6268_v56 }
 0x1d5   : > { %v6274_v25 = vadd.f32 %v4666_v0, %v6268_v56  ;;  %v4603_v26 = vpop.f32.mrb[2].mxu0 }
 0x1d6   : > { %v3857_v31 = vmul.f32 -1.442695, %v6271_v18  ;;  %v4667_v42 = vadd.f32 %v4603_v26, %v4353_v22  ;;  %v2872_v9 = vpop.f32.mrb[3].mxu0 }
 0x1d7   : > { %v3856_v43 = vmul.f32 -1.442695, %v6274_v25  ;;  %v4668_v50 = vadd.f32 %v2872_v9, %v1518_v29 }
 0x1d8   : > { %4937 = vpow2.f32 %v3857_v31  ;;  %v6279_v44 = vadd.f32 %v4667_v42, %v6268_v56 }
 0x1d9   : > { %4939 = vpow2.f32 %v3856_v43  ;;  %v6282_v51 = vadd.f32 %v4668_v50, %v6268_v56  ;;  %v4606_v58 = vpop.f32.mrb[4].mxu0 }
 0x1da   : > { %v3859_v10 = vmul.f32 -1.442695, %v6279_v44  ;;  %v4669_v32 = vadd.f32 %v4606_v58, %v4356_v38  ;;  %v2882_v59 = vpop.f32.mrb[5].mxu0 }
 0x1db   : > { %v3858_v3 = vmul.f32 -1.442695, %v6282_v51  ;;  %v4670_v52 = vadd.f32 %v2882_v59, %v1528_v40 }
 0x1dc   : > { %4941 = vpow2.f32 %v3859_v10  ;;  %v6287_v7 = vadd.f32 %v4669_v32, %v6268_v56 }
 0x1dd   : > { %4943 = vpow2.f32 %v3858_v3  ;;  %v6290_v12 = vadd.f32 %v4670_v52, %v6268_v56  ;;  %v4609_v6 = vpop.f32.mrb[6].mxu0 }
 0x1de   : > { %v3861_v19 = vmul.f32 -1.442695, %v6287_v7  ;;  %v4671_v21 = vadd.f32 %v4609_v6, %v4359_v5  ;;  %v2892_v48 = vpop.f32.mrb[7].mxu0 }
 0x1df   : > { %v3860_v53 = vmul.f32 -1.442695, %v6290_v12  ;;  %v4672_v16 = vadd.f32 %v2892_v48, %v1538_v34 }
 0x1e0   : > { %4945 = vpow2.f32 %v3861_v19  ;;  %v6295_v23 = vadd.f32 %v4671_v21, %v6268_v56 }
 0x1e1   : > { %4947 = vpow2.f32 %v3860_v53  ;;  %v6298_v61 = vadd.f32 %v4672_v16, %v6268_v56  ;;  %v4612_v13 = vpop.f32.mrb[8].mxu0 }
 0x1e2   : > { %v4938_v8 = vpop.eup %4937  ;;  %v3863_v55 = vmul.f32 -1.442695, %v6295_v23  ;;  %v4673_v39 = vadd.f32 %v4612_v13, %v4362_v11  ;;  %v2902_v63 = vpop.f32.mrb[9].mxu0 }
 0x1e3   : > { %v4940_v46 = vpop.eup %4939  ;;  %v3189_v54 = vadd.f32 1.0, %v4938_v8  ;;  %v3862_v60 = vmul.f32 -1.442695, %v6298_v61  ;;  %v4674_v33 = vadd.f32 %v2902_v63, %v1548_v14 }
 0x1e4   : > { %4949 = vpow2.f32 %v3863_v55  ;;  %v6303_v2 = vadd.f32 %v4673_v39, %v6268_v56  ;;  %v3188_v47 = vadd.f32 1.0, %v4940_v46 }
 0x1e5   : > { %v6306_v17 = vadd.f32 %v4674_v33, %v6268_v56  ;;  %v4615_v37 = vpop.f32.mrb[10].mxu0  ;;  %4951 = vrcp.f32 %v3189_v54 }
 0x1e6   : > { %v4942_v30 = vpop.eup %4941  ;;  %v3865_v41 = vmul.f32 -1.442695, %v6303_v2  ;;  %v4675_v35 = vadd.f32 %v4615_v37, %v4365_v28  ;;  %v2912_v36 = vpop.f32.mrb[11].mxu0  ;;  %4953 = vpow2.f32 %v3862_v60 }
 0x1e7   : > { %v4944_v22 = vpop.eup %4943  ;;  %v3191_v29 = vadd.f32 1.0, %v4942_v30  ;;  %v3864_v38 = vmul.f32 -1.442695, %v6306_v17  ;;  %v4676_v40 = vadd.f32 %v2912_v36, %v6251_v45 }
 0x1e8   : > { %4955 = vpow2.f32 %v3865_v41  ;;  %v6312_v5 = vadd.f32 %v4675_v35, %v6268_v56  ;;  %v3190_v34 = vadd.f32 1.0, %v4944_v22 }
 0x1e9   : > { %4957 = vrcp.f32 %v3188_v47  ;;  %v6315_v11 = vadd.f32 %v4676_v40, %v6268_v56  ;;  %v4618_v14 = vpop.f32.mrb[12].mxu0 }
 0x1ea   : > { %v4946_v4 = vpop.eup %4945  ;;  %4959 = vrcp.f32 %v3191_v29  ;;  %v3867_v28 = vmul.f32 -1.442695, %v6312_v5  ;;  %v4677_v27 = vadd.f32 %v4618_v14, %v6253_v57  ;;  %v2922_v15 = vpop.f32.mrb[13].mxu0 }
 0x1eb   : > { %v4948_v0 = vpop.eup %4947  ;;  %v3193_v26 = vadd.f32 1.0, %v4946_v4  ;;  %4961 = vpow2.f32 %v3864_v38  ;;  %v3866_v45 = vmul.f32 -1.442695, %v6315_v11  ;;  %v4678_v31 = vadd.f32 %v2922_v15, %v6255_v20 }
 0x1ec   : > { %4963 = vpow2.f32 %v3867_v28  ;;  %v6322_v42 = vadd.f32 %v4677_v27, %v6268_v56  ;;  %v3192_v43 = vadd.f32 1.0, %v4948_v0 }
 0x1ed   : > { %v4427_v9 = vpop.f32.mrb[18].mxu1  ;;  %4965 = vrcp.f32 %v3190_v34  ;;  %v6325_v50 = vadd.f32 %v4678_v31, %v6268_v56  ;;  %v4621_v58 = vpop.f32.mrb[14].mxu0 }
 0x1ee   : > { %v1870_v57 = vpop.f32.mrb[19].mxu1  ;;  %v4950_v10 = vpop.eup %4949  ;;  %4967 = vrcp.f32 %v3193_v26  ;;  %v3869_v32 = vmul.f32 -1.442695, %v6322_v42  ;;  %v4679_v59 = vadd.f32 %v4621_v58, %v6257_v24 }
 0x1ef   : > { %v2932_v3 = vpop.f32.mrb[15].mxu0  ;;  %v3195_v20 = vadd.f32 1.0, %v4950_v10  ;;  %4969 = vpow2.f32 %v3866_v45  ;;  %v3868_v52 = vmul.f32 -1.442695, %v6325_v50  ;;  %v6331_v19 = vpop.eup %4951 }
 0x1f0   : > { %v4680_v6 = vadd.f32 %v2932_v3, %v6259_v49  ;;  %4971 = vpow2.f32 %v3869_v32  ;;  %v6334_v21 = vadd.f32 %v4679_v59, %v6268_v56  ;;  %v4954_v53 = vpop.eup %4953 }
 0x1f1   : > { %v4430_v48 = vpop.f32.mrb[20].mxu1  ;;  %4973 = vrcp.f32 %v3192_v43  ;;  %v4624_v24 = vpop.f32.mrb[16].mxu0  ;;  %v3194_v55 = vadd.f32 1.0, %v4954_v53 }
 0x1f2   : > { %v6337_v16 = vadd.f32 %v4680_v6, %v6268_v56  ;;  %v1880_v13 = vpop.f32.mrb[21].mxu1  ;;  %v4956_v8 = vpop.eup %4955  ;;  %4975 = vpow2.f32 %v3868_v52  ;;  %v3871_v39 = vmul.f32 -1.442695, %v6334_v21  ;;  %v4681_v49 = vadd.f32 %v4624_v24, %v6261_v1 }
 0x1f3   : > { %v2942_v63 = vpop.f32.mrb[17].mxu0  ;;  %v6341_v46 = vpop.eup %4957  ;;  %4977 = vrcp.f32 %v3195_v20  ;;  %v3197_v54 = vadd.f32 1.0, %v4956_v8  ;;  %v3409_v52 = vlaneseq }
 0x1f4   : > { %v3870_v60 = vmul.f32 -1.442695, %v6337_v16  ;;  %v4682_v33 = vadd.f32 %v2942_v63, %v6263_v62  ;;  %v6345_v47 = vpop.eup %4959  ;;  %4979 = vrcp.f32 %v3194_v55  ;;  %v6348_v37 = vadd.f32 %v4681_v49, %v6268_v56 }
 0x1f5   : > { %v4433_v30 = vpop.f32.mrb[22].mxu1  ;;  %v4962_v41 = vpop.eup %4961  ;;  %4981 = vrcp.f32 %v3197_v54 }
 0x1f6   : > { %v6351_v1 = vadd.f32 %v4682_v33, %v6268_v56  ;;  %v4627_v35 = vpop.f32.mrb[18].mxu0  ;;  %v1890_v36 = vpop.f32.mrb[23].mxu1  ;;  %v3196_v29 = vadd.f32 1.0, %v4962_v41  ;;  %4983 = vpow2.f32 %v3871_v39  ;;  %v3873_v38 = vmul.f32 -1.442695, %v6348_v37 }
 0x1f7   : > { %v4964_v22 = vpop.eup %4963  ;;  %v4683_v62 = vadd.f32 %v4627_v35, %v4427_v9  ;;  %v2952_v40 = vpop.f32.mrb[19].mxu0  ;;  %4985 = vpow2.f32 %v3870_v60 }
 0x1f8   : > { %v6354_v34 = vpop.eup %4965  ;;  %v3199_v14 = vadd.f32 1.0, %v4964_v22  ;;  %v3872_v4 = vmul.f32 -1.442695, %v6351_v1  ;;  %v4684_v28 = vadd.f32 %v2952_v40, %v1870_v57  ;;  %4987 = vrcp.f32 %v3196_v29 }
 0x1f9   : > { %v6357_v27 = vpop.eup %4967  ;;  %v6360_v15 = vadd.f32 %v4683_v62, %v6268_v56  ;;  %v4436_v0 = vpop.f32.mrb[24].mxu1  ;;  %v3410_v29 = vshrl.u32 %v3409_v52, 7 }
 0x1fa   : > { %v4970_v26 = vpop.eup %4969  ;;  %4989 = vrcp.f32 %v3199_v14  ;;  %v6363_v45 = vadd.f32 %v4684_v28, %v6268_v56  ;;  %v4630_v31 = vpop.f32.mrb[20].mxu0  ;;  %v3411_v14 = vstv %s5117_s22 }
 0x1fb   : > { %v1900_v9 = vpop.f32.mrb[25].mxu1  ;;  %v4972_v43 = vpop.eup %4971  ;;  %v3198_v58 = vadd.f32 1.0, %v4970_v26  ;;  %4991 = vpow2.f32 %v3873_v38  ;;  %v3875_v10 = vmul.f32 -1.442695, %v6360_v15  ;;  %v4685_v57 = vadd.f32 %v4630_v31, %v4430_v48 }
 0x1fc   : > { %v2962_v32 = vpop.f32.mrb[21].mxu0  ;;  %v6366_v59 = vpop.eup %4973  ;;  %v3201_v3 = vadd.f32 1.0, %v4972_v43  ;;  %4993 = vpow2.f32 %v3872_v4  ;;  %v3874_v53 = vmul.f32 -1.442695, %v6363_v45  ;;  %vm6398_vm6 = vcmp.eq.s32.totalorder %v3410_v29, %v3411_v14 }
 0x1fd   : > { %v4686_v20 = vadd.f32 %v2962_v32, %v1880_v13  ;;  %v4976_v6 = vpop.eup %4975  ;;  %4995 = vrcp.f32 %v3198_v58  ;;  %v6370_v24 = vadd.f32 %v4685_v57, %v6268_v56  ;;  %v4439_v8 = vpop.f32.mrb[26].mxu1  ;;  %v6428_v14 = vmul.f32 %v6345_v47, %v6279_v44 }
 0x1fe   : > { %v6372_v55 = vpop.eup %4977  ;;  %4997 = vrcp.f32 %v3201_v3  ;;  %v3200_v39 = vadd.f32 1.0, %v4976_v6  ;;  %v4633_v49 = vpop.f32.mrb[22].mxu0 }
 0x1ff   : > { %v6375_v48 = vadd.f32 %v4686_v20, %v6268_v56  ;;  %v1910_v63 = vpop.f32.mrb[27].mxu1  ;;  %v6377_v13 = vpop.eup %4979  ;;  %4999 = vpow2.f32 %v3875_v10  ;;  %v3877_v54 = vmul.f32 -1.442695, %v6370_v24  ;;  %v4687_v60 = vadd.f32 %v4633_v49, %v4433_v30 }
 0x200   : > { %v2972_v33 = vpop.f32.mrb[23].mxu0  ;;  %v6380_v41 = vpop.eup %4981  ;;  %5001 = vrcp.f32 %v3200_v39  ;;  %v6462_v52 = vmul.f32 %v6372_v55, %v6295_v23 }
 0x201   : > { %v3876_v35 = vmul.f32 -1.442695, %v6375_v48  ;;  %v4688_v22 = vadd.f32 %v2972_v33, %v1890_v36  ;;  %v4984_v38 = vpop.eup %4983  ;;  %5003 = vpow2.f32 %v3874_v53  ;;  %v6384_v62 = vadd.f32 %v4687_v60, %v6268_v56  ;;  %v4442_v40 = vpop.f32.mrb[28].mxu1 }
 0x202   : > { %v4986_v4 = vpop.eup %4985  ;;  %v3203_v28 = vadd.f32 1.0, %v4984_v38  ;;  %5005 = vpow2.f32 %v3877_v54  ;;  %v4636_v26 = vpop.f32.mrb[24].mxu0  ;;  %v6404_v53 = vmul.f32 %v6331_v19, %v6271_v18  ;;  %v6411_v54 = vmul.f32 %v6341_v46, %v6274_v25  ;;  %v3889_v25 = vld [vmem:[%s6632_s5] ss:$0 sm:$0xff] }
 0x203   : > { %v6388_v30 = vadd.f32 %v4688_v22, %v6268_v56  ;;  %v6390_v31 = vpop.f32.mrb[29].mxu1  ;;  %v6392_v43 = vpop.eup %4987  ;;  %v3202_v36 = vadd.f32 1.0, %v4986_v4  ;;  %5007 = vpow2.f32 %v3876_v35  ;;  %v3879_v58 = vmul.f32 -1.442695, %v6384_v62 }
 0x204   : > { %v4689_v10 = vadd.f32 %v4636_v26, %v4436_v0  ;;  %v2982_v57 = vpop.f32.mrb[25].mxu0  ;;  %v6395_v32 = vpop.eup %4989  ;;  %5009 = vrcp.f32 %v3203_v28 }
 0x205   : > { %v3878_v3 = vmul.f32 -1.442695, %v6388_v30  ;;  %v4690_v20 = vadd.f32 %v2982_v57, %v1900_v9  ;;  %v4992_v6 = vpop.eup %4991  ;;  %5011 = vrcp.f32 %v3202_v36  ;;  %v4445_v0 = vpop.f32.mrb[30].mxu1  ;;  %v6433_v36 = vmul.f32 %v6354_v34, %v6282_v51 }
 0x206   : > { %v6407_v39 = vadd.f32 %v4689_v10, %v6268_v56  ;;  %v4994_v49 = vpop.eup %4993  ;;  %v3205_v9 = vadd.f32 1.0, %v4992_v6  ;;  %5013 = vpow2.f32 %v3879_v58  ;;  %v4639_v33 = vpop.f32.mrb[26].mxu0 }
 0x207   : > { %v6414_v60 = vadd.f32 %v4690_v20, %v6268_v56  ;;  %v6416_v35 = vpop.f32.mrb[31].mxu1  ;;  %v6418_v18 = vpop.eup %4995  ;;  %v3204_v19 = vadd.f32 1.0, %v4994_v49  ;;  %5015 = vpow2.f32 %v3878_v3  ;;  %v4691_v29 = vadd.f32 %v4639_v33, %v4439_v8 }
 0x208   : > { %v3881_v22 = vmul.f32 -1.442695, %v6407_v39  ;;  %v2992_v38 = vpop.f32.mrb[27].mxu0  ;;  %v6424_v46 = vpop.eup %4997  ;;  %5017 = vrcp.f32 %v3205_v9  ;;  %v6437_v8 = vmul.f32 %v6357_v27, %v6287_v7  ;;  %v6449_v7 = vmul.f32 %v6366_v59, %v6290_v12 }
 0x209   : > { %v3880_v4 = vmul.f32 -1.442695, %v6414_v60  ;;  %v4692_v28 = vadd.f32 %v2992_v38, %v1910_v63  ;;  %v5000_v26 = vpop.eup %4999  ;;  %5019 = vrcp.f32 %v3204_v19  ;;  %v6440_v58 = vadd.f32 %v4691_v29, %v6268_v56  ;;  %v3405_v10 = vpop.f32.mrb[32].mxu1 }
 0x20a   : > { %v6442_v44 = vpop.eup %5001  ;;  %v3207_v47 = vadd.f32 1.0, %v5000_v26  ;;  %5021 = vpow2.f32 %v3881_v22  ;;  %v4642_v57 = vpop.f32.mrb[28].mxu0  ;;  %v3406_v3 = vadd.f32 %v3889_v25, %v3405_v10 }
 0x20b   : > { %v6445_v63 = vadd.f32 %v4692_v28, %v6268_v56  ;;  %v4656_v51 = vpop.f32.mrb[33].mxu1  ;;  %v5004_v34 = vpop.eup %5003  ;;  %5023 = vpow2.f32 %v3880_v4  ;;  %v3883_v27 = vmul.f32 -1.442695, %v6440_v58  ;;  %v4693_v20 = vadd.f32 %v4642_v57, %v4442_v40 }
 0x20c   : > { %v3002_v6 = vpop.f32.mrb[29].mxu0  ;;  %v5006_v49 = vpop.eup %5005  ;;  %5025 = vrcp.f32 %v3207_v47  ;;  %v3206_v9 = vadd.f32 1.0, %v5004_v34  ;;  %v3413_v19 = vsel %vm6398_vm6, %v3406_v3, 0.0  ;;  %v6467_v51 = vmul.f32 %v6377_v13, %v6298_v61 }
 0x20d   : > { %v3882_v33 = vmul.f32 -1.442695, %v6445_v63  ;;  %v5008_v22 = vpop.eup %5007  ;;  %v3209_v29 = vadd.f32 1.0, %v5006_v49  ;;  %5027 = vpow2.f32 %v3883_v27  ;;  %v6456_v38 = vadd.f32 %v4693_v20, %v6268_v56  ;;  %v4645_v28 = vpop.f32.mrb[30].mxu0 }
 0x20e   : > { %v3415_v12 = vsel %vm3414_vm7, %v3413_v19, 0.0  ;;  %v5010_v59 = vpop.eup %5009  ;;  %5029 = vrcp.f32 %v3206_v9  ;;  %v3208_v40 = vadd.f32 1.0, %v5008_v22  ;;  %v4694_v4 = vadd.f32 %v3002_v6, %v6390_v31  ;;  %v3012_v57 = vpop.f32.mrb[31].mxu0 }
 0x20f   : > { %v3416_v25 = vrot.slane %v3415_v12, 4  ;;  %v5012_v26 = vpop.eup %5011  ;;  %5031 = vrcp.f32 %v3209_v29  ;;  %v3885_v10 = vmul.f32 -1.442695, %v6456_v38  ;;  %v4695_v47 = vadd.f32 %v4645_v28, %v4445_v0 }
 0x210   : > { %v5014_v3 = vpop.eup %5013  ;;  %5033 = vrcp.f32 %v3208_v40  ;;  %v6470_v31 = vadd.f32 %v4694_v4, %v6268_v56  ;;  %v4696_v55 = vadd.f32 %v3012_v57, %v6416_v35  ;;  %v3293_v9 = vmul.f32 %v6380_v41, %v6303_v2 }
 0x211   : > { %v3417_v34 = vadd.f32 %v3416_v25, %v3415_v12  ;;  %v5016_v27 = vpop.eup %5015  ;;  %v3211_v20 = vadd.f32 1.0, %v5014_v3  ;;  %5035 = vpow2.f32 %v3882_v33  ;;  %v6473_v23 = vadd.f32 %v4695_v47, %v6268_v56 }
 0x212   : > { %v5018_v0 = vpop.eup %5017  ;;  %v3210_v6 = vadd.f32 1.0, %v5016_v27  ;;  %5037 = vpow2.f32 %v3885_v10  ;;  %v3884_v61 = vmul.f32 -1.442695, %v6470_v31  ;;  %v6481_v33 = vadd.f32 %v4696_v55, %v6268_v56 }
 0x213   : > { %v3418_v49 = vrot.slane %v3417_v34, 2  ;;  %v5020_v13 = vpop.eup %5019  ;;  %5039 = vrcp.f32 %v3211_v20  ;;  %v3887_v19 = vmul.f32 -1.442695, %v6473_v23  ;;  %v3292_v35 = vmul.f32 %v6392_v43, %v6306_v17 }
 0x214   : > { %v5022_v22 = vpop.eup %5021  ;;  %v3295_v29 = vmul.f32 %v6395_v32, %v6312_v5  ;;  %5041 = vrcp.f32 %v3210_v6  ;;  %v3294_v2 = vmul.f32 %v6418_v18, %v6315_v11  ;;  %v3886_v25 = vmul.f32 -1.442695, %v6481_v33 }
 0x215   : > { %v3419_v12 = vadd.f32 %v3418_v49, %v3417_v34  ;;  %v5024_v40 = vpop.eup %5023  ;;  %v3213_v41 = vadd.f32 1.0, %v5022_v22  ;;  %5043 = vpow2.f32 %v3884_v61  ;;  %v3297_v56 = vmul.f32 %v6424_v46, %v6322_v42 }
 0x216   : > { %v5026_v4 = vpop.eup %5025  ;;  %v3212_v28 = vadd.f32 1.0, %v5024_v40  ;;  %5045 = vpow2.f32 %v3887_v19  ;;  %v3296_v5 = vmul.f32 %v6442_v44, %v6325_v50  ;;  %v3299_v43 = vmul.f32 %v5010_v59, %v6334_v21 }
 0x217   : > { %v3420_v10 = vrot.slane %v3419_v12, 1  ;;  %v5028_v17 = vpop.eup %5027  ;;  %v3298_v11 = vmul.f32 %v5012_v26, %v6337_v16  ;;  %5047 = vrcp.f32 %v3213_v41  ;;  %v3301_v18 = vmul.f32 %v5018_v0, %v6348_v37 }
 0x218   : > { %v5030_v32 = vpop.eup %5029  ;;  %5049 = vrcp.f32 %v3212_v28  ;;  %v3215_v47 = vadd.f32 1.0, %v5028_v17  ;;  %v3300_v46 = vmul.f32 %v5020_v13, %v6351_v1  ;;  %v3303_v3 = vmul.f32 %v5026_v4, %v6360_v15 }
 0x219   : > { %v6498_v57 = vadd.f32 %v3420_v10, %v3419_v12  ;;  %v5032_v42 = vpop.eup %5031  ;;  %v3302_v34 = vmul.f32 %v5030_v32, %v6363_v45  ;;  %5051 = vpow2.f32 %v3886_v25 }
 0x21a   : > { %v5034_v50 = vpop.eup %5033  ;;  %v3305_v21 = vmul.f32 %v5032_v42, %v6370_v24  ;;  %5053 = vrcp.f32 %v3215_v47 }
 0x21b   : > { %v3422_v16 = vadd.f32 %v6498_v57, %v6411_v54  ;;  %v3423_v37 = vadd.f32 %v6498_v57, %v6404_v53  ;;  %v5036_v1 = vpop.eup %5035  ;;  %v3304_v15 = vmul.f32 %v5034_v50, %v6375_v48  ;;  %v3424_v45 = vadd.f32 %v6498_v57, %v6433_v36 }
 0x21c   : > { %v3425_v44 = vadd.f32 %v6498_v57, %v6428_v14  ;;  %v3426_v24 = vadd.f32 %v6498_v57, %v6449_v7  ;;  %v5038_v59 = vpop.eup %5037  ;;  %v3214_v54 = vadd.f32 1.0, %v5036_v1  ;;  %v3427_v53 = vadd.f32 %v6498_v57, %v6437_v8 }
 0x21d   : > { %v3428_v48 = vadd.f32 %v6498_v57, %v6467_v51  ;;  %v3429_v26 = vadd.f32 %v6498_v57, %v6462_v52  ;;  %3455 = vst.msk [vmem:[%s6506_s16] sm:$0xff] %vm3454_vm8, %v3422_v16  ;;  %3456 = vst.msk [vmem:[%s6506_s16 + $0x8] sm:$0xff] %vm3454_vm8, %v3423_v37  ;;  %v5040_v14 = vpop.eup %5039  ;;  %v3217_v36 = vadd.f32 1.0, %v5038_v59  ;;  %v3430_v7 = vadd.f32 %v6498_v57, %v3292_v35 }
 0x21e   : > { %v3431_v27 = vadd.f32 %v6498_v57, %v3293_v9  ;;  %v3432_v8 = vadd.f32 %v6498_v57, %v3294_v2  ;;  %3457 = vst.msk [vmem:[%s6506_s16 + $0x10] sm:$0xff] %vm3454_vm8, %v3424_v45  ;;  %3458 = vst.msk [vmem:[%s6506_s16 + $0x18] sm:$0xff] %vm3454_vm8, %v3425_v44  ;;  %v5042_v52 = vpop.eup %5041  ;;  %v3307_v51 = vmul.f32 %v5040_v14, %v6384_v62  ;;  %5055 = vrcp.f32 %v3214_v54 }
 0x21f   : > { %3459 = vst.msk [vmem:[%s6506_s16 + $0x20] sm:$0xff] %vm3454_vm8, %v3426_v24  ;;  %v3433_v20 = vadd.f32 %v6498_v57, %v3295_v29  ;;  %v3434_v55 = vadd.f32 %v6498_v57, %v3296_v5  ;;  %3460 = vst.msk [vmem:[%s6506_s16 + $0x28] sm:$0xff] %vm3454_vm8, %v3427_v53  ;;  %v5044_v0 = vpop.eup %5043  ;;  %v3306_v6 = vmul.f32 %v5042_v52, %v6388_v30  ;;  %5057 = vrcp.f32 %v3217_v36 }
 0x220   : > { %3461 = vst.msk [vmem:[%s6506_s16 + $0x30] sm:$0xff] %vm3454_vm8, %v3428_v48  ;;  %3462 = vst.msk [vmem:[%s6506_s16 + $0x38] sm:$0xff] %vm3454_vm8, %v3429_v26  ;;  %v3435_v49 = vadd.f32 %v6498_v57, %v3297_v56  ;;  %v3436_v62 = vadd.f32 %v6498_v57, %v3298_v11  ;;  %v5046_v61 = vpop.eup %5045  ;;  %v3437_v13 = vadd.f32 %v6498_v57, %v3299_v43  ;;  %v3216_v4 = vadd.f32 1.0, %v5044_v0 }
 0x221   : > { %3463 = vst.msk [vmem:[%s6506_s16 + $0x40] sm:$0xff] %vm3454_vm8, %v3430_v7  ;;  %3464 = vst.msk [vmem:[%s6506_s16 + $0x48] sm:$0xff] %vm3454_vm8, %v3431_v27  ;;  %v3438_v9 = vadd.f32 %v6498_v57, %v3300_v46  ;;  %v3439_v30 = vadd.f32 %v6498_v57, %v3301_v18  ;;  %v3440_v19 = vadd.f32 %v6498_v57, %v3302_v34  ;;  %v5048_v22 = vpop.eup %5047  ;;  %v3219_v56 = vadd.f32 1.0, %v5046_v61 }
 0x222   : > { %3465 = vst.msk [vmem:[%s6506_s16 + $0x50] sm:$0xff] %vm3454_vm8, %v3432_v8  ;;  %3466 = vst.msk [vmem:[%s6506_s16 + $0x58] sm:$0xff] %vm3454_vm8, %v3433_v20  ;;  %v3441_v35 = vadd.f32 %v6498_v57, %v3303_v3  ;;  %v3442_v29 = vadd.f32 %v6498_v57, %v3304_v15  ;;  %v3443_v12 = vadd.f32 %v6498_v57, %v3305_v21  ;;  %v5050_v2 = vpop.eup %5049  ;;  %5059 = vrcp.f32 %v3216_v4 }
 0x223   : > { %3467 = vst.msk [vmem:[%s6506_s16 + $0x60] sm:$0xff] %vm3454_vm8, %v3434_v55  ;;  %v3444_v40 = vadd.f32 %v6498_v57, %v3306_v6  ;;  %3468 = vst.msk [vmem:[%s6506_s16 + $0x68] sm:$0xff] %vm3454_vm8, %v3435_v49  ;;  %v3309_v41 = vmul.f32 %v5048_v22, %v6407_v39  ;;  %v3445_v25 = vadd.f32 %v6498_v57, %v3307_v51  ;;  %v5052_v28 = vpop.eup %5051  ;;  %5061 = vrcp.f32 %v3219_v56 }
 0x224   : > { %3469 = vst.msk [vmem:[%s6506_s16 + $0x70] sm:$0xff] %vm3454_vm8, %v3436_v62  ;;  %3470 = vst.msk [vmem:[%s6506_s16 + $0x78] sm:$0xff] %vm3454_vm8, %v3437_v13  ;;  %v3308_v10 = vmul.f32 %v5050_v2, %v6414_v60  ;;  %v5054_v39 = vpop.eup %5053  ;;  %v3218_v5 = vadd.f32 1.0, %v5052_v28 }
 0x225   : > { %3471 = vst.msk [vmem:[%s6506_s16 + $0x80] sm:$0xff] %vm3454_vm8, %v3438_v9  ;;  %3472 = vst.msk [vmem:[%s6506_s16 + $0x88] sm:$0xff] %vm3454_vm8, %v3439_v30  ;;  %v3447_v17 = vadd.f32 %v6498_v57, %v3309_v41  ;;  %v3311_v60 = vmul.f32 %v5054_v39, %v6440_v58 }
 0x226   : > { %3473 = vst.msk [vmem:[%s6506_s16 + $0x90] sm:$0xff] %vm3454_vm8, %v3440_v19  ;;  %3474 = vst.msk [vmem:[%s6506_s16 + $0x98] sm:$0xff] %vm3454_vm8, %v3441_v35  ;;  %v3446_v43 = vadd.f32 %v6498_v57, %v3308_v10  ;;  %5063 = vrcp.f32 %v3218_v5 }
 0x227   : > { %3475 = vst.msk [vmem:[%s6506_s16 + $0xa0] sm:$0xff] %vm3454_vm8, %v3442_v29  ;;  %3476 = vst.msk [vmem:[%s6506_s16 + $0xa8] sm:$0xff] %vm3454_vm8, %v3443_v12  ;;  %v3449_v11 = vadd.f32 %v6498_v57, %v3311_v60 }
 0x228   : > { %3477 = vst.msk [vmem:[%s6506_s16 + $0xb0] sm:$0xff] %vm3454_vm8, %v3444_v40  ;;  %3478 = vst.msk [vmem:[%s6506_s16 + $0xb8] sm:$0xff] %vm3454_vm8, %v3445_v25  ;;  %v5056_v32 = vpop.eup %5055 }
 0x229   : > { %3480 = vst.msk [vmem:[%s6506_s16 + $0xc8] sm:$0xff] %vm3454_vm8, %v3447_v17  ;;  %3479 = vst.msk [vmem:[%s6506_s16 + $0xc0] sm:$0xff] %vm3454_vm8, %v3446_v43  ;;  %v5058_v18 = vpop.eup %5057  ;;  %v3310_v47 = vmul.f32 %v5056_v32, %v6445_v63 }
 0x22a   : > { %3482 = vst.msk [vmem:[%s6506_s16 + $0xd8] sm:$0xff] %vm3454_vm8, %v3449_v11  ;;  %v3313_v58 = vmul.f32 %v5058_v18, %v6456_v38 }
 0x22b   : > { %v3448_v42 = vadd.f32 %v6498_v57, %v3310_v47 }
 0x22c   : > { %v3451_v46 = vadd.f32 %v6498_v57, %v3313_v58  ;;  %v5060_v3 = vpop.eup %5059 }
 0x22d   : > { %3481 = vst.msk [vmem:[%s6506_s16 + $0xd0] sm:$0xff] %vm3454_vm8, %v3448_v42  ;;  %v5062_v34 = vpop.eup %5061  ;;  %v3312_v50 = vmul.f32 %v5060_v3, %v6470_v31 }
 0x22e   : > { %3484 = vst.msk [vmem:[%s6506_s16 + $0xe8] sm:$0xff] %vm3454_vm8, %v3451_v46  ;;  %v3315_v63 = vmul.f32 %v5062_v34, %v6473_v23 }
 0x22f   : > { %v3450_v16 = vadd.f32 %v6498_v57, %v3312_v50 }
 0x230   : > { %v5064_v21 = vpop.eup %5063  ;;  %v3453_v37 = vadd.f32 %v6498_v57, %v3315_v63 }
 0x231   : > { %v3314_v38 = vmul.f32 %v5064_v21, %v6481_v33  ;;  %3483 = vst.msk [vmem:[%s6506_s16 + $0xe0] sm:$0xff] %vm3454_vm8, %v3450_v16 }
 0x232   : > { %3486 = vst.msk [vmem:[%s6506_s16 + $0xf8] sm:$0xff] %vm3454_vm8, %v3453_v37 }
 0x233   : > { %v3452_v1 = vadd.f32 %v6498_v57, %v3314_v38 }
 0x235   : > { %3485 = vst.msk [vmem:[%s6506_s16 + $0xf0] sm:$0xff] %vm3454_vm8, %v3452_v1 }
 0x236 PF: > { %s16_s21 = sadd.s32 1, %s5071_s21  }
 0x237   : > { %p13_p4 = scmp.ge.s32.totalorder %s16_s21, 4  }
 0x239   :  { %15 = sbr.rel (!%p13_p4) target bundleno = 1 (0x1), region = 82 }

// kernel: down_block_forward.7
= control target key start
LH: loop header
LB: loop body
LE: loop exit
PB: predicated region body
PF: predicated region fallthrough
CT: control target
= control target key end

     0   :  { %s5073_s21 = smov 0   ;;  %s6569_s0 = inlined_call_operand.vmem [shape: f32[2,18,18,8], index: 0, kind: input, shape index: {}]   ;;  %s6570_s1 = inlined_call_operand.vmem [shape: f32[9,8,8], index: 1, kind: input, shape index: {}]   ;;  %s6571_s2 = inlined_call_operand.vmem [shape: f32[1,8], index: 2, kind: input, shape index: {}]   ;;  %s6572_s3 = inlined_call_operand.vmem [shape: f32[2,32], index: 3, kind: input, shape index: {}]   ;;  %s6573_s4 = inlined_call_operand.vmem [shape: f32[32,8], index: 4, kind: input, shape index: {}]   ;;  %s6574_s5 = inlined_call_operand.vmem [shape: f32[1,8], index: 5, kind: input, shape index: {}]   ;;  %s6575_s6 = inlined_call_operand.vmem [shape: f32[2,16,16,8], index: 6, kind: output, shape index: {}]  }
   0x1 LB: > { %s5079_s22 = sadd.s32 4294967295, %s5033_s21   ;;  %p3517_p0 = scmp.ge.s32.totalorder %s5033_s21, 1  ;;  %s5033_s21 = sphi %s5073_s21, %s16_s21  }
   0x2   : > { %p212_p1 = scmp.lt.s32.totalorder %s5033_s21, 3 }
   0x4   : > { %p213_p2 = pnand %p3517_p0, %p212_p1 }
   0x6   : > { %216 = sbr.rel (%p213_p2) target bundleno = 566 (0x236), region = 44 }
   0xd   : > { %v5086_v0 = vld [vmem:[%s6570_s1 + $0x20] sm:$0xff]  ;;  %v3521_v1 = vld [vmem:[%s6570_s1 + $0x8] sm:$0xff]  ;;  %p242_p3 = scmp.lt.s32.totalorder %s5079_s22, 1  ;;  %vm355_vm0 = vcmask 1046528   ;;  %vm438_vm1 = vcmask 64512   ;;  %v5172_v33 = vld [vmem:[%s6570_s1 + $0x30] sm:$0xff] }
   0xe   : > { %v3685_v2 = vld [vmem:[%s6570_s1 + $0x28] sm:$0xff]  ;;  %4358 = vmatprep.subr.mxu0 %v5086_v0  ;;  %4158 = vmatprep.subr.mxu1 %v3521_v1  ;;  %v306_v3 = vld [vmem:[%s6570_s1] sm:$0xff]  ;;  %v5182_v35 = vld [vmem:[%s6570_s1 + $0x10] sm:$0xff]  ;;  %vm1017_vm2 = vcmask 1045504   ;;  %vm5036_vm3 = vmmov 0   ;;  %vm3307_vm4 = vcmask 261120  }
   0xf   : > { %4359 = vmatpush3.msra.mxu0 %v5086_v0  ;;  %4159 = vmatpush3.msra.mxu1 %v3521_v1  ;;  %s5101_s7 = scalar_select %p242_p3, %s5079_s22, 1  ;;  %vm3386_vm6 = vcmask 58368  }
  0x10   : > { %4408 = vmatprep.subr.mxu0 %v3685_v2  ;;  %4208 = vmatprep.subr.mxu1 %v306_v3 }
  0x11   : > { %s4883_s8 = smul.u32 432, %s5101_s7  ;;  %s3855_s14 = sshll.u32 %s5101_s7, 8 }
  0x12   : > { %s6448_s16 = scalar_lea.vmem %s6575_s6, %s3855_s14 }
  0x13   : > { %s5107_s11 = scalar_lea.vmem %s6569_s0, %s4883_s8 }
  0x14   : > { %v5110_v4 = vld [vmem:[%s5107_s11] sm:$0xff]  ;;  %v5113_v5 = vld [vmem:[%s5107_s11 + $0x8] sm:$0xff]  ;;  %v5116_v6 = vld [vmem:[%s5107_s11 + $0x18] sm:$0xff] }
  0x15   : > { %6647 = vst [vmem:[#allocation2_spill] sm:$0xff] %v5116_v6  ;;  %v356_v7 = vrot.slane %v5110_v4, 1  ;;  %v357_v8 = vrot.slane %v5113_v5, 1  ;;  %v5121_v9 = vld [vmem:[%s5107_s11 + $0x20] sm:$0xff]  ;;  %v361_v10 = vrot.slane %v5116_v6, 1  ;;  %v5133_v15 = vld [vmem:[%s5107_s11 + $0x30] sm:$0xff] }
  0x16   : > { %6648 = vst [vmem:[#allocation3_spill] sm:$0xff] %v5121_v9  ;;  %v5125_v11 = vld [vmem:[%s5107_s11 + $0x10] sm:$0x3]  ;;  %v362_v12 = vrot.slane %v5121_v9, 1  ;;  %v5130_v14 = vld [vmem:[%s5107_s11 + $0x28] sm:$0x3] }
  0x17   : > { %v359_v13 = vrot.slane %v5125_v11, 1  ;;  %v358_v16 = vsel %vm355_vm0, %v356_v7, %v357_v8  ;;  %v364_v17 = vrot.slane %v5130_v14, 1  ;;  %v5138_v18 = vld [vmem:[%s5107_s11 + $0x38] sm:$0xff]  ;;  %v366_v19 = vrot.slane %v5133_v15, 1  ;;  %v5142_v20 = vld [vmem:[%s5107_s11 + $0x40] sm:$0x3] }
  0x18   : > { %4160 = vmatprep.mubr.msk.f32.mxu1 %vm438_vm1, %v358_v16  ;;  %v363_v21 = vsel %vm355_vm0, %v361_v10, %v362_v12  ;;  %v367_v23 = vrot.slane %v5138_v18, 1  ;;  %v369_v24 = vrot.slane %v5142_v20, 1  ;;  %v5150_v25 = vld [vmem:[%s5107_s11 + $0x48] sm:$0xff]  ;;  %v5153_v26 = vld [vmem:[%s5107_s11 + $0x50] sm:$0xff]  ;;  %v5156_v27 = vld [vmem:[%s5107_s11 + $0x58] sm:$0x3] }
  0x19   : > { %v360_v22 = vsel %vm355_vm0, %v357_v8, %v359_v13  ;;  %4360 = vmatprep.mubr.msk.f32.mxu0 %vm438_vm1, %v363_v21  ;;  %v365_v28 = vsel %vm355_vm0, %v362_v12, %v364_v17  ;;  %v371_v29 = vrot.slane %v5150_v25, 1  ;;  %v372_v30 = vrot.slane %v5153_v26, 1  ;;  %v5164_v31 = vld [vmem:[%s5107_s11 + $0x60] sm:$0xff]  ;;  %v5167_v32 = vld [vmem:[%s5107_s11 + $0x68] sm:$0xff]  ;;  %v5196_v41 = vld [vmem:[%s5107_s11 + $0x70] sm:$0x3] }
  0x1a   : > { %4161 = vmatmul.mubr.msk.f32.vlgmr.msra.gmra.mrb[0].mxu1 %vm438_vm1, %v360_v22  ;;  %4361 = vmatmul.mubr.msk.f32.vlgmr.msra.gmra.mrb[0].mxu0 %vm438_vm1, %v365_v28  ;;  %v5177_v34 = vsel %vm355_vm0, %v366_v19, %v367_v23  ;;  %v5187_v36 = vsel %vm355_vm0, %v367_v23, %v369_v24  ;;  %v374_v37 = vrot.slane %v5156_v27, 1  ;;  %v376_v39 = vrot.slane %v5164_v31, 1  ;;  %v5201_v42 = vld [vmem:[%s5107_s11 + $0x78] sm:$0xff]  ;;  %v5204_v43 = vld [vmem:[%s5107_s11 + $0x80] sm:$0xff]  ;;  %v5223_v49 = vld [vmem:[%s5107_s11 + $0x88] sm:$0x3] }
  0x1b   : > { %4163 = vmatprep.mubr.msk.f32.mxu1 %vm438_vm1, %v363_v21  ;;  %6649 = vst [vmem:[#allocation4_spill] sm:$0xff] %v5177_v34  ;;  %4409 = vmatpush3.msra.mxu0 %v3685_v2  ;;  %6650 = vst [vmem:[#allocation5_spill] sm:$0xff] %v5187_v36  ;;  %v5191_v38 = vsel %vm355_vm0, %v371_v29, %v372_v30  ;;  %v377_v40 = vrot.slane %v5167_v32, 1  ;;  %v379_v45 = vrot.slane %v5196_v41, 1  ;;  %v381_v47 = vrot.slane %v5201_v42, 1  ;;  %v5228_v50 = vld [vmem:[%s5107_s11 + $0x90] sm:$0xff] }
  0x1c   : > { %4363 = vmatprep.mubr.msk.f32.mxu0 %vm438_vm1, %v5177_v34  ;;  %6651 = vst [vmem:[#allocation6_spill] sm:$0xff] %v5191_v38  ;;  %4209 = vmatpush3.msra.mxu1 %v306_v3  ;;  %v5214_v44 = vsel %vm355_vm0, %v372_v30, %v374_v37  ;;  %v382_v48 = vrot.slane %v5204_v43, 1  ;;  %v5231_v51 = vld [vmem:[%s5107_s11 + $0x98] sm:$0xff]  ;;  %v384_v53 = vrot.slane %v5223_v49, 1  ;;  %v386_v55 = vrot.slane %v5228_v50, 1  ;;  %v5254_v58 = vld [vmem:[%s5107_s11 + $0xa8] sm:$0xff] }
  0x1d   : > { %4458 = vmatprep.subr.mxu0 %v5172_v33  ;;  %4258 = vmatprep.subr.mxu1 %v5182_v35  ;;  %6652 = vst [vmem:[#allocation7_spill] sm:$0xff] %v5214_v44  ;;  %v5218_v46 = vsel %vm355_vm0, %v376_v39, %v377_v40  ;;  %v5240_v52 = vsel %vm355_vm0, %v377_v40, %v379_v45  ;;  %v387_v56 = vrot.slane %v5231_v51, 1  ;;  %v5249_v57 = vld [vmem:[%s5107_s11 + $0xa0] sm:$0x3]  ;;  %v5257_v59 = vld [vmem:[%s5107_s11 + $0xb0] sm:$0xff]  ;;  %v391_v63 = vrot.slane %v5254_v58, 1 }
  0x1e   : > { %4164 = vmatmul.mubr.msk.f32.gmra.mrb[2].mxu1 %vm438_vm1, %v365_v28  ;;  %4364 = vmatmul.mubr.msk.f32.gmra.mrb[2].mxu0 %vm438_vm1, %v5187_v36  ;;  %6653 = vst [vmem:[#allocation8_spill] sm:$0xff] %v5218_v46  ;;  %6654 = vst [vmem:[#allocation9_spill] sm:$0xff] %v5240_v52  ;;  %v5244_v54 = vsel %vm355_vm0, %v381_v47, %v382_v48  ;;  %v5266_v60 = vsel %vm355_vm0, %v382_v48, %v384_v53  ;;  %v389_v61 = vrot.slane %v5249_v57, 1  ;;  %v5275_v2 = vld [vmem:[%s5107_s11 + $0xb8] sm:$0x3]  ;;  %v5280_v3 = vld [vmem:[%s5107_s11 + $0xc0] sm:$0xff] }
  0x1f   : > { %4166 = vmatprep.mubr.msk.f32.mxu1 %vm438_vm1, %v5177_v34  ;;  %4366 = vmatprep.mubr.msk.f32.mxu0 %vm438_vm1, %v5191_v38  ;;  %6655 = vst [vmem:[#allocation10_spill] sm:$0xff] %v5244_v54  ;;  %6656 = vst [vmem:[#allocation11_spill] sm:$0xff] %v5266_v60  ;;  %v5270_v62 = vsel %vm355_vm0, %v386_v55, %v387_v56  ;;  %v392_v1 = vrot.slane %v5257_v59, 1  ;;  %v5283_v7 = vld [vmem:[%s5107_s11 + $0xc8] sm:$0xff]  ;;  %v394_v10 = vrot.slane %v5275_v2, 1  ;;  %v396_v13 = vrot.slane %v5280_v3, 1 }
  0x20   : > { %6657 = vst [vmem:[#allocation12_spill] sm:$0xff] %v5270_v62  ;;  %v5292_v8 = vsel %vm355_vm0, %v387_v56, %v389_v61  ;;  %v397_v16 = vrot.slane %v5283_v7, 1  ;;  %v5301_v17 = vld [vmem:[%s5107_s11 + $0xd0] sm:$0x3]  ;;  %v5306_v19 = vld [vmem:[%s5107_s11 + $0xd8] sm:$0xff]  ;;  %v5309_v21 = vld [vmem:[%s5107_s11 + $0xe0] sm:$0xff] }
  0x21   : > { %6658 = vst [vmem:[#allocation13_spill] sm:$0xff] %v5292_v8  ;;  %v5296_v12 = vsel %vm355_vm0, %v391_v63, %v392_v1  ;;  %v5318_v22 = vsel %vm355_vm0, %v392_v1, %v394_v10  ;;  %v399_v23 = vrot.slane %v5301_v17, 1  ;;  %v401_v28 = vrot.slane %v5306_v19, 1  ;;  %v5327_v30 = vld [vmem:[%s5107_s11 + $0xe8] sm:$0x3]  ;;  %v5347_v48 = vld [vmem:[%s5107_s11 + $0xf0] sm:$0xff] }
  0x22   : > { %4167 = vmatmul.mubr.msk.f32.gmra.mrb[4].mxu1 %vm438_vm1, %v5187_v36  ;;  %4367 = vmatmul.mubr.msk.f32.gmra.mrb[4].mxu0 %vm438_vm1, %v5214_v44  ;;  %6659 = vst [vmem:[#allocation14_spill] sm:$0xff] %v5296_v12  ;;  %6660 = vst [vmem:[#allocation15_spill] sm:$0xff] %v5318_v22  ;;  %v5322_v24 = vsel %vm355_vm0, %v396_v13, %v397_v16  ;;  %v402_v29 = vrot.slane %v5309_v21, 1  ;;  %v404_v39 = vrot.slane %v5327_v30, 1  ;;  %v1023_v45 = vrot.slane %v5116_v6, 2  ;;  %v5350_v53 = vld [vmem:[%s5107_s11 + $0xf8] sm:$0xff] }
  0x23   : > { %4169 = vmatprep.mubr.msk.f32.mxu1 %vm438_vm1, %v5191_v38  ;;  %4369 = vmatprep.mubr.msk.f32.mxu0 %vm438_vm1, %v5218_v46  ;;  %6661 = vst [vmem:[#allocation16_spill] sm:$0xff] %v5322_v24  ;;  %v5338_v37 = vsel %vm355_vm0, %v397_v16, %v399_v23  ;;  %v1024_v47 = vrot.slane %v5121_v9, 2  ;;  %v1026_v55 = vrot.slane %v5130_v14, 2  ;;  %v406_v61 = vrot.slane %v5347_v48, 1  ;;  %v5367_v1 = vld [vmem:[%s5107_s11 + $0x100] sm:$0x3] }
  0x24   : > { %6662 = vst [vmem:[#allocation17_spill] sm:$0xff] %v5338_v37  ;;  %v5342_v40 = vsel %vm355_vm0, %v401_v28, %v402_v29  ;;  %v5362_v56 = vsel %vm355_vm0, %v402_v29, %v404_v39  ;;  %v407_v63 = vrot.slane %v5350_v53, 1  ;;  %v1028_v10 = vrot.slane %v5133_v15, 2  ;;  %v5375_v16 = vld [vmem:[%s5107_s11 + $0x108] sm:$0xff]  ;;  %v5378_v23 = vld [vmem:[%s5107_s11 + $0x110] sm:$0xff] }
  0x25   : > { %6663 = vst [vmem:[#allocation18_spill] sm:$0xff] %v5342_v40  ;;  %6664 = vst [vmem:[#allocation19_spill] sm:$0xff] %v5362_v56  ;;  %v5370_v14 = vsel %vm1017_vm2, %v1023_v45, %v1024_v47  ;;  %v1029_v13 = vrot.slane %v5138_v18, 2  ;;  %v5387_v28 = vsel %vm1017_vm2, %v1024_v47, %v1026_v55  ;;  %v409_v29 = vrot.slane %v5367_v1, 1  ;;  %v5476_v38 = vld [vmem:[%s5107_s11 + $0x148] sm:$0x3] }
  0x26   : > { %4170 = vmatmul.mubr.msk.f32.gmra.mrb[6].mxu1 %vm438_vm1, %v5214_v44  ;;  %4370 = vmatmul.mubr.msk.f32.gmra.mrb[6].mxu0 %vm438_vm1, %v5240_v52  ;;  %v5393_v39 = vsel %vm355_vm0, %v406_v61, %v407_v63  ;;  %v1031_v45 = vrot.slane %v5142_v20, 2  ;;  %v1033_v47 = vrot.slane %v5150_v25, 2  ;;  %v1034_v55 = vrot.slane %v5153_v26, 2  ;;  %v5410_v61 = vld [vmem:[%s5107_s11 + $0x128] sm:$0xff]  ;;  %v5417_v20 = vld [vmem:[%s6570_s1 + $0x38] sm:$0xff] }
  0x27   : > { %4172 = vmatprep.mubr.msk.f32.mxu1 %vm438_vm1, %v5218_v46  ;;  %4372 = vmatprep.mubr.msk.f32.mxu0 %vm438_vm1, %v5244_v54  ;;  %6665 = vst [vmem:[#allocation20_spill] sm:$0xff] %v5393_v39  ;;  %v1041_v46 = vrot.slane %v5196_v41, 2  ;;  %v1046_v36 = vrot.slane %v5223_v49, 2  ;;  %v1048_v49 = vrot.slane %v5228_v50, 2 }
  0x2a   : > { %4173 = vmatmul.mubr.msk.f32.gmra.mrb[8].mxu1 %vm438_vm1, %v5240_v52  ;;  %4373 = vmatmul.mubr.msk.f32.gmra.mrb[8].mxu0 %vm438_vm1, %v5266_v60  ;;  %v5448_v52 = vld [vmem:[%s5107_s11 + $0x138] sm:$0xff] }
  0x2b   : > { %4175 = vmatprep.mubr.msk.f32.mxu1 %vm438_vm1, %v5244_v54  ;;  %4375 = vmatprep.mubr.msk.f32.mxu0 %vm438_vm1, %v5270_v62  ;;  %v5443_v54 = vsel %vm1017_vm2, %v1033_v47, %v1034_v55  ;;  %v421_v44 = vrot.slane %v5448_v52, 1 }
  0x2c   : > { %6670 = vst [vmem:[#allocation25_spill] sm:$0xff] %v5443_v54 }
  0x2e   : > { %4176 = vmatmul.mubr.msk.f32.gmra.mrb[10].mxu1 %vm438_vm1, %v5266_v60  ;;  %4376 = vmatmul.mubr.msk.f32.gmra.mrb[10].mxu0 %vm438_vm1, %v5292_v8 }
  0x2f   : > { %4178 = vmatprep.mubr.msk.f32.mxu1 %vm438_vm1, %v5270_v62  ;;  %4378 = vmatprep.mubr.msk.f32.mxu0 %vm438_vm1, %v5296_v12  ;;  %v5432_v62 = vsel %vm1017_vm2, %v1029_v13, %v1031_v45 }
  0x30   : > { %6668 = vst [vmem:[#allocation23_spill] sm:$0xff] %v5432_v62 }
  0x32   : > { %4179 = vmatmul.mubr.msk.f32.gmra.mrb[12].mxu1 %vm438_vm1, %v5292_v8  ;;  %4379 = vmatmul.mubr.msk.f32.gmra.mrb[12].mxu0 %vm438_vm1, %v5318_v22 }
  0x33   : > { %4181 = vmatprep.mubr.msk.f32.mxu1 %vm438_vm1, %v5296_v12  ;;  %4381 = vmatprep.mubr.msk.f32.mxu0 %vm438_vm1, %v5322_v24  ;;  %v5407_v12 = vld [vmem:[%s5107_s11 + $0x120] sm:$0xff] }
  0x36   : > { %4182 = vmatmul.mubr.msk.f32.gmra.mrb[14].mxu1 %vm438_vm1, %v5318_v22  ;;  %4382 = vmatmul.mubr.msk.f32.gmra.mrb[14].mxu0 %vm438_vm1, %v5338_v37  ;;  %v5399_v22 = vld [vmem:[%s5107_s11 + $0x118] sm:$0x3] }
  0x37   : > { %4184 = vmatprep.mubr.msk.f32.mxu1 %vm438_vm1, %v5322_v24  ;;  %4384 = vmatprep.mubr.msk.f32.mxu0 %vm438_vm1, %v5342_v40  ;;  %v412_v24 = vrot.slane %v5378_v23, 1  ;;  %v414_v8 = vrot.slane %v5399_v22, 1 }
  0x3a   : > { %4185 = vmatmul.mubr.msk.f32.gmra.mrb[16].mxu1 %vm438_vm1, %v5338_v37  ;;  %4385 = vmatmul.mubr.msk.f32.gmra.mrb[16].mxu0 %vm438_vm1, %v5362_v56  ;;  %v411_v37 = vrot.slane %v5375_v16, 1 }
  0x3b   : > { %4187 = vmatprep.mubr.msk.f32.mxu1 %vm438_vm1, %v5342_v40  ;;  %4410 = vmatprep.mubr.msk.f32.mxu0 %vm438_vm1, %v5370_v14  ;;  %v5402_v40 = vsel %vm1017_vm2, %v1028_v10, %v1029_v13  ;;  %v5424_v10 = vsel %vm355_vm0, %v407_v63, %v409_v29  ;;  %v417_v63 = vrot.slane %v5410_v61, 1  ;;  %v5440_v29 = vld [vmem:[%s5107_s11 + $0x130] sm:$0x3]  ;;  %v5451_v13 = vld [vmem:[%s5107_s11 + $0x140] sm:$0xff] }
  0x3c   : > { %6666 = vst [vmem:[#allocation21_spill] sm:$0xff] %v5402_v40  ;;  %6667 = vst [vmem:[#allocation22_spill] sm:$0xff] %v5424_v10  ;;  %v5435_v60 = vsel %vm355_vm0, %v411_v37, %v412_v24  ;;  %v5461_v37 = vsel %vm355_vm0, %v412_v24, %v414_v8  ;;  %v419_v47 = vrot.slane %v5440_v29, 1  ;;  %v1043_v24 = vrot.slane %v5201_v42, 2 }
  0x3d   : > { %6669 = vst [vmem:[#allocation24_spill] sm:$0xff] %v5435_v60  ;;  %6671 = vst [vmem:[#allocation26_spill] sm:$0xff] %v5461_v37 }
  0x3e   : > { %4188 = vmatmul.mubr.msk.f32.gmra.mrb[18].mxu1 %vm438_vm1, %v5362_v56  ;;  %4411 = vmatmul.mubr.msk.f32.vlgmr.msra.gmra.mrb[0].mxu0 %vm438_vm1, %v5387_v28  ;;  %v1036_v56 = vrot.slane %v5156_v27, 2  ;;  %v1038_v27 = vrot.slane %v5164_v31, 2  ;;  %v5496_v41 = vsel %vm355_vm0, %v417_v63, %v419_v47  ;;  %v1049_v47 = vrot.slane %v5231_v51, 2 }
  0x3f   : > { %4190 = vmatprep.mubr.msk.f32.mxu1 %vm438_vm1, %v5393_v39  ;;  %4459 = vmatpush3.msra.mxu0 %v5172_v33  ;;  %v416_v39 = vrot.slane %v5407_v12, 1  ;;  %v1039_v33 = vrot.slane %v5167_v32, 2  ;;  %6675 = vst [vmem:[#allocation30_spill] sm:$0xff] %v5496_v41 }
  0x40   : > { %4413 = vmatprep.mubr.msk.f32.mxu0 %vm438_vm1, %v5402_v40  ;;  %4508 = vmatprep.subr.mxu0 %v5417_v20  ;;  %v5464_v45 = vsel %vm1017_vm2, %v1034_v55, %v1036_v56  ;;  %v1044_v56 = vrot.slane %v5204_v43, 2  ;;  %v5484_v55 = vld [vmem:[%s5107_s11 + $0x150] sm:$0xff]  ;;  %v5546_v40 = vld [vmem:[%s5107_s11 + $0x178] sm:$0x3] }
  0x41   : > { %6672 = vst [vmem:[#allocation27_spill] sm:$0xff] %v5464_v45  ;;  %v5479_v8 = vsel %vm1017_vm2, %v1038_v27, %v1039_v33  ;;  %v424_v27 = vrot.slane %v5476_v38, 1  ;;  %v5503_v34 = vsel %vm1017_vm2, %v1039_v33, %v1041_v46  ;;  %v5522_v46 = vld [vmem:[%s5107_s11 + $0x170] sm:$0xff] }
  0x42   : > { %4191 = vmatmul.mubr.msk.f32.gmra.mrb[20].mxu1 %vm438_vm1, %v5424_v10  ;;  %4414 = vmatmul.mubr.msk.f32.gmra.mrb[2].mxu0 %vm438_vm1, %v5432_v62  ;;  %v5470_v10 = vsel %vm355_vm0, %v416_v39, %v417_v63  ;;  %6674 = vst [vmem:[#allocation29_spill] sm:$0xff] %v5479_v8  ;;  %v5487_v39 = vld [vmem:[%s5107_s11 + $0x158] sm:$0xff]  ;;  %6676 = vst [vmem:[#allocation31_spill] sm:$0xff] %v5503_v34  ;;  %v5514_v63 = vsel %vm1017_vm2, %v1043_v24, %v1044_v56 }
  0x43   : > { %4193 = vmatprep.mubr.msk.f32.mxu1 %vm438_vm1, %v5435_v60  ;;  %4416 = vmatprep.mubr.msk.f32.mxu0 %vm438_vm1, %v5443_v54  ;;  %6673 = vst [vmem:[#allocation28_spill] sm:$0xff] %v5470_v10  ;;  %v422_v60 = vrot.slane %v5451_v13, 1  ;;  %v5511_v54 = vld [vmem:[%s5107_s11 + $0x160] sm:$0x3]  ;;  %v5534_v33 = vsel %vm1017_vm2, %v1044_v56, %v1046_v36  ;;  %v1053_v36 = vrot.slane %v5254_v58, 2  ;;  %v1054_v56 = vrot.slane %v5257_v59, 2 }
  0x44   : > { %6679 = vst [vmem:[#allocation34_spill] sm:$0xff] %v5534_v33  ;;  %v429_v24 = vrot.slane %v5511_v54, 1 }
  0x46   : > { %4194 = vmatmul.mubr.msk.f32.gmra.mrb[22].mxu1 %vm438_vm1, %v5461_v37  ;;  %4417 = vmatmul.mubr.msk.f32.gmra.mrb[4].mxu0 %vm438_vm1, %v5464_v45  ;;  %v5506_v37 = vsel %vm355_vm0, %v421_v44, %v422_v60  ;;  %v426_v45 = vrot.slane %v5484_v55, 1  ;;  %v5531_v44 = vsel %vm355_vm0, %v422_v60, %v424_v27  ;;  %v5549_v60 = vsel %vm1017_vm2, %v1048_v49, %v1049_v47 }
  0x47   : > { %4196 = vmatprep.mubr.msk.f32.mxu1 %vm438_vm1, %v5470_v10  ;;  %4419 = vmatprep.mubr.msk.f32.mxu0 %vm438_vm1, %v5479_v8  ;;  %6677 = vst [vmem:[#allocation32_spill] sm:$0xff] %v5506_v37  ;;  %v427_v10 = vrot.slane %v5487_v39, 1  ;;  %v5519_v8 = vld [vmem:[%s5107_s11 + $0x168] sm:$0xff]  ;;  %6678 = vst [vmem:[#allocation33_spill] sm:$0xff] %v5531_v44 }
  0x49   : > { %v5540_v62 = vsel %vm355_vm0, %v426_v45, %v427_v10  ;;  %v434_v45 = vrot.slane %v5546_v40, 1 }
  0x4a   : > { %4197 = vmatmul.mubr.msk.f32.gmra.mrb[24].mxu1 %vm438_vm1, %v5496_v41  ;;  %4420 = vmatmul.mubr.msk.f32.gmra.mrb[6].mxu0 %vm438_vm1, %v5503_v34  ;;  %6680 = vst [vmem:[#allocation35_spill] sm:$0xff] %v5540_v62  ;;  %v1051_v41 = vrot.slane %v5249_v57, 2  ;;  %v431_v34 = vrot.slane %v5519_v8, 1  ;;  %v5560_v57 = vsel %vm355_vm0, %v427_v10, %v429_v24  ;;  %v1059_v10 = vrot.slane %v5283_v7, 2 }
  0x4b   : > { %4199 = vmatprep.mubr.msk.f32.mxu1 %vm438_vm1, %v5506_v37  ;;  %4422 = vmatprep.mubr.msk.f32.mxu0 %vm438_vm1, %v5514_v63  ;;  %v432_v37 = vrot.slane %v5522_v46, 1  ;;  %6681 = vst [vmem:[#allocation36_spill] sm:$0xff] %v5560_v57  ;;  %v1063_v24 = vrot.slane %v5306_v19, 2 }
  0x4c   : > { %v5566_v27 = vsel %vm1017_vm2, %v1049_v47, %v1051_v41  ;;  %v1061_v41 = vrot.slane %v5301_v17, 2 }
  0x4d   : > { %v5569_v49 = vsel %vm355_vm0, %v431_v34, %v432_v37  ;;  %v5584_v34 = vsel %vm355_vm0, %v432_v37, %v434_v45  ;;  %v5619_v45 = vld [vmem:[%s6570_s1 + $0x18] sm:$0xff] }
  0x4e   : > { %4200 = vmatmul.mubr.msk.f32.gmra.mrb[26].mxu1 %vm438_vm1, %v5531_v44  ;;  %4423 = vmatmul.mubr.msk.f32.gmra.mrb[8].mxu0 %vm438_vm1, %v5534_v33  ;;  %6682 = vst [vmem:[#allocation37_spill] sm:$0xff] %v5569_v49  ;;  %v1056_v44 = vrot.slane %v5275_v2, 2  ;;  %v5573_v33 = vsel %vm1017_vm2, %v1053_v36, %v1054_v56  ;;  %6683 = vst [vmem:[#allocation38_spill] sm:$0xff] %v5584_v34  ;;  %v1064_v36 = vrot.slane %v5309_v21, 2 }
  0x4f   : > { %4202 = vmatprep.mubr.msk.f32.mxu1 %vm438_vm1, %v5540_v62  ;;  %4425 = vmatprep.mubr.msk.f32.mxu0 %vm438_vm1, %v5549_v60  ;;  %v1058_v62 = vrot.slane %v5280_v3, 2  ;;  %v5606_v17 = vsel %vm1017_vm2, %v1059_v10, %v1061_v41 }
  0x50   : > { %v5589_v2 = vsel %vm1017_vm2, %v1054_v56, %v1056_v44  ;;  %v5610_v37 = vsel %vm1017_vm2, %v1063_v24, %v1064_v36  ;;  %v1068_v44 = vrot.slane %v5347_v48, 2  ;;  %v1069_v56 = vrot.slane %v5350_v53, 2 }
  0x51   : > { %v5593_v47 = vsel %vm1017_vm2, %v1058_v62, %v1059_v10  ;;  %v1066_v62 = vrot.slane %v5327_v30, 2  ;;  %v1071_v10 = vrot.slane %v5367_v1, 2  ;;  %v1073_v24 = vrot.slane %v5375_v16, 2 }
  0x52   : > { %4203 = vmatmul.mubr.msk.f32.gmra.mrb[28].mxu1 %vm438_vm1, %v5560_v57  ;;  %4426 = vmatmul.mubr.msk.f32.gmra.mrb[10].mxu0 %vm438_vm1, %v5566_v27  ;;  %v5633_v41 = vsel %vm1017_vm2, %v1068_v44, %v1069_v56  ;;  %v1076_v1 = vrot.slane %v5399_v22, 2  ;;  %v1079_v44 = vrot.slane %v5410_v61, 2  ;;  %v1089_v57 = vrot.slane %v5487_v39, 2 }
  0x53   : > { %4205 = vmatprep.mubr.msk.f32.mxu1 %vm438_vm1, %v5569_v49  ;;  %4428 = vmatprep.mubr.msk.f32.mxu0 %vm438_vm1, %v5573_v33  ;;  %v5628_v30 = vsel %vm1017_vm2, %v1064_v36, %v1066_v62  ;;  %v1078_v62 = vrot.slane %v5407_v12, 2  ;;  %v1084_v49 = vrot.slane %v5451_v13, 2 }
  0x56   : > { %4206 = vmatmul.mubr.msk.f32.gmra.mrb[30].mxu1 %vm438_vm1, %v5584_v34  ;;  %4429 = vmatmul.mubr.msk.f32.gmra.mrb[12].mxu0 %vm438_vm1, %v5589_v2  ;;  %v1074_v34 = vrot.slane %v5378_v23, 2 }
  0x57   : > { %4210 = vmatprep.mubr.msk.f32.mxu1 %vm438_vm1, %v5110_v4  ;;  %4431 = vmatprep.mubr.msk.f32.mxu0 %vm438_vm1, %v5593_v47 }
  0x58   : > { %v5651_v36 = vsel %vm1017_vm2, %v1073_v24, %v1074_v34  ;;  %v5664_v22 = vsel %vm1017_vm2, %v1074_v34, %v1076_v1  ;;  %v1083_v24 = vrot.slane %v5448_v52, 2  ;;  %v1086_v34 = vrot.slane %v5476_v38, 2 }
  0x59   : > { %6685 = vst [vmem:[#allocation40_spill] sm:$0xff] %v5651_v36 }
  0x5a   : > { %4211 = vmatmul.mubr.msk.f32.vlgmr.msra.gmra.mrb[0].mxu1 %vm438_vm1, %v5113_v5  ;;  %4432 = vmatmul.mubr.msk.f32.gmra.mrb[14].mxu0 %vm438_vm1, %v5606_v17  ;;  %v5685_v1 = vsel %vm1017_vm2, %v1083_v24, %v1084_v49  ;;  %v5698_v38 = vsel %vm1017_vm2, %v1084_v49, %v1086_v34  ;;  %v1093_v24 = vrot.slane %v5519_v8, 2  ;;  %v1096_v49 = vrot.slane %v5546_v40, 2 }
  0x5b   : > { %4213 = vmatprep.mubr.msk.f32.mxu1 %vm438_vm1, %v5116_v6  ;;  %4434 = vmatprep.mubr.msk.f32.mxu0 %vm438_vm1, %v5610_v37  ;;  %6688 = vst [vmem:[#allocation43_spill] sm:$0xff] %v5685_v1  ;;  %v5709_v6 = vld [vmem:[%s5107_s11 + $0x180] sm:$0xff] }
  0x5c   : > { %4259 = vmatpush3.msra.mxu1 %v5182_v35  ;;  %v5647_v35 = vsel %vm1017_vm2, %v1069_v56, %v1071_v10  ;;  %v1081_v56 = vrot.slane %v5440_v29, 2  ;;  %v5668_v10 = vsel %vm1017_vm2, %v1078_v62, %v1079_v44  ;;  %v1088_v62 = vrot.slane %v5484_v55, 2 }
  0x5d   : > { %4308 = vmatprep.subr.mxu1 %v5619_v45  ;;  %6684 = vst [vmem:[#allocation39_spill] sm:$0xff] %v5647_v35  ;;  %6686 = vst [vmem:[#allocation41_spill] sm:$0xff] %v5668_v10 }
  0x5e   : > { %4214 = vmatmul.mubr.msk.f32.gmra.mrb[2].mxu1 %vm438_vm1, %v5121_v9  ;;  %4435 = vmatmul.mubr.msk.f32.gmra.mrb[16].mxu0 %vm438_vm1, %v5628_v30  ;;  %v5681_v29 = vsel %vm1017_vm2, %v1079_v44, %v1081_v56  ;;  %v1091_v44 = vrot.slane %v5511_v54, 2  ;;  %v5702_v56 = vsel %vm1017_vm2, %v1088_v62, %v1089_v57  ;;  %v1094_v9 = vrot.slane %v5522_v46, 2 }
  0x5f   : > { %4216 = vmatprep.mubr.msk.f32.mxu1 %vm438_vm1, %v5133_v15  ;;  %4437 = vmatprep.mubr.msk.f32.mxu0 %vm438_vm1, %v5633_v41  ;;  %6687 = vst [vmem:[#allocation42_spill] sm:$0xff] %v5681_v29  ;;  %6689 = vst [vmem:[#allocation44_spill] sm:$0xff] %v5702_v56  ;;  %v1955_v62 = vrot.slane %v5709_v6, 2 }
  0x60   : > { %v5721_v54 = vsel %vm1017_vm2, %v1089_v57, %v1091_v44  ;;  %v5725_v34 = vsel %vm1017_vm2, %v1093_v24, %v1094_v9  ;;  %v5741_v40 = vsel %vm1017_vm2, %v1094_v9, %v1096_v49  ;;  %v1019_v24 = vrot.slane %v5113_v5, 2  ;;  %v6695_v5 = vld [vmem:[#allocation21_spill] sm:$0xff] }
  0x61   : > { %6690 = vst [vmem:[#allocation45_spill] sm:$0xff] %v5721_v54  ;;  %6691 = vst [vmem:[#allocation46_spill] sm:$0xff] %v5725_v34  ;;  %v1021_v49 = vrot.slane %v5125_v11, 2  ;;  %v6696_v11 = vld [vmem:[#allocation23_spill] sm:$0xff] }
  0x62   : > { %4217 = vmatmul.mubr.msk.f32.gmra.mrb[4].mxu1 %vm438_vm1, %v5138_v18  ;;  %4438 = vmatmul.mubr.msk.f32.gmra.mrb[18].mxu0 %vm438_vm1, %v5647_v35  ;;  %6692 = vst [vmem:[#allocation47_spill] sm:$0xff] %v5741_v40 }
  0x63   : > { %4219 = vmatprep.mubr.msk.f32.mxu1 %vm438_vm1, %v5150_v25  ;;  %4440 = vmatprep.mubr.msk.f32.mxu0 %vm438_vm1, %v5651_v36 }
  0x66   : > { %4220 = vmatmul.mubr.msk.f32.gmra.mrb[6].mxu1 %vm438_vm1, %v5153_v26  ;;  %4441 = vmatmul.mubr.msk.f32.gmra.mrb[20].mxu0 %vm438_vm1, %v5664_v22 }
  0x67   : > { %4222 = vmatprep.mubr.msk.f32.mxu1 %vm438_vm1, %v5164_v31  ;;  %4443 = vmatprep.mubr.msk.f32.mxu0 %vm438_vm1, %v5668_v10  ;;  %v5730_v10 = vld [vmem:[%s5107_s11 + $0x190] sm:$0x3] }
  0x68   : > { %v1958_v57 = vrot.slane %v5730_v10, 2 }
  0x6a   : > { %4223 = vmatmul.mubr.msk.f32.gmra.mrb[8].mxu1 %vm438_vm1, %v5167_v32  ;;  %4444 = vmatmul.mubr.msk.f32.gmra.mrb[22].mxu0 %vm438_vm1, %v5681_v29  ;;  %v5712_v29 = vld [vmem:[%s5107_s11 + $0x188] sm:$0xff] }
  0x6b   : > { %4225 = vmatprep.mubr.msk.f32.mxu1 %vm438_vm1, %v5201_v42  ;;  %4446 = vmatprep.mubr.msk.f32.mxu0 %vm438_vm1, %v5685_v1  ;;  %v1956_v1 = vrot.slane %v5712_v29, 2 }
  0x6d   : > { %v5745_v44 = vsel %vm1017_vm2, %v1955_v62, %v1956_v1  ;;  %v5756_v9 = vsel %vm1017_vm2, %v1956_v1, %v1958_v57  ;;  %v5771_v1 = vld [vmem:[%s6570_s1 + $0x40] sm:$0xff]  ;;  %v6700_v57 = vld [vmem:[#allocation31_spill] sm:$0xff] }
  0x6e   : > { %4226 = vmatmul.mubr.msk.f32.gmra.mrb[10].mxu1 %vm438_vm1, %v5204_v43  ;;  %4447 = vmatmul.mubr.msk.f32.gmra.mrb[24].mxu0 %vm438_vm1, %v5698_v38  ;;  %6693 = vst [vmem:[#allocation48_spill] sm:$0xff] %v5745_v44  ;;  %6694 = vst [vmem:[#allocation49_spill] sm:$0xff] %v5756_v9 }
  0x6f   : > { %4228 = vmatprep.mubr.msk.f32.mxu1 %vm438_vm1, %v5228_v50  ;;  %4449 = vmatprep.mubr.msk.f32.mxu0 %vm438_vm1, %v5702_v56 }
  0x72   : > { %4229 = vmatmul.mubr.msk.f32.gmra.mrb[12].mxu1 %vm438_vm1, %v5231_v51  ;;  %4450 = vmatmul.mubr.msk.f32.gmra.mrb[26].mxu0 %vm438_vm1, %v5721_v54 }
  0x73   : > { %4231 = vmatprep.mubr.msk.f32.mxu1 %vm438_vm1, %v5254_v58  ;;  %4452 = vmatprep.mubr.msk.f32.mxu0 %vm438_vm1, %v5725_v34 }
  0x76   : > { %4232 = vmatmul.mubr.msk.f32.gmra.mrb[14].mxu1 %vm438_vm1, %v5257_v59  ;;  %4453 = vmatmul.mubr.msk.f32.gmra.mrb[28].mxu0 %vm438_vm1, %v5741_v40 }
  0x77   : > { %4234 = vmatprep.mubr.msk.f32.mxu1 %vm438_vm1, %v5280_v3  ;;  %4455 = vmatprep.mubr.msk.f32.mxu0 %vm438_vm1, %v5745_v44  ;;  %v6705_v44 = vld [vmem:[#allocation7_spill] sm:$0xff] }
  0x7a   : > { %4235 = vmatmul.mubr.msk.f32.gmra.mrb[16].mxu1 %vm438_vm1, %v5283_v7  ;;  %4456 = vmatmul.mubr.msk.f32.gmra.mrb[30].mxu0 %vm438_vm1, %v5756_v9  ;;  %v6704_v9 = vld [vmem:[#allocation6_spill] sm:$0xff] }
  0x7b   : > { %4237 = vmatprep.mubr.msk.f32.mxu1 %vm438_vm1, %v5306_v19  ;;  %4460 = vmatprep.mubr.msk.f32.mxu0 %vm438_vm1, %v5133_v15 }
  0x7e   : > { %4238 = vmatmul.mubr.msk.f32.gmra.mrb[18].mxu1 %vm438_vm1, %v5309_v21  ;;  %4461 = vmatmul.mubr.msk.f32.vlgmr.msra.gmra.mrb[0].mxu0 %vm438_vm1, %v5138_v18 }
  0x7f   : > { %4240 = vmatprep.mubr.msk.f32.mxu1 %vm438_vm1, %v5347_v48  ;;  %4509 = vmatpush3.msra.mxu0 %v5417_v20  ;;  %v1018_v20 = vrot.slane %v5110_v4, 2  ;;  %v1022_v4 = vsel %vm1017_vm2, %v1019_v24, %v1021_v49  ;;  %v5902_v49 = vld [vmem:[%s5107_s11 + $0x1a0] sm:$0xff] }
  0x80   : > { %4463 = vmatprep.mubr.msk.f32.mxu0 %vm438_vm1, %v5150_v25  ;;  %4558 = vmatprep.subr.mxu0 %v5771_v1 }
  0x81   : > { %v1020_v62 = vsel %vm1017_vm2, %v1018_v20, %v1019_v24  ;;  %v6701_v20 = vld [vmem:[#allocation34_spill] sm:$0xff]  ;;  %v5891_v24 = vld [vmem:[%s5107_s11 + $0x198] sm:$0xff] }
  0x82   : > { %4241 = vmatmul.mubr.msk.f32.gmra.mrb[20].mxu1 %vm438_vm1, %v5350_v53  ;;  %4464 = vmatmul.mubr.msk.f32.gmra.mrb[2].mxu0 %vm438_vm1, %v5153_v26 }
  0x83   : > { %4243 = vmatprep.mubr.msk.f32.mxu1 %vm438_vm1, %v5375_v16  ;;  %4466 = vmatprep.mubr.msk.f32.mxu0 %vm438_vm1, %v5164_v31 }
  0x86   : > { %4244 = vmatmul.mubr.msk.f32.gmra.mrb[22].mxu1 %vm438_vm1, %v5378_v23  ;;  %4467 = vmatmul.mubr.msk.f32.gmra.mrb[4].mxu0 %vm438_vm1, %v5167_v32 }
  0x87   : > { %4246 = vmatprep.mubr.msk.f32.mxu1 %vm438_vm1, %v5407_v12  ;;  %4469 = vmatprep.mubr.msk.f32.mxu0 %vm438_vm1, %v5201_v42 }
  0x8a   : > { %4247 = vmatmul.mubr.msk.f32.gmra.mrb[24].mxu1 %vm438_vm1, %v5410_v61  ;;  %4470 = vmatmul.mubr.msk.f32.gmra.mrb[6].mxu0 %vm438_vm1, %v5204_v43 }
  0x8b   : > { %4249 = vmatprep.mubr.msk.f32.mxu1 %vm438_vm1, %v5448_v52  ;;  %4472 = vmatprep.mubr.msk.f32.mxu0 %vm438_vm1, %v5228_v50 }
  0x8e   : > { %4250 = vmatmul.mubr.msk.f32.gmra.mrb[26].mxu1 %vm438_vm1, %v5451_v13  ;;  %4473 = vmatmul.mubr.msk.f32.gmra.mrb[8].mxu0 %vm438_vm1, %v5231_v51 }
  0x8f   : > { %4252 = vmatprep.mubr.msk.f32.mxu1 %vm438_vm1, %v5484_v55  ;;  %4475 = vmatprep.mubr.msk.f32.mxu0 %vm438_vm1, %v5254_v58 }
  0x92   : > { %4253 = vmatmul.mubr.msk.f32.gmra.mrb[28].mxu1 %vm438_vm1, %v5487_v39  ;;  %4476 = vmatmul.mubr.msk.f32.gmra.mrb[10].mxu0 %vm438_vm1, %v5257_v59 }
  0x93   : > { %4255 = vmatprep.mubr.msk.f32.mxu1 %vm438_vm1, %v5519_v8  ;;  %4478 = vmatprep.mubr.msk.f32.mxu0 %vm438_vm1, %v5280_v3 }
  0x96   : > { %4256 = vmatmul.mubr.msk.f32.gmra.mrb[30].mxu1 %vm438_vm1, %v5522_v46  ;;  %4479 = vmatmul.mubr.msk.f32.gmra.mrb[12].mxu0 %vm438_vm1, %v5283_v7 }
  0x97   : > { %4260 = vmatprep.mubr.msk.f32.mxu1 %vm438_vm1, %v1020_v62  ;;  %4481 = vmatprep.mubr.msk.f32.mxu0 %vm438_vm1, %v5306_v19  ;;  %v6702_v62 = vld [vmem:[#allocation4_spill] sm:$0xff] }
  0x9a   : > { %4261 = vmatmul.mubr.msk.f32.vlgmr.msra.gmra.mrb[0].mxu1 %vm438_vm1, %v1022_v4  ;;  %4482 = vmatmul.mubr.msk.f32.gmra.mrb[14].mxu0 %vm438_vm1, %v5309_v21  ;;  %v6703_v4 = vld [vmem:[#allocation5_spill] sm:$0xff] }
  0x9b   : > { %4263 = vmatprep.mubr.msk.f32.mxu1 %vm438_vm1, %v5370_v14  ;;  %4484 = vmatprep.mubr.msk.f32.mxu0 %vm438_vm1, %v5347_v48  ;;  %v6697_v14 = vld [vmem:[#allocation25_spill] sm:$0xff] }
  0x9c   : > { %4309 = vmatpush3.msra.mxu1 %v5619_v45  ;;  %v6699_v45 = vld [vmem:[#allocation29_spill] sm:$0xff] }
  0x9d   : > { %4625 = vmatprep.subr.mxu1 %v5086_v0 }
  0x9e   : > { %4264 = vmatmul.mubr.msk.f32.gmra.mrb[2].mxu1 %vm438_vm1, %v5387_v28  ;;  %4485 = vmatmul.mubr.msk.f32.gmra.mrb[16].mxu0 %vm438_vm1, %v5350_v53  ;;  %v6698_v28 = vld [vmem:[#allocation27_spill] sm:$0xff] }
  0x9f   : > { %4266 = vmatprep.mubr.msk.f32.mxu1 %vm438_vm1, %v6695_v5  ;;  %4487 = vmatprep.mubr.msk.f32.mxu0 %vm438_vm1, %v5375_v16 }
  0xa2   : > { %4267 = vmatmul.mubr.msk.f32.gmra.mrb[4].mxu1 %vm438_vm1, %v6696_v11  ;;  %4488 = vmatmul.mubr.msk.f32.gmra.mrb[18].mxu0 %vm438_vm1, %v5378_v23 }
  0xa3   : > { %4269 = vmatprep.mubr.msk.f32.mxu1 %vm438_vm1, %v6697_v14  ;;  %4490 = vmatprep.mubr.msk.f32.mxu0 %vm438_vm1, %v5407_v12 }
  0xa6   : > { %4270 = vmatmul.mubr.msk.f32.gmra.mrb[6].mxu1 %vm438_vm1, %v6698_v28  ;;  %4491 = vmatmul.mubr.msk.f32.gmra.mrb[20].mxu0 %vm438_vm1, %v5410_v61 }
  0xa7   : > { %4272 = vmatprep.mubr.msk.f32.mxu1 %vm438_vm1, %v6699_v45  ;;  %4493 = vmatprep.mubr.msk.f32.mxu0 %vm438_vm1, %v5448_v52 }
  0xaa   : > { %4273 = vmatmul.mubr.msk.f32.gmra.mrb[8].mxu1 %vm438_vm1, %v6700_v57  ;;  %4494 = vmatmul.mubr.msk.f32.gmra.mrb[22].mxu0 %vm438_vm1, %v5451_v13 }
  0xab   : > { %4275 = vmatprep.mubr.msk.f32.mxu1 %vm438_vm1, %v5514_v63  ;;  %4496 = vmatprep.mubr.msk.f32.mxu0 %vm438_vm1, %v5484_v55 }
  0xae   : > { %4276 = vmatmul.mubr.msk.f32.gmra.mrb[10].mxu1 %vm438_vm1, %v6701_v20  ;;  %4497 = vmatmul.mubr.msk.f32.gmra.mrb[24].mxu0 %vm438_vm1, %v5487_v39 }
  0xaf   : > { %4278 = vmatprep.mubr.msk.f32.mxu1 %vm438_vm1, %v5549_v60  ;;  %4499 = vmatprep.mubr.msk.f32.mxu0 %vm438_vm1, %v5519_v8 }
  0xb2   : > { %4279 = vmatmul.mubr.msk.f32.gmra.mrb[12].mxu1 %vm438_vm1, %v5566_v27  ;;  %4500 = vmatmul.mubr.msk.f32.gmra.mrb[26].mxu0 %vm438_vm1, %v5522_v46 }
  0xb3   : > { %4281 = vmatprep.mubr.msk.f32.mxu1 %vm438_vm1, %v5573_v33  ;;  %4502 = vmatprep.mubr.msk.f32.mxu0 %vm438_vm1, %v5709_v6 }
  0xb6   : > { %4282 = vmatmul.mubr.msk.f32.gmra.mrb[14].mxu1 %vm438_vm1, %v5589_v2  ;;  %4503 = vmatmul.mubr.msk.f32.gmra.mrb[28].mxu0 %vm438_vm1, %v5712_v29 }
  0xb7   : > { %4284 = vmatprep.mubr.msk.f32.mxu1 %vm438_vm1, %v5593_v47  ;;  %4505 = vmatprep.mubr.msk.f32.mxu0 %vm438_vm1, %v5891_v24 }
  0xba   : > { %4285 = vmatmul.mubr.msk.f32.gmra.mrb[16].mxu1 %vm438_vm1, %v5606_v17  ;;  %4506 = vmatmul.mubr.msk.f32.gmra.mrb[30].mxu0 %vm438_vm1, %v5902_v49 }
  0xbb   : > { %4287 = vmatprep.mubr.msk.f32.mxu1 %vm438_vm1, %v5610_v37  ;;  %4510 = vmatprep.mubr.msk.f32.mxu0 %vm438_vm1, %v6702_v62  ;;  %v6706_v62 = vld [vmem:[#allocation8_spill] sm:$0xff] }
  0xbe   : > { %4288 = vmatmul.mubr.msk.f32.gmra.mrb[18].mxu1 %vm438_vm1, %v5628_v30  ;;  %4511 = vmatmul.mubr.msk.f32.vlgmr.msra.gmra.mrb[0].mxu0 %vm438_vm1, %v6703_v4  ;;  %v6707_v4 = vld [vmem:[#allocation9_spill] sm:$0xff] }
  0xbf   : > { %4290 = vmatprep.mubr.msk.f32.mxu1 %vm438_vm1, %v5633_v41  ;;  %4559 = vmatpush3.msra.mxu0 %v5771_v1  ;;  %v6708_v1 = vld [vmem:[#allocation41_spill] sm:$0xff] }
  0xc0   : > { %4513 = vmatprep.mubr.msk.f32.mxu0 %vm438_vm1, %v6704_v9  ;;  %v6709_v9 = vld [vmem:[#allocation10_spill] sm:$0xff] }
  0xc2   : > { %4291 = vmatmul.mubr.msk.f32.gmra.mrb[20].mxu1 %vm438_vm1, %v5647_v35  ;;  %4514 = vmatmul.mubr.msk.f32.gmra.mrb[2].mxu0 %vm438_vm1, %v6705_v44  ;;  %v6710_v35 = vld [vmem:[#allocation42_spill] sm:$0xff]  ;;  %v6711_v44 = vld [vmem:[#allocation11_spill] sm:$0xff] }
  0xc3   : > { %4293 = vmatprep.mubr.msk.f32.mxu1 %vm438_vm1, %v5651_v36  ;;  %4516 = vmatprep.mubr.msk.f32.mxu0 %vm438_vm1, %v6706_v62  ;;  %v6712_v36 = vld [vmem:[#allocation43_spill] sm:$0xff]  ;;  %v6713_v62 = vld [vmem:[#allocation12_spill] sm:$0xff] }
  0xc6   : > { %4294 = vmatmul.mubr.msk.f32.gmra.mrb[22].mxu1 %vm438_vm1, %v5664_v22  ;;  %4517 = vmatmul.mubr.msk.f32.gmra.mrb[4].mxu0 %vm438_vm1, %v6707_v4  ;;  %v6714_v4 = vld [vmem:[#allocation13_spill] sm:$0xff] }
  0xc7   : > { %4296 = vmatprep.mubr.msk.f32.mxu1 %vm438_vm1, %v6708_v1  ;;  %4519 = vmatprep.mubr.msk.f32.mxu0 %vm438_vm1, %v6709_v9  ;;  %v6715_v9 = vld [vmem:[#allocation14_spill] sm:$0xff] }
  0xca   : > { %4297 = vmatmul.mubr.msk.f32.gmra.mrb[24].mxu1 %vm438_vm1, %v6710_v35  ;;  %4520 = vmatmul.mubr.msk.f32.gmra.mrb[6].mxu0 %vm438_vm1, %v6711_v44  ;;  %v6716_v44 = vld [vmem:[#allocation15_spill] sm:$0xff] }
  0xcb   : > { %4299 = vmatprep.mubr.msk.f32.mxu1 %vm438_vm1, %v6712_v36  ;;  %4522 = vmatprep.mubr.msk.f32.mxu0 %vm438_vm1, %v6713_v62  ;;  %v6717_v62 = vld [vmem:[#allocation16_spill] sm:$0xff] }
  0xce   : > { %4300 = vmatmul.mubr.msk.f32.gmra.mrb[26].mxu1 %vm438_vm1, %v5698_v38  ;;  %4523 = vmatmul.mubr.msk.f32.gmra.mrb[8].mxu0 %vm438_vm1, %v6714_v4  ;;  %v6718_v4 = vld [vmem:[#allocation17_spill] sm:$0xff] }
  0xcf   : > { %4302 = vmatprep.mubr.msk.f32.mxu1 %vm438_vm1, %v5702_v56  ;;  %4525 = vmatprep.mubr.msk.f32.mxu0 %vm438_vm1, %v6715_v9  ;;  %v6719_v56 = vld [vmem:[#allocation2_spill] sm:$0xff] }
  0xd0   : > { %v6720_v9 = vld [vmem:[#allocation18_spill] sm:$0xff] }
  0xd2   : > { %4303 = vmatmul.mubr.msk.f32.gmra.mrb[28].mxu1 %vm438_vm1, %v5721_v54  ;;  %4526 = vmatmul.mubr.msk.f32.gmra.mrb[10].mxu0 %vm438_vm1, %v6716_v44  ;;  %v6721_v54 = vld [vmem:[#allocation3_spill] sm:$0xff] }
  0xd3   : > { %4305 = vmatprep.mubr.msk.f32.mxu1 %vm438_vm1, %v5725_v34  ;;  %4528 = vmatprep.mubr.msk.f32.mxu0 %vm438_vm1, %v6717_v62  ;;  %v6722_v44 = vld [vmem:[#allocation19_spill] sm:$0xff]  ;;  %v6723_v62 = vld [vmem:[#allocation20_spill] sm:$0xff] }
  0xd4   : > { %v6028_v34 = vld [vmem:[%s5107_s11 + $0x1a8] sm:$0x3] }
  0xd6   : > { %4306 = vmatmul.mubr.msk.f32.gmra.mrb[30].mxu1 %vm438_vm1, %v5741_v40  ;;  %4529 = vmatmul.mubr.msk.f32.gmra.mrb[12].mxu0 %vm438_vm1, %v6718_v4  ;;  %v6644_v4 = vmov 0.0|0.0  }
  0xd7   : > { %4310 = vmatprep.mubr.msk.f32.mxu1 %vm438_vm1, %v6719_v56  ;;  %4531 = vmatprep.mubr.msk.f32.mxu0 %vm438_vm1, %v6720_v9  ;;  %v6724_v56 = vld [vmem:[#allocation22_spill] sm:$0xff]  ;;  %v6732_v9 = vld [vmem:[#allocation36_spill] sm:$0xff] }
  0xda   : > { %4311 = vmatmul.mubr.msk.f32.vlgmr.msra.gmra.mrb[0].mxu1 %vm438_vm1, %v6721_v54  ;;  %4532 = vmatmul.mubr.msk.f32.gmra.mrb[14].mxu0 %vm438_vm1, %v6722_v44  ;;  %v6725_v54 = vld [vmem:[#allocation24_spill] sm:$0xff]  ;;  %v2489_v44 = vrot.slane %v5891_v24, 1 }
  0xdb   : > { %4313 = vmatprep.mubr.msk.f32.mxu1 %vm438_vm1, %v5133_v15  ;;  %4534 = vmatprep.mubr.msk.f32.mxu0 %vm438_vm1, %v6723_v62  ;;  %v6726_v15 = vld [vmem:[#allocation26_spill] sm:$0xff] }
  0xdc   : > { %4626 = vmatpush3.msra.mxu1 %v5086_v0  ;;  %v6727_v0 = vld [vmem:[#allocation28_spill] sm:$0xff] }
  0xdd   : > { %4619 = vmatprep.subr.bf16.mxu1 %v6644_v4  ;;  %v2490_v4 = vrot.slane %v5902_v49, 1 }
  0xde   : > { %4314 = vmatmul.mubr.msk.f32.gmra.mrb[2].mxu1 %vm438_vm1, %v5138_v18  ;;  %4535 = vmatmul.mubr.msk.f32.gmra.mrb[16].mxu0 %vm438_vm1, %v6724_v56  ;;  %v6728_v18 = vld [vmem:[#allocation30_spill] sm:$0xff] }
  0xdf   : > { %4316 = vmatprep.mubr.msk.f32.mxu1 %vm438_vm1, %v5150_v25  ;;  %4537 = vmatprep.mubr.msk.f32.mxu0 %vm438_vm1, %v6725_v54  ;;  %v6729_v25 = vld [vmem:[#allocation32_spill] sm:$0xff] }
  0xe2   : > { %4317 = vmatmul.mubr.msk.f32.gmra.mrb[4].mxu1 %vm438_vm1, %v5153_v26  ;;  %4538 = vmatmul.mubr.msk.f32.gmra.mrb[18].mxu0 %vm438_vm1, %v6726_v15  ;;  %v6730_v26 = vld [vmem:[#allocation33_spill] sm:$0xff] }
  0xe3   : > { %4319 = vmatprep.mubr.msk.f32.mxu1 %vm438_vm1, %v5164_v31  ;;  %4540 = vmatprep.mubr.msk.f32.mxu0 %vm438_vm1, %v6727_v0  ;;  %v6731_v31 = vld [vmem:[#allocation35_spill] sm:$0xff] }
  0xe6   : > { %4320 = vmatmul.mubr.msk.f32.gmra.mrb[6].mxu1 %vm438_vm1, %v5167_v32  ;;  %4541 = vmatmul.mubr.msk.f32.gmra.mrb[20].mxu0 %vm438_vm1, %v6728_v18  ;;  %v1687_v32 = vrot.slane %v5709_v6, 1 }
  0xe7   : > { %4322 = vmatprep.mubr.msk.f32.mxu1 %vm438_vm1, %v5201_v42  ;;  %4543 = vmatprep.mubr.msk.f32.mxu0 %vm438_vm1, %v6729_v25  ;;  %v1688_v42 = vrot.slane %v5712_v29, 1 }
  0xe9   : > { %v6025_v40 = vsel %vm355_vm0, %v1687_v32, %v1688_v42  ;;  %v2491_v32 = vsel %vm355_vm0, %v2489_v44, %v2490_v4 }
  0xea   : > { %4323 = vmatmul.mubr.msk.f32.gmra.mrb[8].mxu1 %vm438_vm1, %v5204_v43  ;;  %4544 = vmatmul.mubr.msk.f32.gmra.mrb[22].mxu0 %vm438_vm1, %v6730_v26  ;;  %v6733_v43 = vld [vmem:[#allocation37_spill] sm:$0xff] }
  0xeb   : > { %4325 = vmatprep.mubr.msk.f32.mxu1 %vm438_vm1, %v5228_v50  ;;  %4546 = vmatprep.mubr.msk.f32.mxu0 %vm438_vm1, %v6731_v31  ;;  %v1690_v50 = vrot.slane %v5730_v10, 1  ;;  %v2492_v10 = vrot.slane %v6028_v34, 1 }
  0xee   : > { %4326 = vmatmul.mubr.msk.f32.gmra.mrb[10].mxu1 %vm438_vm1, %v5231_v51  ;;  %4547 = vmatmul.mubr.msk.f32.gmra.mrb[24].mxu0 %vm438_vm1, %v6732_v9  ;;  %v6734_v51 = vld [vmem:[#allocation38_spill] sm:$0xff] }
  0xef   : > { %4328 = vmatprep.mubr.msk.f32.mxu1 %vm438_vm1, %v5254_v58  ;;  %4549 = vmatprep.mubr.msk.f32.mxu0 %vm438_vm1, %v6733_v43  ;;  %v6039_v58 = vsel %vm355_vm0, %v1688_v42, %v1690_v50 }
  0xf2   : > { %4329 = vmatmul.mubr.msk.f32.gmra.mrb[12].mxu1 %vm438_vm1, %v5257_v59  ;;  %4550 = vmatmul.mubr.msk.f32.gmra.mrb[26].mxu0 %vm438_vm1, %v6734_v51  ;;  %v2493_v59 = vsel %vm355_vm0, %v2490_v4, %v2492_v10 }
  0xf3   : > { %4331 = vmatprep.mubr.msk.f32.mxu1 %vm438_vm1, %v5280_v3  ;;  %4552 = vmatprep.mubr.msk.f32.mxu0 %vm438_vm1, %v6025_v40  ;;  %v3288_v3 = vld [vmem:[%s6572_s3] sm:$0x3] }
  0xf6   : > { %4332 = vmatmul.mubr.msk.f32.gmra.mrb[14].mxu1 %vm438_vm1, %v5283_v7  ;;  %4553 = vmatmul.mubr.msk.f32.gmra.mrb[28].mxu0 %vm438_vm1, %v6039_v58  ;;  %v3296_v7 = vld [vmem:[%s6573_s4] sm:$0xff] }
  0xf7   : > { %4334 = vmatprep.mubr.msk.f32.mxu1 %vm438_vm1, %v5306_v19  ;;  %4555 = vmatprep.mubr.msk.f32.mxu0 %vm438_vm1, %v2491_v32  ;;  %v3298_v19 = vld [vmem:[%s6573_s4 + $0x10] sm:$0xff] }
  0xfa   : > { %4335 = vmatmul.mubr.msk.f32.gmra.mrb[16].mxu1 %vm438_vm1, %v5309_v21  ;;  %4556 = vmatmul.mubr.msk.f32.gmra.mrb[30].mxu0 %vm438_vm1, %v2493_v59  ;;  %v3299_v21 = vld [vmem:[%s6573_s4 + $0x18] sm:$0xff] }
  0xfb   : > { %4337 = vmatprep.mubr.msk.f32.mxu1 %vm438_vm1, %v5347_v48  ;;  %4560 = vmatprep.mubr.msk.f32.mxu0 %vm438_vm1, %v6695_v5  ;;  %v4623_v48 = vpack.c.bf16 %v3299_v21, %v3298_v19 }
  0xfe   : > { %4338 = vmatmul.mubr.msk.f32.gmra.mrb[18].mxu1 %vm438_vm1, %v5350_v53  ;;  %4561 = vmatmul.mubr.msk.f32.vlgmr.msra.gmra.mrb[0].mxu0 %vm438_vm1, %v6696_v11  ;;  %v6735_v53 = vmov 0.0|0.0  }
  0xff   : > { %4340 = vmatprep.mubr.msk.f32.mxu1 %vm438_vm1, %v5375_v16  ;;  %4563 = vmatprep.mubr.msk.f32.mxu0 %vm438_vm1, %v6697_v14 }
 0x102   : > { %4341 = vmatmul.mubr.msk.f32.gmra.mrb[20].mxu1 %vm438_vm1, %v5378_v23  ;;  %4564 = vmatmul.mubr.msk.f32.gmra.mrb[2].mxu0 %vm438_vm1, %v6698_v28  ;;  %v6736_v23 = vld [vmem:[#allocation39_spill] sm:$0xff] }
 0x103   : > { %4343 = vmatprep.mubr.msk.f32.mxu1 %vm438_vm1, %v5407_v12  ;;  %4566 = vmatprep.mubr.msk.f32.mxu0 %vm438_vm1, %v6699_v45  ;;  %v3297_v12 = vld [vmem:[%s6573_s4 + $0x8] sm:$0xff] }
 0x106   : > { %4344 = vmatmul.mubr.msk.f32.gmra.mrb[22].mxu1 %vm438_vm1, %v5410_v61  ;;  %4567 = vmatmul.mubr.msk.f32.gmra.mrb[4].mxu0 %vm438_vm1, %v6700_v57  ;;  %v6737_v61 = vld [vmem:[#allocation40_spill] sm:$0xff] }
 0x107   : > { %4346 = vmatprep.mubr.msk.f32.mxu1 %vm438_vm1, %v5448_v52  ;;  %4569 = vmatprep.mubr.msk.f32.mxu0 %vm438_vm1, %v5514_v63  ;;  %v3850_v52 = vmul.f32 -1.442695, %v3288_v3  ;;  %v6740_v63 = vld [vmem:[#allocation46_spill] sm:$0xff] }
 0x109   : > { %4895 = vpow2.f32 %v3850_v52 }
 0x10a   : > { %4347 = vmatmul.mubr.msk.f32.gmra.mrb[24].mxu1 %vm438_vm1, %v5451_v13  ;;  %4570 = vmatmul.mubr.msk.f32.gmra.mrb[6].mxu0 %vm438_vm1, %v6701_v20 }
 0x10b   : > { %4349 = vmatprep.mubr.msk.f32.mxu1 %vm438_vm1, %v5484_v55  ;;  %4572 = vmatprep.mubr.msk.f32.mxu0 %vm438_vm1, %v5549_v60 }
 0x10e   : > { %4350 = vmatmul.mubr.msk.f32.gmra.mrb[26].mxu1 %vm438_vm1, %v5487_v39  ;;  %4573 = vmatmul.mubr.msk.f32.gmra.mrb[8].mxu0 %vm438_vm1, %v5566_v27  ;;  %v6739_v39 = vld [vmem:[#allocation45_spill] sm:$0xff]  ;;  %v6741_v27 = vld [vmem:[#allocation47_spill] sm:$0xff] }
 0x10f   : > { %4352 = vmatprep.mubr.msk.f32.mxu1 %vm438_vm1, %v5519_v8  ;;  %4575 = vmatprep.mubr.msk.f32.mxu0 %vm438_vm1, %v5573_v33  ;;  %v6738_v8 = vld [vmem:[#allocation44_spill] sm:$0xff]  ;;  %v2758_v33 = vrot.slane %v5902_v49, 2 }
 0x112   : > { %4353 = vmatmul.mubr.msk.f32.gmra.mrb[28].mxu1 %vm438_vm1, %v5522_v46  ;;  %4576 = vmatmul.mubr.msk.f32.gmra.mrb[10].mxu0 %vm438_vm1, %v5589_v2  ;;  %v2757_v46 = vrot.slane %v5891_v24, 2  ;;  %v5037_v2 = vmov 0.0  }
 0x113   : > { %4355 = vmatprep.mubr.msk.f32.mxu1 %vm438_vm1, %v5709_v6  ;;  %4578 = vmatprep.mubr.msk.f32.mxu0 %vm438_vm1, %v5593_v47  ;;  %v4620_v6 = vpack.c.bf16 %v3297_v12, %v3296_v7  ;;  %v4896_v16 = vpop.eup %4895  ;;  %v6742_v47 = vld [vmem:[#allocation48_spill] sm:$0xff] }
 0x114   : > { %v3292_v13 = vadd.f32 1.0, %v4896_v16 }
 0x116   : > { %4356 = vmatmul.mubr.msk.f32.gmra.mrb[30].mxu1 %vm438_vm1, %v5712_v29  ;;  %4579 = vmatmul.mubr.msk.f32.gmra.mrb[12].mxu0 %vm438_vm1, %v5606_v17  ;;  %4897 = vrcp.f32 %v3292_v13  ;;  %v2760_v17 = vrot.slane %v6028_v34, 2 }
 0x117   : > { %4387 = vmatprep.mubr.msk.f32.mxu1 %vm438_vm1, %v6723_v62  ;;  %4581 = vmatprep.mubr.msk.f32.mxu0 %vm438_vm1, %v5610_v37  ;;  %v2759_v37 = vsel %vm1017_vm2, %v2757_v46, %v2758_v33 }
 0x11a   : > { %4388 = vmatmul.mubr.msk.f32.vlgmr.msra.gmra.mrb[18].mxu1 %vm438_vm1, %v6724_v56  ;;  %4582 = vmatmul.mubr.msk.f32.gmra.mrb[14].mxu0 %vm438_vm1, %v5628_v30  ;;  %v6743_v30 = vld [vmem:[#allocation49_spill] sm:$0xff]  ;;  %v6210_v56 = vld [vmem:[%s6571_s2] ss:$0 sm:$0xff] }
 0x11b   : > { %4390 = vmatprep.mubr.msk.f32.mxu1 %vm438_vm1, %v6725_v54  ;;  %4584 = vmatprep.mubr.msk.f32.mxu0 %vm438_vm1, %v5633_v41  ;;  %v2761_v41 = vsel %vm1017_vm2, %v2758_v33, %v2760_v17 }
 0x11c   : > { %4621 = vmatpush3.bf16.msra.mxu1 %v4620_v6 }
 0x11d   : > { %4622 = vmatprep.subr.bf16.mxu1 %v6735_v53 }
 0x11e   : > { %4391 = vmatmul.mubr.msk.f32.gmra.mrb[20].mxu1 %vm438_vm1, %v6726_v15  ;;  %4585 = vmatmul.mubr.msk.f32.gmra.mrb[16].mxu0 %vm438_vm1, %v6736_v23 }
 0x11f   : > { %4393 = vmatprep.mubr.msk.f32.mxu1 %vm438_vm1, %v6727_v0  ;;  %4587 = vmatprep.mubr.msk.f32.mxu0 %vm438_vm1, %v6737_v61 }
 0x120   : > { %4624 = vmatpush3.bf16.msra.mxu1 %v4623_v48  ;;  %v4898_v55 = vpop.eup %4897 }
 0x121   : > { %v3295_v60 = vmul.f32 %v4898_v55, %v3288_v3 }
 0x122   : > { %4394 = vmatmul.mubr.msk.f32.gmra.mrb[22].mxu1 %vm438_vm1, %v6728_v18  ;;  %4588 = vmatmul.mubr.msk.f32.gmra.mrb[18].mxu0 %vm438_vm1, %v5664_v22 }
 0x123   : > { %4396 = vmatprep.mubr.msk.f32.mxu1 %vm438_vm1, %v6729_v25  ;;  %4590 = vmatprep.mubr.msk.f32.mxu0 %vm438_vm1, %v6708_v1 }
 0x126   : > { %4397 = vmatmul.mubr.msk.f32.gmra.mrb[24].mxu1 %vm438_vm1, %v6730_v26  ;;  %4591 = vmatmul.mubr.msk.f32.gmra.mrb[20].mxu0 %vm438_vm1, %v6710_v35 }
 0x127   : > { %4399 = vmatprep.mubr.msk.f32.mxu1 %vm438_vm1, %v6731_v31  ;;  %4593 = vmatprep.mubr.msk.f32.mxu0 %vm438_vm1, %v6712_v36 }
 0x12a   : > { %4400 = vmatmul.mubr.msk.f32.gmra.mrb[26].mxu1 %vm438_vm1, %v6732_v9  ;;  %4594 = vmatmul.mubr.msk.f32.gmra.mrb[22].mxu0 %vm438_vm1, %v5698_v38 }
 0x12b   : > { %4402 = vmatprep.mubr.msk.f32.mxu1 %vm438_vm1, %v6733_v43  ;;  %4596 = vmatprep.mubr.msk.f32.mxu0 %vm438_vm1, %v6738_v8 }
 0x12e   : > { %4403 = vmatmul.mubr.msk.f32.gmra.mrb[28].mxu1 %vm438_vm1, %v6734_v51  ;;  %4597 = vmatmul.mubr.msk.f32.gmra.mrb[24].mxu0 %vm438_vm1, %v6739_v39 }
 0x12f   : > { %4405 = vmatprep.mubr.msk.f32.mxu1 %vm438_vm1, %v6025_v40  ;;  %4599 = vmatprep.mubr.msk.f32.mxu0 %vm438_vm1, %v6740_v63 }
 0x132   : > { %4406 = vmatmul.mubr.msk.f32.gmra.mrb[30].mxu1 %vm438_vm1, %v6039_v58  ;;  %4600 = vmatmul.mubr.msk.f32.gmra.mrb[26].mxu0 %vm438_vm1, %v6741_v27 }
 0x133   : > { %4616 = vmatprep.mubr.msk.f32.mxu1 %vm5036_vm3, %v5037_v2  ;;  %4602 = vmatprep.mubr.msk.f32.mxu0 %vm438_vm1, %v6742_v47 }
 0x136   : > { %4617 = vmatmul.mubr.msk.f32.vlgmr.msra.gmra.mrb[32].mxu1 %vm3307_vm4, %v3295_v60  ;;  %4603 = vmatmul.mubr.msk.f32.gmra.mrb[28].mxu0 %vm438_vm1, %v6743_v30 }
 0x137   : > { %4605 = vmatprep.mubr.msk.f32.mxu0 %vm438_vm1, %v2759_v37 }
 0x13a   : > { %4606 = vmatmul.mubr.msk.f32.gmra.mrb[30].mxu0 %vm438_vm1, %v2761_v41 }
 0x1ad   : > { %v4312_v35 = vpop.f32.mrb[0].mxu1 }
 0x1ae   : > { %v1495_v36 = vpop.f32.mrb[1].mxu1 }
 0x1b1   : > { %v4315_v22 = vpop.f32.mrb[2].mxu1 }
 0x1b2   : > { %v1505_v29 = vpop.f32.mrb[3].mxu1 }
 0x1b5   : > { %v4318_v38 = vpop.f32.mrb[4].mxu1 }
 0x1b6   : > { %v1515_v40 = vpop.f32.mrb[5].mxu1 }
 0x1b9   : > { %v4321_v5 = vpop.f32.mrb[6].mxu1 }
 0x1ba   : > { %v1525_v34 = vpop.f32.mrb[7].mxu1 }
 0x1bd   : > { %v4324_v11 = vpop.f32.mrb[8].mxu1 }
 0x1be   : > { %v1535_v14 = vpop.f32.mrb[9].mxu1 }
 0x1c1   : > { %v4327_v28 = vpop.f32.mrb[10].mxu1 }
 0x1c2   : > { %v6193_v45 = vpop.f32.mrb[11].mxu1 }
 0x1c5   : > { %v6195_v57 = vpop.f32.mrb[12].mxu1 }
 0x1c6   : > { %v6197_v20 = vpop.f32.mrb[13].mxu1 }
 0x1c9   : > { %v6199_v24 = vpop.f32.mrb[14].mxu1 }
 0x1ca   : > { %v6201_v49 = vpop.f32.mrb[15].mxu1 }
 0x1cd   : > { %v6203_v1 = vpop.f32.mrb[16].mxu1 }
 0x1ce   : > { %v6205_v62 = vpop.f32.mrb[17].mxu1 }
 0x1d1   : > { %v4562_v4 = vpop.f32.mrb[0].mxu0 }
 0x1d2   : > { %v4627_v54 = vadd.f32 %v4562_v4, %v4312_v35  ;;  %v2834_v15 = vpop.f32.mrb[1].mxu0 }
 0x1d3   : > { %v4628_v0 = vadd.f32 %v2834_v15, %v1495_v36 }
 0x1d4   : > { %v6213_v18 = vadd.f32 %v4627_v54, %v6210_v56 }
 0x1d5   : > { %v6216_v25 = vadd.f32 %v4628_v0, %v6210_v56  ;;  %v4565_v26 = vpop.f32.mrb[2].mxu0 }
 0x1d6   : > { %v3819_v31 = vmul.f32 -1.442695, %v6213_v18  ;;  %v4629_v42 = vadd.f32 %v4565_v26, %v4315_v22  ;;  %v2844_v9 = vpop.f32.mrb[3].mxu0 }
 0x1d7   : > { %v3818_v43 = vmul.f32 -1.442695, %v6216_v25  ;;  %v4630_v50 = vadd.f32 %v2844_v9, %v1505_v29 }
 0x1d8   : > { %4899 = vpow2.f32 %v3819_v31  ;;  %v6221_v44 = vadd.f32 %v4629_v42, %v6210_v56 }
 0x1d9   : > { %4901 = vpow2.f32 %v3818_v43  ;;  %v6224_v51 = vadd.f32 %v4630_v50, %v6210_v56  ;;  %v4568_v58 = vpop.f32.mrb[4].mxu0 }
 0x1da   : > { %v3821_v10 = vmul.f32 -1.442695, %v6221_v44  ;;  %v4631_v32 = vadd.f32 %v4568_v58, %v4318_v38  ;;  %v2854_v59 = vpop.f32.mrb[5].mxu0 }
 0x1db   : > { %v3820_v3 = vmul.f32 -1.442695, %v6224_v51  ;;  %v4632_v52 = vadd.f32 %v2854_v59, %v1515_v40 }
 0x1dc   : > { %4903 = vpow2.f32 %v3821_v10  ;;  %v6229_v7 = vadd.f32 %v4631_v32, %v6210_v56 }
 0x1dd   : > { %4905 = vpow2.f32 %v3820_v3  ;;  %v6232_v12 = vadd.f32 %v4632_v52, %v6210_v56  ;;  %v4571_v6 = vpop.f32.mrb[6].mxu0 }
 0x1de   : > { %v3823_v19 = vmul.f32 -1.442695, %v6229_v7  ;;  %v4633_v21 = vadd.f32 %v4571_v6, %v4321_v5  ;;  %v2864_v48 = vpop.f32.mrb[7].mxu0 }
 0x1df   : > { %v3822_v53 = vmul.f32 -1.442695, %v6232_v12  ;;  %v4634_v16 = vadd.f32 %v2864_v48, %v1525_v34 }
 0x1e0   : > { %4907 = vpow2.f32 %v3823_v19  ;;  %v6237_v23 = vadd.f32 %v4633_v21, %v6210_v56 }
 0x1e1   : > { %4909 = vpow2.f32 %v3822_v53  ;;  %v6240_v61 = vadd.f32 %v4634_v16, %v6210_v56  ;;  %v4574_v13 = vpop.f32.mrb[8].mxu0 }
 0x1e2   : > { %v4900_v8 = vpop.eup %4899  ;;  %v3825_v55 = vmul.f32 -1.442695, %v6237_v23  ;;  %v4635_v39 = vadd.f32 %v4574_v13, %v4324_v11  ;;  %v2874_v63 = vpop.f32.mrb[9].mxu0 }
 0x1e3   : > { %v4902_v46 = vpop.eup %4901  ;;  %v3161_v33 = vadd.f32 1.0, %v4900_v8  ;;  %v3824_v60 = vmul.f32 -1.442695, %v6240_v61  ;;  %v4636_v27 = vadd.f32 %v2874_v63, %v1535_v14 }
 0x1e4   : > { %4911 = vpow2.f32 %v3825_v55  ;;  %v6245_v2 = vadd.f32 %v4635_v39, %v6210_v56  ;;  %v3160_v47 = vadd.f32 1.0, %v4902_v46 }
 0x1e5   : > { %v6248_v17 = vadd.f32 %v4636_v27, %v6210_v56  ;;  %v4577_v37 = vpop.f32.mrb[10].mxu0  ;;  %4913 = vrcp.f32 %v3161_v33 }
 0x1e6   : > { %v4904_v30 = vpop.eup %4903  ;;  %v3827_v41 = vmul.f32 -1.442695, %v6245_v2  ;;  %v4637_v35 = vadd.f32 %v4577_v37, %v4327_v28  ;;  %v2884_v36 = vpop.f32.mrb[11].mxu0  ;;  %4915 = vpow2.f32 %v3824_v60 }
 0x1e7   : > { %v4906_v22 = vpop.eup %4905  ;;  %v3163_v29 = vadd.f32 1.0, %v4904_v30  ;;  %v3826_v38 = vmul.f32 -1.442695, %v6248_v17  ;;  %v4638_v40 = vadd.f32 %v2884_v36, %v6193_v45 }
 0x1e8   : > { %4917 = vpow2.f32 %v3827_v41  ;;  %v6254_v5 = vadd.f32 %v4637_v35, %v6210_v56  ;;  %v3162_v34 = vadd.f32 1.0, %v4906_v22 }
 0x1e9   : > { %4919 = vrcp.f32 %v3160_v47  ;;  %v6257_v11 = vadd.f32 %v4638_v40, %v6210_v56  ;;  %v4580_v14 = vpop.f32.mrb[12].mxu0 }
 0x1ea   : > { %v4908_v4 = vpop.eup %4907  ;;  %4921 = vrcp.f32 %v3163_v29  ;;  %v3829_v28 = vmul.f32 -1.442695, %v6254_v5  ;;  %v4639_v54 = vadd.f32 %v4580_v14, %v6195_v57  ;;  %v2894_v15 = vpop.f32.mrb[13].mxu0 }
 0x1eb   : > { %v4910_v0 = vpop.eup %4909  ;;  %v3165_v26 = vadd.f32 1.0, %v4908_v4  ;;  %4923 = vpow2.f32 %v3826_v38  ;;  %v3828_v45 = vmul.f32 -1.442695, %v6257_v11  ;;  %v4640_v31 = vadd.f32 %v2894_v15, %v6197_v20 }
 0x1ec   : > { %4925 = vpow2.f32 %v3829_v28  ;;  %v6264_v42 = vadd.f32 %v4639_v54, %v6210_v56  ;;  %v3164_v43 = vadd.f32 1.0, %v4910_v0 }
 0x1ed   : > { %v4389_v9 = vpop.f32.mrb[18].mxu1  ;;  %4927 = vrcp.f32 %v3162_v34  ;;  %v6267_v50 = vadd.f32 %v4640_v31, %v6210_v56  ;;  %v4583_v58 = vpop.f32.mrb[14].mxu0 }
 0x1ee   : > { %v1854_v57 = vpop.f32.mrb[19].mxu1  ;;  %v4912_v10 = vpop.eup %4911  ;;  %4929 = vrcp.f32 %v3165_v26  ;;  %v3831_v32 = vmul.f32 -1.442695, %v6264_v42  ;;  %v4641_v59 = vadd.f32 %v4583_v58, %v6199_v24 }
 0x1ef   : > { %v2904_v3 = vpop.f32.mrb[15].mxu0  ;;  %v3167_v20 = vadd.f32 1.0, %v4912_v10  ;;  %4931 = vpow2.f32 %v3828_v45  ;;  %v3830_v52 = vmul.f32 -1.442695, %v6267_v50  ;;  %v6273_v19 = vpop.eup %4913 }
 0x1f0   : > { %v4642_v6 = vadd.f32 %v2904_v3, %v6201_v49  ;;  %4933 = vpow2.f32 %v3831_v32  ;;  %v6276_v21 = vadd.f32 %v4641_v59, %v6210_v56  ;;  %v4916_v53 = vpop.eup %4915 }
 0x1f1   : > { %v4392_v48 = vpop.f32.mrb[20].mxu1  ;;  %4935 = vrcp.f32 %v3164_v43  ;;  %v4586_v24 = vpop.f32.mrb[16].mxu0  ;;  %v3166_v55 = vadd.f32 1.0, %v4916_v53 }
 0x1f2   : > { %v6279_v16 = vadd.f32 %v4642_v6, %v6210_v56  ;;  %v1864_v13 = vpop.f32.mrb[21].mxu1  ;;  %v4918_v8 = vpop.eup %4917  ;;  %4937 = vpow2.f32 %v3830_v52  ;;  %v3833_v39 = vmul.f32 -1.442695, %v6276_v21  ;;  %v4643_v49 = vadd.f32 %v4586_v24, %v6203_v1 }
 0x1f3   : > { %v2914_v63 = vpop.f32.mrb[17].mxu0  ;;  %v6283_v46 = vpop.eup %4919  ;;  %4939 = vrcp.f32 %v3167_v20  ;;  %v3169_v33 = vadd.f32 1.0, %v4918_v8  ;;  %v3381_v52 = vlaneseq }
 0x1f4   : > { %v3832_v60 = vmul.f32 -1.442695, %v6279_v16  ;;  %v4644_v27 = vadd.f32 %v2914_v63, %v6205_v62  ;;  %v6287_v47 = vpop.eup %4921  ;;  %4941 = vrcp.f32 %v3166_v55  ;;  %v6290_v37 = vadd.f32 %v4643_v49, %v6210_v56 }
 0x1f5   : > { %v4395_v30 = vpop.f32.mrb[22].mxu1  ;;  %v4924_v41 = vpop.eup %4923  ;;  %4943 = vrcp.f32 %v3169_v33 }
 0x1f6   : > { %v6293_v1 = vadd.f32 %v4644_v27, %v6210_v56  ;;  %v4589_v35 = vpop.f32.mrb[18].mxu0  ;;  %v1874_v36 = vpop.f32.mrb[23].mxu1  ;;  %v3168_v29 = vadd.f32 1.0, %v4924_v41  ;;  %4945 = vpow2.f32 %v3833_v39  ;;  %v3835_v38 = vmul.f32 -1.442695, %v6290_v37 }
 0x1f7   : > { %v4926_v22 = vpop.eup %4925  ;;  %v4645_v62 = vadd.f32 %v4589_v35, %v4389_v9  ;;  %v2924_v40 = vpop.f32.mrb[19].mxu0  ;;  %4947 = vpow2.f32 %v3832_v60 }
 0x1f8   : > { %v6296_v34 = vpop.eup %4927  ;;  %v3171_v14 = vadd.f32 1.0, %v4926_v22  ;;  %v3834_v4 = vmul.f32 -1.442695, %v6293_v1  ;;  %v4646_v28 = vadd.f32 %v2924_v40, %v1854_v57  ;;  %4949 = vrcp.f32 %v3168_v29 }
 0x1f9   : > { %v6299_v54 = vpop.eup %4929  ;;  %v6302_v15 = vadd.f32 %v4645_v62, %v6210_v56  ;;  %v4398_v0 = vpop.f32.mrb[24].mxu1  ;;  %v3382_v29 = vshrl.u32 %v3381_v52, 7 }
 0x1fa   : > { %v4932_v26 = vpop.eup %4931  ;;  %4951 = vrcp.f32 %v3171_v14  ;;  %v6305_v45 = vadd.f32 %v4646_v28, %v6210_v56  ;;  %v4592_v31 = vpop.f32.mrb[20].mxu0  ;;  %v3383_v14 = vstv %s5079_s22 }
 0x1fb   : > { %v1884_v9 = vpop.f32.mrb[25].mxu1  ;;  %v4934_v43 = vpop.eup %4933  ;;  %v3170_v58 = vadd.f32 1.0, %v4932_v26  ;;  %4953 = vpow2.f32 %v3835_v38  ;;  %v3837_v10 = vmul.f32 -1.442695, %v6302_v15  ;;  %v4647_v57 = vadd.f32 %v4592_v31, %v4392_v48 }
 0x1fc   : > { %v2934_v32 = vpop.f32.mrb[21].mxu0  ;;  %v6308_v59 = vpop.eup %4935  ;;  %v3173_v3 = vadd.f32 1.0, %v4934_v43  ;;  %4955 = vpow2.f32 %v3834_v4  ;;  %v3836_v53 = vmul.f32 -1.442695, %v6305_v45  ;;  %vm6340_vm5 = vcmp.eq.s32.totalorder %v3382_v29, %v3383_v14 }
 0x1fd   : > { %v4648_v20 = vadd.f32 %v2934_v32, %v1864_v13  ;;  %v4938_v6 = vpop.eup %4937  ;;  %4957 = vrcp.f32 %v3170_v58  ;;  %v6312_v24 = vadd.f32 %v4647_v57, %v6210_v56  ;;  %v4401_v8 = vpop.f32.mrb[26].mxu1  ;;  %v6370_v14 = vmul.f32 %v6287_v47, %v6221_v44 }
 0x1fe   : > { %v6314_v55 = vpop.eup %4939  ;;  %4959 = vrcp.f32 %v3173_v3  ;;  %v3172_v39 = vadd.f32 1.0, %v4938_v6  ;;  %v4595_v49 = vpop.f32.mrb[22].mxu0 }
 0x1ff   : > { %v6317_v48 = vadd.f32 %v4648_v20, %v6210_v56  ;;  %v1894_v63 = vpop.f32.mrb[27].mxu1  ;;  %v6319_v13 = vpop.eup %4941  ;;  %4961 = vpow2.f32 %v3837_v10  ;;  %v3839_v33 = vmul.f32 -1.442695, %v6312_v24  ;;  %v4649_v60 = vadd.f32 %v4595_v49, %v4395_v30 }
 0x200   : > { %v2944_v27 = vpop.f32.mrb[23].mxu0  ;;  %v6322_v41 = vpop.eup %4943  ;;  %4963 = vrcp.f32 %v3172_v39  ;;  %v6404_v52 = vmul.f32 %v6314_v55, %v6237_v23 }
 0x201   : > { %v3838_v35 = vmul.f32 -1.442695, %v6317_v48  ;;  %v4650_v22 = vadd.f32 %v2944_v27, %v1874_v36  ;;  %v4946_v38 = vpop.eup %4945  ;;  %4965 = vpow2.f32 %v3836_v53  ;;  %v6326_v62 = vadd.f32 %v4649_v60, %v6210_v56  ;;  %v4404_v40 = vpop.f32.mrb[28].mxu1 }
 0x202   : > { %v4948_v4 = vpop.eup %4947  ;;  %v3175_v28 = vadd.f32 1.0, %v4946_v38  ;;  %4967 = vpow2.f32 %v3839_v33  ;;  %v4598_v26 = vpop.f32.mrb[24].mxu0  ;;  %v6346_v53 = vmul.f32 %v6273_v19, %v6213_v18  ;;  %v6353_v33 = vmul.f32 %v6283_v46, %v6216_v25  ;;  %v3851_v25 = vld [vmem:[%s6574_s5] ss:$0 sm:$0xff] }
 0x203   : > { %v6330_v30 = vadd.f32 %v4650_v22, %v6210_v56  ;;  %v6332_v31 = vpop.f32.mrb[29].mxu1  ;;  %v6334_v43 = vpop.eup %4949  ;;  %v3174_v36 = vadd.f32 1.0, %v4948_v4  ;;  %4969 = vpow2.f32 %v3838_v35  ;;  %v3841_v58 = vmul.f32 -1.442695, %v6326_v62 }
 0x204   : > { %v4651_v10 = vadd.f32 %v4598_v26, %v4398_v0  ;;  %v2954_v57 = vpop.f32.mrb[25].mxu0  ;;  %v6337_v32 = vpop.eup %4951  ;;  %4971 = vrcp.f32 %v3175_v28 }
 0x205   : > { %v3840_v3 = vmul.f32 -1.442695, %v6330_v30  ;;  %v4652_v20 = vadd.f32 %v2954_v57, %v1884_v9  ;;  %v4954_v6 = vpop.eup %4953  ;;  %4973 = vrcp.f32 %v3174_v36  ;;  %v4407_v0 = vpop.f32.mrb[30].mxu1  ;;  %v6375_v36 = vmul.f32 %v6296_v34, %v6224_v51 }
 0x206   : > { %v6349_v39 = vadd.f32 %v4651_v10, %v6210_v56  ;;  %v4956_v49 = vpop.eup %4955  ;;  %v3177_v9 = vadd.f32 1.0, %v4954_v6  ;;  %4975 = vpow2.f32 %v3841_v58  ;;  %v4601_v27 = vpop.f32.mrb[26].mxu0 }
 0x207   : > { %v6356_v60 = vadd.f32 %v4652_v20, %v6210_v56  ;;  %v6358_v35 = vpop.f32.mrb[31].mxu1  ;;  %v6360_v18 = vpop.eup %4957  ;;  %v3176_v19 = vadd.f32 1.0, %v4956_v49  ;;  %4977 = vpow2.f32 %v3840_v3  ;;  %v4653_v29 = vadd.f32 %v4601_v27, %v4401_v8 }
 0x208   : > { %v3843_v22 = vmul.f32 -1.442695, %v6349_v39  ;;  %v2964_v38 = vpop.f32.mrb[27].mxu0  ;;  %v6366_v46 = vpop.eup %4959  ;;  %4979 = vrcp.f32 %v3177_v9  ;;  %v6379_v8 = vmul.f32 %v6299_v54, %v6229_v7  ;;  %v6391_v7 = vmul.f32 %v6308_v59, %v6232_v12 }
 0x209   : > { %v3842_v4 = vmul.f32 -1.442695, %v6356_v60  ;;  %v4654_v28 = vadd.f32 %v2964_v38, %v1894_v63  ;;  %v4962_v26 = vpop.eup %4961  ;;  %4981 = vrcp.f32 %v3176_v19  ;;  %v6382_v58 = vadd.f32 %v4653_v29, %v6210_v56  ;;  %v3377_v10 = vpop.f32.mrb[32].mxu1 }
 0x20a   : > { %v6384_v44 = vpop.eup %4963  ;;  %v3179_v47 = vadd.f32 1.0, %v4962_v26  ;;  %4983 = vpow2.f32 %v3843_v22  ;;  %v4604_v57 = vpop.f32.mrb[28].mxu0  ;;  %v3378_v3 = vadd.f32 %v3851_v25, %v3377_v10 }
 0x20b   : > { %v6387_v63 = vadd.f32 %v4654_v28, %v6210_v56  ;;  %v4618_v51 = vpop.f32.mrb[33].mxu1  ;;  %v4966_v34 = vpop.eup %4965  ;;  %4985 = vpow2.f32 %v3842_v4  ;;  %v3845_v54 = vmul.f32 -1.442695, %v6382_v58  ;;  %v4655_v20 = vadd.f32 %v4604_v57, %v4404_v40 }
 0x20c   : > { %v2974_v6 = vpop.f32.mrb[29].mxu0  ;;  %v4968_v49 = vpop.eup %4967  ;;  %4987 = vrcp.f32 %v3179_v47  ;;  %v3178_v9 = vadd.f32 1.0, %v4966_v34  ;;  %v3385_v19 = vsel %vm6340_vm5, %v3378_v3, 0.0  ;;  %v6409_v51 = vmul.f32 %v6319_v13, %v6240_v61 }
 0x20d   : > { %v3844_v27 = vmul.f32 -1.442695, %v6387_v63  ;;  %v4970_v22 = vpop.eup %4969  ;;  %v3181_v29 = vadd.f32 1.0, %v4968_v49  ;;  %4989 = vpow2.f32 %v3845_v54  ;;  %v6398_v38 = vadd.f32 %v4655_v20, %v6210_v56  ;;  %v4607_v28 = vpop.f32.mrb[30].mxu0 }
 0x20e   : > { %v3387_v12 = vsel %vm3386_vm6, %v3385_v19, 0.0  ;;  %v4972_v59 = vpop.eup %4971  ;;  %4991 = vrcp.f32 %v3178_v9  ;;  %v3180_v40 = vadd.f32 1.0, %v4970_v22  ;;  %v4656_v4 = vadd.f32 %v2974_v6, %v6332_v31  ;;  %v2984_v57 = vpop.f32.mrb[31].mxu0 }
 0x20f   : > { %v3388_v25 = vrot.slane %v3387_v12, 4  ;;  %v4974_v26 = vpop.eup %4973  ;;  %4993 = vrcp.f32 %v3181_v29  ;;  %v3847_v10 = vmul.f32 -1.442695, %v6398_v38  ;;  %v4657_v47 = vadd.f32 %v4607_v28, %v4407_v0 }
 0x210   : > { %v4976_v3 = vpop.eup %4975  ;;  %4995 = vrcp.f32 %v3180_v40  ;;  %v6412_v31 = vadd.f32 %v4656_v4, %v6210_v56  ;;  %v4658_v55 = vadd.f32 %v2984_v57, %v6358_v35  ;;  %v3265_v9 = vmul.f32 %v6322_v41, %v6245_v2 }
 0x211   : > { %v3389_v34 = vadd.f32 %v3388_v25, %v3387_v12  ;;  %v4978_v54 = vpop.eup %4977  ;;  %v3183_v20 = vadd.f32 1.0, %v4976_v3  ;;  %4997 = vpow2.f32 %v3844_v27  ;;  %v6415_v23 = vadd.f32 %v4657_v47, %v6210_v56 }
 0x212   : > { %v4980_v0 = vpop.eup %4979  ;;  %v3182_v6 = vadd.f32 1.0, %v4978_v54  ;;  %4999 = vpow2.f32 %v3847_v10  ;;  %v3846_v61 = vmul.f32 -1.442695, %v6412_v31  ;;  %v6423_v27 = vadd.f32 %v4658_v55, %v6210_v56 }
 0x213   : > { %v3390_v49 = vrot.slane %v3389_v34, 2  ;;  %v4982_v13 = vpop.eup %4981  ;;  %5001 = vrcp.f32 %v3183_v20  ;;  %v3849_v19 = vmul.f32 -1.442695, %v6415_v23  ;;  %v3264_v35 = vmul.f32 %v6334_v43, %v6248_v17 }
 0x214   : > { %v4984_v22 = vpop.eup %4983  ;;  %v3267_v29 = vmul.f32 %v6337_v32, %v6254_v5  ;;  %5003 = vrcp.f32 %v3182_v6  ;;  %v3266_v2 = vmul.f32 %v6360_v18, %v6257_v11  ;;  %v3848_v25 = vmul.f32 -1.442695, %v6423_v27 }
 0x215   : > { %v3391_v12 = vadd.f32 %v3390_v49, %v3389_v34  ;;  %v4986_v40 = vpop.eup %4985  ;;  %v3185_v41 = vadd.f32 1.0, %v4984_v22  ;;  %5005 = vpow2.f32 %v3846_v61  ;;  %v3269_v56 = vmul.f32 %v6366_v46, %v6264_v42 }
 0x216   : > { %v4988_v4 = vpop.eup %4987  ;;  %v3184_v28 = vadd.f32 1.0, %v4986_v40  ;;  %5007 = vpow2.f32 %v3849_v19  ;;  %v3268_v5 = vmul.f32 %v6384_v44, %v6267_v50  ;;  %v3271_v43 = vmul.f32 %v4972_v59, %v6276_v21 }
 0x217   : > { %v3392_v10 = vrot.slane %v3391_v12, 1  ;;  %v4990_v17 = vpop.eup %4989  ;;  %v3270_v11 = vmul.f32 %v4974_v26, %v6279_v16  ;;  %5009 = vrcp.f32 %v3185_v41  ;;  %v3273_v18 = vmul.f32 %v4980_v0, %v6290_v37 }
 0x218   : > { %v4992_v32 = vpop.eup %4991  ;;  %5011 = vrcp.f32 %v3184_v28  ;;  %v3187_v47 = vadd.f32 1.0, %v4990_v17  ;;  %v3272_v46 = vmul.f32 %v4982_v13, %v6293_v1  ;;  %v3275_v3 = vmul.f32 %v4988_v4, %v6302_v15 }
 0x219   : > { %v6440_v57 = vadd.f32 %v3392_v10, %v3391_v12  ;;  %v4994_v42 = vpop.eup %4993  ;;  %v3274_v34 = vmul.f32 %v4992_v32, %v6305_v45  ;;  %5013 = vpow2.f32 %v3848_v25 }
 0x21a   : > { %v4996_v50 = vpop.eup %4995  ;;  %v3277_v21 = vmul.f32 %v4994_v42, %v6312_v24  ;;  %5015 = vrcp.f32 %v3187_v47 }
 0x21b   : > { %v3394_v16 = vadd.f32 %v6440_v57, %v6353_v33  ;;  %v3395_v37 = vadd.f32 %v6440_v57, %v6346_v53  ;;  %v4998_v1 = vpop.eup %4997  ;;  %v3276_v15 = vmul.f32 %v4996_v50, %v6317_v48  ;;  %v3396_v45 = vadd.f32 %v6440_v57, %v6375_v36 }
 0x21c   : > { %v3397_v44 = vadd.f32 %v6440_v57, %v6370_v14  ;;  %v3398_v24 = vadd.f32 %v6440_v57, %v6391_v7  ;;  %v5000_v59 = vpop.eup %4999  ;;  %v3186_v33 = vadd.f32 1.0, %v4998_v1  ;;  %v3399_v53 = vadd.f32 %v6440_v57, %v6379_v8 }
 0x21d   : > { %v3400_v48 = vadd.f32 %v6440_v57, %v6409_v51  ;;  %v3401_v26 = vadd.f32 %v6440_v57, %v6404_v52  ;;  %3426 = vst.msk [vmem:[%s6448_s16] sm:$0xff] %vm438_vm1, %v3394_v16  ;;  %3427 = vst.msk [vmem:[%s6448_s16 + $0x8] sm:$0xff] %vm438_vm1, %v3395_v37  ;;  %v5002_v14 = vpop.eup %5001  ;;  %v3189_v36 = vadd.f32 1.0, %v5000_v59  ;;  %v3402_v7 = vadd.f32 %v6440_v57, %v3264_v35 }
 0x21e   : > { %v3403_v54 = vadd.f32 %v6440_v57, %v3265_v9  ;;  %v3404_v8 = vadd.f32 %v6440_v57, %v3266_v2  ;;  %3428 = vst.msk [vmem:[%s6448_s16 + $0x10] sm:$0xff] %vm438_vm1, %v3396_v45  ;;  %3429 = vst.msk [vmem:[%s6448_s16 + $0x18] sm:$0xff] %vm438_vm1, %v3397_v44  ;;  %v5004_v52 = vpop.eup %5003  ;;  %v3279_v51 = vmul.f32 %v5002_v14, %v6326_v62  ;;  %5017 = vrcp.f32 %v3186_v33 }
 0x21f   : > { %3430 = vst.msk [vmem:[%s6448_s16 + $0x20] sm:$0xff] %vm438_vm1, %v3398_v24  ;;  %v3405_v20 = vadd.f32 %v6440_v57, %v3267_v29  ;;  %v3406_v55 = vadd.f32 %v6440_v57, %v3268_v5  ;;  %3431 = vst.msk [vmem:[%s6448_s16 + $0x28] sm:$0xff] %vm438_vm1, %v3399_v53  ;;  %v5006_v0 = vpop.eup %5005  ;;  %v3278_v6 = vmul.f32 %v5004_v52, %v6330_v30  ;;  %5019 = vrcp.f32 %v3189_v36 }
 0x220   : > { %3432 = vst.msk [vmem:[%s6448_s16 + $0x30] sm:$0xff] %vm438_vm1, %v3400_v48  ;;  %3433 = vst.msk [vmem:[%s6448_s16 + $0x38] sm:$0xff] %vm438_vm1, %v3401_v26  ;;  %v3407_v49 = vadd.f32 %v6440_v57, %v3269_v56  ;;  %v3408_v62 = vadd.f32 %v6440_v57, %v3270_v11  ;;  %v5008_v61 = vpop.eup %5007  ;;  %v3409_v13 = vadd.f32 %v6440_v57, %v3271_v43  ;;  %v3188_v4 = vadd.f32 1.0, %v5006_v0 }
 0x221   : > { %3434 = vst.msk [vmem:[%s6448_s16 + $0x40] sm:$0xff] %vm438_vm1, %v3402_v7  ;;  %3435 = vst.msk [vmem:[%s6448_s16 + $0x48] sm:$0xff] %vm438_vm1, %v3403_v54  ;;  %v3410_v9 = vadd.f32 %v6440_v57, %v3272_v46  ;;  %v3411_v30 = vadd.f32 %v6440_v57, %v3273_v18  ;;  %v3412_v19 = vadd.f32 %v6440_v57, %v3274_v34  ;;  %v5010_v22 = vpop.eup %5009  ;;  %v3191_v56 = vadd.f32 1.0, %v5008_v61 }
 0x222   : > { %3436 = vst.msk [vmem:[%s6448_s16 + $0x50] sm:$0xff] %vm438_vm1, %v3404_v8  ;;  %3437 = vst.msk [vmem:[%s6448_s16 + $0x58] sm:$0xff] %vm438_vm1, %v3405_v20  ;;  %v3413_v35 = vadd.f32 %v6440_v57, %v3275_v3  ;;  %v3414_v29 = vadd.f32 %v6440_v57, %v3276_v15  ;;  %v3415_v12 = vadd.f32 %v6440_v57, %v3277_v21  ;;  %v5012_v2 = vpop.eup %5011  ;;  %5021 = vrcp.f32 %v3188_v4 }
 0x223   : > { %3438 = vst.msk [vmem:[%s6448_s16 + $0x60] sm:$0xff] %vm438_vm1, %v3406_v55  ;;  %v3416_v40 = vadd.f32 %v6440_v57, %v3278_v6  ;;  %3439 = vst.msk [vmem:[%s6448_s16 + $0x68] sm:$0xff] %vm438_vm1, %v3407_v49  ;;  %v3281_v41 = vmul.f32 %v5010_v22, %v6349_v39  ;;  %v3417_v25 = vadd.f32 %v6440_v57, %v3279_v51  ;;  %v5014_v28 = vpop.eup %5013  ;;  %5023 = vrcp.f32 %v3191_v56 }
 0x224   : > { %3440 = vst.msk [vmem:[%s6448_s16 + $0x70] sm:$0xff] %vm438_vm1, %v3408_v62  ;;  %3441 = vst.msk [vmem:[%s6448_s16 + $0x78] sm:$0xff] %vm438_vm1, %v3409_v13  ;;  %v3280_v10 = vmul.f32 %v5012_v2, %v6356_v60  ;;  %v5016_v39 = vpop.eup %5015  ;;  %v3190_v5 = vadd.f32 1.0, %v5014_v28 }
 0x225   : > { %3442 = vst.msk [vmem:[%s6448_s16 + $0x80] sm:$0xff] %vm438_vm1, %v3410_v9  ;;  %3443 = vst.msk [vmem:[%s6448_s16 + $0x88] sm:$0xff] %vm438_vm1, %v3411_v30  ;;  %v3419_v17 = vadd.f32 %v6440_v57, %v3281_v41  ;;  %v3283_v60 = vmul.f32 %v5016_v39, %v6382_v58 }
 0x226   : > { %3444 = vst.msk [vmem:[%s6448_s16 + $0x90] sm:$0xff] %vm438_vm1, %v3412_v19  ;;  %3445 = vst.msk [vmem:[%s6448_s16 + $0x98] sm:$0xff] %vm438_vm1, %v3413_v35  ;;  %v3418_v43 = vadd.f32 %v6440_v57, %v3280_v10  ;;  %5025 = vrcp.f32 %v3190_v5 }
 0x227   : > { %3446 = vst.msk [vmem:[%s6448_s16 + $0xa0] sm:$0xff] %vm438_vm1, %v3414_v29  ;;  %3447 = vst.msk [vmem:[%s6448_s16 + $0xa8] sm:$0xff] %vm438_vm1, %v3415_v12  ;;  %v3421_v11 = vadd.f32 %v6440_v57, %v3283_v60 }
 0x228   : > { %3448 = vst.msk [vmem:[%s6448_s16 + $0xb0] sm:$0xff] %vm438_vm1, %v3416_v40  ;;  %3449 = vst.msk [vmem:[%s6448_s16 + $0xb8] sm:$0xff] %vm438_vm1, %v3417_v25  ;;  %v5018_v32 = vpop.eup %5017 }
 0x229   : > { %3451 = vst.msk [vmem:[%s6448_s16 + $0xc8] sm:$0xff] %vm438_vm1, %v3419_v17  ;;  %3450 = vst.msk [vmem:[%s6448_s16 + $0xc0] sm:$0xff] %vm438_vm1, %v3418_v43  ;;  %v5020_v18 = vpop.eup %5019  ;;  %v3282_v47 = vmul.f32 %v5018_v32, %v6387_v63 }
 0x22a   : > { %3453 = vst.msk [vmem:[%s6448_s16 + $0xd8] sm:$0xff] %vm438_vm1, %v3421_v11  ;;  %v3285_v58 = vmul.f32 %v5020_v18, %v6398_v38 }
 0x22b   : > { %v3420_v42 = vadd.f32 %v6440_v57, %v3282_v47 }
 0x22c   : > { %v3423_v46 = vadd.f32 %v6440_v57, %v3285_v58  ;;  %v5022_v3 = vpop.eup %5021 }
 0x22d   : > { %3452 = vst.msk [vmem:[%s6448_s16 + $0xd0] sm:$0xff] %vm438_vm1, %v3420_v42  ;;  %v5024_v34 = vpop.eup %5023  ;;  %v3284_v50 = vmul.f32 %v5022_v3, %v6412_v31 }
 0x22e   : > { %3455 = vst.msk [vmem:[%s6448_s16 + $0xe8] sm:$0xff] %vm438_vm1, %v3423_v46  ;;  %v3287_v63 = vmul.f32 %v5024_v34, %v6415_v23 }
 0x22f   : > { %v3422_v16 = vadd.f32 %v6440_v57, %v3284_v50 }
 0x230   : > { %v5026_v21 = vpop.eup %5025  ;;  %v3425_v37 = vadd.f32 %v6440_v57, %v3287_v63 }
 0x231   : > { %v3286_v38 = vmul.f32 %v5026_v21, %v6423_v27  ;;  %3454 = vst.msk [vmem:[%s6448_s16 + $0xe0] sm:$0xff] %vm438_vm1, %v3422_v16 }
 0x232   : > { %3457 = vst.msk [vmem:[%s6448_s16 + $0xf8] sm:$0xff] %vm438_vm1, %v3425_v37 }
 0x233   : > { %v3424_v1 = vadd.f32 %v6440_v57, %v3286_v38 }
 0x235   : > { %3456 = vst.msk [vmem:[%s6448_s16 + $0xf0] sm:$0xff] %vm438_vm1, %v3424_v1 }
 0x236 PF: > { %s16_s21 = sadd.s32 1, %s5033_s21  }
 0x237   : > { %p13_p4 = scmp.ge.s32.totalorder %s16_s21, 4  }
 0x239   :  { %15 = sbr.rel (!%p13_p4) target bundleno = 1 (0x1), region = 82 }

// kernel: down_block_forward.6
= control target key start
LH: loop header
LB: loop body
LE: loop exit
PB: predicated region body
PF: predicated region fallthrough
CT: control target
= control target key end

     0   :  { %s5448_s21 = smov 0   ;;  %s7105_s0 = inlined_call_operand.vmem [shape: f32[2,18,18,8], index: 0, kind: input, shape index: {}]   ;;  %s7106_s1 = inlined_call_operand.vmem [shape: f32[9,8,8], index: 1, kind: input, shape index: {}]   ;;  %s7107_s2 = inlined_call_operand.vmem [shape: f32[1,8], index: 2, kind: input, shape index: {}]   ;;  %s7108_s3 = inlined_call_operand.vmem [shape: f32[2,16,16,4], index: 3, kind: input, shape index: {}]   ;;  %s7109_s4 = inlined_call_operand.vmem [shape: f32[4,8], index: 4, kind: input, shape index: {}]   ;;  %s7110_s5 = inlined_call_operand.vmem [shape: f32[1,8], index: 5, kind: input, shape index: {}]   ;;  %s7111_s6 = inlined_call_operand.vmem [shape: f32[2,16,16,8], index: 6, kind: output, shape index: {}]  }
   0x1 LB: > { %s3805_s22 = sadd.s32 4294967295, %s5411_s21   ;;  %p3809_p0 = scmp.ge.s32.totalorder %s5411_s21, 1  ;;  %s5411_s21 = sphi %s5448_s21, %s16_s21  }
   0x2   : > { %p222_p1 = scmp.lt.s32.totalorder %s5411_s21, 3 }
   0x4   : > { %p223_p2 = pnand %p3809_p0, %p222_p1 }
   0x6   : > { %226 = sbr.rel (%p223_p2) target bundleno = 594 (0x252), region = 44 }
   0xd   : > { %v3946_v0 = vld [vmem:[%s7106_s1 + $0x20] sm:$0xff]  ;;  %v3815_v1 = vld [vmem:[%s7106_s1 + $0x8] sm:$0xff]  ;;  %p257_p3 = scmp.lt.s32.totalorder %s3805_s22, 1  ;;  %vm375_vm0 = vcmask 1046528   ;;  %vm458_vm1 = vcmask 64512   ;;  %v5539_v33 = vld [vmem:[%s7106_s1 + $0x30] sm:$0xff] }
   0xe   : > { %v3979_v2 = vld [vmem:[%s7106_s1 + $0x28] sm:$0xff]  ;;  %4712 = vmatprep.subr.mxu0 %v3946_v0  ;;  %4512 = vmatprep.subr.mxu1 %v3815_v1  ;;  %v326_v3 = vld [vmem:[%s7106_s1] sm:$0xff]  ;;  %v5549_v35 = vld [vmem:[%s7106_s1 + $0x10] sm:$0xff]  ;;  %vm1037_vm2 = vcmask 1045504   ;;  %vm3445_vm3 = vcmask 1043456   ;;  %vm3348_vm4 = vcmask 31744  }
   0xf   : > { %4713 = vmatpush3.msra.mxu0 %v3946_v0  ;;  %4513 = vmatpush3.msra.mxu1 %v3815_v1  ;;  %s7273_s22 = smov (!%p257_p3, %s3805_s22), 1 }
  0x10   : > { %4762 = vmatprep.subr.mxu0 %v3979_v2  ;;  %4562 = vmatprep.subr.mxu1 %v326_v3  ;;  %s5268_s7 = smul.u32 432, %s7273_s22  ;;  %s4180_s25 = sshll.u32 %s7273_s22, 8 }
  0x11   : > { %s6478_s28 = scalar_lea.vmem %s7108_s3, %s4180_s25  ;;  %s6825_s11 = scalar_lea.vmem %s7111_s6, %s4180_s25 }
  0x12   : > { %s5474_s10 = scalar_lea.vmem %s7105_s0, %s5268_s7 }
  0x13   : > { %v5477_v4 = vld [vmem:[%s5474_s10] sm:$0xff]  ;;  %v5480_v5 = vld [vmem:[%s5474_s10 + $0x8] sm:$0xff]  ;;  %v5483_v6 = vld [vmem:[%s5474_s10 + $0x18] sm:$0xff] }
  0x14   : > { %7171 = vst [vmem:[#allocation2_spill] sm:$0xff] %v5483_v6  ;;  %v376_v7 = vrot.slane %v5477_v4, 1  ;;  %v377_v8 = vrot.slane %v5480_v5, 1  ;;  %v5488_v9 = vld [vmem:[%s5474_s10 + $0x20] sm:$0xff]  ;;  %v381_v10 = vrot.slane %v5483_v6, 1  ;;  %v5500_v15 = vld [vmem:[%s5474_s10 + $0x30] sm:$0xff] }
  0x15   : > { %7172 = vst [vmem:[#allocation3_spill] sm:$0xff] %v5488_v9  ;;  %v5492_v11 = vld [vmem:[%s5474_s10 + $0x10] sm:$0x3]  ;;  %v382_v12 = vrot.slane %v5488_v9, 1  ;;  %v5497_v14 = vld [vmem:[%s5474_s10 + $0x28] sm:$0x3] }
  0x16   : > { %7173 = vst [vmem:[#allocation4_spill] sm:$0xff] %v5492_v11  ;;  %v379_v13 = vrot.slane %v5492_v11, 1  ;;  %v378_v16 = vsel %vm375_vm0, %v376_v7, %v377_v8  ;;  %v384_v17 = vrot.slane %v5497_v14, 1  ;;  %v5505_v18 = vld [vmem:[%s5474_s10 + $0x38] sm:$0xff]  ;;  %v386_v19 = vrot.slane %v5500_v15, 1  ;;  %v5517_v25 = vld [vmem:[%s5474_s10 + $0x48] sm:$0xff] }
  0x17   : > { %v5509_v20 = vld [vmem:[%s5474_s10 + $0x40] sm:$0x3]  ;;  %4514 = vmatprep.mubr.msk.f32.mxu1 %vm458_vm1, %v378_v16  ;;  %v383_v21 = vsel %vm375_vm0, %v381_v10, %v382_v12  ;;  %v387_v23 = vrot.slane %v5505_v18, 1  ;;  %v5520_v26 = vld [vmem:[%s5474_s10 + $0x50] sm:$0xff]  ;;  %v5523_v27 = vld [vmem:[%s5474_s10 + $0x58] sm:$0x3] }
  0x18   : > { %v380_v22 = vsel %vm375_vm0, %v377_v8, %v379_v13  ;;  %v389_v24 = vrot.slane %v5509_v20, 1  ;;  %4714 = vmatprep.mubr.msk.f32.mxu0 %vm458_vm1, %v383_v21  ;;  %v385_v28 = vsel %vm375_vm0, %v382_v12, %v384_v17  ;;  %v391_v29 = vrot.slane %v5517_v25, 1  ;;  %v5531_v31 = vld [vmem:[%s5474_s10 + $0x60] sm:$0xff]  ;;  %v5534_v32 = vld [vmem:[%s5474_s10 + $0x68] sm:$0xff]  ;;  %v5563_v41 = vld [vmem:[%s5474_s10 + $0x70] sm:$0x3] }
  0x19   : > { %4515 = vmatmul.mubr.msk.f32.vlgmr.msra.gmra.mrb[0].mxu1 %vm458_vm1, %v380_v22  ;;  %v392_v30 = vrot.slane %v5520_v26, 1  ;;  %4715 = vmatmul.mubr.msk.f32.vlgmr.msra.gmra.mrb[0].mxu0 %vm458_vm1, %v385_v28  ;;  %v5544_v34 = vsel %vm375_vm0, %v386_v19, %v387_v23  ;;  %v394_v37 = vrot.slane %v5523_v27, 1  ;;  %v396_v39 = vrot.slane %v5531_v31, 1  ;;  %v5568_v42 = vld [vmem:[%s5474_s10 + $0x78] sm:$0xff]  ;;  %v5571_v43 = vld [vmem:[%s5474_s10 + $0x80] sm:$0xff]  ;;  %v5595_v50 = vld [vmem:[%s5474_s10 + $0x90] sm:$0xff] }
  0x1a   : > { %4517 = vmatprep.mubr.msk.f32.mxu1 %vm458_vm1, %v383_v21  ;;  %7174 = vst [vmem:[#allocation5_spill] sm:$0xff] %v5544_v34  ;;  %4763 = vmatpush3.msra.mxu0 %v3979_v2  ;;  %v5554_v36 = vsel %vm375_vm0, %v387_v23, %v389_v24  ;;  %v397_v40 = vrot.slane %v5534_v32, 1  ;;  %v399_v45 = vrot.slane %v5563_v41, 1  ;;  %v401_v47 = vrot.slane %v5568_v42, 1  ;;  %v5590_v49 = vld [vmem:[%s5474_s10 + $0x88] sm:$0x3] }
  0x1b   : > { %4717 = vmatprep.mubr.msk.f32.mxu0 %vm458_vm1, %v5544_v34  ;;  %7175 = vst [vmem:[#allocation6_spill] sm:$0xff] %v5554_v36  ;;  %v5558_v38 = vsel %vm375_vm0, %v391_v29, %v392_v30  ;;  %4563 = vmatpush3.msra.mxu1 %v326_v3  ;;  %v5581_v44 = vsel %vm375_vm0, %v392_v30, %v394_v37  ;;  %v402_v48 = vrot.slane %v5571_v43, 1  ;;  %v5598_v51 = vld [vmem:[%s5474_s10 + $0x98] sm:$0xff]  ;;  %v404_v53 = vrot.slane %v5590_v49, 1  ;;  %v5616_v57 = vld [vmem:[%s5474_s10 + $0xa0] sm:$0x3] }
  0x1c   : > { %7176 = vst [vmem:[#allocation7_spill] sm:$0xff] %v5558_v38  ;;  %4812 = vmatprep.subr.mxu0 %v5539_v33  ;;  %4612 = vmatprep.subr.mxu1 %v5549_v35  ;;  %7177 = vst [vmem:[#allocation8_spill] sm:$0xff] %v5581_v44  ;;  %v5585_v46 = vsel %vm375_vm0, %v396_v39, %v397_v40  ;;  %v5607_v52 = vsel %vm375_vm0, %v397_v40, %v399_v45  ;;  %v406_v55 = vrot.slane %v5595_v50, 1  ;;  %v5621_v58 = vld [vmem:[%s5474_s10 + $0xa8] sm:$0xff]  ;;  %v5624_v59 = vld [vmem:[%s5474_s10 + $0xb0] sm:$0xff] }
  0x1d   : > { %4518 = vmatmul.mubr.msk.f32.gmra.mrb[2].mxu1 %vm458_vm1, %v385_v28  ;;  %4718 = vmatmul.mubr.msk.f32.gmra.mrb[2].mxu0 %vm458_vm1, %v5554_v36  ;;  %7178 = vst [vmem:[#allocation9_spill] sm:$0xff] %v5585_v46  ;;  %7179 = vst [vmem:[#allocation10_spill] sm:$0xff] %v5607_v52  ;;  %v5611_v54 = vsel %vm375_vm0, %v401_v47, %v402_v48  ;;  %v407_v56 = vrot.slane %v5598_v51, 1  ;;  %v5633_v60 = vsel %vm375_vm0, %v402_v48, %v404_v53  ;;  %v5642_v1 = vld [vmem:[%s5474_s10 + $0xb8] sm:$0x3]  ;;  %v5647_v2 = vld [vmem:[%s5474_s10 + $0xc0] sm:$0xff] }
  0x1e   : > { %4520 = vmatprep.mubr.msk.f32.mxu1 %vm458_vm1, %v5544_v34  ;;  %4720 = vmatprep.mubr.msk.f32.mxu0 %vm458_vm1, %v5558_v38  ;;  %7180 = vst [vmem:[#allocation11_spill] sm:$0xff] %v5611_v54  ;;  %7181 = vst [vmem:[#allocation12_spill] sm:$0xff] %v5633_v60  ;;  %v409_v61 = vrot.slane %v5616_v57, 1  ;;  %v411_v63 = vrot.slane %v5621_v58, 1  ;;  %v412_v0 = vrot.slane %v5624_v59, 1  ;;  %v5650_v3 = vld [vmem:[%s5474_s10 + $0xc8] sm:$0xff] }
  0x1f   : > { %v5637_v62 = vsel %vm375_vm0, %v406_v55, %v407_v56  ;;  %v414_v8 = vrot.slane %v5642_v1, 1  ;;  %v416_v12 = vrot.slane %v5647_v2, 1  ;;  %v417_v13 = vrot.slane %v5650_v3, 1  ;;  %v5668_v16 = vld [vmem:[%s5474_s10 + $0xd0] sm:$0x3]  ;;  %v5673_v17 = vld [vmem:[%s5474_s10 + $0xd8] sm:$0xff] }
  0x20   : > { %7182 = vst [vmem:[#allocation13_spill] sm:$0xff] %v5637_v62  ;;  %v5659_v7 = vsel %vm375_vm0, %v407_v56, %v409_v61  ;;  %v5663_v10 = vsel %vm375_vm0, %v411_v63, %v412_v0  ;;  %v5676_v19 = vld [vmem:[%s5474_s10 + $0xe0] sm:$0xff]  ;;  %v419_v22 = vrot.slane %v5668_v16, 1  ;;  %v421_v24 = vrot.slane %v5673_v17, 1  ;;  %v5694_v29 = vld [vmem:[%s5474_s10 + $0xe8] sm:$0x3] }
  0x21   : > { %4521 = vmatmul.mubr.msk.f32.gmra.mrb[4].mxu1 %vm458_vm1, %v5554_v36  ;;  %4721 = vmatmul.mubr.msk.f32.gmra.mrb[4].mxu0 %vm458_vm1, %v5581_v44  ;;  %7183 = vst [vmem:[#allocation14_spill] sm:$0xff] %v5659_v7  ;;  %7184 = vst [vmem:[#allocation15_spill] sm:$0xff] %v5663_v10  ;;  %v5685_v21 = vsel %vm375_vm0, %v412_v0, %v414_v8  ;;  %v5689_v23 = vsel %vm375_vm0, %v416_v12, %v417_v13  ;;  %v422_v28 = vrot.slane %v5676_v19, 1  ;;  %v5699_v30 = vld [vmem:[%s5474_s10 + $0xf0] sm:$0xff]  ;;  %v5702_v37 = vld [vmem:[%s5474_s10 + $0xf8] sm:$0xff] }
  0x22   : > { %4523 = vmatprep.mubr.msk.f32.mxu1 %vm458_vm1, %v5558_v38  ;;  %4723 = vmatprep.mubr.msk.f32.mxu0 %vm458_vm1, %v5585_v46  ;;  %7185 = vst [vmem:[#allocation16_spill] sm:$0xff] %v5685_v21  ;;  %7186 = vst [vmem:[#allocation17_spill] sm:$0xff] %v5689_v23  ;;  %v5711_v39 = vsel %vm375_vm0, %v417_v13, %v419_v22  ;;  %v424_v40 = vrot.slane %v5694_v29, 1  ;;  %v426_v47 = vrot.slane %v5699_v30, 1  ;;  %v427_v48 = vrot.slane %v5702_v37, 1  ;;  %v5725_v55 = vld [vmem:[%s5474_s10 + $0x108] sm:$0xff] }
  0x23   : > { %7187 = vst [vmem:[#allocation18_spill] sm:$0xff] %v5711_v39  ;;  %v5715_v45 = vsel %vm375_vm0, %v421_v24, %v422_v28  ;;  %v5720_v53 = vld [vmem:[%s5474_s10 + $0x100] sm:$0x3]  ;;  %v5728_v56 = vld [vmem:[%s5474_s10 + $0x110] sm:$0xff]  ;;  %v431_v8 = vrot.slane %v5725_v55, 1  ;;  %v5754_v24 = vld [vmem:[%s5474_s10 + $0x128] sm:$0xff] }
  0x24   : > { %7188 = vst [vmem:[#allocation19_spill] sm:$0xff] %v5715_v45  ;;  %v5737_v61 = vsel %vm375_vm0, %v422_v28, %v424_v40  ;;  %v429_v63 = vrot.slane %v5720_v53, 1  ;;  %v5741_v0 = vsel %vm375_vm0, %v426_v47, %v427_v48  ;;  %v432_v12 = vrot.slane %v5728_v56, 1  ;;  %v5746_v13 = vld [vmem:[%s5474_s10 + $0x118] sm:$0x3]  ;;  %v5751_v22 = vld [vmem:[%s5474_s10 + $0x120] sm:$0xff] }
  0x25   : > { %4524 = vmatmul.mubr.msk.f32.gmra.mrb[6].mxu1 %vm458_vm1, %v5581_v44  ;;  %4724 = vmatmul.mubr.msk.f32.gmra.mrb[6].mxu0 %vm458_vm1, %v5607_v52  ;;  %7189 = vst [vmem:[#allocation20_spill] sm:$0xff] %v5737_v61  ;;  %7190 = vst [vmem:[#allocation21_spill] sm:$0xff] %v5741_v0  ;;  %v434_v40 = vrot.slane %v5746_v13, 1  ;;  %v5850_v38 = vld [vmem:[%s5474_s10 + $0x178] sm:$0x3]  ;;  %v5858_v36 = vld [vmem:[%s5474_s10 + $0x188] sm:$0xff] }
  0x26   : > { %4526 = vmatprep.mubr.msk.f32.mxu1 %vm458_vm1, %v5585_v46  ;;  %4726 = vmatprep.mubr.msk.f32.mxu0 %vm458_vm1, %v5611_v54  ;;  %v5763_v28 = vsel %vm375_vm0, %v427_v48, %v429_v63  ;;  %v5767_v47 = vsel %vm375_vm0, %v431_v8, %v432_v12  ;;  %v5780_v48 = vld [vmem:[%s5474_s10 + $0x140] sm:$0xff]  ;;  %7200 = vst [vmem:[#allocation31_spill] sm:$0xff] %v5858_v36  ;;  %v1708_v34 = vrot.slane %v5858_v36, 1  ;;  %v5876_v11 = vld [vmem:[%s5474_s10 + $0x190] sm:$0x3] }
  0x27   : > { %7191 = vst [vmem:[#allocation22_spill] sm:$0xff] %v5763_v28  ;;  %7192 = vst [vmem:[#allocation23_spill] sm:$0xff] %v5767_v47  ;;  %v5789_v63 = vsel %vm375_vm0, %v432_v12, %v434_v40  ;;  %v5806_v12 = vld [vmem:[%s5474_s10 + $0x158] sm:$0xff] }
  0x28   : > { %7193 = vst [vmem:[#allocation24_spill] sm:$0xff] %v5789_v63 }
  0x29   : > { %4527 = vmatmul.mubr.msk.f32.gmra.mrb[8].mxu1 %vm458_vm1, %v5607_v52  ;;  %4727 = vmatmul.mubr.msk.f32.gmra.mrb[8].mxu0 %vm458_vm1, %v5633_v60  ;;  %v5824_v52 = vld [vmem:[%s5474_s10 + $0x160] sm:$0x3] }
  0x2a   : > { %4529 = vmatprep.mubr.msk.f32.mxu1 %vm458_vm1, %v5611_v54  ;;  %4729 = vmatprep.mubr.msk.f32.mxu0 %vm458_vm1, %v5637_v62  ;;  %v447_v54 = vrot.slane %v5806_v12, 1 }
  0x2d   : > { %4530 = vmatmul.mubr.msk.f32.gmra.mrb[10].mxu1 %vm458_vm1, %v5633_v60  ;;  %4730 = vmatmul.mubr.msk.f32.gmra.mrb[10].mxu0 %vm458_vm1, %v5659_v7 }
  0x2e   : > { %4532 = vmatprep.mubr.msk.f32.mxu1 %vm458_vm1, %v5637_v62  ;;  %4732 = vmatprep.mubr.msk.f32.mxu0 %vm458_vm1, %v5663_v10  ;;  %v5798_v62 = vld [vmem:[%s5474_s10 + $0x148] sm:$0x3] }
  0x2f   : > { %v444_v40 = vrot.slane %v5798_v62, 1 }
  0x31   : > { %4533 = vmatmul.mubr.msk.f32.gmra.mrb[12].mxu1 %vm458_vm1, %v5659_v7  ;;  %4733 = vmatmul.mubr.msk.f32.gmra.mrb[12].mxu0 %vm458_vm1, %v5685_v21  ;;  %v442_v7 = vrot.slane %v5780_v48, 1 }
  0x32   : > { %4535 = vmatprep.mubr.msk.f32.mxu1 %vm458_vm1, %v5663_v10  ;;  %4735 = vmatprep.mubr.msk.f32.mxu0 %vm458_vm1, %v5689_v23 }
  0x35   : > { %4536 = vmatmul.mubr.msk.f32.gmra.mrb[14].mxu1 %vm458_vm1, %v5685_v21  ;;  %4736 = vmatmul.mubr.msk.f32.gmra.mrb[14].mxu0 %vm458_vm1, %v5711_v39  ;;  %v5772_v21 = vld [vmem:[%s5474_s10 + $0x130] sm:$0x3] }
  0x36   : > { %4538 = vmatprep.mubr.msk.f32.mxu1 %vm458_vm1, %v5689_v23  ;;  %4738 = vmatprep.mubr.msk.f32.mxu0 %vm458_vm1, %v5715_v45  ;;  %v437_v23 = vrot.slane %v5754_v24, 1  ;;  %v439_v8 = vrot.slane %v5772_v21, 1 }
  0x39   : > { %4539 = vmatmul.mubr.msk.f32.gmra.mrb[16].mxu1 %vm458_vm1, %v5711_v39  ;;  %4739 = vmatmul.mubr.msk.f32.gmra.mrb[16].mxu0 %vm458_vm1, %v5737_v61  ;;  %v436_v39 = vrot.slane %v5751_v22, 1 }
  0x3a   : > { %4541 = vmatprep.mubr.msk.f32.mxu1 %vm458_vm1, %v5715_v45  ;;  %4741 = vmatprep.mubr.msk.f32.mxu0 %vm458_vm1, %v5741_v0  ;;  %v5777_v45 = vld [vmem:[%s5474_s10 + $0x138] sm:$0xff] }
  0x3b   : > { %v441_v10 = vrot.slane %v5777_v45, 1 }
  0x3d   : > { %4542 = vmatmul.mubr.msk.f32.gmra.mrb[18].mxu1 %vm458_vm1, %v5737_v61  ;;  %4742 = vmatmul.mubr.msk.f32.gmra.mrb[18].mxu0 %vm458_vm1, %v5763_v28  ;;  %v5793_v61 = vsel %vm375_vm0, %v436_v39, %v437_v23  ;;  %v5815_v39 = vsel %vm375_vm0, %v437_v23, %v439_v8  ;;  %v5832_v23 = vld [vmem:[%s5474_s10 + $0x170] sm:$0xff]  ;;  %v449_v8 = vrot.slane %v5824_v52, 1 }
  0x3e   : > { %4544 = vmatprep.mubr.msk.f32.mxu1 %vm458_vm1, %v5741_v0  ;;  %4744 = vmatprep.mubr.msk.f32.mxu0 %vm458_vm1, %v5767_v47  ;;  %7194 = vst [vmem:[#allocation25_spill] sm:$0xff] %v5793_v61  ;;  %v5803_v0 = vld [vmem:[%s5474_s10 + $0x150] sm:$0xff]  ;;  %7195 = vst [vmem:[#allocation26_spill] sm:$0xff] %v5815_v39  ;;  %v452_v44 = vrot.slane %v5832_v23, 1 }
  0x3f   : > { %v446_v60 = vrot.slane %v5803_v0, 1 }
  0x41   : > { %4545 = vmatmul.mubr.msk.f32.gmra.mrb[20].mxu1 %vm458_vm1, %v5763_v28  ;;  %4745 = vmatmul.mubr.msk.f32.gmra.mrb[20].mxu0 %vm458_vm1, %v5789_v63  ;;  %v5819_v28 = vsel %vm375_vm0, %v441_v10, %v442_v7  ;;  %v5841_v10 = vsel %vm375_vm0, %v442_v7, %v444_v40  ;;  %v454_v7 = vrot.slane %v5850_v38, 1 }
  0x42   : > { %4547 = vmatprep.mubr.msk.f32.mxu1 %vm458_vm1, %v5767_v47  ;;  %4747 = vmatprep.mubr.msk.f32.mxu0 %vm458_vm1, %v5793_v61  ;;  %7196 = vst [vmem:[#allocation27_spill] sm:$0xff] %v5819_v28  ;;  %v5829_v47 = vld [vmem:[%s5474_s10 + $0x168] sm:$0xff]  ;;  %7197 = vst [vmem:[#allocation28_spill] sm:$0xff] %v5841_v10 }
  0x43   : > { %v451_v46 = vrot.slane %v5829_v47, 1 }
  0x45   : > { %4548 = vmatmul.mubr.msk.f32.gmra.mrb[22].mxu1 %vm458_vm1, %v5789_v63  ;;  %4748 = vmatmul.mubr.msk.f32.gmra.mrb[22].mxu0 %vm458_vm1, %v5815_v39  ;;  %v5845_v63 = vsel %vm375_vm0, %v446_v60, %v447_v54  ;;  %v5867_v60 = vsel %vm375_vm0, %v447_v54, %v449_v8  ;;  %v5871_v40 = vsel %vm375_vm0, %v451_v46, %v452_v44  ;;  %v1710_v54 = vrot.slane %v5876_v11, 1 }
  0x46   : > { %4550 = vmatprep.mubr.msk.f32.mxu1 %vm458_vm1, %v5793_v61  ;;  %4750 = vmatprep.mubr.msk.f32.mxu0 %vm458_vm1, %v5819_v28  ;;  %7198 = vst [vmem:[#allocation29_spill] sm:$0xff] %v5845_v63  ;;  %v5855_v61 = vld [vmem:[%s5474_s10 + $0x180] sm:$0xff]  ;;  %7201 = vst [vmem:[#allocation32_spill] sm:$0xff] %v5867_v60  ;;  %v5887_v46 = vsel %vm375_vm0, %v452_v44, %v454_v7  ;;  %v1046_v44 = vrot.slane %v5497_v14, 2 }
  0x47   : > { %7199 = vst [vmem:[#allocation30_spill] sm:$0xff] %v5855_v61  ;;  %7202 = vst [vmem:[#allocation33_spill] sm:$0xff] %v5871_v40 }
  0x48   : > { %7203 = vst [vmem:[#allocation34_spill] sm:$0xff] %v5887_v46 }
  0x49   : > { %4551 = vmatmul.mubr.msk.f32.gmra.mrb[24].mxu1 %vm458_vm1, %v5815_v39  ;;  %4751 = vmatmul.mubr.msk.f32.gmra.mrb[24].mxu0 %vm458_vm1, %v5841_v10  ;;  %v1707_v39 = vrot.slane %v5855_v61, 1 }
  0x4a   : > { %4553 = vmatprep.mubr.msk.f32.mxu1 %vm458_vm1, %v5819_v28  ;;  %4753 = vmatprep.mubr.msk.f32.mxu0 %vm458_vm1, %v5845_v63  ;;  %v1043_v28 = vrot.slane %v5483_v6, 2 }
  0x4b   : > { %v5891_v8 = vsel %vm375_vm0, %v1707_v39, %v1708_v34  ;;  %v5905_v39 = vsel %vm375_vm0, %v1708_v34, %v1710_v54  ;;  %v1051_v34 = vrot.slane %v5509_v20, 2  ;;  %v1053_v54 = vrot.slane %v5517_v25, 2  ;;  %v5943_v20 = vld [vmem:[%s7106_s1 + $0x18] sm:$0xff] }
  0x4c   : > { %7204 = vst [vmem:[#allocation35_spill] sm:$0xff] %v5891_v8  ;;  %7205 = vst [vmem:[#allocation36_spill] sm:$0xff] %v5905_v39 }
  0x4d   : > { %4554 = vmatmul.mubr.msk.f32.gmra.mrb[26].mxu1 %vm458_vm1, %v5841_v10  ;;  %4754 = vmatmul.mubr.msk.f32.gmra.mrb[26].mxu0 %vm458_vm1, %v5867_v60  ;;  %v1044_v10 = vrot.slane %v5488_v9, 2 }
  0x4e   : > { %4556 = vmatprep.mubr.msk.f32.mxu1 %vm458_vm1, %v5845_v63  ;;  %4756 = vmatprep.mubr.msk.f32.mxu0 %vm458_vm1, %v5871_v40  ;;  %v1049_v63 = vrot.slane %v5505_v18, 2 }
  0x4f   : > { %v5908_v7 = vsel %vm1037_vm2, %v1043_v28, %v1044_v10  ;;  %v5921_v14 = vsel %vm1037_vm2, %v1044_v10, %v1046_v44 }
  0x50   : > { %v5949_v10 = vsel %vm1037_vm2, %v1049_v63, %v1051_v34  ;;  %v1064_v34 = vrot.slane %v5571_v43, 2 }
  0x51   : > { %4557 = vmatmul.mubr.msk.f32.gmra.mrb[28].mxu1 %vm458_vm1, %v5867_v60  ;;  %4757 = vmatmul.mubr.msk.f32.gmra.mrb[28].mxu0 %vm458_vm1, %v5887_v46  ;;  %v1048_v60 = vrot.slane %v5500_v15, 2 }
  0x52   : > { %4559 = vmatprep.mubr.msk.f32.mxu1 %vm458_vm1, %v5871_v40  ;;  %4759 = vmatprep.mubr.msk.f32.mxu0 %vm458_vm1, %v5891_v8  ;;  %v1054_v8 = vrot.slane %v5520_v26, 2  ;;  %v1059_v40 = vrot.slane %v5534_v32, 2 }
  0x53   : > { %v5925_v28 = vsel %vm1037_vm2, %v1048_v60, %v1049_v63  ;;  %v1056_v60 = vrot.slane %v5523_v27, 2  ;;  %v1063_v63 = vrot.slane %v5568_v42, 2 }
  0x54   : > { %v5953_v44 = vsel %vm1037_vm2, %v1053_v54, %v1054_v8  ;;  %v1068_v54 = vrot.slane %v5595_v50, 2 }
  0x55   : > { %4560 = vmatmul.mubr.msk.f32.gmra.mrb[30].mxu1 %vm458_vm1, %v5887_v46  ;;  %4760 = vmatmul.mubr.msk.f32.gmra.mrb[30].mxu0 %vm458_vm1, %v5905_v39  ;;  %v5934_v39 = vld [vmem:[%s7106_s1 + $0x38] sm:$0xff]  ;;  %v1058_v46 = vrot.slane %v5531_v31, 2  ;;  %v5969_v27 = vsel %vm1037_vm2, %v1054_v8, %v1056_v60  ;;  %v5990_v8 = vsel %vm1037_vm2, %v1063_v63, %v1064_v34  ;;  %v1069_v60 = vrot.slane %v5598_v51, 2 }
  0x56   : > { %4564 = vmatprep.mubr.msk.f32.mxu1 %vm458_vm1, %v5477_v4  ;;  %4764 = vmatprep.mubr.msk.f32.mxu0 %vm458_vm1, %v5908_v7  ;;  %v1073_v63 = vrot.slane %v5621_v58, 2 }
  0x59   : > { %4565 = vmatmul.mubr.msk.f32.vlgmr.msra.gmra.mrb[0].mxu1 %vm458_vm1, %v5480_v5  ;;  %4765 = vmatmul.mubr.msk.f32.vlgmr.msra.gmra.mrb[0].mxu0 %vm458_vm1, %v5921_v14 }
  0x5a   : > { %4567 = vmatprep.mubr.msk.f32.mxu1 %vm458_vm1, %v5483_v6  ;;  %4813 = vmatpush3.msra.mxu0 %v5539_v33  ;;  %v1061_v33 = vrot.slane %v5563_v41, 2  ;;  %v1079_v6 = vrot.slane %v5650_v3, 2 }
  0x5b   : > { %4767 = vmatprep.mubr.msk.f32.mxu0 %vm458_vm1, %v5925_v28  ;;  %4613 = vmatpush3.msra.mxu1 %v5549_v35  ;;  %v5973_v35 = vsel %vm1037_vm2, %v1058_v46, %v1059_v40  ;;  %v1066_v46 = vrot.slane %v5590_v49, 2 }
  0x5c   : > { %4862 = vmatprep.subr.mxu0 %v5934_v39  ;;  %4662 = vmatprep.subr.mxu1 %v5943_v20  ;;  %v5986_v41 = vsel %vm1037_vm2, %v1059_v40, %v1061_v33  ;;  %v1071_v40 = vrot.slane %v5616_v57, 2  ;;  %v6007_v33 = vsel %vm1037_vm2, %v1068_v54, %v1069_v60  ;;  %v1078_v54 = vrot.slane %v5647_v2, 2 }
  0x5d   : > { %4568 = vmatmul.mubr.msk.f32.gmra.mrb[2].mxu1 %vm458_vm1, %v5488_v9  ;;  %4768 = vmatmul.mubr.msk.f32.gmra.mrb[2].mxu0 %vm458_vm1, %v5949_v10  ;;  %v6003_v49 = vsel %vm1037_vm2, %v1064_v34, %v1066_v46  ;;  %7206 = vst [vmem:[#allocation37_spill] sm:$0xff] %v6007_v33  ;;  %v1074_v9 = vrot.slane %v5624_v59, 2  ;;  %v1076_v34 = vrot.slane %v5642_v1, 2 }
  0x5e   : > { %4570 = vmatprep.mubr.msk.f32.mxu1 %vm458_vm1, %v5500_v15  ;;  %4770 = vmatprep.mubr.msk.f32.mxu0 %vm458_vm1, %v5953_v44  ;;  %v6020_v57 = vsel %vm1037_vm2, %v1069_v60, %v1071_v40  ;;  %v1081_v60 = vrot.slane %v5668_v16, 2  ;;  %v6041_v40 = vsel %vm1037_vm2, %v1078_v54, %v1079_v6  ;;  %v1086_v16 = vrot.slane %v5694_v29, 2 }
  0x5f   : > { %v6024_v46 = vsel %vm1037_vm2, %v1073_v63, %v1074_v9  ;;  %v6037_v1 = vsel %vm1037_vm2, %v1074_v9, %v1076_v34  ;;  %7208 = vst [vmem:[#allocation39_spill] sm:$0xff] %v6041_v40  ;;  %v1083_v63 = vrot.slane %v5673_v17, 2  ;;  %v1088_v54 = vrot.slane %v5699_v30, 2 }
  0x60   : > { %7207 = vst [vmem:[#allocation38_spill] sm:$0xff] %v6024_v46  ;;  %v6054_v9 = vsel %vm1037_vm2, %v1079_v6, %v1081_v60  ;;  %v1091_v29 = vrot.slane %v5720_v53, 2 }
  0x61   : > { %4571 = vmatmul.mubr.msk.f32.gmra.mrb[4].mxu1 %vm458_vm1, %v5505_v18  ;;  %4771 = vmatmul.mubr.msk.f32.gmra.mrb[4].mxu0 %vm458_vm1, %v5969_v27 }
  0x62   : > { %4573 = vmatprep.mubr.msk.f32.mxu1 %vm458_vm1, %v5517_v25  ;;  %4773 = vmatprep.mubr.msk.f32.mxu0 %vm458_vm1, %v5973_v35 }
  0x65   : > { %4574 = vmatmul.mubr.msk.f32.gmra.mrb[6].mxu1 %vm458_vm1, %v5520_v26  ;;  %4774 = vmatmul.mubr.msk.f32.gmra.mrb[6].mxu0 %vm458_vm1, %v5986_v41 }
  0x66   : > { %4576 = vmatprep.mubr.msk.f32.mxu1 %vm458_vm1, %v5531_v31  ;;  %4776 = vmatprep.mubr.msk.f32.mxu0 %vm458_vm1, %v5990_v8 }
  0x69   : > { %4577 = vmatmul.mubr.msk.f32.gmra.mrb[8].mxu1 %vm458_vm1, %v5534_v32  ;;  %4777 = vmatmul.mubr.msk.f32.gmra.mrb[8].mxu0 %vm458_vm1, %v6003_v49 }
  0x6a   : > { %4579 = vmatprep.mubr.msk.f32.mxu1 %vm458_vm1, %v5568_v42  ;;  %4779 = vmatprep.mubr.msk.f32.mxu0 %vm458_vm1, %v6007_v33  ;;  %v1084_v33 = vrot.slane %v5676_v19, 2 }
  0x6c   : > { %v6058_v34 = vsel %vm1037_vm2, %v1083_v63, %v1084_v33  ;;  %v6071_v6 = vsel %vm1037_vm2, %v1084_v33, %v1086_v16  ;;  %v1093_v63 = vrot.slane %v5725_v55, 2  ;;  %v1096_v33 = vrot.slane %v5746_v13, 2 }
  0x6d   : > { %4580 = vmatmul.mubr.msk.f32.gmra.mrb[10].mxu1 %vm458_vm1, %v5571_v43  ;;  %4780 = vmatmul.mubr.msk.f32.gmra.mrb[10].mxu0 %vm458_vm1, %v6020_v57  ;;  %7209 = vst [vmem:[#allocation40_spill] sm:$0xff] %v6058_v34 }
  0x6e   : > { %4582 = vmatprep.mubr.msk.f32.mxu1 %vm458_vm1, %v5595_v50  ;;  %4782 = vmatprep.mubr.msk.f32.mxu0 %vm458_vm1, %v6024_v46  ;;  %v1089_v46 = vrot.slane %v5702_v37, 2 }
  0x70   : > { %v6075_v60 = vsel %vm1037_vm2, %v1088_v54, %v1089_v46  ;;  %v6088_v53 = vsel %vm1037_vm2, %v1089_v46, %v1091_v29  ;;  %v1098_v54 = vrot.slane %v5751_v22, 2  ;;  %v1101_v46 = vrot.slane %v5772_v21, 2 }
  0x71   : > { %4583 = vmatmul.mubr.msk.f32.gmra.mrb[12].mxu1 %vm458_vm1, %v5598_v51  ;;  %4783 = vmatmul.mubr.msk.f32.gmra.mrb[12].mxu0 %vm458_vm1, %v6037_v1  ;;  %7210 = vst [vmem:[#allocation41_spill] sm:$0xff] %v6075_v60 }
  0x72   : > { %4585 = vmatprep.mubr.msk.f32.mxu1 %vm458_vm1, %v5621_v58  ;;  %4785 = vmatprep.mubr.msk.f32.mxu0 %vm458_vm1, %v6041_v40  ;;  %v1094_v40 = vrot.slane %v5728_v56, 2 }
  0x74   : > { %v6092_v16 = vsel %vm1037_vm2, %v1093_v63, %v1094_v40  ;;  %v6105_v13 = vsel %vm1037_vm2, %v1094_v40, %v1096_v33  ;;  %v1103_v63 = vrot.slane %v5777_v45, 2  ;;  %v1106_v40 = vrot.slane %v5798_v62, 2 }
  0x75   : > { %4586 = vmatmul.mubr.msk.f32.gmra.mrb[14].mxu1 %vm458_vm1, %v5624_v59  ;;  %4786 = vmatmul.mubr.msk.f32.gmra.mrb[14].mxu0 %vm458_vm1, %v6054_v9  ;;  %7211 = vst [vmem:[#allocation42_spill] sm:$0xff] %v6092_v16 }
  0x76   : > { %4588 = vmatprep.mubr.msk.f32.mxu1 %vm458_vm1, %v5647_v2  ;;  %4788 = vmatprep.mubr.msk.f32.mxu0 %vm458_vm1, %v6058_v34  ;;  %v1099_v34 = vrot.slane %v5754_v24, 2 }
  0x78   : > { %v6109_v29 = vsel %vm1037_vm2, %v1098_v54, %v1099_v34  ;;  %v6122_v21 = vsel %vm1037_vm2, %v1099_v34, %v1101_v46  ;;  %v1108_v54 = vrot.slane %v5803_v0, 2  ;;  %v1111_v34 = vrot.slane %v5824_v52, 2 }
  0x79   : > { %4589 = vmatmul.mubr.msk.f32.gmra.mrb[16].mxu1 %vm458_vm1, %v5650_v3  ;;  %4789 = vmatmul.mubr.msk.f32.gmra.mrb[16].mxu0 %vm458_vm1, %v6071_v6  ;;  %7212 = vst [vmem:[#allocation43_spill] sm:$0xff] %v6109_v29 }
  0x7a   : > { %4591 = vmatprep.mubr.msk.f32.mxu1 %vm458_vm1, %v5673_v17  ;;  %4791 = vmatprep.mubr.msk.f32.mxu0 %vm458_vm1, %v6075_v60  ;;  %v1104_v60 = vrot.slane %v5780_v48, 2 }
  0x7c   : > { %v6126_v33 = vsel %vm1037_vm2, %v1103_v63, %v1104_v60  ;;  %v6139_v62 = vsel %vm1037_vm2, %v1104_v60, %v1106_v40  ;;  %v1113_v63 = vrot.slane %v5829_v47, 2  ;;  %v1116_v60 = vrot.slane %v5850_v38, 2 }
  0x7d   : > { %4592 = vmatmul.mubr.msk.f32.gmra.mrb[18].mxu1 %vm458_vm1, %v5676_v19  ;;  %4792 = vmatmul.mubr.msk.f32.gmra.mrb[18].mxu0 %vm458_vm1, %v6088_v53  ;;  %7213 = vst [vmem:[#allocation44_spill] sm:$0xff] %v6126_v33 }
  0x7e   : > { %4594 = vmatprep.mubr.msk.f32.mxu1 %vm458_vm1, %v5699_v30  ;;  %4794 = vmatprep.mubr.msk.f32.mxu0 %vm458_vm1, %v6092_v16  ;;  %v1109_v16 = vrot.slane %v5806_v12, 2 }
  0x80   : > { %v6143_v46 = vsel %vm1037_vm2, %v1108_v54, %v1109_v16  ;;  %v6156_v52 = vsel %vm1037_vm2, %v1109_v16, %v1111_v34  ;;  %v1975_v54 = vrot.slane %v5855_v61, 2  ;;  %v1978_v16 = vrot.slane %v5876_v11, 2 }
  0x81   : > { %4595 = vmatmul.mubr.msk.f32.gmra.mrb[20].mxu1 %vm458_vm1, %v5702_v37  ;;  %4795 = vmatmul.mubr.msk.f32.gmra.mrb[20].mxu0 %vm458_vm1, %v6105_v13  ;;  %7214 = vst [vmem:[#allocation45_spill] sm:$0xff] %v6156_v52  ;;  %v1038_v34 = vrot.slane %v5477_v4, 2 }
  0x82   : > { %4597 = vmatprep.mubr.msk.f32.mxu1 %vm458_vm1, %v5725_v55  ;;  %4797 = vmatprep.mubr.msk.f32.mxu0 %vm458_vm1, %v6109_v29  ;;  %v1114_v29 = vrot.slane %v5832_v23, 2 }
  0x84   : > { %v6160_v40 = vsel %vm1037_vm2, %v1113_v63, %v1114_v29  ;;  %v6173_v38 = vsel %vm1037_vm2, %v1114_v29, %v1116_v60  ;;  %v1039_v63 = vrot.slane %v5480_v5, 2  ;;  %v6206_v29 = vld [vmem:[%s7106_s1 + $0x40] sm:$0xff]  ;;  %v7226_v60 = vld [vmem:[#allocation43_spill] sm:$0xff] }
  0x85   : > { %4598 = vmatmul.mubr.msk.f32.gmra.mrb[22].mxu1 %vm458_vm1, %v5728_v56  ;;  %4798 = vmatmul.mubr.msk.f32.gmra.mrb[22].mxu0 %vm458_vm1, %v6122_v21  ;;  %7215 = vst [vmem:[#allocation46_spill] sm:$0xff] %v6160_v40  ;;  %7216 = vst [vmem:[#allocation47_spill] sm:$0xff] %v6173_v38 }
  0x86   : > { %4600 = vmatprep.mubr.msk.f32.mxu1 %vm458_vm1, %v5751_v22  ;;  %4800 = vmatprep.mubr.msk.f32.mxu0 %vm458_vm1, %v6126_v33  ;;  %v1976_v33 = vrot.slane %v5858_v36, 2  ;;  %v1040_v5 = vsel %vm1037_vm2, %v1038_v34, %v1039_v63  ;;  %v6329_v34 = vld [vmem:[%s5474_s10 + $0x198] sm:$0xff] }
  0x88   : > { %v6179_v36 = vsel %vm1037_vm2, %v1975_v54, %v1976_v33  ;;  %v6191_v4 = vsel %vm1037_vm2, %v1976_v33, %v1978_v16  ;;  %v7224_v33 = vld [vmem:[#allocation41_spill] sm:$0xff]  ;;  %v7227_v54 = vld [vmem:[#allocation44_spill] sm:$0xff]  ;;  %v7228_v16 = vld [vmem:[#allocation30_spill] sm:$0xff] }
  0x89   : > { %4601 = vmatmul.mubr.msk.f32.gmra.mrb[24].mxu1 %vm458_vm1, %v5754_v24  ;;  %4801 = vmatmul.mubr.msk.f32.gmra.mrb[24].mxu0 %vm458_vm1, %v6139_v62  ;;  %7217 = vst [vmem:[#allocation48_spill] sm:$0xff] %v6179_v36 }
  0x8a   : > { %4603 = vmatprep.mubr.msk.f32.mxu1 %vm458_vm1, %v5777_v45  ;;  %4803 = vmatprep.mubr.msk.f32.mxu0 %vm458_vm1, %v6143_v46 }
  0x8d   : > { %4604 = vmatmul.mubr.msk.f32.gmra.mrb[26].mxu1 %vm458_vm1, %v5780_v48  ;;  %4804 = vmatmul.mubr.msk.f32.gmra.mrb[26].mxu0 %vm458_vm1, %v6156_v52  ;;  %v7218_v52 = vld [vmem:[#allocation4_spill] sm:$0xff] }
  0x8e   : > { %4606 = vmatprep.mubr.msk.f32.mxu1 %vm458_vm1, %v5803_v0  ;;  %4806 = vmatprep.mubr.msk.f32.mxu0 %vm458_vm1, %v6160_v40  ;;  %v1041_v61 = vrot.slane %v7218_v52, 2  ;;  %7219 = vst [vmem:[#allocation4_spill] sm:$0xff] %v6191_v4  ;;  %v7225_v52 = vld [vmem:[#allocation42_spill] sm:$0xff] }
  0x90   : > { %v1042_v11 = vsel %vm1037_vm2, %v1039_v63, %v1041_v61  ;;  %v6215_v61 = vld [vmem:[%s7109_s4] sm:$0xf]  ;;  %v7229_v63 = vld [vmem:[#allocation45_spill] sm:$0xff] }
  0x91   : > { %4607 = vmatmul.mubr.msk.f32.gmra.mrb[28].mxu1 %vm458_vm1, %v5806_v12  ;;  %4807 = vmatmul.mubr.msk.f32.gmra.mrb[28].mxu0 %vm458_vm1, %v6173_v38 }
  0x92   : > { %4609 = vmatprep.mubr.msk.f32.mxu1 %vm458_vm1, %v5829_v47  ;;  %4809 = vmatprep.mubr.msk.f32.mxu0 %vm458_vm1, %v6179_v36  ;;  %v7232_v36 = vld [vmem:[#allocation5_spill] sm:$0xff] }
  0x95   : > { %4610 = vmatmul.mubr.msk.f32.gmra.mrb[30].mxu1 %vm458_vm1, %v5832_v23  ;;  %4810 = vmatmul.mubr.msk.f32.gmra.mrb[30].mxu0 %vm458_vm1, %v6191_v4  ;;  %v7231_v4 = vld [vmem:[#allocation2_spill] sm:$0xff] }
  0x96   : > { %4614 = vmatprep.mubr.msk.f32.mxu1 %vm458_vm1, %v1040_v5  ;;  %4814 = vmatprep.mubr.msk.f32.mxu0 %vm458_vm1, %v5500_v15  ;;  %v7230_v5 = vld [vmem:[#allocation31_spill] sm:$0xff] }
  0x99   : > { %4615 = vmatmul.mubr.msk.f32.vlgmr.msra.gmra.mrb[0].mxu1 %vm458_vm1, %v1042_v11  ;;  %4815 = vmatmul.mubr.msk.f32.vlgmr.msra.gmra.mrb[0].mxu0 %vm458_vm1, %v5505_v18  ;;  %v6340_v11 = vld [vmem:[%s5474_s10 + $0x1a0] sm:$0xff] }
  0x9a   : > { %4617 = vmatprep.mubr.msk.f32.mxu1 %vm458_vm1, %v5908_v7  ;;  %4863 = vmatpush3.msra.mxu0 %v5934_v39  ;;  %v7220_v39 = vld [vmem:[#allocation37_spill] sm:$0xff]  ;;  %v7221_v7 = vld [vmem:[#allocation38_spill] sm:$0xff] }
  0x9b   : > { %4817 = vmatprep.mubr.msk.f32.mxu0 %vm458_vm1, %v5517_v25  ;;  %4663 = vmatpush3.msra.mxu1 %v5943_v20  ;;  %v7223_v20 = vld [vmem:[#allocation40_spill] sm:$0xff] }
  0x9c   : > { %4912 = vmatprep.subr.mxu0 %v6206_v29  ;;  %4962 = vmatprep.subr.msk.mxu1 %vm3445_vm3, %v6215_v61 }
  0x9d   : > { %4618 = vmatmul.mubr.msk.f32.gmra.mrb[2].mxu1 %vm458_vm1, %v5921_v14  ;;  %4818 = vmatmul.mubr.msk.f32.gmra.mrb[2].mxu0 %vm458_vm1, %v5520_v26  ;;  %v7222_v14 = vld [vmem:[#allocation39_spill] sm:$0xff] }
  0x9e   : > { %4620 = vmatprep.mubr.msk.f32.mxu1 %vm458_vm1, %v5925_v28  ;;  %4820 = vmatprep.mubr.msk.f32.mxu0 %vm458_vm1, %v5531_v31 }
  0xa1   : > { %4621 = vmatmul.mubr.msk.f32.gmra.mrb[4].mxu1 %vm458_vm1, %v5949_v10  ;;  %4821 = vmatmul.mubr.msk.f32.gmra.mrb[4].mxu0 %vm458_vm1, %v5534_v32 }
  0xa2   : > { %4623 = vmatprep.mubr.msk.f32.mxu1 %vm458_vm1, %v5953_v44  ;;  %4823 = vmatprep.mubr.msk.f32.mxu0 %vm458_vm1, %v5568_v42 }
  0xa5   : > { %4624 = vmatmul.mubr.msk.f32.gmra.mrb[6].mxu1 %vm458_vm1, %v5969_v27  ;;  %4824 = vmatmul.mubr.msk.f32.gmra.mrb[6].mxu0 %vm458_vm1, %v5571_v43 }
  0xa6   : > { %4626 = vmatprep.mubr.msk.f32.mxu1 %vm458_vm1, %v5973_v35  ;;  %4826 = vmatprep.mubr.msk.f32.mxu0 %vm458_vm1, %v5595_v50 }
  0xa9   : > { %4627 = vmatmul.mubr.msk.f32.gmra.mrb[8].mxu1 %vm458_vm1, %v5986_v41  ;;  %4827 = vmatmul.mubr.msk.f32.gmra.mrb[8].mxu0 %vm458_vm1, %v5598_v51 }
  0xaa   : > { %4629 = vmatprep.mubr.msk.f32.mxu1 %vm458_vm1, %v5990_v8  ;;  %4829 = vmatprep.mubr.msk.f32.mxu0 %vm458_vm1, %v5621_v58 }
  0xad   : > { %4630 = vmatmul.mubr.msk.f32.gmra.mrb[10].mxu1 %vm458_vm1, %v6003_v49  ;;  %4830 = vmatmul.mubr.msk.f32.gmra.mrb[10].mxu0 %vm458_vm1, %v5624_v59 }
  0xae   : > { %4632 = vmatprep.mubr.msk.f32.mxu1 %vm458_vm1, %v7220_v39  ;;  %4832 = vmatprep.mubr.msk.f32.mxu0 %vm458_vm1, %v5647_v2 }
  0xb1   : > { %4633 = vmatmul.mubr.msk.f32.gmra.mrb[12].mxu1 %vm458_vm1, %v6020_v57  ;;  %4833 = vmatmul.mubr.msk.f32.gmra.mrb[12].mxu0 %vm458_vm1, %v5650_v3 }
  0xb2   : > { %4635 = vmatprep.mubr.msk.f32.mxu1 %vm458_vm1, %v7221_v7  ;;  %4835 = vmatprep.mubr.msk.f32.mxu0 %vm458_vm1, %v5673_v17 }
  0xb5   : > { %4636 = vmatmul.mubr.msk.f32.gmra.mrb[14].mxu1 %vm458_vm1, %v6037_v1  ;;  %4836 = vmatmul.mubr.msk.f32.gmra.mrb[14].mxu0 %vm458_vm1, %v5676_v19 }
  0xb6   : > { %4638 = vmatprep.mubr.msk.f32.mxu1 %vm458_vm1, %v7222_v14  ;;  %4838 = vmatprep.mubr.msk.f32.mxu0 %vm458_vm1, %v5699_v30 }
  0xb9   : > { %4639 = vmatmul.mubr.msk.f32.gmra.mrb[16].mxu1 %vm458_vm1, %v6054_v9  ;;  %4839 = vmatmul.mubr.msk.f32.gmra.mrb[16].mxu0 %vm458_vm1, %v5702_v37 }
  0xba   : > { %4641 = vmatprep.mubr.msk.f32.mxu1 %vm458_vm1, %v7223_v20  ;;  %4841 = vmatprep.mubr.msk.f32.mxu0 %vm458_vm1, %v5725_v55 }
  0xbd   : > { %4642 = vmatmul.mubr.msk.f32.gmra.mrb[18].mxu1 %vm458_vm1, %v6071_v6  ;;  %4842 = vmatmul.mubr.msk.f32.gmra.mrb[18].mxu0 %vm458_vm1, %v5728_v56 }
  0xbe   : > { %4644 = vmatprep.mubr.msk.f32.mxu1 %vm458_vm1, %v7224_v33  ;;  %4844 = vmatprep.mubr.msk.f32.mxu0 %vm458_vm1, %v5751_v22 }
  0xc1   : > { %4645 = vmatmul.mubr.msk.f32.gmra.mrb[20].mxu1 %vm458_vm1, %v6088_v53  ;;  %4845 = vmatmul.mubr.msk.f32.gmra.mrb[20].mxu0 %vm458_vm1, %v5754_v24 }
  0xc2   : > { %4647 = vmatprep.mubr.msk.f32.mxu1 %vm458_vm1, %v7225_v52  ;;  %4847 = vmatprep.mubr.msk.f32.mxu0 %vm458_vm1, %v5777_v45 }
  0xc5   : > { %4648 = vmatmul.mubr.msk.f32.gmra.mrb[22].mxu1 %vm458_vm1, %v6105_v13  ;;  %4848 = vmatmul.mubr.msk.f32.gmra.mrb[22].mxu0 %vm458_vm1, %v5780_v48 }
  0xc6   : > { %4650 = vmatprep.mubr.msk.f32.mxu1 %vm458_vm1, %v7226_v60  ;;  %4850 = vmatprep.mubr.msk.f32.mxu0 %vm458_vm1, %v5803_v0 }
  0xc9   : > { %4651 = vmatmul.mubr.msk.f32.gmra.mrb[24].mxu1 %vm458_vm1, %v6122_v21  ;;  %4851 = vmatmul.mubr.msk.f32.gmra.mrb[24].mxu0 %vm458_vm1, %v5806_v12 }
  0xca   : > { %4653 = vmatprep.mubr.msk.f32.mxu1 %vm458_vm1, %v7227_v54  ;;  %4853 = vmatprep.mubr.msk.f32.mxu0 %vm458_vm1, %v5829_v47 }
  0xcd   : > { %4654 = vmatmul.mubr.msk.f32.gmra.mrb[26].mxu1 %vm458_vm1, %v6139_v62  ;;  %4854 = vmatmul.mubr.msk.f32.gmra.mrb[26].mxu0 %vm458_vm1, %v5832_v23 }
  0xce   : > { %4656 = vmatprep.mubr.msk.f32.mxu1 %vm458_vm1, %v6143_v46  ;;  %4856 = vmatprep.mubr.msk.f32.mxu0 %vm458_vm1, %v7228_v16 }
  0xd1   : > { %4657 = vmatmul.mubr.msk.f32.gmra.mrb[28].mxu1 %vm458_vm1, %v7229_v63  ;;  %4857 = vmatmul.mubr.msk.f32.gmra.mrb[28].mxu0 %vm458_vm1, %v7230_v5  ;;  %v7233_v63 = vld [vmem:[#allocation3_spill] sm:$0xff] }
  0xd2   : > { %4659 = vmatprep.mubr.msk.f32.mxu1 %vm458_vm1, %v6160_v40  ;;  %4859 = vmatprep.mubr.msk.f32.mxu0 %vm458_vm1, %v6329_v34  ;;  %v7234_v40 = vld [vmem:[#allocation6_spill] sm:$0xff] }
  0xd5   : > { %4660 = vmatmul.mubr.msk.f32.gmra.mrb[30].mxu1 %vm458_vm1, %v6173_v38  ;;  %4860 = vmatmul.mubr.msk.f32.gmra.mrb[30].mxu0 %vm458_vm1, %v6340_v11  ;;  %v7235_v38 = vld [vmem:[#allocation7_spill] sm:$0xff] }
  0xd6   : > { %4664 = vmatprep.mubr.msk.f32.mxu1 %vm458_vm1, %v7231_v4  ;;  %4864 = vmatprep.mubr.msk.f32.mxu0 %vm458_vm1, %v7232_v36  ;;  %v7236_v36 = vld [vmem:[#allocation8_spill] sm:$0xff]  ;;  %v6460_v4 = vld [vmem:[%s5474_s10 + $0x1a8] sm:$0x3] }
  0xd9   : > { %4665 = vmatmul.mubr.msk.f32.vlgmr.msra.gmra.mrb[0].mxu1 %vm458_vm1, %v7233_v63  ;;  %4865 = vmatmul.mubr.msk.f32.vlgmr.msra.gmra.mrb[0].mxu0 %vm458_vm1, %v7234_v40  ;;  %v7237_v40 = vld [vmem:[#allocation9_spill] sm:$0xff]  ;;  %v3308_v63 = vld [vmem:[%s6478_s28] sm:$0xff] }
  0xda   : > { %4667 = vmatprep.mubr.msk.f32.mxu1 %vm458_vm1, %v5500_v15  ;;  %4913 = vmatpush3.msra.mxu0 %v6206_v29  ;;  %v7238_v15 = vld [vmem:[#allocation10_spill] sm:$0xff]  ;;  %v2512_v29 = vrot.slane %v6460_v4, 1 }
  0xdb   : > { %4867 = vmatprep.mubr.msk.f32.mxu0 %vm458_vm1, %v7235_v38  ;;  %4963 = vmatpush3.msk.msra.mxu1 %vm3445_vm3, %v6215_v61  ;;  %v7239_v38 = vld [vmem:[#allocation11_spill] sm:$0xff] }
  0xdd   : > { %4668 = vmatmul.mubr.msk.f32.gmra.mrb[2].mxu1 %vm458_vm1, %v5505_v18  ;;  %4868 = vmatmul.mubr.msk.f32.gmra.mrb[2].mxu0 %vm458_vm1, %v7236_v36  ;;  %v7240_v18 = vld [vmem:[#allocation12_spill] sm:$0xff]  ;;  %v3312_v36 = vld [vmem:[%s6478_s28 + $0x20] sm:$0xff] }
  0xde   : > { %4670 = vmatprep.mubr.msk.f32.mxu1 %vm458_vm1, %v5517_v25  ;;  %4870 = vmatprep.mubr.msk.f32.mxu0 %vm458_vm1, %v7237_v40  ;;  %v7241_v25 = vld [vmem:[#allocation13_spill] sm:$0xff] }
  0xdf   : > { %v7263_v40 = vld [vmem:[#allocation45_spill] sm:$0xff] }
  0xe1   : > { %4671 = vmatmul.mubr.msk.f32.gmra.mrb[4].mxu1 %vm458_vm1, %v5520_v26  ;;  %4871 = vmatmul.mubr.msk.f32.gmra.mrb[4].mxu0 %vm458_vm1, %v7238_v15  ;;  %v7242_v26 = vld [vmem:[#allocation14_spill] sm:$0xff] }
  0xe2   : > { %4673 = vmatprep.mubr.msk.f32.mxu1 %vm458_vm1, %v5531_v31  ;;  %4873 = vmatprep.mubr.msk.f32.mxu0 %vm458_vm1, %v7239_v38  ;;  %v7243_v31 = vld [vmem:[#allocation15_spill] sm:$0xff]  ;;  %v7264_v15 = vld [vmem:[#allocation46_spill] sm:$0xff]  ;;  %v2777_v38 = vrot.slane %v6329_v34, 2 }
  0xe5   : > { %4674 = vmatmul.mubr.msk.f32.gmra.mrb[6].mxu1 %vm458_vm1, %v5534_v32  ;;  %4874 = vmatmul.mubr.msk.f32.gmra.mrb[6].mxu0 %vm458_vm1, %v7240_v18  ;;  %v7244_v32 = vld [vmem:[#allocation16_spill] sm:$0xff]  ;;  %v2778_v18 = vrot.slane %v6340_v11, 2 }
  0xe6   : > { %4676 = vmatprep.mubr.msk.f32.mxu1 %vm458_vm1, %v5568_v42  ;;  %4876 = vmatprep.mubr.msk.f32.mxu0 %vm458_vm1, %v7241_v25  ;;  %v7245_v42 = vld [vmem:[#allocation17_spill] sm:$0xff]  ;;  %v3337_v25 = vld [vmem:[%s6478_s28 + $0xe8] sm:$0xff] }
  0xe9   : > { %4677 = vmatmul.mubr.msk.f32.gmra.mrb[8].mxu1 %vm458_vm1, %v5571_v43  ;;  %4877 = vmatmul.mubr.msk.f32.gmra.mrb[8].mxu0 %vm458_vm1, %v7242_v26  ;;  %v7246_v43 = vld [vmem:[#allocation18_spill] sm:$0xff]  ;;  %v7266_v26 = vld [vmem:[#allocation48_spill] sm:$0xff] }
  0xea   : > { %4679 = vmatprep.mubr.msk.f32.mxu1 %vm458_vm1, %v5595_v50  ;;  %4879 = vmatprep.mubr.msk.f32.mxu0 %vm458_vm1, %v7243_v31  ;;  %v7247_v50 = vld [vmem:[#allocation19_spill] sm:$0xff]  ;;  %v2780_v31 = vrot.slane %v6460_v4, 2 }
  0xed   : > { %4680 = vmatmul.mubr.msk.f32.gmra.mrb[10].mxu1 %vm458_vm1, %v5598_v51  ;;  %4880 = vmatmul.mubr.msk.f32.gmra.mrb[10].mxu0 %vm458_vm1, %v7244_v32  ;;  %v7248_v51 = vld [vmem:[#allocation20_spill] sm:$0xff] }
  0xee   : > { %4682 = vmatprep.mubr.msk.f32.mxu1 %vm458_vm1, %v5621_v58  ;;  %4882 = vmatprep.mubr.msk.f32.mxu0 %vm458_vm1, %v7245_v42  ;;  %v7249_v58 = vld [vmem:[#allocation21_spill] sm:$0xff]  ;;  %v3338_v32 = vld [vmem:[%s6478_s28 + $0xf0] sm:$0xff]  ;;  %v2779_v42 = vsel %vm1037_vm2, %v2777_v38, %v2778_v18 }
  0xf1   : > { %4683 = vmatmul.mubr.msk.f32.gmra.mrb[12].mxu1 %vm458_vm1, %v5624_v59  ;;  %4883 = vmatmul.mubr.msk.f32.gmra.mrb[12].mxu0 %vm458_vm1, %v7246_v43  ;;  %v7250_v59 = vld [vmem:[#allocation22_spill] sm:$0xff]  ;;  %v2781_v43 = vsel %vm1037_vm2, %v2778_v18, %v2780_v31 }
  0xf2   : > { %4685 = vmatprep.mubr.msk.f32.mxu1 %vm458_vm1, %v5647_v2  ;;  %4885 = vmatprep.mubr.msk.f32.mxu0 %vm458_vm1, %v7247_v50  ;;  %v7251_v2 = vld [vmem:[#allocation23_spill] sm:$0xff] }
  0xf5   : > { %4686 = vmatmul.mubr.msk.f32.gmra.mrb[14].mxu1 %vm458_vm1, %v5650_v3  ;;  %4886 = vmatmul.mubr.msk.f32.gmra.mrb[14].mxu0 %vm458_vm1, %v7248_v51  ;;  %v7252_v3 = vld [vmem:[#allocation24_spill] sm:$0xff] }
  0xf6   : > { %4688 = vmatprep.mubr.msk.f32.mxu1 %vm458_vm1, %v5673_v17  ;;  %4888 = vmatprep.mubr.msk.f32.mxu0 %vm458_vm1, %v7249_v58  ;;  %v7253_v17 = vld [vmem:[#allocation25_spill] sm:$0xff] }
  0xf9   : > { %4689 = vmatmul.mubr.msk.f32.gmra.mrb[16].mxu1 %vm458_vm1, %v5676_v19  ;;  %4889 = vmatmul.mubr.msk.f32.gmra.mrb[16].mxu0 %vm458_vm1, %v7250_v59  ;;  %v7254_v19 = vld [vmem:[#allocation26_spill] sm:$0xff] }
  0xfa   : > { %4691 = vmatprep.mubr.msk.f32.mxu1 %vm458_vm1, %v5699_v30  ;;  %4891 = vmatprep.mubr.msk.f32.mxu0 %vm458_vm1, %v7251_v2  ;;  %v7255_v30 = vld [vmem:[#allocation27_spill] sm:$0xff] }
  0xfd   : > { %4692 = vmatmul.mubr.msk.f32.gmra.mrb[18].mxu1 %vm458_vm1, %v5702_v37  ;;  %4892 = vmatmul.mubr.msk.f32.gmra.mrb[18].mxu0 %vm458_vm1, %v7252_v3  ;;  %v7256_v37 = vld [vmem:[#allocation28_spill] sm:$0xff] }
  0xfe   : > { %4694 = vmatprep.mubr.msk.f32.mxu1 %vm458_vm1, %v5725_v55  ;;  %4894 = vmatprep.mubr.msk.f32.mxu0 %vm458_vm1, %v7253_v17  ;;  %v7257_v55 = vld [vmem:[#allocation29_spill] sm:$0xff] }
 0x101   : > { %4695 = vmatmul.mubr.msk.f32.gmra.mrb[20].mxu1 %vm458_vm1, %v5728_v56  ;;  %4895 = vmatmul.mubr.msk.f32.gmra.mrb[20].mxu0 %vm458_vm1, %v7254_v19  ;;  %v7258_v56 = vld [vmem:[#allocation32_spill] sm:$0xff] }
 0x102   : > { %4697 = vmatprep.mubr.msk.f32.mxu1 %vm458_vm1, %v5751_v22  ;;  %4897 = vmatprep.mubr.msk.f32.mxu0 %vm458_vm1, %v7255_v30  ;;  %v7259_v22 = vld [vmem:[#allocation33_spill] sm:$0xff] }
 0x105   : > { %4698 = vmatmul.mubr.msk.f32.gmra.mrb[22].mxu1 %vm458_vm1, %v5754_v24  ;;  %4898 = vmatmul.mubr.msk.f32.gmra.mrb[22].mxu0 %vm458_vm1, %v7256_v37  ;;  %v2509_v24 = vrot.slane %v6329_v34, 1  ;;  %v7267_v34 = vld [vmem:[#allocation4_spill] sm:$0xff] }
 0x106   : > { %4700 = vmatprep.mubr.msk.f32.mxu1 %vm458_vm1, %v5777_v45  ;;  %4900 = vmatprep.mubr.msk.f32.mxu0 %vm458_vm1, %v7257_v55  ;;  %v2510_v45 = vrot.slane %v6340_v11, 1  ;;  %v3339_v11 = vld [vmem:[%s6478_s28 + $0xf8] sm:$0xff] }
 0x108   : > { %v2511_v61 = vsel %vm375_vm0, %v2509_v24, %v2510_v45 }
 0x109   : > { %4701 = vmatmul.mubr.msk.f32.gmra.mrb[24].mxu1 %vm458_vm1, %v5780_v48  ;;  %4901 = vmatmul.mubr.msk.f32.gmra.mrb[24].mxu0 %vm458_vm1, %v7258_v56  ;;  %v7260_v48 = vld [vmem:[#allocation34_spill] sm:$0xff] }
 0x10a   : > { %4703 = vmatprep.mubr.msk.f32.mxu1 %vm458_vm1, %v5803_v0  ;;  %4903 = vmatprep.mubr.msk.f32.mxu0 %vm458_vm1, %v7259_v22  ;;  %v7261_v0 = vld [vmem:[#allocation35_spill] sm:$0xff] }
 0x10d   : > { %4704 = vmatmul.mubr.msk.f32.gmra.mrb[26].mxu1 %vm458_vm1, %v5806_v12  ;;  %4904 = vmatmul.mubr.msk.f32.gmra.mrb[26].mxu0 %vm458_vm1, %v7260_v48  ;;  %v2513_v12 = vsel %vm375_vm0, %v2510_v45, %v2512_v29 }
 0x10e   : > { %4706 = vmatprep.mubr.msk.f32.mxu1 %vm458_vm1, %v5829_v47  ;;  %4906 = vmatprep.mubr.msk.f32.mxu0 %vm458_vm1, %v7261_v0  ;;  %v7262_v47 = vld [vmem:[#allocation36_spill] sm:$0xff] }
 0x111   : > { %4707 = vmatmul.mubr.msk.f32.gmra.mrb[28].mxu1 %vm458_vm1, %v5832_v23  ;;  %4907 = vmatmul.mubr.msk.f32.gmra.mrb[28].mxu0 %vm458_vm1, %v7262_v47  ;;  %v3309_v23 = vld [vmem:[%s6478_s28 + $0x8] sm:$0xff] }
 0x112   : > { %4709 = vmatprep.mubr.msk.f32.mxu1 %vm458_vm1, %v7228_v16  ;;  %4909 = vmatprep.mubr.msk.f32.mxu0 %vm458_vm1, %v2511_v61  ;;  %v3310_v16 = vld [vmem:[%s6478_s28 + $0x10] sm:$0xff] }
 0x115   : > { %4710 = vmatmul.mubr.msk.f32.gmra.mrb[30].mxu1 %vm458_vm1, %v7230_v5  ;;  %4910 = vmatmul.mubr.msk.f32.gmra.mrb[30].mxu0 %vm458_vm1, %v2513_v12  ;;  %v3311_v5 = vld [vmem:[%s6478_s28 + $0x18] sm:$0xff] }
 0x116   : > { %4964 = vmatprep.mubr.msk.f32.mxu1 %vm3348_vm4, %v3308_v63  ;;  %4914 = vmatprep.mubr.msk.f32.mxu0 %vm458_vm1, %v5925_v28  ;;  %v3313_v28 = vld [vmem:[%s6478_s28 + $0x28] sm:$0xff] }
 0x119   : > { %4965 = vmatmul.mubr.msk.f32.vlgmr.msra.gmra.mrb[32].mxu1 %vm3348_vm4, %v3309_v23  ;;  %4915 = vmatmul.mubr.msk.f32.vlgmr.msra.gmra.mrb[0].mxu0 %vm458_vm1, %v5949_v10  ;;  %v3314_v10 = vld [vmem:[%s6478_s28 + $0x30] sm:$0xff] }
 0x11a   : > { %4967 = vmatprep.mubr.msk.f32.mxu1 %vm3348_vm4, %v3310_v16  ;;  %4917 = vmatprep.mubr.msk.f32.mxu0 %vm458_vm1, %v5953_v44  ;;  %v3315_v44 = vld [vmem:[%s6478_s28 + $0x38] sm:$0xff] }
 0x11d   : > { %4968 = vmatmul.mubr.msk.f32.gmra.mrb[34].mxu1 %vm3348_vm4, %v3311_v5  ;;  %4918 = vmatmul.mubr.msk.f32.gmra.mrb[2].mxu0 %vm458_vm1, %v5969_v27  ;;  %v3316_v27 = vld [vmem:[%s6478_s28 + $0x40] sm:$0xff] }
 0x11e   : > { %4970 = vmatprep.mubr.msk.f32.mxu1 %vm3348_vm4, %v3312_v36  ;;  %4920 = vmatprep.mubr.msk.f32.mxu0 %vm458_vm1, %v5973_v35  ;;  %v3317_v35 = vld [vmem:[%s6478_s28 + $0x48] sm:$0xff] }
 0x121   : > { %4971 = vmatmul.mubr.msk.f32.gmra.mrb[36].mxu1 %vm3348_vm4, %v3313_v28  ;;  %4921 = vmatmul.mubr.msk.f32.gmra.mrb[4].mxu0 %vm458_vm1, %v5986_v41  ;;  %v3318_v41 = vld [vmem:[%s6478_s28 + $0x50] sm:$0xff] }
 0x122   : > { %4973 = vmatprep.mubr.msk.f32.mxu1 %vm3348_vm4, %v3314_v10  ;;  %4923 = vmatprep.mubr.msk.f32.mxu0 %vm458_vm1, %v5990_v8  ;;  %v3319_v8 = vld [vmem:[%s6478_s28 + $0x58] sm:$0xff] }
 0x125   : > { %4974 = vmatmul.mubr.msk.f32.gmra.mrb[38].mxu1 %vm3348_vm4, %v3315_v44  ;;  %4924 = vmatmul.mubr.msk.f32.gmra.mrb[6].mxu0 %vm458_vm1, %v6003_v49  ;;  %v3320_v49 = vld [vmem:[%s6478_s28 + $0x60] sm:$0xff] }
 0x126   : > { %4976 = vmatprep.mubr.msk.f32.mxu1 %vm3348_vm4, %v3316_v27  ;;  %4926 = vmatprep.mubr.msk.f32.mxu0 %vm458_vm1, %v7220_v39  ;;  %v3321_v39 = vld [vmem:[%s6478_s28 + $0x68] sm:$0xff] }
 0x129   : > { %4977 = vmatmul.mubr.msk.f32.gmra.mrb[40].mxu1 %vm3348_vm4, %v3317_v35  ;;  %4927 = vmatmul.mubr.msk.f32.gmra.mrb[8].mxu0 %vm458_vm1, %v6020_v57  ;;  %v3322_v57 = vld [vmem:[%s6478_s28 + $0x70] sm:$0xff] }
 0x12a   : > { %4979 = vmatprep.mubr.msk.f32.mxu1 %vm3348_vm4, %v3318_v41  ;;  %4929 = vmatprep.mubr.msk.f32.mxu0 %vm458_vm1, %v7221_v7  ;;  %v3323_v7 = vld [vmem:[%s6478_s28 + $0x78] sm:$0xff] }
 0x12d   : > { %4980 = vmatmul.mubr.msk.f32.gmra.mrb[42].mxu1 %vm3348_vm4, %v3319_v8  ;;  %4930 = vmatmul.mubr.msk.f32.gmra.mrb[10].mxu0 %vm458_vm1, %v6037_v1  ;;  %v3324_v1 = vld [vmem:[%s6478_s28 + $0x80] sm:$0xff] }
 0x12e   : > { %4982 = vmatprep.mubr.msk.f32.mxu1 %vm3348_vm4, %v3320_v49  ;;  %4932 = vmatprep.mubr.msk.f32.mxu0 %vm458_vm1, %v7222_v14  ;;  %v3325_v14 = vld [vmem:[%s6478_s28 + $0x88] sm:$0xff]  ;;  %v6679_v49 = vld [vmem:[%s7107_s2] ss:$0 sm:$0xff] }
 0x131   : > { %4983 = vmatmul.mubr.msk.f32.gmra.mrb[44].mxu1 %vm3348_vm4, %v3321_v39  ;;  %4933 = vmatmul.mubr.msk.f32.gmra.mrb[12].mxu0 %vm458_vm1, %v6054_v9  ;;  %v3326_v9 = vld [vmem:[%s6478_s28 + $0x90] sm:$0xff] }
 0x132   : > { %4985 = vmatprep.mubr.msk.f32.mxu1 %vm3348_vm4, %v3322_v57  ;;  %4935 = vmatprep.mubr.msk.f32.mxu0 %vm458_vm1, %v7223_v20  ;;  %v3327_v20 = vld [vmem:[%s6478_s28 + $0x98] sm:$0xff] }
 0x135   : > { %4986 = vmatmul.mubr.msk.f32.gmra.mrb[46].mxu1 %vm3348_vm4, %v3323_v7  ;;  %4936 = vmatmul.mubr.msk.f32.gmra.mrb[14].mxu0 %vm458_vm1, %v6071_v6  ;;  %v3328_v6 = vld [vmem:[%s6478_s28 + $0xa0] sm:$0xff] }
 0x136   : > { %4988 = vmatprep.mubr.msk.f32.mxu1 %vm3348_vm4, %v3324_v1  ;;  %4938 = vmatprep.mubr.msk.f32.mxu0 %vm458_vm1, %v7224_v33  ;;  %v3329_v33 = vld [vmem:[%s6478_s28 + $0xa8] sm:$0xff] }
 0x139   : > { %4989 = vmatmul.mubr.msk.f32.gmra.mrb[48].mxu1 %vm3348_vm4, %v3325_v14  ;;  %4939 = vmatmul.mubr.msk.f32.gmra.mrb[16].mxu0 %vm458_vm1, %v6088_v53  ;;  %v3330_v53 = vld [vmem:[%s6478_s28 + $0xb0] sm:$0xff] }
 0x13a   : > { %4991 = vmatprep.mubr.msk.f32.mxu1 %vm3348_vm4, %v3326_v9  ;;  %4941 = vmatprep.mubr.msk.f32.mxu0 %vm458_vm1, %v7225_v52  ;;  %v3331_v52 = vld [vmem:[%s6478_s28 + $0xb8] sm:$0xff] }
 0x13d   : > { %4992 = vmatmul.mubr.msk.f32.gmra.mrb[50].mxu1 %vm3348_vm4, %v3327_v20  ;;  %4942 = vmatmul.mubr.msk.f32.gmra.mrb[18].mxu0 %vm458_vm1, %v6105_v13  ;;  %v3332_v13 = vld [vmem:[%s6478_s28 + $0xc0] sm:$0xff] }
 0x13e   : > { %4994 = vmatprep.mubr.msk.f32.mxu1 %vm3348_vm4, %v3328_v6  ;;  %4944 = vmatprep.mubr.msk.f32.mxu0 %vm458_vm1, %v7226_v60  ;;  %v3333_v60 = vld [vmem:[%s6478_s28 + $0xc8] sm:$0xff] }
 0x141   : > { %4995 = vmatmul.mubr.msk.f32.gmra.mrb[52].mxu1 %vm3348_vm4, %v3329_v33  ;;  %4945 = vmatmul.mubr.msk.f32.gmra.mrb[20].mxu0 %vm458_vm1, %v6122_v21  ;;  %v3334_v21 = vld [vmem:[%s6478_s28 + $0xd0] sm:$0xff] }
 0x142   : > { %4997 = vmatprep.mubr.msk.f32.mxu1 %vm3348_vm4, %v3330_v53  ;;  %4947 = vmatprep.mubr.msk.f32.mxu0 %vm458_vm1, %v7227_v54  ;;  %v3335_v54 = vld [vmem:[%s6478_s28 + $0xd8] sm:$0xff] }
 0x145   : > { %4998 = vmatmul.mubr.msk.f32.gmra.mrb[54].mxu1 %vm3348_vm4, %v3331_v52  ;;  %4948 = vmatmul.mubr.msk.f32.gmra.mrb[22].mxu0 %vm458_vm1, %v6139_v62  ;;  %v3336_v62 = vld [vmem:[%s6478_s28 + $0xe0] sm:$0xff] }
 0x146   : > { %5000 = vmatprep.mubr.msk.f32.mxu1 %vm3348_vm4, %v3332_v13  ;;  %4950 = vmatprep.mubr.msk.f32.mxu0 %vm458_vm1, %v6143_v46  ;;  %v7265_v46 = vld [vmem:[#allocation47_spill] sm:$0xff] }
 0x149   : > { %5001 = vmatmul.mubr.msk.f32.gmra.mrb[56].mxu1 %vm3348_vm4, %v3333_v60  ;;  %4951 = vmatmul.mubr.msk.f32.gmra.mrb[24].mxu0 %vm458_vm1, %v7263_v40 }
 0x14a   : > { %5003 = vmatprep.mubr.msk.f32.mxu1 %vm3348_vm4, %v3334_v21  ;;  %4953 = vmatprep.mubr.msk.f32.mxu0 %vm458_vm1, %v7264_v15 }
 0x14d   : > { %5004 = vmatmul.mubr.msk.f32.gmra.mrb[58].mxu1 %vm3348_vm4, %v3335_v54  ;;  %4954 = vmatmul.mubr.msk.f32.gmra.mrb[26].mxu0 %vm458_vm1, %v7265_v46 }
 0x14e   : > { %5006 = vmatprep.mubr.msk.f32.mxu1 %vm3348_vm4, %v3336_v62  ;;  %4956 = vmatprep.mubr.msk.f32.mxu0 %vm458_vm1, %v7266_v26 }
 0x151   : > { %5007 = vmatmul.mubr.msk.f32.gmra.mrb[60].mxu1 %vm3348_vm4, %v3337_v25  ;;  %4957 = vmatmul.mubr.msk.f32.gmra.mrb[28].mxu0 %vm458_vm1, %v7267_v34 }
 0x152   : > { %5009 = vmatprep.mubr.msk.f32.mxu1 %vm3348_vm4, %v3338_v32  ;;  %4959 = vmatprep.mubr.msk.f32.mxu0 %vm458_vm1, %v2779_v42 }
 0x155   : > { %5010 = vmatmul.mubr.msk.f32.gmra.mrb[62].mxu1 %vm3348_vm4, %v3339_v11  ;;  %4960 = vmatmul.mubr.msk.f32.gmra.mrb[30].mxu0 %vm458_vm1, %v2781_v43 }
 0x1ac   : > { %v4666_v50 = vpop.f32.mrb[0].mxu1 }
 0x1ad   : > { %v1515_v51 = vpop.f32.mrb[1].mxu1 }
 0x1b0   : > { %v4669_v58 = vpop.f32.mrb[2].mxu1 }
 0x1b1   : > { %v1525_v59 = vpop.f32.mrb[3].mxu1 }
 0x1b4   : > { %v4672_v2 = vpop.f32.mrb[4].mxu1 }
 0x1b5   : > { %v1535_v3 = vpop.f32.mrb[5].mxu1 }
 0x1b8   : > { %v6622_v17 = vpop.f32.mrb[6].mxu1 }
 0x1b9   : > { %v6624_v19 = vpop.f32.mrb[7].mxu1 }
 0x1bc   : > { %v6626_v30 = vpop.f32.mrb[8].mxu1 }
 0x1bd   : > { %v6628_v37 = vpop.f32.mrb[9].mxu1 }
 0x1c0   : > { %v6630_v55 = vpop.f32.mrb[10].mxu1 }
 0x1c1   : > { %v6632_v56 = vpop.f32.mrb[11].mxu1 }
 0x1c4   : > { %v6634_v22 = vpop.f32.mrb[12].mxu1 }
 0x1c5   : > { %v6636_v24 = vpop.f32.mrb[13].mxu1 }
 0x1c8   : > { %v6638_v45 = vpop.f32.mrb[14].mxu1 }
 0x1c9   : > { %v6640_v4 = vpop.f32.mrb[15].mxu1 }
 0x1cc   : > { %v6642_v48 = vpop.f32.mrb[16].mxu1 }
 0x1cd   : > { %v6644_v0 = vpop.f32.mrb[17].mxu1 }
 0x1d0   : > { %v6646_v29 = vpop.f32.mrb[18].mxu1 }
 0x1d1   : > { %v6648_v61 = vpop.f32.mrb[19].mxu1 }
 0x1d4   : > { %v6650_v47 = vpop.f32.mrb[20].mxu1 }
 0x1d5   : > { %v6652_v12 = vpop.f32.mrb[21].mxu1 }
 0x1d8   : > { %v6654_v63 = vpop.f32.mrb[22].mxu1 }
 0x1d9   : > { %v6656_v23 = vpop.f32.mrb[23].mxu1 }
 0x1dc   : > { %v6658_v16 = vpop.f32.mrb[24].mxu1 }
 0x1dd   : > { %v6660_v5 = vpop.f32.mrb[25].mxu1 }
 0x1e0   : > { %v6662_v36 = vpop.f32.mrb[26].mxu1 }
 0x1e1   : > { %v6664_v28 = vpop.f32.mrb[27].mxu1 }
 0x1e4   : > { %v6666_v10 = vpop.f32.mrb[28].mxu1 }
 0x1e5   : > { %v6668_v44 = vpop.f32.mrb[29].mxu1 }
 0x1e8   : > { %v6670_v27 = vpop.f32.mrb[30].mxu1 }
 0x1e9   : > { %7268 = vst [vmem:[#allocation37_spill] sm:$0xff] %v6670_v27  ;;  %v6672_v35 = vpop.f32.mrb[31].mxu1 }
 0x1ea   : > { %7269 = vst [vmem:[#allocation38_spill] sm:$0xff] %v6672_v35 }
 0x1ec   : > { %v6674_v41 = vpop.f32.mrb[32].mxu1  ;;  %v4916_v8 = vpop.f32.mrb[0].mxu0 }
 0x1ed   : > { %v3515_v39 = vpop.f32.mrb[33].mxu1  ;;  %v5012_v57 = vadd.f32 %v4916_v8, %v4666_v50  ;;  %v2854_v7 = vpop.f32.mrb[1].mxu0 }
 0x1ee   : > { %v5013_v1 = vadd.f32 %v2854_v7, %v1515_v51 }
 0x1ef   : > { %v6682_v14 = vadd.f32 %v5012_v57, %v6679_v49 }
 0x1f0   : > { %v6684_v9 = vpop.f32.mrb[34].mxu1  ;;  %v6687_v20 = vadd.f32 %v5013_v1, %v6679_v49  ;;  %v4919_v6 = vpop.f32.mrb[2].mxu0 }
 0x1f1   : > { %v6689_v33 = vpop.f32.mrb[35].mxu1  ;;  %v4113_v53 = vmul.f32 -1.442695, %v6682_v14  ;;  %v5014_v52 = vadd.f32 %v4919_v6, %v4669_v58  ;;  %v2864_v13 = vpop.f32.mrb[3].mxu0 }
 0x1f2   : > { %v4112_v60 = vmul.f32 -1.442695, %v6687_v20  ;;  %v5015_v21 = vadd.f32 %v2864_v13, %v1525_v59 }
 0x1f3   : > { %5277 = vpow2.f32 %v4113_v53  ;;  %v6694_v40 = vadd.f32 %v5014_v52, %v6679_v49 }
 0x1f4   : > { %v6696_v54 = vpop.f32.mrb[36].mxu1  ;;  %5279 = vpow2.f32 %v4112_v60  ;;  %v6699_v15 = vadd.f32 %v5015_v21, %v6679_v49  ;;  %v4922_v62 = vpop.f32.mrb[4].mxu0 }
 0x1f5   : > { %v6701_v38 = vpop.f32.mrb[37].mxu1  ;;  %v4115_v18 = vmul.f32 -1.442695, %v6694_v40  ;;  %v5016_v46 = vadd.f32 %v4922_v62, %v4672_v2  ;;  %v2874_v25 = vpop.f32.mrb[5].mxu0 }
 0x1f6   : > { %v4114_v26 = vmul.f32 -1.442695, %v6699_v15  ;;  %v5017_v31 = vadd.f32 %v2874_v25, %v1535_v3 }
 0x1f7   : > { %5281 = vpow2.f32 %v4115_v18  ;;  %v6706_v32 = vadd.f32 %v5016_v46, %v6679_v49 }
 0x1f8   : > { %v6708_v42 = vpop.f32.mrb[38].mxu1  ;;  %5283 = vpow2.f32 %v4114_v26  ;;  %v6711_v34 = vadd.f32 %v5017_v31, %v6679_v49  ;;  %v4925_v11 = vpop.f32.mrb[6].mxu0 }
 0x1f9   : > { %v6713_v43 = vpop.f32.mrb[39].mxu1  ;;  %v4117_v50 = vmul.f32 -1.442695, %v6706_v32  ;;  %v5018_v51 = vadd.f32 %v4925_v11, %v6622_v17  ;;  %v2884_v58 = vpop.f32.mrb[7].mxu0 }
 0x1fa   : > { %v4116_v59 = vmul.f32 -1.442695, %v6711_v34  ;;  %v5019_v2 = vadd.f32 %v2884_v58, %v6624_v19  ;;  %v6732_v19 = vld [vmem:[%s7110_s5] ss:$0 sm:$0xff] }
 0x1fb   : > { %5285 = vpow2.f32 %v4117_v50  ;;  %v6720_v3 = vadd.f32 %v5018_v51, %v6679_v49  ;;  %v6744_v31 = vadd.f32 %v6674_v41, %v6732_v19  ;;  %v6747_v11 = vadd.f32 %v6732_v19, %v3515_v39 }
 0x1fc   : > { %v6722_v8 = vpop.f32.mrb[40].mxu1  ;;  %5287 = vpow2.f32 %v4116_v59  ;;  %v6725_v57 = vadd.f32 %v5019_v2, %v6679_v49  ;;  %v4928_v7 = vpop.f32.mrb[8].mxu0  ;;  %v6753_v2 = vadd.f32 %v6684_v9, %v6732_v19 }
 0x1fd   : > { %v3555_v1 = vpop.f32.mrb[41].mxu1  ;;  %v5278_v6 = vpop.eup %5277  ;;  %v4119_v17 = vmul.f32 -1.442695, %v6720_v3  ;;  %v5020_v53 = vadd.f32 %v4928_v7, %v6626_v30 }
 0x1fe   : > { %v2894_v52 = vpop.f32.mrb[9].mxu0  ;;  %v5280_v13 = vpop.eup %5279  ;;  %v3181_v60 = vadd.f32 1.0, %v5278_v6  ;;  %v4118_v21 = vmul.f32 -1.442695, %v6725_v57 }
 0x1ff   : > { %v5021_v62 = vadd.f32 %v2894_v52, %v6628_v37  ;;  %v3180_v18 = vadd.f32 1.0, %v5280_v13  ;;  %5289 = vpow2.f32 %v4119_v17  ;;  %v6737_v46 = vadd.f32 %v5020_v53, %v6679_v49 }
 0x200   : > { %v4981_v25 = vpop.f32.mrb[42].mxu1  ;;  %5291 = vrcp.f32 %v3181_v60  ;;  %v4931_v26 = vpop.f32.mrb[10].mxu0  ;;  %v6769_v60 = vadd.f32 %v6696_v54, %v6732_v19 }
 0x201   : > { %v6740_v30 = vadd.f32 %v5021_v62, %v6679_v49  ;;  %v3565_v50 = vpop.f32.mrb[43].mxu1  ;;  %v5282_v37 = vpop.eup %5281  ;;  %5293 = vrcp.f32 %v3180_v18  ;;  %v4121_v51 = vmul.f32 -1.442695, %v6737_v46  ;;  %v5022_v58 = vadd.f32 %v4931_v26, %v6630_v55 }
 0x202   : > { %v2904_v59 = vpop.f32.mrb[11].mxu0  ;;  %v5284_v7 = vpop.eup %5283  ;;  %v3183_v6 = vadd.f32 1.0, %v5282_v37  ;;  %5295 = vpow2.f32 %v4118_v21  ;;  %v6762_v55 = vadd.f32 %v6732_v19, %v6689_v33  ;;  %v6781_v37 = vadd.f32 %v6708_v42, %v6732_v19 }
 0x203   : > { %v4120_v41 = vmul.f32 -1.442695, %v6740_v30  ;;  %v5023_v39 = vadd.f32 %v2904_v59, %v6632_v56  ;;  %v3182_v17 = vadd.f32 1.0, %v5284_v7  ;;  %5297 = vpow2.f32 %v4121_v51 }
 0x204   : > { %v6758_v53 = vadd.f32 %v5022_v58, %v6679_v49  ;;  %v4984_v52 = vpop.f32.mrb[44].mxu1  ;;  %5299 = vrcp.f32 %v3183_v6  ;;  %v4934_v13 = vpop.f32.mrb[12].mxu0  ;;  %v6773_v56 = vadd.f32 %v6732_v19, %v6701_v38 }
 0x205   : > { %v6765_v9 = vadd.f32 %v5023_v39, %v6679_v49  ;;  %v6775_v21 = vpop.f32.mrb[45].mxu1  ;;  %v5286_v62 = vpop.eup %5285  ;;  %5301 = vrcp.f32 %v3182_v17  ;;  %v5024_v18 = vadd.f32 %v4934_v13, %v6634_v22  ;;  %v6790_v22 = vadd.f32 %v6732_v19, %v6713_v43 }
 0x206   : > { %v4123_v33 = vmul.f32 -1.442695, %v6758_v53  ;;  %v2914_v26 = vpop.f32.mrb[13].mxu0  ;;  %v5288_v51 = vpop.eup %5287  ;;  %v3185_v54 = vadd.f32 1.0, %v5286_v62  ;;  %5303 = vpow2.f32 %v4120_v41  ;;  %v6797_v41 = vadd.f32 %v6722_v8, %v6732_v19 }
 0x207   : > { %v4122_v58 = vmul.f32 -1.442695, %v6765_v9  ;;  %v5025_v38 = vadd.f32 %v2914_v26, %v6636_v24  ;;  %v3184_v59 = vadd.f32 1.0, %v5288_v51  ;;  %v6786_v7 = vadd.f32 %v5024_v18, %v6679_v49 }
 0x208   : > { %5305 = vpow2.f32 %v4123_v33  ;;  %v4987_v6 = vpop.f32.mrb[46].mxu1  ;;  %v4937_v39 = vpop.f32.mrb[14].mxu0  ;;  %v6800_v24 = vadd.f32 %v6732_v19, %v3555_v1  ;;  %v6807_v18 = vadd.f32 %v4981_v25, %v6732_v19 }
 0x209   : > { %5307 = vrcp.f32 %v3185_v54  ;;  %v6793_v42 = vadd.f32 %v5025_v38, %v6679_v49  ;;  %v6802_v17 = vpop.f32.mrb[47].mxu1  ;;  %v5290_v13 = vpop.eup %5289  ;;  %v4125_v43 = vmul.f32 -1.442695, %v6786_v7  ;;  %v5026_v62 = vadd.f32 %v4937_v39, %v6638_v45 }
 0x20a   : > { %5309 = vrcp.f32 %v3184_v59  ;;  %v2924_v33 = vpop.f32.mrb[15].mxu0  ;;  %v5292_v26 = vpop.eup %5291  ;;  %v3187_v51 = vadd.f32 1.0, %v5290_v13  ;;  %v6816_v45 = vadd.f32 %v6732_v19, %v3565_v50 }
 0x20b   : > { %5311 = vpow2.f32 %v4122_v58  ;;  %v4124_v8 = vmul.f32 -1.442695, %v6793_v42  ;;  %v5027_v1 = vadd.f32 %v2924_v33, %v6640_v4  ;;  %v5294_v54 = vpop.eup %5293  ;;  %v6812_v38 = vadd.f32 %v5026_v62, %v6679_v49 }
 0x20c   : > { %5313 = vpow2.f32 %v4125_v43  ;;  %v3277_v59 = vmul.f32 %v5292_v26, %v6682_v14  ;;  %v6818_v39 = vpop.f32.mrb[48].mxu1  ;;  %v5296_v25 = vpop.eup %5295  ;;  %v3276_v58 = vmul.f32 %v5294_v54, %v6687_v20  ;;  %v6832_v14 = vadd.f32 %v4984_v52, %v6732_v19 }
 0x20d   : > { %5315 = vrcp.f32 %v3187_v51  ;;  %v6828_v4 = vadd.f32 %v5027_v1, %v6679_v49  ;;  %v4940_v13 = vpop.f32.mrb[16].mxu0  ;;  %v6834_v50 = vpop.f32.mrb[49].mxu1  ;;  %v3186_v62 = vadd.f32 1.0, %v5296_v25  ;;  %v4127_v33 = vmul.f32 -1.442695, %v6812_v38 }
 0x20e   : > { %v5298_v43 = vpop.eup %5297  ;;  %5317 = vpow2.f32 %v4124_v8  ;;  %v3675_v26 = vadd.f32 %v6744_v31, %v3277_v59  ;;  %v2934_v51 = vpop.f32.mrb[17].mxu0  ;;  %v3674_v54 = vadd.f32 %v6747_v11, %v3276_v58  ;;  %v5028_v52 = vadd.f32 %v4940_v13, %v6642_v48 }
 0x20f   : > { %v5300_v1 = vpop.eup %5299  ;;  %v3189_v35 = vadd.f32 1.0, %v5298_v43  ;;  %v4126_v20 = vmul.f32 -1.442695, %v6828_v4  ;;  %5319 = vrcp.f32 %v3186_v62  ;;  %v5029_v8 = vadd.f32 %v2934_v51, %v6644_v0 }
 0x210   : > { %v5302_v27 = vpop.eup %5301  ;;  %3707 = vst.msk [vmem:[%s6825_s11 + $0x8] sm:$0xff] %vm458_vm1, %v3675_v26  ;;  %v3279_v25 = vmul.f32 %v5300_v1, %v6694_v40  ;;  %v6847_v31 = vadd.f32 %v6732_v19, %v6775_v21  ;;  %v6849_v59 = vpop.f32.mrb[50].mxu1  ;;  %3706 = vst.msk [vmem:[%s6825_s11] sm:$0xff] %vm458_vm1, %v3674_v54  ;;  %v6854_v48 = vadd.f32 %v5028_v52, %v6679_v49 }
 0x211   : > { %v5304_v43 = vpop.eup %5303  ;;  %5321 = vrcp.f32 %v3189_v35  ;;  %v3278_v11 = vmul.f32 %v5302_v27, %v6699_v15  ;;  %v4943_v58 = vpop.f32.mrb[18].mxu0  ;;  %v6858_v0 = vadd.f32 %v4987_v6, %v6732_v19  ;;  %v6863_v62 = vadd.f32 %v5029_v8, %v6679_v49 }
 0x212   : > { %v6860_v40 = vpop.f32.mrb[51].mxu1  ;;  %v5306_v21 = vpop.eup %5305  ;;  %v3188_v13 = vadd.f32 1.0, %v5304_v43  ;;  %5323 = vpow2.f32 %v4127_v33  ;;  %v3677_v35 = vadd.f32 %v6753_v2, %v3279_v25  ;;  %v4129_v27 = vmul.f32 -1.442695, %v6854_v48 }
 0x213   : > { %v2944_v26 = vpop.f32.mrb[19].mxu0  ;;  %v5308_v51 = vpop.eup %5307  ;;  %v3191_v1 = vadd.f32 1.0, %v5306_v21  ;;  %5325 = vpow2.f32 %v4126_v20  ;;  %v3676_v15 = vadd.f32 %v6762_v55, %v3278_v11  ;;  %v4128_v54 = vmul.f32 -1.442695, %v6863_v62 }
 0x214   : > { %v5310_v6 = vpop.eup %5309  ;;  %5327 = vrcp.f32 %v3188_v13  ;;  %3709 = vst.msk [vmem:[%s6825_s11 + $0x18] sm:$0xff] %vm458_vm1, %v3677_v35  ;;  %v5030_v33 = vadd.f32 %v4943_v58, %v6646_v29  ;;  %v5031_v52 = vadd.f32 %v2944_v26, %v6648_v61  ;;  %v6873_v2 = vpop.f32.mrb[52].mxu1  ;;  %v3281_v20 = vmul.f32 %v5308_v51, %v6706_v32 }
 0x215   : > { %v5312_v8 = vpop.eup %5311  ;;  %5329 = vrcp.f32 %v3191_v1  ;;  %3708 = vst.msk [vmem:[%s6825_s11 + $0x10] sm:$0xff] %vm458_vm1, %v3676_v15  ;;  %v3280_v55 = vmul.f32 %v5310_v6, %v6711_v34  ;;  %v4946_v25 = vpop.f32.mrb[20].mxu0  ;;  %v6881_v43 = vadd.f32 %v6732_v19, %v6802_v17 }
 0x216   : > { %v6883_v11 = vpop.f32.mrb[53].mxu1  ;;  %v5314_v29 = vpop.eup %5313  ;;  %v3190_v58 = vadd.f32 1.0, %v5312_v8  ;;  %5331 = vpow2.f32 %v4129_v27  ;;  %v6886_v61 = vadd.f32 %v5030_v33, %v6679_v49  ;;  %v6889_v21 = vadd.f32 %v5031_v52, %v6679_v49 }
 0x217   : > { %v2954_v32 = vpop.f32.mrb[21].mxu0  ;;  %v5316_v34 = vpop.eup %5315  ;;  %v3193_v13 = vadd.f32 1.0, %v5314_v29  ;;  %5333 = vpow2.f32 %v4128_v54  ;;  %v3679_v17 = vadd.f32 %v6769_v60, %v3281_v20  ;;  %v3678_v35 = vadd.f32 %v6773_v56, %v3280_v55 }
 0x218   : > { %v5318_v26 = vpop.eup %5317  ;;  %5335 = vrcp.f32 %v3190_v58  ;;  %v4131_v51 = vmul.f32 -1.442695, %v6886_v61  ;;  %v4130_v1 = vmul.f32 -1.442695, %v6889_v21  ;;  %v5032_v27 = vadd.f32 %v4946_v25, %v6650_v47  ;;  %v6896_v15 = vpop.f32.mrb[54].mxu1 }
 0x219   : > { %5337 = vrcp.f32 %v3193_v13  ;;  %v3192_v6 = vadd.f32 1.0, %v5318_v26  ;;  %3711 = vst.msk [vmem:[%s6825_s11 + $0x28] sm:$0xff] %vm458_vm1, %v3679_v17  ;;  %3710 = vst.msk [vmem:[%s6825_s11 + $0x20] sm:$0xff] %vm458_vm1, %v3678_v35  ;;  %v5033_v60 = vadd.f32 %v2954_v32, %v6652_v12  ;;  %v3283_v56 = vmul.f32 %v5316_v34, %v6720_v3  ;;  %v4949_v54 = vpop.f32.mrb[22].mxu0  ;;  %v6904_v33 = vpop.f32.mrb[55].mxu1 }
 0x21a   : > { %v5320_v52 = vpop.eup %5319  ;;  %5339 = vpow2.f32 %v4131_v51  ;;  %v6907_v8 = vadd.f32 %v5032_v27, %v6679_v49  ;;  %v5034_v47 = vadd.f32 %v4949_v54, %v6654_v63  ;;  %v2964_v20 = vpop.f32.mrb[23].mxu0  ;;  %v6912_v55 = vadd.f32 %v6818_v39, %v6732_v19 }
 0x21b   : > { %v5322_v25 = vpop.eup %5321  ;;  %5341 = vrcp.f32 %v3192_v6  ;;  %v6915_v12 = vadd.f32 %v5033_v60, %v6679_v49  ;;  %v3681_v3 = vadd.f32 %v6781_v37, %v3283_v56  ;;  %v3282_v29 = vmul.f32 %v5320_v52, %v6725_v57 }
 0x21c   : > { %v5324_v58 = vpop.eup %5323  ;;  %5343 = vpow2.f32 %v4130_v1  ;;  %v4133_v32 = vmul.f32 -1.442695, %v6907_v8  ;;  %v6921_v63 = vadd.f32 %v5034_v47, %v6679_v49  ;;  %v5035_v34 = vadd.f32 %v2964_v20, %v6656_v23  ;;  %v6924_v39 = vpop.f32.mrb[56].mxu1 }
 0x21d   : > { %v5326_v13 = vpop.eup %5325  ;;  %v3195_v17 = vadd.f32 1.0, %v5324_v58  ;;  %v4132_v35 = vmul.f32 -1.442695, %v6915_v12  ;;  %3713 = vst.msk [vmem:[%s6825_s11 + $0x38] sm:$0xff] %vm458_vm1, %v3681_v3  ;;  %v3680_v57 = vadd.f32 %v6790_v22, %v3282_v29  ;;  %v3285_v37 = vmul.f32 %v5322_v25, %v6737_v46  ;;  %v4952_v26 = vpop.f32.mrb[24].mxu0 }
 0x21e   : > { %v6931_v51 = vpop.f32.mrb[57].mxu1  ;;  %v5328_v1 = vpop.eup %5327  ;;  %v3194_v27 = vadd.f32 1.0, %v5326_v13  ;;  %5345 = vpow2.f32 %v4133_v32  ;;  %v4135_v23 = vmul.f32 -1.442695, %v6921_v63  ;;  %v6935_v6 = vadd.f32 %v5035_v34, %v6679_v49 }
 0x21f   : > { %v2974_v60 = vpop.f32.mrb[25].mxu0  ;;  %v5330_v56 = vpop.eup %5329  ;;  %5347 = vrcp.f32 %v3195_v17  ;;  %3712 = vst.msk [vmem:[%s6825_s11 + $0x30] sm:$0xff] %vm458_vm1, %v3680_v57  ;;  %v3683_v22 = vadd.f32 %v6797_v41, %v3285_v37  ;;  %v3284_v46 = vmul.f32 %v5328_v1, %v6740_v30  ;;  %v5036_v54 = vadd.f32 %v4952_v26, %v6658_v16 }
 0x220   : > { %v5332_v52 = vpop.eup %5331  ;;  %5349 = vrcp.f32 %v3194_v27  ;;  %v4134_v47 = vmul.f32 -1.442695, %v6935_v6  ;;  %v5037_v20 = vadd.f32 %v2974_v60, %v6660_v5  ;;  %v3287_v25 = vmul.f32 %v5330_v56, %v6758_v53  ;;  %v6945_v3 = vpop.f32.mrb[58].mxu1 }
 0x221   : > { %v5334_v29 = vpop.eup %5333  ;;  %v3197_v58 = vadd.f32 1.0, %v5332_v52  ;;  %5351 = vpow2.f32 %v4132_v35  ;;  %3715 = vst.msk [vmem:[%s6825_s11 + $0x48] sm:$0xff] %vm458_vm1, %v3683_v22  ;;  %v3682_v30 = vadd.f32 %v6800_v24, %v3284_v46  ;;  %v6951_v16 = vadd.f32 %v5036_v54, %v6679_v49  ;;  %v4955_v41 = vpop.f32.mrb[26].mxu0 }
 0x222   : > { %v6953_v32 = vpop.f32.mrb[59].mxu1  ;;  %v5336_v5 = vpop.eup %5335  ;;  %v3196_v34 = vadd.f32 1.0, %v5334_v29  ;;  %5353 = vpow2.f32 %v4135_v23  ;;  %v6956_v53 = vadd.f32 %v5037_v20, %v6679_v49  ;;  %v3685_v13 = vadd.f32 %v6807_v18, %v3287_v25 }
 0x223   : > { %v2984_v17 = vpop.f32.mrb[27].mxu0  ;;  %v5338_v35 = vpop.eup %5337  ;;  %5355 = vrcp.f32 %v3197_v58  ;;  %3714 = vst.msk [vmem:[%s6825_s11 + $0x40] sm:$0xff] %vm458_vm1, %v3682_v30  ;;  %v4137_v24 = vmul.f32 -1.442695, %v6951_v16  ;;  %v3286_v57 = vmul.f32 %v5336_v5, %v6765_v9  ;;  %v5038_v37 = vadd.f32 %v4955_v41, %v6662_v36 }
 0x224   : > { %v5340_v26 = vpop.eup %5339  ;;  %5357 = vrcp.f32 %v3196_v34  ;;  %v4136_v1 = vmul.f32 -1.442695, %v6956_v53  ;;  %3717 = vst.msk [vmem:[%s6825_s11 + $0x58] sm:$0xff] %vm458_vm1, %v3685_v13  ;;  %v5039_v27 = vadd.f32 %v2984_v17, %v6664_v28  ;;  %v3289_v18 = vmul.f32 %v5338_v35, %v6786_v7  ;;  %v6969_v23 = vpop.f32.mrb[60].mxu1 }
 0x225   : > { %v5342_v60 = vpop.eup %5341  ;;  %v3199_v56 = vadd.f32 1.0, %v5340_v26  ;;  %5359 = vpow2.f32 %v4134_v47  ;;  %v3684_v9 = vadd.f32 %v6816_v45, %v3286_v57  ;;  %v6973_v36 = vadd.f32 %v5038_v37, %v6679_v49  ;;  %v4958_v22 = vpop.f32.mrb[28].mxu0 }
 0x226   : > { %v6975_v46 = vpop.f32.mrb[61].mxu1  ;;  %v5344_v54 = vpop.eup %5343  ;;  %5361 = vpow2.f32 %v4137_v24  ;;  %v6978_v28 = vadd.f32 %v5039_v27, %v6679_v49  ;;  %v3687_v7 = vadd.f32 %v6832_v14, %v3289_v18  ;;  %v3288_v52 = vmul.f32 %v5342_v60, %v6793_v42  ;;  %v7270_v24 = vld [vmem:[#allocation37_spill] sm:$0xff]  ;;  %v7271_v27 = vld [vmem:[#allocation38_spill] sm:$0xff] }
 0x227   : > { %v2994_v20 = vpop.f32.mrb[29].mxu0  ;;  %5363 = vrcp.f32 %v3199_v56  ;;  %v3198_v47 = vadd.f32 1.0, %v5344_v54  ;;  %3716 = vst.msk [vmem:[%s6825_s11 + $0x50] sm:$0xff] %vm458_vm1, %v3684_v9  ;;  %v4139_v45 = vmul.f32 -1.442695, %v6973_v36  ;;  %v5040_v25 = vadd.f32 %v4958_v22, %v6666_v10 }
 0x228   : > { %v5346_v29 = vpop.eup %5345  ;;  %5365 = vpow2.f32 %v4136_v1  ;;  %v4138_v58 = vmul.f32 -1.442695, %v6978_v28  ;;  %3719 = vst.msk [vmem:[%s6825_s11 + $0x68] sm:$0xff] %vm458_vm1, %v3687_v7  ;;  %v3686_v14 = vadd.f32 %v6847_v31, %v3288_v52  ;;  %v5041_v42 = vadd.f32 %v2994_v20, %v6668_v44  ;;  %v6991_v30 = vpop.f32.mrb[62].mxu1 }
 0x229   : > { %v5348_v41 = vpop.eup %5347  ;;  %5367 = vrcp.f32 %v3198_v47  ;;  %v3201_v5 = vadd.f32 1.0, %v5346_v29  ;;  %v6994_v34 = vadd.f32 %v5040_v25, %v6679_v49  ;;  %v4961_v10 = vpop.f32.mrb[30].mxu0  ;;  %v3596_v13 = vadd.f32 %v6732_v19, %v6834_v50 }
 0x22a   : > { %v3665_v17 = vpop.f32.mrb[63].mxu1  ;;  %v5350_v35 = vpop.eup %5349  ;;  %5369 = vpow2.f32 %v4139_v45  ;;  %3718 = vst.msk [vmem:[%s6825_s11 + $0x60] sm:$0xff] %vm458_vm1, %v3686_v14  ;;  %v7001_v31 = vadd.f32 %v5041_v42, %v6679_v49  ;;  %v3291_v44 = vmul.f32 %v5348_v41, %v6812_v38  ;;  %v5042_v57 = vadd.f32 %v4961_v10, %v7270_v24 }
 0x22b   : > { %v3004_v37 = vpop.f32.mrb[31].mxu0  ;;  %v5352_v26 = vpop.eup %5351  ;;  %5371 = vrcp.f32 %v3201_v5  ;;  %v4141_v1 = vmul.f32 -1.442695, %v6994_v34  ;;  %v3290_v50 = vmul.f32 %v5350_v35, %v6828_v4  ;;  %v3611_v25 = vadd.f32 %v6849_v59, %v6732_v19 }
 0x22c   : > { %v5043_v18 = vadd.f32 %v3004_v37, %v7271_v27  ;;  %v5354_v60 = vpop.eup %5353  ;;  %v3200_v56 = vadd.f32 1.0, %v5352_v26  ;;  %5373 = vpow2.f32 %v4138_v58  ;;  %v4140_v9 = vmul.f32 -1.442695, %v7001_v31 }
 0x22d   : > { %v3689_v38 = vadd.f32 %v6858_v0, %v3291_v44  ;;  %v5356_v22 = vpop.eup %5355  ;;  %v3203_v54 = vadd.f32 1.0, %v5354_v60  ;;  %5375 = vpow2.f32 %v4141_v1  ;;  %v3688_v7 = vadd.f32 %v6881_v43, %v3290_v50 }
 0x22e   : > { %v7012_v52 = vadd.f32 %v5042_v57, %v6679_v49  ;;  %v5358_v20 = vpop.eup %5357  ;;  %5377 = vrcp.f32 %v3200_v56  ;;  %v7017_v4 = vadd.f32 %v5043_v18, %v6679_v49  ;;  %v3293_v47 = vmul.f32 %v5356_v22, %v6854_v48 }
 0x22f   : > { %3721 = vst.msk [vmem:[%s6825_s11 + $0x78] sm:$0xff] %vm458_vm1, %v3689_v38  ;;  %v5360_v45 = vpop.eup %5359  ;;  %5379 = vrcp.f32 %v3203_v54  ;;  %3720 = vst.msk [vmem:[%s6825_s11 + $0x70] sm:$0xff] %vm458_vm1, %v3688_v7  ;;  %v3292_v43 = vmul.f32 %v5358_v20, %v6863_v62  ;;  %v3606_v59 = vadd.f32 %v6732_v19, %v6860_v40  ;;  %v3621_v24 = vadd.f32 %v6873_v2, %v6732_v19 }
 0x230   : > { %v4143_v0 = vmul.f32 -1.442695, %v7012_v52  ;;  %v5362_v29 = vpop.eup %5361  ;;  %v3202_v58 = vadd.f32 1.0, %v5360_v45  ;;  %5381 = vpow2.f32 %v4140_v9  ;;  %v4142_v49 = vmul.f32 -1.442695, %v7017_v4 }
 0x231   : > { %v3691_v48 = vadd.f32 %v6912_v55, %v3293_v47  ;;  %v5364_v14 = vpop.eup %5363  ;;  %v3205_v42 = vadd.f32 1.0, %v5362_v29  ;;  %v3690_v41 = vadd.f32 %v3596_v13, %v3292_v43  ;;  %v7039_v37 = vadd.f32 %v6732_v19, %v3665_v17 }
 0x232   : > { %5383 = vpow2.f32 %v4143_v0  ;;  %v5366_v5 = vpop.eup %5365  ;;  %v3295_v62 = vmul.f32 %v5364_v14, %v6886_v61  ;;  %v3616_v27 = vadd.f32 %v6732_v19, %v6883_v11  ;;  %v3631_v17 = vadd.f32 %v6896_v15, %v6732_v19 }
 0x233   : > { %5385 = vrcp.f32 %v3202_v58  ;;  %3723 = vst.msk [vmem:[%s6825_s11 + $0x88] sm:$0xff] %vm458_vm1, %v3691_v48  ;;  %v5368_v10 = vpop.eup %5367  ;;  %v3204_v35 = vadd.f32 1.0, %v5366_v5  ;;  %3722 = vst.msk [vmem:[%s6825_s11 + $0x80] sm:$0xff] %vm458_vm1, %v3690_v41  ;;  %v3626_v7 = vadd.f32 %v6732_v19, %v6904_v33  ;;  %v3641_v45 = vadd.f32 %v6924_v39, %v6732_v19 }
 0x234   : > { %5387 = vrcp.f32 %v3205_v42  ;;  %v5370_v55 = vpop.eup %5369  ;;  %v3693_v44 = vadd.f32 %v3611_v25, %v3295_v62  ;;  %v3294_v13 = vmul.f32 %v5368_v10, %v6889_v21  ;;  %v3636_v43 = vadd.f32 %v6732_v19, %v6931_v51 }
 0x235   : > { %5389 = vpow2.f32 %v4142_v49  ;;  %v5372_v57 = vpop.eup %5371  ;;  %v3207_v61 = vadd.f32 1.0, %v5370_v55  ;;  %v3646_v14 = vadd.f32 %v6732_v19, %v6953_v32  ;;  %v3656_v32 = vadd.f32 %v6732_v19, %v6975_v46 }
 0x236   : > { %5391 = vrcp.f32 %v3204_v35  ;;  %v5374_v40 = vpop.eup %5373  ;;  %3725 = vst.msk [vmem:[%s6825_s11 + $0x98] sm:$0xff] %vm458_vm1, %v3693_v44  ;;  %v3692_v26 = vadd.f32 %v3606_v59, %v3294_v13  ;;  %v3297_v1 = vmul.f32 %v5372_v57, %v6907_v8 }
 0x237   : > { %v5376_v50 = vpop.eup %5375  ;;  %5393 = vrcp.f32 %v3207_v61  ;;  %v3206_v21 = vadd.f32 1.0, %v5374_v40 }
 0x238   : > { %v5378_v2 = vpop.eup %5377  ;;  %v3209_v18 = vadd.f32 1.0, %v5376_v50  ;;  %3724 = vst.msk [vmem:[%s6825_s11 + $0x90] sm:$0xff] %vm458_vm1, %v3692_v26  ;;  %v3695_v60 = vadd.f32 %v3621_v24, %v3297_v1 }
 0x239   : > { %v5380_v56 = vpop.eup %5379  ;;  %5395 = vrcp.f32 %v3206_v21  ;;  %v3296_v9 = vmul.f32 %v5378_v2, %v6915_v12 }
 0x23a   : > { %v5382_v8 = vpop.eup %5381  ;;  %5397 = vrcp.f32 %v3209_v18  ;;  %3727 = vst.msk [vmem:[%s6825_s11 + $0xa8] sm:$0xff] %vm458_vm1, %v3695_v60  ;;  %v3299_v11 = vmul.f32 %v5380_v56, %v6921_v63 }
 0x23b   : > { %v3208_v22 = vadd.f32 1.0, %v5382_v8  ;;  %v3694_v54 = vadd.f32 %v3616_v27, %v3296_v9 }
 0x23c   : > { %v5384_v38 = vpop.eup %5383  ;;  %v3697_v47 = vadd.f32 %v3631_v17, %v3299_v11 }
 0x23d   : > { %v5386_v20 = vpop.eup %5385  ;;  %v3211_v15 = vadd.f32 1.0, %v5384_v38  ;;  %5399 = vrcp.f32 %v3208_v22  ;;  %3726 = vst.msk [vmem:[%s6825_s11 + $0xa0] sm:$0xff] %vm458_vm1, %v3694_v54 }
 0x23e   : > { %v5388_v12 = vpop.eup %5387  ;;  %v3298_v63 = vmul.f32 %v5386_v20, %v6935_v6  ;;  %3729 = vst.msk [vmem:[%s6825_s11 + $0xb8] sm:$0xff] %vm458_vm1, %v3697_v47  ;;  %v3651_v6 = vadd.f32 %v6945_v3, %v6732_v19 }
 0x23f   : > { %v5390_v0 = vpop.eup %5389  ;;  %5401 = vrcp.f32 %v3211_v15  ;;  %v3301_v33 = vmul.f32 %v5388_v12, %v6951_v16 }
 0x240   : > { %v5392_v25 = vpop.eup %5391  ;;  %v3210_v39 = vadd.f32 1.0, %v5390_v0  ;;  %v3696_v29 = vadd.f32 %v3626_v7, %v3298_v63 }
 0x241   : > { %v3699_v58 = vadd.f32 %v3641_v45, %v3301_v33  ;;  %v3300_v49 = vmul.f32 %v5392_v25, %v6956_v53  ;;  %v5394_v48 = vpop.eup %5393  ;;  %v3661_v53 = vadd.f32 %v6969_v23, %v6732_v19  ;;  %v3671_v23 = vadd.f32 %v6991_v30, %v6732_v19 }
 0x242   : > { %5403 = vrcp.f32 %v3210_v39  ;;  %3728 = vst.msk [vmem:[%s6825_s11 + $0xb0] sm:$0xff] %vm458_vm1, %v3696_v29  ;;  %v3303_v51 = vmul.f32 %v5394_v48, %v6973_v36 }
 0x243   : > { %3731 = vst.msk [vmem:[%s6825_s11 + $0xc8] sm:$0xff] %vm458_vm1, %v3699_v58  ;;  %v3698_v16 = vadd.f32 %v3636_v43, %v3300_v49  ;;  %v5396_v42 = vpop.eup %5395 }
 0x244   : > { %v5398_v41 = vpop.eup %5397  ;;  %v3701_v3 = vadd.f32 %v3651_v6, %v3303_v51  ;;  %v3302_v5 = vmul.f32 %v5396_v42, %v6978_v28 }
 0x245   : > { %3730 = vst.msk [vmem:[%s6825_s11 + $0xc0] sm:$0xff] %vm458_vm1, %v3698_v16  ;;  %v3305_v62 = vmul.f32 %v5398_v41, %v6994_v34 }
 0x246   : > { %3733 = vst.msk [vmem:[%s6825_s11 + $0xd8] sm:$0xff] %vm458_vm1, %v3701_v3  ;;  %v3700_v36 = vadd.f32 %v3646_v14, %v3302_v5 }
 0x247   : > { %v5400_v59 = vpop.eup %5399  ;;  %v3703_v10 = vadd.f32 %v3661_v53, %v3305_v62 }
 0x248   : > { %3732 = vst.msk [vmem:[%s6825_s11 + $0xd0] sm:$0xff] %vm458_vm1, %v3700_v36  ;;  %v3304_v28 = vmul.f32 %v5400_v59, %v7001_v31 }
 0x249   : > { %v5402_v35 = vpop.eup %5401  ;;  %3735 = vst.msk [vmem:[%s6825_s11 + $0xe8] sm:$0xff] %vm458_vm1, %v3703_v10 }
 0x24a   : > { %v3307_v34 = vmul.f32 %v5402_v35, %v7012_v52  ;;  %v3702_v55 = vadd.f32 %v3656_v32, %v3304_v28 }
 0x24c   : > { %v5404_v44 = vpop.eup %5403  ;;  %v3705_v13 = vadd.f32 %v3671_v23, %v3307_v34  ;;  %3734 = vst.msk [vmem:[%s6825_s11 + $0xe0] sm:$0xff] %vm458_vm1, %v3702_v55 }
 0x24d   : > { %v3306_v46 = vmul.f32 %v5404_v44, %v7017_v4 }
 0x24e   : > { %3737 = vst.msk [vmem:[%s6825_s11 + $0xf8] sm:$0xff] %vm458_vm1, %v3705_v13 }
 0x24f   : > { %v3704_v19 = vadd.f32 %v7039_v37, %v3306_v46 }
 0x251   : > { %3736 = vst.msk [vmem:[%s6825_s11 + $0xf0] sm:$0xff] %vm458_vm1, %v3704_v19 }
 0x252 PF: > { %s16_s21 = sadd.s32 1, %s5411_s21  }
 0x253   : > { %p13_p4 = scmp.ge.s32.totalorder %s16_s21, 4  }
 0x255   :  { %15 = sbr.rel (!%p13_p4) target bundleno = 1 (0x1), region = 85 }

// kernel: down_block_forward.8
= control target key start
LH: loop header
LB: loop body
LE: loop exit
PB: predicated region body
PF: predicated region fallthrough
CT: control target
= control target key end

     0   :  { %s5442_s21 = smov 0   ;;  %s7097_s0 = inlined_call_operand.vmem [shape: f32[2,18,18,8], index: 0, kind: input, shape index: {}]   ;;  %s7098_s1 = inlined_call_operand.vmem [shape: f32[9,8,8], index: 1, kind: input, shape index: {}]   ;;  %s7099_s2 = inlined_call_operand.vmem [shape: f32[1,8], index: 2, kind: input, shape index: {}]   ;;  %s7100_s3 = inlined_call_operand.vmem [shape: f32[2,16,16,8], index: 3, kind: input, shape index: {}]   ;;  %s7101_s4 = inlined_call_operand.vmem [shape: f32[8,8], index: 4, kind: input, shape index: {}]   ;;  %s7102_s5 = inlined_call_operand.vmem [shape: f32[1,8], index: 5, kind: input, shape index: {}]   ;;  %s7103_s6 = inlined_call_operand.vmem [shape: f32[2,16,16,8], index: 6, kind: output, shape index: {}]  }
   0x1 LB: > { %s3800_s22 = sadd.s32 4294967295, %s5405_s21   ;;  %p3804_p0 = scmp.ge.s32.totalorder %s5405_s21, 1  ;;  %s5405_s21 = sphi %s5442_s21, %s16_s21  }
   0x2   : > { %p222_p1 = scmp.lt.s32.totalorder %s5405_s21, 3 }
   0x4   : > { %p223_p2 = pnand %p3804_p0, %p222_p1 }
   0x6   : > { %226 = sbr.rel (%p223_p2) target bundleno = 594 (0x252), region = 44 }
   0xd   : > { %v3941_v0 = vld [vmem:[%s7098_s1 + $0x20] sm:$0xff]  ;;  %v3810_v1 = vld [vmem:[%s7098_s1 + $0x8] sm:$0xff]  ;;  %p257_p3 = scmp.lt.s32.totalorder %s3800_s22, 1  ;;  %vm375_vm0 = vcmask 1046528   ;;  %vm458_vm1 = vcmask 64512   ;;  %v5533_v33 = vld [vmem:[%s7098_s1 + $0x30] sm:$0xff] }
   0xe   : > { %v3974_v2 = vld [vmem:[%s7098_s1 + $0x28] sm:$0xff]  ;;  %4706 = vmatprep.subr.mxu0 %v3941_v0  ;;  %4506 = vmatprep.subr.mxu1 %v3810_v1  ;;  %v326_v3 = vld [vmem:[%s7098_s1] sm:$0xff]  ;;  %v5543_v35 = vld [vmem:[%s7098_s1 + $0x10] sm:$0xff]  ;;  %vm1037_vm2 = vcmask 1045504  }
   0xf   : > { %4707 = vmatpush3.msra.mxu0 %v3941_v0  ;;  %4507 = vmatpush3.msra.mxu1 %v3810_v1  ;;  %s7265_s22 = smov (!%p257_p3, %s3800_s22), 1 }
  0x10   : > { %4756 = vmatprep.subr.mxu0 %v3974_v2  ;;  %4556 = vmatprep.subr.mxu1 %v326_v3  ;;  %s5262_s7 = smul.u32 432, %s7265_s22  ;;  %s4174_s25 = sshll.u32 %s7265_s22, 8 }
  0x11   : > { %s6470_s28 = scalar_lea.vmem %s7100_s3, %s4174_s25  ;;  %s6817_s11 = scalar_lea.vmem %s7103_s6, %s4174_s25 }
  0x12   : > { %s5468_s10 = scalar_lea.vmem %s7097_s0, %s5262_s7 }
  0x13   : > { %v5471_v4 = vld [vmem:[%s5468_s10] sm:$0xff]  ;;  %v5474_v5 = vld [vmem:[%s5468_s10 + $0x8] sm:$0xff]  ;;  %v5477_v6 = vld [vmem:[%s5468_s10 + $0x18] sm:$0xff] }
  0x14   : > { %7163 = vst [vmem:[#allocation2_spill] sm:$0xff] %v5477_v6  ;;  %v376_v7 = vrot.slane %v5471_v4, 1  ;;  %v377_v8 = vrot.slane %v5474_v5, 1  ;;  %v5482_v9 = vld [vmem:[%s5468_s10 + $0x20] sm:$0xff]  ;;  %v381_v10 = vrot.slane %v5477_v6, 1  ;;  %v5494_v15 = vld [vmem:[%s5468_s10 + $0x30] sm:$0xff] }
  0x15   : > { %7164 = vst [vmem:[#allocation3_spill] sm:$0xff] %v5482_v9  ;;  %v5486_v11 = vld [vmem:[%s5468_s10 + $0x10] sm:$0x3]  ;;  %v382_v12 = vrot.slane %v5482_v9, 1  ;;  %v5491_v14 = vld [vmem:[%s5468_s10 + $0x28] sm:$0x3] }
  0x16   : > { %7165 = vst [vmem:[#allocation4_spill] sm:$0xff] %v5486_v11  ;;  %v379_v13 = vrot.slane %v5486_v11, 1  ;;  %v378_v16 = vsel %vm375_vm0, %v376_v7, %v377_v8  ;;  %v384_v17 = vrot.slane %v5491_v14, 1  ;;  %v5499_v18 = vld [vmem:[%s5468_s10 + $0x38] sm:$0xff]  ;;  %v386_v19 = vrot.slane %v5494_v15, 1  ;;  %v5511_v25 = vld [vmem:[%s5468_s10 + $0x48] sm:$0xff] }
  0x17   : > { %v5503_v20 = vld [vmem:[%s5468_s10 + $0x40] sm:$0x3]  ;;  %4508 = vmatprep.mubr.msk.f32.mxu1 %vm458_vm1, %v378_v16  ;;  %v383_v21 = vsel %vm375_vm0, %v381_v10, %v382_v12  ;;  %v387_v23 = vrot.slane %v5499_v18, 1  ;;  %v5514_v26 = vld [vmem:[%s5468_s10 + $0x50] sm:$0xff]  ;;  %v5517_v27 = vld [vmem:[%s5468_s10 + $0x58] sm:$0x3] }
  0x18   : > { %v380_v22 = vsel %vm375_vm0, %v377_v8, %v379_v13  ;;  %v389_v24 = vrot.slane %v5503_v20, 1  ;;  %4708 = vmatprep.mubr.msk.f32.mxu0 %vm458_vm1, %v383_v21  ;;  %v385_v28 = vsel %vm375_vm0, %v382_v12, %v384_v17  ;;  %v391_v29 = vrot.slane %v5511_v25, 1  ;;  %v5525_v31 = vld [vmem:[%s5468_s10 + $0x60] sm:$0xff]  ;;  %v5528_v32 = vld [vmem:[%s5468_s10 + $0x68] sm:$0xff]  ;;  %v5557_v41 = vld [vmem:[%s5468_s10 + $0x70] sm:$0x3] }
  0x19   : > { %4509 = vmatmul.mubr.msk.f32.vlgmr.msra.gmra.mrb[0].mxu1 %vm458_vm1, %v380_v22  ;;  %v392_v30 = vrot.slane %v5514_v26, 1  ;;  %4709 = vmatmul.mubr.msk.f32.vlgmr.msra.gmra.mrb[0].mxu0 %vm458_vm1, %v385_v28  ;;  %v5538_v34 = vsel %vm375_vm0, %v386_v19, %v387_v23  ;;  %v394_v37 = vrot.slane %v5517_v27, 1  ;;  %v396_v39 = vrot.slane %v5525_v31, 1  ;;  %v5562_v42 = vld [vmem:[%s5468_s10 + $0x78] sm:$0xff]  ;;  %v5565_v43 = vld [vmem:[%s5468_s10 + $0x80] sm:$0xff]  ;;  %v5589_v50 = vld [vmem:[%s5468_s10 + $0x90] sm:$0xff] }
  0x1a   : > { %4511 = vmatprep.mubr.msk.f32.mxu1 %vm458_vm1, %v383_v21  ;;  %7166 = vst [vmem:[#allocation5_spill] sm:$0xff] %v5538_v34  ;;  %4757 = vmatpush3.msra.mxu0 %v3974_v2  ;;  %v5548_v36 = vsel %vm375_vm0, %v387_v23, %v389_v24  ;;  %v397_v40 = vrot.slane %v5528_v32, 1  ;;  %v399_v45 = vrot.slane %v5557_v41, 1  ;;  %v401_v47 = vrot.slane %v5562_v42, 1  ;;  %v5584_v49 = vld [vmem:[%s5468_s10 + $0x88] sm:$0x3] }
  0x1b   : > { %4711 = vmatprep.mubr.msk.f32.mxu0 %vm458_vm1, %v5538_v34  ;;  %7167 = vst [vmem:[#allocation6_spill] sm:$0xff] %v5548_v36  ;;  %v5552_v38 = vsel %vm375_vm0, %v391_v29, %v392_v30  ;;  %4557 = vmatpush3.msra.mxu1 %v326_v3  ;;  %v5575_v44 = vsel %vm375_vm0, %v392_v30, %v394_v37  ;;  %v402_v48 = vrot.slane %v5565_v43, 1  ;;  %v5592_v51 = vld [vmem:[%s5468_s10 + $0x98] sm:$0xff]  ;;  %v404_v53 = vrot.slane %v5584_v49, 1  ;;  %v5610_v57 = vld [vmem:[%s5468_s10 + $0xa0] sm:$0x3] }
  0x1c   : > { %7168 = vst [vmem:[#allocation7_spill] sm:$0xff] %v5552_v38  ;;  %4806 = vmatprep.subr.mxu0 %v5533_v33  ;;  %4606 = vmatprep.subr.mxu1 %v5543_v35  ;;  %7169 = vst [vmem:[#allocation8_spill] sm:$0xff] %v5575_v44  ;;  %v5579_v46 = vsel %vm375_vm0, %v396_v39, %v397_v40  ;;  %v5601_v52 = vsel %vm375_vm0, %v397_v40, %v399_v45  ;;  %v406_v55 = vrot.slane %v5589_v50, 1  ;;  %v5615_v58 = vld [vmem:[%s5468_s10 + $0xa8] sm:$0xff]  ;;  %v5618_v59 = vld [vmem:[%s5468_s10 + $0xb0] sm:$0xff] }
  0x1d   : > { %4512 = vmatmul.mubr.msk.f32.gmra.mrb[2].mxu1 %vm458_vm1, %v385_v28  ;;  %4712 = vmatmul.mubr.msk.f32.gmra.mrb[2].mxu0 %vm458_vm1, %v5548_v36  ;;  %7170 = vst [vmem:[#allocation9_spill] sm:$0xff] %v5579_v46  ;;  %7171 = vst [vmem:[#allocation10_spill] sm:$0xff] %v5601_v52  ;;  %v5605_v54 = vsel %vm375_vm0, %v401_v47, %v402_v48  ;;  %v407_v56 = vrot.slane %v5592_v51, 1  ;;  %v5627_v60 = vsel %vm375_vm0, %v402_v48, %v404_v53  ;;  %v5636_v1 = vld [vmem:[%s5468_s10 + $0xb8] sm:$0x3]  ;;  %v5641_v2 = vld [vmem:[%s5468_s10 + $0xc0] sm:$0xff] }
  0x1e   : > { %4514 = vmatprep.mubr.msk.f32.mxu1 %vm458_vm1, %v5538_v34  ;;  %4714 = vmatprep.mubr.msk.f32.mxu0 %vm458_vm1, %v5552_v38  ;;  %7172 = vst [vmem:[#allocation11_spill] sm:$0xff] %v5605_v54  ;;  %7173 = vst [vmem:[#allocation12_spill] sm:$0xff] %v5627_v60  ;;  %v409_v61 = vrot.slane %v5610_v57, 1  ;;  %v411_v63 = vrot.slane %v5615_v58, 1  ;;  %v412_v0 = vrot.slane %v5618_v59, 1  ;;  %v5644_v3 = vld [vmem:[%s5468_s10 + $0xc8] sm:$0xff] }
  0x1f   : > { %v5631_v62 = vsel %vm375_vm0, %v406_v55, %v407_v56  ;;  %v414_v8 = vrot.slane %v5636_v1, 1  ;;  %v416_v12 = vrot.slane %v5641_v2, 1  ;;  %v417_v13 = vrot.slane %v5644_v3, 1  ;;  %v5662_v16 = vld [vmem:[%s5468_s10 + $0xd0] sm:$0x3]  ;;  %v5667_v17 = vld [vmem:[%s5468_s10 + $0xd8] sm:$0xff] }
  0x20   : > { %7174 = vst [vmem:[#allocation13_spill] sm:$0xff] %v5631_v62  ;;  %v5653_v7 = vsel %vm375_vm0, %v407_v56, %v409_v61  ;;  %v5657_v10 = vsel %vm375_vm0, %v411_v63, %v412_v0  ;;  %v5670_v19 = vld [vmem:[%s5468_s10 + $0xe0] sm:$0xff]  ;;  %v419_v22 = vrot.slane %v5662_v16, 1  ;;  %v421_v24 = vrot.slane %v5667_v17, 1  ;;  %v5688_v29 = vld [vmem:[%s5468_s10 + $0xe8] sm:$0x3] }
  0x21   : > { %4515 = vmatmul.mubr.msk.f32.gmra.mrb[4].mxu1 %vm458_vm1, %v5548_v36  ;;  %4715 = vmatmul.mubr.msk.f32.gmra.mrb[4].mxu0 %vm458_vm1, %v5575_v44  ;;  %7175 = vst [vmem:[#allocation14_spill] sm:$0xff] %v5653_v7  ;;  %7176 = vst [vmem:[#allocation15_spill] sm:$0xff] %v5657_v10  ;;  %v5679_v21 = vsel %vm375_vm0, %v412_v0, %v414_v8  ;;  %v5683_v23 = vsel %vm375_vm0, %v416_v12, %v417_v13  ;;  %v422_v28 = vrot.slane %v5670_v19, 1  ;;  %v5693_v30 = vld [vmem:[%s5468_s10 + $0xf0] sm:$0xff]  ;;  %v5696_v37 = vld [vmem:[%s5468_s10 + $0xf8] sm:$0xff] }
  0x22   : > { %4517 = vmatprep.mubr.msk.f32.mxu1 %vm458_vm1, %v5552_v38  ;;  %4717 = vmatprep.mubr.msk.f32.mxu0 %vm458_vm1, %v5579_v46  ;;  %7177 = vst [vmem:[#allocation16_spill] sm:$0xff] %v5679_v21  ;;  %7178 = vst [vmem:[#allocation17_spill] sm:$0xff] %v5683_v23  ;;  %v5705_v39 = vsel %vm375_vm0, %v417_v13, %v419_v22  ;;  %v424_v40 = vrot.slane %v5688_v29, 1  ;;  %v426_v47 = vrot.slane %v5693_v30, 1  ;;  %v427_v48 = vrot.slane %v5696_v37, 1  ;;  %v5719_v55 = vld [vmem:[%s5468_s10 + $0x108] sm:$0xff] }
  0x23   : > { %7179 = vst [vmem:[#allocation18_spill] sm:$0xff] %v5705_v39  ;;  %v5709_v45 = vsel %vm375_vm0, %v421_v24, %v422_v28  ;;  %v5714_v53 = vld [vmem:[%s5468_s10 + $0x100] sm:$0x3]  ;;  %v5722_v56 = vld [vmem:[%s5468_s10 + $0x110] sm:$0xff]  ;;  %v431_v8 = vrot.slane %v5719_v55, 1  ;;  %v5748_v24 = vld [vmem:[%s5468_s10 + $0x128] sm:$0xff] }
  0x24   : > { %7180 = vst [vmem:[#allocation19_spill] sm:$0xff] %v5709_v45  ;;  %v5731_v61 = vsel %vm375_vm0, %v422_v28, %v424_v40  ;;  %v429_v63 = vrot.slane %v5714_v53, 1  ;;  %v5735_v0 = vsel %vm375_vm0, %v426_v47, %v427_v48  ;;  %v432_v12 = vrot.slane %v5722_v56, 1  ;;  %v5740_v13 = vld [vmem:[%s5468_s10 + $0x118] sm:$0x3]  ;;  %v5745_v22 = vld [vmem:[%s5468_s10 + $0x120] sm:$0xff] }
  0x25   : > { %4518 = vmatmul.mubr.msk.f32.gmra.mrb[6].mxu1 %vm458_vm1, %v5575_v44  ;;  %4718 = vmatmul.mubr.msk.f32.gmra.mrb[6].mxu0 %vm458_vm1, %v5601_v52  ;;  %7181 = vst [vmem:[#allocation20_spill] sm:$0xff] %v5731_v61  ;;  %7182 = vst [vmem:[#allocation21_spill] sm:$0xff] %v5735_v0  ;;  %v434_v40 = vrot.slane %v5740_v13, 1  ;;  %v5844_v38 = vld [vmem:[%s5468_s10 + $0x178] sm:$0x3]  ;;  %v5852_v36 = vld [vmem:[%s5468_s10 + $0x188] sm:$0xff] }
  0x26   : > { %4520 = vmatprep.mubr.msk.f32.mxu1 %vm458_vm1, %v5579_v46  ;;  %4720 = vmatprep.mubr.msk.f32.mxu0 %vm458_vm1, %v5605_v54  ;;  %v5757_v28 = vsel %vm375_vm0, %v427_v48, %v429_v63  ;;  %v5761_v47 = vsel %vm375_vm0, %v431_v8, %v432_v12  ;;  %v5774_v48 = vld [vmem:[%s5468_s10 + $0x140] sm:$0xff]  ;;  %7192 = vst [vmem:[#allocation31_spill] sm:$0xff] %v5852_v36  ;;  %v1708_v34 = vrot.slane %v5852_v36, 1  ;;  %v5870_v11 = vld [vmem:[%s5468_s10 + $0x190] sm:$0x3] }
  0x27   : > { %7183 = vst [vmem:[#allocation22_spill] sm:$0xff] %v5757_v28  ;;  %7184 = vst [vmem:[#allocation23_spill] sm:$0xff] %v5761_v47  ;;  %v5783_v63 = vsel %vm375_vm0, %v432_v12, %v434_v40  ;;  %v5800_v12 = vld [vmem:[%s5468_s10 + $0x158] sm:$0xff] }
  0x28   : > { %7185 = vst [vmem:[#allocation24_spill] sm:$0xff] %v5783_v63 }
  0x29   : > { %4521 = vmatmul.mubr.msk.f32.gmra.mrb[8].mxu1 %vm458_vm1, %v5601_v52  ;;  %4721 = vmatmul.mubr.msk.f32.gmra.mrb[8].mxu0 %vm458_vm1, %v5627_v60  ;;  %v5818_v52 = vld [vmem:[%s5468_s10 + $0x160] sm:$0x3] }
  0x2a   : > { %4523 = vmatprep.mubr.msk.f32.mxu1 %vm458_vm1, %v5605_v54  ;;  %4723 = vmatprep.mubr.msk.f32.mxu0 %vm458_vm1, %v5631_v62  ;;  %v447_v54 = vrot.slane %v5800_v12, 1 }
  0x2d   : > { %4524 = vmatmul.mubr.msk.f32.gmra.mrb[10].mxu1 %vm458_vm1, %v5627_v60  ;;  %4724 = vmatmul.mubr.msk.f32.gmra.mrb[10].mxu0 %vm458_vm1, %v5653_v7 }
  0x2e   : > { %4526 = vmatprep.mubr.msk.f32.mxu1 %vm458_vm1, %v5631_v62  ;;  %4726 = vmatprep.mubr.msk.f32.mxu0 %vm458_vm1, %v5657_v10  ;;  %v5792_v62 = vld [vmem:[%s5468_s10 + $0x148] sm:$0x3] }
  0x2f   : > { %v444_v40 = vrot.slane %v5792_v62, 1 }
  0x31   : > { %4527 = vmatmul.mubr.msk.f32.gmra.mrb[12].mxu1 %vm458_vm1, %v5653_v7  ;;  %4727 = vmatmul.mubr.msk.f32.gmra.mrb[12].mxu0 %vm458_vm1, %v5679_v21  ;;  %v442_v7 = vrot.slane %v5774_v48, 1 }
  0x32   : > { %4529 = vmatprep.mubr.msk.f32.mxu1 %vm458_vm1, %v5657_v10  ;;  %4729 = vmatprep.mubr.msk.f32.mxu0 %vm458_vm1, %v5683_v23 }
  0x35   : > { %4530 = vmatmul.mubr.msk.f32.gmra.mrb[14].mxu1 %vm458_vm1, %v5679_v21  ;;  %4730 = vmatmul.mubr.msk.f32.gmra.mrb[14].mxu0 %vm458_vm1, %v5705_v39  ;;  %v5766_v21 = vld [vmem:[%s5468_s10 + $0x130] sm:$0x3] }
  0x36   : > { %4532 = vmatprep.mubr.msk.f32.mxu1 %vm458_vm1, %v5683_v23  ;;  %4732 = vmatprep.mubr.msk.f32.mxu0 %vm458_vm1, %v5709_v45  ;;  %v437_v23 = vrot.slane %v5748_v24, 1  ;;  %v439_v8 = vrot.slane %v5766_v21, 1 }
  0x39   : > { %4533 = vmatmul.mubr.msk.f32.gmra.mrb[16].mxu1 %vm458_vm1, %v5705_v39  ;;  %4733 = vmatmul.mubr.msk.f32.gmra.mrb[16].mxu0 %vm458_vm1, %v5731_v61  ;;  %v436_v39 = vrot.slane %v5745_v22, 1 }
  0x3a   : > { %4535 = vmatprep.mubr.msk.f32.mxu1 %vm458_vm1, %v5709_v45  ;;  %4735 = vmatprep.mubr.msk.f32.mxu0 %vm458_vm1, %v5735_v0  ;;  %v5771_v45 = vld [vmem:[%s5468_s10 + $0x138] sm:$0xff] }
  0x3b   : > { %v441_v10 = vrot.slane %v5771_v45, 1 }
  0x3d   : > { %4536 = vmatmul.mubr.msk.f32.gmra.mrb[18].mxu1 %vm458_vm1, %v5731_v61  ;;  %4736 = vmatmul.mubr.msk.f32.gmra.mrb[18].mxu0 %vm458_vm1, %v5757_v28  ;;  %v5787_v61 = vsel %vm375_vm0, %v436_v39, %v437_v23  ;;  %v5809_v39 = vsel %vm375_vm0, %v437_v23, %v439_v8  ;;  %v5826_v23 = vld [vmem:[%s5468_s10 + $0x170] sm:$0xff]  ;;  %v449_v8 = vrot.slane %v5818_v52, 1 }
  0x3e   : > { %4538 = vmatprep.mubr.msk.f32.mxu1 %vm458_vm1, %v5735_v0  ;;  %4738 = vmatprep.mubr.msk.f32.mxu0 %vm458_vm1, %v5761_v47  ;;  %7186 = vst [vmem:[#allocation25_spill] sm:$0xff] %v5787_v61  ;;  %v5797_v0 = vld [vmem:[%s5468_s10 + $0x150] sm:$0xff]  ;;  %7187 = vst [vmem:[#allocation26_spill] sm:$0xff] %v5809_v39  ;;  %v452_v44 = vrot.slane %v5826_v23, 1 }
  0x3f   : > { %v446_v60 = vrot.slane %v5797_v0, 1 }
  0x41   : > { %4539 = vmatmul.mubr.msk.f32.gmra.mrb[20].mxu1 %vm458_vm1, %v5757_v28  ;;  %4739 = vmatmul.mubr.msk.f32.gmra.mrb[20].mxu0 %vm458_vm1, %v5783_v63  ;;  %v5813_v28 = vsel %vm375_vm0, %v441_v10, %v442_v7  ;;  %v5835_v10 = vsel %vm375_vm0, %v442_v7, %v444_v40  ;;  %v454_v7 = vrot.slane %v5844_v38, 1 }
  0x42   : > { %4541 = vmatprep.mubr.msk.f32.mxu1 %vm458_vm1, %v5761_v47  ;;  %4741 = vmatprep.mubr.msk.f32.mxu0 %vm458_vm1, %v5787_v61  ;;  %7188 = vst [vmem:[#allocation27_spill] sm:$0xff] %v5813_v28  ;;  %v5823_v47 = vld [vmem:[%s5468_s10 + $0x168] sm:$0xff]  ;;  %7189 = vst [vmem:[#allocation28_spill] sm:$0xff] %v5835_v10 }
  0x43   : > { %v451_v46 = vrot.slane %v5823_v47, 1 }
  0x45   : > { %4542 = vmatmul.mubr.msk.f32.gmra.mrb[22].mxu1 %vm458_vm1, %v5783_v63  ;;  %4742 = vmatmul.mubr.msk.f32.gmra.mrb[22].mxu0 %vm458_vm1, %v5809_v39  ;;  %v5839_v63 = vsel %vm375_vm0, %v446_v60, %v447_v54  ;;  %v5861_v60 = vsel %vm375_vm0, %v447_v54, %v449_v8  ;;  %v5865_v40 = vsel %vm375_vm0, %v451_v46, %v452_v44  ;;  %v1710_v54 = vrot.slane %v5870_v11, 1 }
  0x46   : > { %4544 = vmatprep.mubr.msk.f32.mxu1 %vm458_vm1, %v5787_v61  ;;  %4744 = vmatprep.mubr.msk.f32.mxu0 %vm458_vm1, %v5813_v28  ;;  %7190 = vst [vmem:[#allocation29_spill] sm:$0xff] %v5839_v63  ;;  %v5849_v61 = vld [vmem:[%s5468_s10 + $0x180] sm:$0xff]  ;;  %7193 = vst [vmem:[#allocation32_spill] sm:$0xff] %v5861_v60  ;;  %v5881_v46 = vsel %vm375_vm0, %v452_v44, %v454_v7  ;;  %v1046_v44 = vrot.slane %v5491_v14, 2 }
  0x47   : > { %7191 = vst [vmem:[#allocation30_spill] sm:$0xff] %v5849_v61  ;;  %7194 = vst [vmem:[#allocation33_spill] sm:$0xff] %v5865_v40 }
  0x48   : > { %7195 = vst [vmem:[#allocation34_spill] sm:$0xff] %v5881_v46 }
  0x49   : > { %4545 = vmatmul.mubr.msk.f32.gmra.mrb[24].mxu1 %vm458_vm1, %v5809_v39  ;;  %4745 = vmatmul.mubr.msk.f32.gmra.mrb[24].mxu0 %vm458_vm1, %v5835_v10  ;;  %v1707_v39 = vrot.slane %v5849_v61, 1 }
  0x4a   : > { %4547 = vmatprep.mubr.msk.f32.mxu1 %vm458_vm1, %v5813_v28  ;;  %4747 = vmatprep.mubr.msk.f32.mxu0 %vm458_vm1, %v5839_v63  ;;  %v1043_v28 = vrot.slane %v5477_v6, 2 }
  0x4b   : > { %v5885_v8 = vsel %vm375_vm0, %v1707_v39, %v1708_v34  ;;  %v5899_v39 = vsel %vm375_vm0, %v1708_v34, %v1710_v54  ;;  %v1051_v34 = vrot.slane %v5503_v20, 2  ;;  %v1053_v54 = vrot.slane %v5511_v25, 2  ;;  %v5937_v20 = vld [vmem:[%s7098_s1 + $0x18] sm:$0xff] }
  0x4c   : > { %7196 = vst [vmem:[#allocation35_spill] sm:$0xff] %v5885_v8  ;;  %7197 = vst [vmem:[#allocation36_spill] sm:$0xff] %v5899_v39 }
  0x4d   : > { %4548 = vmatmul.mubr.msk.f32.gmra.mrb[26].mxu1 %vm458_vm1, %v5835_v10  ;;  %4748 = vmatmul.mubr.msk.f32.gmra.mrb[26].mxu0 %vm458_vm1, %v5861_v60  ;;  %v1044_v10 = vrot.slane %v5482_v9, 2 }
  0x4e   : > { %4550 = vmatprep.mubr.msk.f32.mxu1 %vm458_vm1, %v5839_v63  ;;  %4750 = vmatprep.mubr.msk.f32.mxu0 %vm458_vm1, %v5865_v40  ;;  %v1049_v63 = vrot.slane %v5499_v18, 2 }
  0x4f   : > { %v5902_v7 = vsel %vm1037_vm2, %v1043_v28, %v1044_v10  ;;  %v5915_v14 = vsel %vm1037_vm2, %v1044_v10, %v1046_v44 }
  0x50   : > { %v5943_v10 = vsel %vm1037_vm2, %v1049_v63, %v1051_v34  ;;  %v1064_v34 = vrot.slane %v5565_v43, 2 }
  0x51   : > { %4551 = vmatmul.mubr.msk.f32.gmra.mrb[28].mxu1 %vm458_vm1, %v5861_v60  ;;  %4751 = vmatmul.mubr.msk.f32.gmra.mrb[28].mxu0 %vm458_vm1, %v5881_v46  ;;  %v1048_v60 = vrot.slane %v5494_v15, 2 }
  0x52   : > { %4553 = vmatprep.mubr.msk.f32.mxu1 %vm458_vm1, %v5865_v40  ;;  %4753 = vmatprep.mubr.msk.f32.mxu0 %vm458_vm1, %v5885_v8  ;;  %v1054_v8 = vrot.slane %v5514_v26, 2  ;;  %v1059_v40 = vrot.slane %v5528_v32, 2 }
  0x53   : > { %v5919_v28 = vsel %vm1037_vm2, %v1048_v60, %v1049_v63  ;;  %v1056_v60 = vrot.slane %v5517_v27, 2  ;;  %v1063_v63 = vrot.slane %v5562_v42, 2 }
  0x54   : > { %v5947_v44 = vsel %vm1037_vm2, %v1053_v54, %v1054_v8  ;;  %v1068_v54 = vrot.slane %v5589_v50, 2 }
  0x55   : > { %4554 = vmatmul.mubr.msk.f32.gmra.mrb[30].mxu1 %vm458_vm1, %v5881_v46  ;;  %4754 = vmatmul.mubr.msk.f32.gmra.mrb[30].mxu0 %vm458_vm1, %v5899_v39  ;;  %v5928_v39 = vld [vmem:[%s7098_s1 + $0x38] sm:$0xff]  ;;  %v1058_v46 = vrot.slane %v5525_v31, 2  ;;  %v5963_v27 = vsel %vm1037_vm2, %v1054_v8, %v1056_v60  ;;  %v5984_v8 = vsel %vm1037_vm2, %v1063_v63, %v1064_v34  ;;  %v1069_v60 = vrot.slane %v5592_v51, 2 }
  0x56   : > { %4558 = vmatprep.mubr.msk.f32.mxu1 %vm458_vm1, %v5471_v4  ;;  %4758 = vmatprep.mubr.msk.f32.mxu0 %vm458_vm1, %v5902_v7  ;;  %v1073_v63 = vrot.slane %v5615_v58, 2 }
  0x59   : > { %4559 = vmatmul.mubr.msk.f32.vlgmr.msra.gmra.mrb[0].mxu1 %vm458_vm1, %v5474_v5  ;;  %4759 = vmatmul.mubr.msk.f32.vlgmr.msra.gmra.mrb[0].mxu0 %vm458_vm1, %v5915_v14 }
  0x5a   : > { %4561 = vmatprep.mubr.msk.f32.mxu1 %vm458_vm1, %v5477_v6  ;;  %4807 = vmatpush3.msra.mxu0 %v5533_v33  ;;  %v1061_v33 = vrot.slane %v5557_v41, 2  ;;  %v1079_v6 = vrot.slane %v5644_v3, 2 }
  0x5b   : > { %4761 = vmatprep.mubr.msk.f32.mxu0 %vm458_vm1, %v5919_v28  ;;  %4607 = vmatpush3.msra.mxu1 %v5543_v35  ;;  %v5967_v35 = vsel %vm1037_vm2, %v1058_v46, %v1059_v40  ;;  %v1066_v46 = vrot.slane %v5584_v49, 2 }
  0x5c   : > { %4856 = vmatprep.subr.mxu0 %v5928_v39  ;;  %4656 = vmatprep.subr.mxu1 %v5937_v20  ;;  %v5980_v41 = vsel %vm1037_vm2, %v1059_v40, %v1061_v33  ;;  %v1071_v40 = vrot.slane %v5610_v57, 2  ;;  %v6001_v33 = vsel %vm1037_vm2, %v1068_v54, %v1069_v60  ;;  %v1078_v54 = vrot.slane %v5641_v2, 2 }
  0x5d   : > { %4562 = vmatmul.mubr.msk.f32.gmra.mrb[2].mxu1 %vm458_vm1, %v5482_v9  ;;  %4762 = vmatmul.mubr.msk.f32.gmra.mrb[2].mxu0 %vm458_vm1, %v5943_v10  ;;  %v5997_v49 = vsel %vm1037_vm2, %v1064_v34, %v1066_v46  ;;  %7198 = vst [vmem:[#allocation37_spill] sm:$0xff] %v6001_v33  ;;  %v1074_v9 = vrot.slane %v5618_v59, 2  ;;  %v1076_v34 = vrot.slane %v5636_v1, 2 }
  0x5e   : > { %4564 = vmatprep.mubr.msk.f32.mxu1 %vm458_vm1, %v5494_v15  ;;  %4764 = vmatprep.mubr.msk.f32.mxu0 %vm458_vm1, %v5947_v44  ;;  %v6014_v57 = vsel %vm1037_vm2, %v1069_v60, %v1071_v40  ;;  %v1081_v60 = vrot.slane %v5662_v16, 2  ;;  %v6035_v40 = vsel %vm1037_vm2, %v1078_v54, %v1079_v6  ;;  %v1086_v16 = vrot.slane %v5688_v29, 2 }
  0x5f   : > { %v6018_v46 = vsel %vm1037_vm2, %v1073_v63, %v1074_v9  ;;  %v6031_v1 = vsel %vm1037_vm2, %v1074_v9, %v1076_v34  ;;  %7200 = vst [vmem:[#allocation39_spill] sm:$0xff] %v6035_v40  ;;  %v1083_v63 = vrot.slane %v5667_v17, 2  ;;  %v1088_v54 = vrot.slane %v5693_v30, 2 }
  0x60   : > { %7199 = vst [vmem:[#allocation38_spill] sm:$0xff] %v6018_v46  ;;  %v6048_v9 = vsel %vm1037_vm2, %v1079_v6, %v1081_v60  ;;  %v1091_v29 = vrot.slane %v5714_v53, 2 }
  0x61   : > { %4565 = vmatmul.mubr.msk.f32.gmra.mrb[4].mxu1 %vm458_vm1, %v5499_v18  ;;  %4765 = vmatmul.mubr.msk.f32.gmra.mrb[4].mxu0 %vm458_vm1, %v5963_v27 }
  0x62   : > { %4567 = vmatprep.mubr.msk.f32.mxu1 %vm458_vm1, %v5511_v25  ;;  %4767 = vmatprep.mubr.msk.f32.mxu0 %vm458_vm1, %v5967_v35 }
  0x65   : > { %4568 = vmatmul.mubr.msk.f32.gmra.mrb[6].mxu1 %vm458_vm1, %v5514_v26  ;;  %4768 = vmatmul.mubr.msk.f32.gmra.mrb[6].mxu0 %vm458_vm1, %v5980_v41 }
  0x66   : > { %4570 = vmatprep.mubr.msk.f32.mxu1 %vm458_vm1, %v5525_v31  ;;  %4770 = vmatprep.mubr.msk.f32.mxu0 %vm458_vm1, %v5984_v8 }
  0x69   : > { %4571 = vmatmul.mubr.msk.f32.gmra.mrb[8].mxu1 %vm458_vm1, %v5528_v32  ;;  %4771 = vmatmul.mubr.msk.f32.gmra.mrb[8].mxu0 %vm458_vm1, %v5997_v49 }
  0x6a   : > { %4573 = vmatprep.mubr.msk.f32.mxu1 %vm458_vm1, %v5562_v42  ;;  %4773 = vmatprep.mubr.msk.f32.mxu0 %vm458_vm1, %v6001_v33  ;;  %v1084_v33 = vrot.slane %v5670_v19, 2 }
  0x6c   : > { %v6052_v34 = vsel %vm1037_vm2, %v1083_v63, %v1084_v33  ;;  %v6065_v6 = vsel %vm1037_vm2, %v1084_v33, %v1086_v16  ;;  %v1093_v63 = vrot.slane %v5719_v55, 2  ;;  %v1096_v33 = vrot.slane %v5740_v13, 2 }
  0x6d   : > { %4574 = vmatmul.mubr.msk.f32.gmra.mrb[10].mxu1 %vm458_vm1, %v5565_v43  ;;  %4774 = vmatmul.mubr.msk.f32.gmra.mrb[10].mxu0 %vm458_vm1, %v6014_v57  ;;  %7201 = vst [vmem:[#allocation40_spill] sm:$0xff] %v6052_v34 }
  0x6e   : > { %4576 = vmatprep.mubr.msk.f32.mxu1 %vm458_vm1, %v5589_v50  ;;  %4776 = vmatprep.mubr.msk.f32.mxu0 %vm458_vm1, %v6018_v46  ;;  %v1089_v46 = vrot.slane %v5696_v37, 2 }
  0x70   : > { %v6069_v60 = vsel %vm1037_vm2, %v1088_v54, %v1089_v46  ;;  %v6082_v53 = vsel %vm1037_vm2, %v1089_v46, %v1091_v29  ;;  %v1098_v54 = vrot.slane %v5745_v22, 2  ;;  %v1101_v46 = vrot.slane %v5766_v21, 2 }
  0x71   : > { %4577 = vmatmul.mubr.msk.f32.gmra.mrb[12].mxu1 %vm458_vm1, %v5592_v51  ;;  %4777 = vmatmul.mubr.msk.f32.gmra.mrb[12].mxu0 %vm458_vm1, %v6031_v1  ;;  %7202 = vst [vmem:[#allocation41_spill] sm:$0xff] %v6069_v60 }
  0x72   : > { %4579 = vmatprep.mubr.msk.f32.mxu1 %vm458_vm1, %v5615_v58  ;;  %4779 = vmatprep.mubr.msk.f32.mxu0 %vm458_vm1, %v6035_v40  ;;  %v1094_v40 = vrot.slane %v5722_v56, 2 }
  0x74   : > { %v6086_v16 = vsel %vm1037_vm2, %v1093_v63, %v1094_v40  ;;  %v6099_v13 = vsel %vm1037_vm2, %v1094_v40, %v1096_v33  ;;  %v1103_v63 = vrot.slane %v5771_v45, 2  ;;  %v1106_v40 = vrot.slane %v5792_v62, 2 }
  0x75   : > { %4580 = vmatmul.mubr.msk.f32.gmra.mrb[14].mxu1 %vm458_vm1, %v5618_v59  ;;  %4780 = vmatmul.mubr.msk.f32.gmra.mrb[14].mxu0 %vm458_vm1, %v6048_v9  ;;  %7203 = vst [vmem:[#allocation42_spill] sm:$0xff] %v6086_v16 }
  0x76   : > { %4582 = vmatprep.mubr.msk.f32.mxu1 %vm458_vm1, %v5641_v2  ;;  %4782 = vmatprep.mubr.msk.f32.mxu0 %vm458_vm1, %v6052_v34  ;;  %v1099_v34 = vrot.slane %v5748_v24, 2 }
  0x78   : > { %v6103_v29 = vsel %vm1037_vm2, %v1098_v54, %v1099_v34  ;;  %v6116_v21 = vsel %vm1037_vm2, %v1099_v34, %v1101_v46  ;;  %v1108_v54 = vrot.slane %v5797_v0, 2  ;;  %v1111_v34 = vrot.slane %v5818_v52, 2 }
  0x79   : > { %4583 = vmatmul.mubr.msk.f32.gmra.mrb[16].mxu1 %vm458_vm1, %v5644_v3  ;;  %4783 = vmatmul.mubr.msk.f32.gmra.mrb[16].mxu0 %vm458_vm1, %v6065_v6  ;;  %7204 = vst [vmem:[#allocation43_spill] sm:$0xff] %v6103_v29 }
  0x7a   : > { %4585 = vmatprep.mubr.msk.f32.mxu1 %vm458_vm1, %v5667_v17  ;;  %4785 = vmatprep.mubr.msk.f32.mxu0 %vm458_vm1, %v6069_v60  ;;  %v1104_v60 = vrot.slane %v5774_v48, 2 }
  0x7c   : > { %v6120_v33 = vsel %vm1037_vm2, %v1103_v63, %v1104_v60  ;;  %v6133_v62 = vsel %vm1037_vm2, %v1104_v60, %v1106_v40  ;;  %v1113_v63 = vrot.slane %v5823_v47, 2  ;;  %v1116_v60 = vrot.slane %v5844_v38, 2 }
  0x7d   : > { %4586 = vmatmul.mubr.msk.f32.gmra.mrb[18].mxu1 %vm458_vm1, %v5670_v19  ;;  %4786 = vmatmul.mubr.msk.f32.gmra.mrb[18].mxu0 %vm458_vm1, %v6082_v53  ;;  %7205 = vst [vmem:[#allocation44_spill] sm:$0xff] %v6120_v33 }
  0x7e   : > { %4588 = vmatprep.mubr.msk.f32.mxu1 %vm458_vm1, %v5693_v30  ;;  %4788 = vmatprep.mubr.msk.f32.mxu0 %vm458_vm1, %v6086_v16  ;;  %v1109_v16 = vrot.slane %v5800_v12, 2 }
  0x80   : > { %v6137_v46 = vsel %vm1037_vm2, %v1108_v54, %v1109_v16  ;;  %v6150_v52 = vsel %vm1037_vm2, %v1109_v16, %v1111_v34  ;;  %v1975_v54 = vrot.slane %v5849_v61, 2  ;;  %v1978_v16 = vrot.slane %v5870_v11, 2 }
  0x81   : > { %4589 = vmatmul.mubr.msk.f32.gmra.mrb[20].mxu1 %vm458_vm1, %v5696_v37  ;;  %4789 = vmatmul.mubr.msk.f32.gmra.mrb[20].mxu0 %vm458_vm1, %v6099_v13  ;;  %7206 = vst [vmem:[#allocation45_spill] sm:$0xff] %v6150_v52  ;;  %v1038_v34 = vrot.slane %v5471_v4, 2 }
  0x82   : > { %4591 = vmatprep.mubr.msk.f32.mxu1 %vm458_vm1, %v5719_v55  ;;  %4791 = vmatprep.mubr.msk.f32.mxu0 %vm458_vm1, %v6103_v29  ;;  %v1114_v29 = vrot.slane %v5826_v23, 2 }
  0x84   : > { %v6154_v40 = vsel %vm1037_vm2, %v1113_v63, %v1114_v29  ;;  %v6167_v38 = vsel %vm1037_vm2, %v1114_v29, %v1116_v60  ;;  %v1039_v63 = vrot.slane %v5474_v5, 2  ;;  %v6200_v29 = vld [vmem:[%s7098_s1 + $0x40] sm:$0xff]  ;;  %v7218_v60 = vld [vmem:[#allocation43_spill] sm:$0xff] }
  0x85   : > { %4592 = vmatmul.mubr.msk.f32.gmra.mrb[22].mxu1 %vm458_vm1, %v5722_v56  ;;  %4792 = vmatmul.mubr.msk.f32.gmra.mrb[22].mxu0 %vm458_vm1, %v6116_v21  ;;  %7207 = vst [vmem:[#allocation46_spill] sm:$0xff] %v6154_v40  ;;  %7208 = vst [vmem:[#allocation47_spill] sm:$0xff] %v6167_v38 }
  0x86   : > { %4594 = vmatprep.mubr.msk.f32.mxu1 %vm458_vm1, %v5745_v22  ;;  %4794 = vmatprep.mubr.msk.f32.mxu0 %vm458_vm1, %v6120_v33  ;;  %v1976_v33 = vrot.slane %v5852_v36, 2  ;;  %v1040_v5 = vsel %vm1037_vm2, %v1038_v34, %v1039_v63  ;;  %v6322_v34 = vld [vmem:[%s5468_s10 + $0x198] sm:$0xff] }
  0x88   : > { %v6173_v36 = vsel %vm1037_vm2, %v1975_v54, %v1976_v33  ;;  %v6185_v4 = vsel %vm1037_vm2, %v1976_v33, %v1978_v16  ;;  %v7216_v33 = vld [vmem:[#allocation41_spill] sm:$0xff]  ;;  %v7219_v54 = vld [vmem:[#allocation44_spill] sm:$0xff]  ;;  %v7220_v16 = vld [vmem:[#allocation30_spill] sm:$0xff] }
  0x89   : > { %4595 = vmatmul.mubr.msk.f32.gmra.mrb[24].mxu1 %vm458_vm1, %v5748_v24  ;;  %4795 = vmatmul.mubr.msk.f32.gmra.mrb[24].mxu0 %vm458_vm1, %v6133_v62  ;;  %7209 = vst [vmem:[#allocation48_spill] sm:$0xff] %v6173_v36 }
  0x8a   : > { %4597 = vmatprep.mubr.msk.f32.mxu1 %vm458_vm1, %v5771_v45  ;;  %4797 = vmatprep.mubr.msk.f32.mxu0 %vm458_vm1, %v6137_v46 }
  0x8d   : > { %4598 = vmatmul.mubr.msk.f32.gmra.mrb[26].mxu1 %vm458_vm1, %v5774_v48  ;;  %4798 = vmatmul.mubr.msk.f32.gmra.mrb[26].mxu0 %vm458_vm1, %v6150_v52  ;;  %v7210_v52 = vld [vmem:[#allocation4_spill] sm:$0xff] }
  0x8e   : > { %4600 = vmatprep.mubr.msk.f32.mxu1 %vm458_vm1, %v5797_v0  ;;  %4800 = vmatprep.mubr.msk.f32.mxu0 %vm458_vm1, %v6154_v40  ;;  %v1041_v61 = vrot.slane %v7210_v52, 2  ;;  %7211 = vst [vmem:[#allocation4_spill] sm:$0xff] %v6185_v4  ;;  %v7217_v52 = vld [vmem:[#allocation42_spill] sm:$0xff] }
  0x90   : > { %v1042_v11 = vsel %vm1037_vm2, %v1039_v63, %v1041_v61  ;;  %v6209_v61 = vld [vmem:[%s7101_s4] sm:$0xff]  ;;  %v7221_v63 = vld [vmem:[#allocation45_spill] sm:$0xff] }
  0x91   : > { %4601 = vmatmul.mubr.msk.f32.gmra.mrb[28].mxu1 %vm458_vm1, %v5800_v12  ;;  %4801 = vmatmul.mubr.msk.f32.gmra.mrb[28].mxu0 %vm458_vm1, %v6167_v38 }
  0x92   : > { %4603 = vmatprep.mubr.msk.f32.mxu1 %vm458_vm1, %v5823_v47  ;;  %4803 = vmatprep.mubr.msk.f32.mxu0 %vm458_vm1, %v6173_v36  ;;  %v7224_v36 = vld [vmem:[#allocation5_spill] sm:$0xff] }
  0x95   : > { %4604 = vmatmul.mubr.msk.f32.gmra.mrb[30].mxu1 %vm458_vm1, %v5826_v23  ;;  %4804 = vmatmul.mubr.msk.f32.gmra.mrb[30].mxu0 %vm458_vm1, %v6185_v4  ;;  %v7223_v4 = vld [vmem:[#allocation2_spill] sm:$0xff] }
  0x96   : > { %4608 = vmatprep.mubr.msk.f32.mxu1 %vm458_vm1, %v1040_v5  ;;  %4808 = vmatprep.mubr.msk.f32.mxu0 %vm458_vm1, %v5494_v15  ;;  %v7222_v5 = vld [vmem:[#allocation31_spill] sm:$0xff] }
  0x99   : > { %4609 = vmatmul.mubr.msk.f32.vlgmr.msra.gmra.mrb[0].mxu1 %vm458_vm1, %v1042_v11  ;;  %4809 = vmatmul.mubr.msk.f32.vlgmr.msra.gmra.mrb[0].mxu0 %vm458_vm1, %v5499_v18  ;;  %v6333_v11 = vld [vmem:[%s5468_s10 + $0x1a0] sm:$0xff] }
  0x9a   : > { %4611 = vmatprep.mubr.msk.f32.mxu1 %vm458_vm1, %v5902_v7  ;;  %4857 = vmatpush3.msra.mxu0 %v5928_v39  ;;  %v7212_v39 = vld [vmem:[#allocation37_spill] sm:$0xff]  ;;  %v7213_v7 = vld [vmem:[#allocation38_spill] sm:$0xff] }
  0x9b   : > { %4811 = vmatprep.mubr.msk.f32.mxu0 %vm458_vm1, %v5511_v25  ;;  %4657 = vmatpush3.msra.mxu1 %v5937_v20  ;;  %v7215_v20 = vld [vmem:[#allocation40_spill] sm:$0xff] }
  0x9c   : > { %4906 = vmatprep.subr.mxu0 %v6200_v29  ;;  %4956 = vmatprep.subr.mxu1 %v6209_v61 }
  0x9d   : > { %4612 = vmatmul.mubr.msk.f32.gmra.mrb[2].mxu1 %vm458_vm1, %v5915_v14  ;;  %4812 = vmatmul.mubr.msk.f32.gmra.mrb[2].mxu0 %vm458_vm1, %v5514_v26  ;;  %v7214_v14 = vld [vmem:[#allocation39_spill] sm:$0xff] }
  0x9e   : > { %4614 = vmatprep.mubr.msk.f32.mxu1 %vm458_vm1, %v5919_v28  ;;  %4814 = vmatprep.mubr.msk.f32.mxu0 %vm458_vm1, %v5525_v31 }
  0xa1   : > { %4615 = vmatmul.mubr.msk.f32.gmra.mrb[4].mxu1 %vm458_vm1, %v5943_v10  ;;  %4815 = vmatmul.mubr.msk.f32.gmra.mrb[4].mxu0 %vm458_vm1, %v5528_v32 }
  0xa2   : > { %4617 = vmatprep.mubr.msk.f32.mxu1 %vm458_vm1, %v5947_v44  ;;  %4817 = vmatprep.mubr.msk.f32.mxu0 %vm458_vm1, %v5562_v42 }
  0xa5   : > { %4618 = vmatmul.mubr.msk.f32.gmra.mrb[6].mxu1 %vm458_vm1, %v5963_v27  ;;  %4818 = vmatmul.mubr.msk.f32.gmra.mrb[6].mxu0 %vm458_vm1, %v5565_v43 }
  0xa6   : > { %4620 = vmatprep.mubr.msk.f32.mxu1 %vm458_vm1, %v5967_v35  ;;  %4820 = vmatprep.mubr.msk.f32.mxu0 %vm458_vm1, %v5589_v50 }
  0xa9   : > { %4621 = vmatmul.mubr.msk.f32.gmra.mrb[8].mxu1 %vm458_vm1, %v5980_v41  ;;  %4821 = vmatmul.mubr.msk.f32.gmra.mrb[8].mxu0 %vm458_vm1, %v5592_v51 }
  0xaa   : > { %4623 = vmatprep.mubr.msk.f32.mxu1 %vm458_vm1, %v5984_v8  ;;  %4823 = vmatprep.mubr.msk.f32.mxu0 %vm458_vm1, %v5615_v58 }
  0xad   : > { %4624 = vmatmul.mubr.msk.f32.gmra.mrb[10].mxu1 %vm458_vm1, %v5997_v49  ;;  %4824 = vmatmul.mubr.msk.f32.gmra.mrb[10].mxu0 %vm458_vm1, %v5618_v59 }
  0xae   : > { %4626 = vmatprep.mubr.msk.f32.mxu1 %vm458_vm1, %v7212_v39  ;;  %4826 = vmatprep.mubr.msk.f32.mxu0 %vm458_vm1, %v5641_v2 }
  0xb1   : > { %4627 = vmatmul.mubr.msk.f32.gmra.mrb[12].mxu1 %vm458_vm1, %v6014_v57  ;;  %4827 = vmatmul.mubr.msk.f32.gmra.mrb[12].mxu0 %vm458_vm1, %v5644_v3 }
  0xb2   : > { %4629 = vmatprep.mubr.msk.f32.mxu1 %vm458_vm1, %v7213_v7  ;;  %4829 = vmatprep.mubr.msk.f32.mxu0 %vm458_vm1, %v5667_v17 }
  0xb5   : > { %4630 = vmatmul.mubr.msk.f32.gmra.mrb[14].mxu1 %vm458_vm1, %v6031_v1  ;;  %4830 = vmatmul.mubr.msk.f32.gmra.mrb[14].mxu0 %vm458_vm1, %v5670_v19 }
  0xb6   : > { %4632 = vmatprep.mubr.msk.f32.mxu1 %vm458_vm1, %v7214_v14  ;;  %4832 = vmatprep.mubr.msk.f32.mxu0 %vm458_vm1, %v5693_v30 }
  0xb9   : > { %4633 = vmatmul.mubr.msk.f32.gmra.mrb[16].mxu1 %vm458_vm1, %v6048_v9  ;;  %4833 = vmatmul.mubr.msk.f32.gmra.mrb[16].mxu0 %vm458_vm1, %v5696_v37 }
  0xba   : > { %4635 = vmatprep.mubr.msk.f32.mxu1 %vm458_vm1, %v7215_v20  ;;  %4835 = vmatprep.mubr.msk.f32.mxu0 %vm458_vm1, %v5719_v55 }
  0xbd   : > { %4636 = vmatmul.mubr.msk.f32.gmra.mrb[18].mxu1 %vm458_vm1, %v6065_v6  ;;  %4836 = vmatmul.mubr.msk.f32.gmra.mrb[18].mxu0 %vm458_vm1, %v5722_v56 }
  0xbe   : > { %4638 = vmatprep.mubr.msk.f32.mxu1 %vm458_vm1, %v7216_v33  ;;  %4838 = vmatprep.mubr.msk.f32.mxu0 %vm458_vm1, %v5745_v22 }
  0xc1   : > { %4639 = vmatmul.mubr.msk.f32.gmra.mrb[20].mxu1 %vm458_vm1, %v6082_v53  ;;  %4839 = vmatmul.mubr.msk.f32.gmra.mrb[20].mxu0 %vm458_vm1, %v5748_v24 }
  0xc2   : > { %4641 = vmatprep.mubr.msk.f32.mxu1 %vm458_vm1, %v7217_v52  ;;  %4841 = vmatprep.mubr.msk.f32.mxu0 %vm458_vm1, %v5771_v45 }
  0xc5   : > { %4642 = vmatmul.mubr.msk.f32.gmra.mrb[22].mxu1 %vm458_vm1, %v6099_v13  ;;  %4842 = vmatmul.mubr.msk.f32.gmra.mrb[22].mxu0 %vm458_vm1, %v5774_v48 }
  0xc6   : > { %4644 = vmatprep.mubr.msk.f32.mxu1 %vm458_vm1, %v7218_v60  ;;  %4844 = vmatprep.mubr.msk.f32.mxu0 %vm458_vm1, %v5797_v0 }
  0xc9   : > { %4645 = vmatmul.mubr.msk.f32.gmra.mrb[24].mxu1 %vm458_vm1, %v6116_v21  ;;  %4845 = vmatmul.mubr.msk.f32.gmra.mrb[24].mxu0 %vm458_vm1, %v5800_v12 }
  0xca   : > { %4647 = vmatprep.mubr.msk.f32.mxu1 %vm458_vm1, %v7219_v54  ;;  %4847 = vmatprep.mubr.msk.f32.mxu0 %vm458_vm1, %v5823_v47 }
  0xcd   : > { %4648 = vmatmul.mubr.msk.f32.gmra.mrb[26].mxu1 %vm458_vm1, %v6133_v62  ;;  %4848 = vmatmul.mubr.msk.f32.gmra.mrb[26].mxu0 %vm458_vm1, %v5826_v23 }
  0xce   : > { %4650 = vmatprep.mubr.msk.f32.mxu1 %vm458_vm1, %v6137_v46  ;;  %4850 = vmatprep.mubr.msk.f32.mxu0 %vm458_vm1, %v7220_v16 }
  0xd1   : > { %4651 = vmatmul.mubr.msk.f32.gmra.mrb[28].mxu1 %vm458_vm1, %v7221_v63  ;;  %4851 = vmatmul.mubr.msk.f32.gmra.mrb[28].mxu0 %vm458_vm1, %v7222_v5  ;;  %v7225_v63 = vld [vmem:[#allocation3_spill] sm:$0xff] }
  0xd2   : > { %4653 = vmatprep.mubr.msk.f32.mxu1 %vm458_vm1, %v6154_v40  ;;  %4853 = vmatprep.mubr.msk.f32.mxu0 %vm458_vm1, %v6322_v34  ;;  %v7226_v40 = vld [vmem:[#allocation6_spill] sm:$0xff] }
  0xd5   : > { %4654 = vmatmul.mubr.msk.f32.gmra.mrb[30].mxu1 %vm458_vm1, %v6167_v38  ;;  %4854 = vmatmul.mubr.msk.f32.gmra.mrb[30].mxu0 %vm458_vm1, %v6333_v11  ;;  %v7227_v38 = vld [vmem:[#allocation7_spill] sm:$0xff] }
  0xd6   : > { %4658 = vmatprep.mubr.msk.f32.mxu1 %vm458_vm1, %v7223_v4  ;;  %4858 = vmatprep.mubr.msk.f32.mxu0 %vm458_vm1, %v7224_v36  ;;  %v7228_v36 = vld [vmem:[#allocation8_spill] sm:$0xff]  ;;  %v6452_v4 = vld [vmem:[%s5468_s10 + $0x1a8] sm:$0x3] }
  0xd9   : > { %4659 = vmatmul.mubr.msk.f32.vlgmr.msra.gmra.mrb[0].mxu1 %vm458_vm1, %v7225_v63  ;;  %4859 = vmatmul.mubr.msk.f32.vlgmr.msra.gmra.mrb[0].mxu0 %vm458_vm1, %v7226_v40  ;;  %v7229_v40 = vld [vmem:[#allocation9_spill] sm:$0xff]  ;;  %v3308_v63 = vld [vmem:[%s6470_s28] sm:$0xff] }
  0xda   : > { %4661 = vmatprep.mubr.msk.f32.mxu1 %vm458_vm1, %v5494_v15  ;;  %4907 = vmatpush3.msra.mxu0 %v6200_v29  ;;  %v7230_v15 = vld [vmem:[#allocation10_spill] sm:$0xff]  ;;  %v2512_v29 = vrot.slane %v6452_v4, 1 }
  0xdb   : > { %4861 = vmatprep.mubr.msk.f32.mxu0 %vm458_vm1, %v7227_v38  ;;  %4957 = vmatpush3.msra.mxu1 %v6209_v61  ;;  %v7231_v38 = vld [vmem:[#allocation11_spill] sm:$0xff] }
  0xdd   : > { %4662 = vmatmul.mubr.msk.f32.gmra.mrb[2].mxu1 %vm458_vm1, %v5499_v18  ;;  %4862 = vmatmul.mubr.msk.f32.gmra.mrb[2].mxu0 %vm458_vm1, %v7228_v36  ;;  %v7232_v18 = vld [vmem:[#allocation12_spill] sm:$0xff] }
  0xde   : > { %4664 = vmatprep.mubr.msk.f32.mxu1 %vm458_vm1, %v5511_v25  ;;  %4864 = vmatprep.mubr.msk.f32.mxu0 %vm458_vm1, %v7229_v40  ;;  %v7233_v25 = vld [vmem:[#allocation13_spill] sm:$0xff]  ;;  %v3310_v36 = vld [vmem:[%s6470_s28 + $0x10] sm:$0xff] }
  0xdf   : > { %v7255_v40 = vld [vmem:[#allocation45_spill] sm:$0xff] }
  0xe1   : > { %4665 = vmatmul.mubr.msk.f32.gmra.mrb[4].mxu1 %vm458_vm1, %v5514_v26  ;;  %4865 = vmatmul.mubr.msk.f32.gmra.mrb[4].mxu0 %vm458_vm1, %v7230_v15  ;;  %v7234_v26 = vld [vmem:[#allocation14_spill] sm:$0xff] }
  0xe2   : > { %4667 = vmatprep.mubr.msk.f32.mxu1 %vm458_vm1, %v5525_v31  ;;  %4867 = vmatprep.mubr.msk.f32.mxu0 %vm458_vm1, %v7231_v38  ;;  %v7235_v31 = vld [vmem:[#allocation15_spill] sm:$0xff]  ;;  %v7256_v15 = vld [vmem:[#allocation46_spill] sm:$0xff]  ;;  %v2777_v38 = vrot.slane %v6322_v34, 2 }
  0xe5   : > { %4668 = vmatmul.mubr.msk.f32.gmra.mrb[6].mxu1 %vm458_vm1, %v5528_v32  ;;  %4868 = vmatmul.mubr.msk.f32.gmra.mrb[6].mxu0 %vm458_vm1, %v7232_v18  ;;  %v7236_v32 = vld [vmem:[#allocation16_spill] sm:$0xff]  ;;  %v2778_v18 = vrot.slane %v6333_v11, 2 }
  0xe6   : > { %4670 = vmatprep.mubr.msk.f32.mxu1 %vm458_vm1, %v5562_v42  ;;  %4870 = vmatprep.mubr.msk.f32.mxu0 %vm458_vm1, %v7233_v25  ;;  %v7237_v42 = vld [vmem:[#allocation17_spill] sm:$0xff]  ;;  %v3337_v25 = vld [vmem:[%s6470_s28 + $0xe8] sm:$0xff] }
  0xe9   : > { %4671 = vmatmul.mubr.msk.f32.gmra.mrb[8].mxu1 %vm458_vm1, %v5565_v43  ;;  %4871 = vmatmul.mubr.msk.f32.gmra.mrb[8].mxu0 %vm458_vm1, %v7234_v26  ;;  %v7238_v43 = vld [vmem:[#allocation18_spill] sm:$0xff]  ;;  %v7258_v26 = vld [vmem:[#allocation48_spill] sm:$0xff] }
  0xea   : > { %4673 = vmatprep.mubr.msk.f32.mxu1 %vm458_vm1, %v5589_v50  ;;  %4873 = vmatprep.mubr.msk.f32.mxu0 %vm458_vm1, %v7235_v31  ;;  %v7239_v50 = vld [vmem:[#allocation19_spill] sm:$0xff]  ;;  %v2780_v31 = vrot.slane %v6452_v4, 2 }
  0xed   : > { %4674 = vmatmul.mubr.msk.f32.gmra.mrb[10].mxu1 %vm458_vm1, %v5592_v51  ;;  %4874 = vmatmul.mubr.msk.f32.gmra.mrb[10].mxu0 %vm458_vm1, %v7236_v32  ;;  %v7240_v51 = vld [vmem:[#allocation20_spill] sm:$0xff] }
  0xee   : > { %4676 = vmatprep.mubr.msk.f32.mxu1 %vm458_vm1, %v5615_v58  ;;  %4876 = vmatprep.mubr.msk.f32.mxu0 %vm458_vm1, %v7237_v42  ;;  %v7241_v58 = vld [vmem:[#allocation21_spill] sm:$0xff]  ;;  %v3338_v32 = vld [vmem:[%s6470_s28 + $0xf0] sm:$0xff]  ;;  %v2779_v42 = vsel %vm1037_vm2, %v2777_v38, %v2778_v18 }
  0xf1   : > { %4677 = vmatmul.mubr.msk.f32.gmra.mrb[12].mxu1 %vm458_vm1, %v5618_v59  ;;  %4877 = vmatmul.mubr.msk.f32.gmra.mrb[12].mxu0 %vm458_vm1, %v7238_v43  ;;  %v7242_v59 = vld [vmem:[#allocation22_spill] sm:$0xff]  ;;  %v2781_v43 = vsel %vm1037_vm2, %v2778_v18, %v2780_v31 }
  0xf2   : > { %4679 = vmatprep.mubr.msk.f32.mxu1 %vm458_vm1, %v5641_v2  ;;  %4879 = vmatprep.mubr.msk.f32.mxu0 %vm458_vm1, %v7239_v50  ;;  %v7243_v2 = vld [vmem:[#allocation23_spill] sm:$0xff] }
  0xf5   : > { %4680 = vmatmul.mubr.msk.f32.gmra.mrb[14].mxu1 %vm458_vm1, %v5644_v3  ;;  %4880 = vmatmul.mubr.msk.f32.gmra.mrb[14].mxu0 %vm458_vm1, %v7240_v51  ;;  %v7244_v3 = vld [vmem:[#allocation24_spill] sm:$0xff] }
  0xf6   : > { %4682 = vmatprep.mubr.msk.f32.mxu1 %vm458_vm1, %v5667_v17  ;;  %4882 = vmatprep.mubr.msk.f32.mxu0 %vm458_vm1, %v7241_v58  ;;  %v7245_v17 = vld [vmem:[#allocation25_spill] sm:$0xff] }
  0xf9   : > { %4683 = vmatmul.mubr.msk.f32.gmra.mrb[16].mxu1 %vm458_vm1, %v5670_v19  ;;  %4883 = vmatmul.mubr.msk.f32.gmra.mrb[16].mxu0 %vm458_vm1, %v7242_v59  ;;  %v7246_v19 = vld [vmem:[#allocation26_spill] sm:$0xff] }
  0xfa   : > { %4685 = vmatprep.mubr.msk.f32.mxu1 %vm458_vm1, %v5693_v30  ;;  %4885 = vmatprep.mubr.msk.f32.mxu0 %vm458_vm1, %v7243_v2  ;;  %v7247_v30 = vld [vmem:[#allocation27_spill] sm:$0xff] }
  0xfd   : > { %4686 = vmatmul.mubr.msk.f32.gmra.mrb[18].mxu1 %vm458_vm1, %v5696_v37  ;;  %4886 = vmatmul.mubr.msk.f32.gmra.mrb[18].mxu0 %vm458_vm1, %v7244_v3  ;;  %v7248_v37 = vld [vmem:[#allocation28_spill] sm:$0xff] }
  0xfe   : > { %4688 = vmatprep.mubr.msk.f32.mxu1 %vm458_vm1, %v5719_v55  ;;  %4888 = vmatprep.mubr.msk.f32.mxu0 %vm458_vm1, %v7245_v17  ;;  %v7249_v55 = vld [vmem:[#allocation29_spill] sm:$0xff] }
 0x101   : > { %4689 = vmatmul.mubr.msk.f32.gmra.mrb[20].mxu1 %vm458_vm1, %v5722_v56  ;;  %4889 = vmatmul.mubr.msk.f32.gmra.mrb[20].mxu0 %vm458_vm1, %v7246_v19  ;;  %v7250_v56 = vld [vmem:[#allocation32_spill] sm:$0xff] }
 0x102   : > { %4691 = vmatprep.mubr.msk.f32.mxu1 %vm458_vm1, %v5745_v22  ;;  %4891 = vmatprep.mubr.msk.f32.mxu0 %vm458_vm1, %v7247_v30  ;;  %v7251_v22 = vld [vmem:[#allocation33_spill] sm:$0xff] }
 0x105   : > { %4692 = vmatmul.mubr.msk.f32.gmra.mrb[22].mxu1 %vm458_vm1, %v5748_v24  ;;  %4892 = vmatmul.mubr.msk.f32.gmra.mrb[22].mxu0 %vm458_vm1, %v7248_v37  ;;  %v2509_v24 = vrot.slane %v6322_v34, 1  ;;  %v7259_v34 = vld [vmem:[#allocation4_spill] sm:$0xff] }
 0x106   : > { %4694 = vmatprep.mubr.msk.f32.mxu1 %vm458_vm1, %v5771_v45  ;;  %4894 = vmatprep.mubr.msk.f32.mxu0 %vm458_vm1, %v7249_v55  ;;  %v2510_v45 = vrot.slane %v6333_v11, 1  ;;  %v3339_v11 = vld [vmem:[%s6470_s28 + $0xf8] sm:$0xff] }
 0x108   : > { %v2511_v61 = vsel %vm375_vm0, %v2509_v24, %v2510_v45 }
 0x109   : > { %4695 = vmatmul.mubr.msk.f32.gmra.mrb[24].mxu1 %vm458_vm1, %v5774_v48  ;;  %4895 = vmatmul.mubr.msk.f32.gmra.mrb[24].mxu0 %vm458_vm1, %v7250_v56  ;;  %v7252_v48 = vld [vmem:[#allocation34_spill] sm:$0xff] }
 0x10a   : > { %4697 = vmatprep.mubr.msk.f32.mxu1 %vm458_vm1, %v5797_v0  ;;  %4897 = vmatprep.mubr.msk.f32.mxu0 %vm458_vm1, %v7251_v22  ;;  %v7253_v0 = vld [vmem:[#allocation35_spill] sm:$0xff] }
 0x10d   : > { %4698 = vmatmul.mubr.msk.f32.gmra.mrb[26].mxu1 %vm458_vm1, %v5800_v12  ;;  %4898 = vmatmul.mubr.msk.f32.gmra.mrb[26].mxu0 %vm458_vm1, %v7252_v48  ;;  %v2513_v12 = vsel %vm375_vm0, %v2510_v45, %v2512_v29 }
 0x10e   : > { %4700 = vmatprep.mubr.msk.f32.mxu1 %vm458_vm1, %v5823_v47  ;;  %4900 = vmatprep.mubr.msk.f32.mxu0 %vm458_vm1, %v7253_v0  ;;  %v7254_v47 = vld [vmem:[#allocation36_spill] sm:$0xff] }
 0x111   : > { %4701 = vmatmul.mubr.msk.f32.gmra.mrb[28].mxu1 %vm458_vm1, %v5826_v23  ;;  %4901 = vmatmul.mubr.msk.f32.gmra.mrb[28].mxu0 %vm458_vm1, %v7254_v47  ;;  %v3309_v23 = vld [vmem:[%s6470_s28 + $0x8] sm:$0xff] }
 0x112   : > { %4703 = vmatprep.mubr.msk.f32.mxu1 %vm458_vm1, %v7220_v16  ;;  %4903 = vmatprep.mubr.msk.f32.mxu0 %vm458_vm1, %v2511_v61  ;;  %v3311_v16 = vld [vmem:[%s6470_s28 + $0x18] sm:$0xff] }
 0x115   : > { %4704 = vmatmul.mubr.msk.f32.gmra.mrb[30].mxu1 %vm458_vm1, %v7222_v5  ;;  %4904 = vmatmul.mubr.msk.f32.gmra.mrb[30].mxu0 %vm458_vm1, %v2513_v12  ;;  %v3312_v5 = vld [vmem:[%s6470_s28 + $0x20] sm:$0xff] }
 0x116   : > { %4958 = vmatprep.mubr.msk.f32.mxu1 %vm458_vm1, %v3308_v63  ;;  %4908 = vmatprep.mubr.msk.f32.mxu0 %vm458_vm1, %v5919_v28  ;;  %v3313_v28 = vld [vmem:[%s6470_s28 + $0x28] sm:$0xff] }
 0x119   : > { %4959 = vmatmul.mubr.msk.f32.vlgmr.msra.gmra.mrb[32].mxu1 %vm458_vm1, %v3309_v23  ;;  %4909 = vmatmul.mubr.msk.f32.vlgmr.msra.gmra.mrb[0].mxu0 %vm458_vm1, %v5943_v10  ;;  %v3314_v10 = vld [vmem:[%s6470_s28 + $0x30] sm:$0xff] }
 0x11a   : > { %4961 = vmatprep.mubr.msk.f32.mxu1 %vm458_vm1, %v3310_v36  ;;  %4911 = vmatprep.mubr.msk.f32.mxu0 %vm458_vm1, %v5947_v44  ;;  %v3315_v44 = vld [vmem:[%s6470_s28 + $0x38] sm:$0xff] }
 0x11d   : > { %4962 = vmatmul.mubr.msk.f32.gmra.mrb[34].mxu1 %vm458_vm1, %v3311_v16  ;;  %4912 = vmatmul.mubr.msk.f32.gmra.mrb[2].mxu0 %vm458_vm1, %v5963_v27  ;;  %v3316_v27 = vld [vmem:[%s6470_s28 + $0x40] sm:$0xff] }
 0x11e   : > { %4964 = vmatprep.mubr.msk.f32.mxu1 %vm458_vm1, %v3312_v5  ;;  %4914 = vmatprep.mubr.msk.f32.mxu0 %vm458_vm1, %v5967_v35  ;;  %v3317_v35 = vld [vmem:[%s6470_s28 + $0x48] sm:$0xff] }
 0x121   : > { %4965 = vmatmul.mubr.msk.f32.gmra.mrb[36].mxu1 %vm458_vm1, %v3313_v28  ;;  %4915 = vmatmul.mubr.msk.f32.gmra.mrb[4].mxu0 %vm458_vm1, %v5980_v41  ;;  %v3318_v41 = vld [vmem:[%s6470_s28 + $0x50] sm:$0xff] }
 0x122   : > { %4967 = vmatprep.mubr.msk.f32.mxu1 %vm458_vm1, %v3314_v10  ;;  %4917 = vmatprep.mubr.msk.f32.mxu0 %vm458_vm1, %v5984_v8  ;;  %v3319_v8 = vld [vmem:[%s6470_s28 + $0x58] sm:$0xff] }
 0x125   : > { %4968 = vmatmul.mubr.msk.f32.gmra.mrb[38].mxu1 %vm458_vm1, %v3315_v44  ;;  %4918 = vmatmul.mubr.msk.f32.gmra.mrb[6].mxu0 %vm458_vm1, %v5997_v49  ;;  %v3320_v49 = vld [vmem:[%s6470_s28 + $0x60] sm:$0xff] }
 0x126   : > { %4970 = vmatprep.mubr.msk.f32.mxu1 %vm458_vm1, %v3316_v27  ;;  %4920 = vmatprep.mubr.msk.f32.mxu0 %vm458_vm1, %v7212_v39  ;;  %v3321_v39 = vld [vmem:[%s6470_s28 + $0x68] sm:$0xff] }
 0x129   : > { %4971 = vmatmul.mubr.msk.f32.gmra.mrb[40].mxu1 %vm458_vm1, %v3317_v35  ;;  %4921 = vmatmul.mubr.msk.f32.gmra.mrb[8].mxu0 %vm458_vm1, %v6014_v57  ;;  %v3322_v57 = vld [vmem:[%s6470_s28 + $0x70] sm:$0xff] }
 0x12a   : > { %4973 = vmatprep.mubr.msk.f32.mxu1 %vm458_vm1, %v3318_v41  ;;  %4923 = vmatprep.mubr.msk.f32.mxu0 %vm458_vm1, %v7213_v7  ;;  %v3323_v7 = vld [vmem:[%s6470_s28 + $0x78] sm:$0xff] }
 0x12d   : > { %4974 = vmatmul.mubr.msk.f32.gmra.mrb[42].mxu1 %vm458_vm1, %v3319_v8  ;;  %4924 = vmatmul.mubr.msk.f32.gmra.mrb[10].mxu0 %vm458_vm1, %v6031_v1  ;;  %v3324_v1 = vld [vmem:[%s6470_s28 + $0x80] sm:$0xff] }
 0x12e   : > { %4976 = vmatprep.mubr.msk.f32.mxu1 %vm458_vm1, %v3320_v49  ;;  %4926 = vmatprep.mubr.msk.f32.mxu0 %vm458_vm1, %v7214_v14  ;;  %v3325_v14 = vld [vmem:[%s6470_s28 + $0x88] sm:$0xff]  ;;  %v6671_v49 = vld [vmem:[%s7099_s2] ss:$0 sm:$0xff] }
 0x131   : > { %4977 = vmatmul.mubr.msk.f32.gmra.mrb[44].mxu1 %vm458_vm1, %v3321_v39  ;;  %4927 = vmatmul.mubr.msk.f32.gmra.mrb[12].mxu0 %vm458_vm1, %v6048_v9  ;;  %v3326_v9 = vld [vmem:[%s6470_s28 + $0x90] sm:$0xff] }
 0x132   : > { %4979 = vmatprep.mubr.msk.f32.mxu1 %vm458_vm1, %v3322_v57  ;;  %4929 = vmatprep.mubr.msk.f32.mxu0 %vm458_vm1, %v7215_v20  ;;  %v3327_v20 = vld [vmem:[%s6470_s28 + $0x98] sm:$0xff] }
 0x135   : > { %4980 = vmatmul.mubr.msk.f32.gmra.mrb[46].mxu1 %vm458_vm1, %v3323_v7  ;;  %4930 = vmatmul.mubr.msk.f32.gmra.mrb[14].mxu0 %vm458_vm1, %v6065_v6  ;;  %v3328_v6 = vld [vmem:[%s6470_s28 + $0xa0] sm:$0xff] }
 0x136   : > { %4982 = vmatprep.mubr.msk.f32.mxu1 %vm458_vm1, %v3324_v1  ;;  %4932 = vmatprep.mubr.msk.f32.mxu0 %vm458_vm1, %v7216_v33  ;;  %v3329_v33 = vld [vmem:[%s6470_s28 + $0xa8] sm:$0xff] }
 0x139   : > { %4983 = vmatmul.mubr.msk.f32.gmra.mrb[48].mxu1 %vm458_vm1, %v3325_v14  ;;  %4933 = vmatmul.mubr.msk.f32.gmra.mrb[16].mxu0 %vm458_vm1, %v6082_v53  ;;  %v3330_v53 = vld [vmem:[%s6470_s28 + $0xb0] sm:$0xff] }
 0x13a   : > { %4985 = vmatprep.mubr.msk.f32.mxu1 %vm458_vm1, %v3326_v9  ;;  %4935 = vmatprep.mubr.msk.f32.mxu0 %vm458_vm1, %v7217_v52  ;;  %v3331_v52 = vld [vmem:[%s6470_s28 + $0xb8] sm:$0xff] }
 0x13d   : > { %4986 = vmatmul.mubr.msk.f32.gmra.mrb[50].mxu1 %vm458_vm1, %v3327_v20  ;;  %4936 = vmatmul.mubr.msk.f32.gmra.mrb[18].mxu0 %vm458_vm1, %v6099_v13  ;;  %v3332_v13 = vld [vmem:[%s6470_s28 + $0xc0] sm:$0xff] }
 0x13e   : > { %4988 = vmatprep.mubr.msk.f32.mxu1 %vm458_vm1, %v3328_v6  ;;  %4938 = vmatprep.mubr.msk.f32.mxu0 %vm458_vm1, %v7218_v60  ;;  %v3333_v60 = vld [vmem:[%s6470_s28 + $0xc8] sm:$0xff] }
 0x141   : > { %4989 = vmatmul.mubr.msk.f32.gmra.mrb[52].mxu1 %vm458_vm1, %v3329_v33  ;;  %4939 = vmatmul.mubr.msk.f32.gmra.mrb[20].mxu0 %vm458_vm1, %v6116_v21  ;;  %v3334_v21 = vld [vmem:[%s6470_s28 + $0xd0] sm:$0xff] }
 0x142   : > { %4991 = vmatprep.mubr.msk.f32.mxu1 %vm458_vm1, %v3330_v53  ;;  %4941 = vmatprep.mubr.msk.f32.mxu0 %vm458_vm1, %v7219_v54  ;;  %v3335_v54 = vld [vmem:[%s6470_s28 + $0xd8] sm:$0xff] }
 0x145   : > { %4992 = vmatmul.mubr.msk.f32.gmra.mrb[54].mxu1 %vm458_vm1, %v3331_v52  ;;  %4942 = vmatmul.mubr.msk.f32.gmra.mrb[22].mxu0 %vm458_vm1, %v6133_v62  ;;  %v3336_v62 = vld [vmem:[%s6470_s28 + $0xe0] sm:$0xff] }
 0x146   : > { %4994 = vmatprep.mubr.msk.f32.mxu1 %vm458_vm1, %v3332_v13  ;;  %4944 = vmatprep.mubr.msk.f32.mxu0 %vm458_vm1, %v6137_v46  ;;  %v7257_v46 = vld [vmem:[#allocation47_spill] sm:$0xff] }
 0x149   : > { %4995 = vmatmul.mubr.msk.f32.gmra.mrb[56].mxu1 %vm458_vm1, %v3333_v60  ;;  %4945 = vmatmul.mubr.msk.f32.gmra.mrb[24].mxu0 %vm458_vm1, %v7255_v40 }
 0x14a   : > { %4997 = vmatprep.mubr.msk.f32.mxu1 %vm458_vm1, %v3334_v21  ;;  %4947 = vmatprep.mubr.msk.f32.mxu0 %vm458_vm1, %v7256_v15 }
 0x14d   : > { %4998 = vmatmul.mubr.msk.f32.gmra.mrb[58].mxu1 %vm458_vm1, %v3335_v54  ;;  %4948 = vmatmul.mubr.msk.f32.gmra.mrb[26].mxu0 %vm458_vm1, %v7257_v46 }
 0x14e   : > { %5000 = vmatprep.mubr.msk.f32.mxu1 %vm458_vm1, %v3336_v62  ;;  %4950 = vmatprep.mubr.msk.f32.mxu0 %vm458_vm1, %v7258_v26 }
 0x151   : > { %5001 = vmatmul.mubr.msk.f32.gmra.mrb[60].mxu1 %vm458_vm1, %v3337_v25  ;;  %4951 = vmatmul.mubr.msk.f32.gmra.mrb[28].mxu0 %vm458_vm1, %v7259_v34 }
 0x152   : > { %5003 = vmatprep.mubr.msk.f32.mxu1 %vm458_vm1, %v3338_v32  ;;  %4953 = vmatprep.mubr.msk.f32.mxu0 %vm458_vm1, %v2779_v42 }
 0x155   : > { %5004 = vmatmul.mubr.msk.f32.gmra.mrb[62].mxu1 %vm458_vm1, %v3339_v11  ;;  %4954 = vmatmul.mubr.msk.f32.gmra.mrb[30].mxu0 %vm458_vm1, %v2781_v43 }
 0x1ac   : > { %v4660_v50 = vpop.f32.mrb[0].mxu1 }
 0x1ad   : > { %v1515_v51 = vpop.f32.mrb[1].mxu1 }
 0x1b0   : > { %v4663_v58 = vpop.f32.mrb[2].mxu1 }
 0x1b1   : > { %v1525_v59 = vpop.f32.mrb[3].mxu1 }
 0x1b4   : > { %v4666_v2 = vpop.f32.mrb[4].mxu1 }
 0x1b5   : > { %v1535_v3 = vpop.f32.mrb[5].mxu1 }
 0x1b8   : > { %v6614_v17 = vpop.f32.mrb[6].mxu1 }
 0x1b9   : > { %v6616_v19 = vpop.f32.mrb[7].mxu1 }
 0x1bc   : > { %v6618_v30 = vpop.f32.mrb[8].mxu1 }
 0x1bd   : > { %v6620_v37 = vpop.f32.mrb[9].mxu1 }
 0x1c0   : > { %v6622_v55 = vpop.f32.mrb[10].mxu1 }
 0x1c1   : > { %v6624_v56 = vpop.f32.mrb[11].mxu1 }
 0x1c4   : > { %v6626_v22 = vpop.f32.mrb[12].mxu1 }
 0x1c5   : > { %v6628_v24 = vpop.f32.mrb[13].mxu1 }
 0x1c8   : > { %v6630_v45 = vpop.f32.mrb[14].mxu1 }
 0x1c9   : > { %v6632_v4 = vpop.f32.mrb[15].mxu1 }
 0x1cc   : > { %v6634_v48 = vpop.f32.mrb[16].mxu1 }
 0x1cd   : > { %v6636_v0 = vpop.f32.mrb[17].mxu1 }
 0x1d0   : > { %v6638_v29 = vpop.f32.mrb[18].mxu1 }
 0x1d1   : > { %v6640_v61 = vpop.f32.mrb[19].mxu1 }
 0x1d4   : > { %v6642_v47 = vpop.f32.mrb[20].mxu1 }
 0x1d5   : > { %v6644_v12 = vpop.f32.mrb[21].mxu1 }
 0x1d8   : > { %v6646_v63 = vpop.f32.mrb[22].mxu1 }
 0x1d9   : > { %v6648_v23 = vpop.f32.mrb[23].mxu1 }
 0x1dc   : > { %v6650_v36 = vpop.f32.mrb[24].mxu1 }
 0x1dd   : > { %v6652_v16 = vpop.f32.mrb[25].mxu1 }
 0x1e0   : > { %v6654_v5 = vpop.f32.mrb[26].mxu1 }
 0x1e1   : > { %v6656_v28 = vpop.f32.mrb[27].mxu1 }
 0x1e4   : > { %v6658_v10 = vpop.f32.mrb[28].mxu1 }
 0x1e5   : > { %v6660_v44 = vpop.f32.mrb[29].mxu1 }
 0x1e8   : > { %v6662_v27 = vpop.f32.mrb[30].mxu1 }
 0x1e9   : > { %7260 = vst [vmem:[#allocation37_spill] sm:$0xff] %v6662_v27  ;;  %v6664_v35 = vpop.f32.mrb[31].mxu1 }
 0x1ea   : > { %7261 = vst [vmem:[#allocation38_spill] sm:$0xff] %v6664_v35 }
 0x1ec   : > { %v6666_v41 = vpop.f32.mrb[32].mxu1  ;;  %v4910_v8 = vpop.f32.mrb[0].mxu0 }
 0x1ed   : > { %v3510_v39 = vpop.f32.mrb[33].mxu1  ;;  %v5006_v57 = vadd.f32 %v4910_v8, %v4660_v50  ;;  %v2854_v7 = vpop.f32.mrb[1].mxu0 }
 0x1ee   : > { %v5007_v1 = vadd.f32 %v2854_v7, %v1515_v51 }
 0x1ef   : > { %v6674_v14 = vadd.f32 %v5006_v57, %v6671_v49 }
 0x1f0   : > { %v6676_v9 = vpop.f32.mrb[34].mxu1  ;;  %v6679_v20 = vadd.f32 %v5007_v1, %v6671_v49  ;;  %v4913_v6 = vpop.f32.mrb[2].mxu0 }
 0x1f1   : > { %v6681_v33 = vpop.f32.mrb[35].mxu1  ;;  %v4108_v53 = vmul.f32 -1.442695, %v6674_v14  ;;  %v5008_v52 = vadd.f32 %v4913_v6, %v4663_v58  ;;  %v2864_v13 = vpop.f32.mrb[3].mxu0 }
 0x1f2   : > { %v4107_v60 = vmul.f32 -1.442695, %v6679_v20  ;;  %v5009_v21 = vadd.f32 %v2864_v13, %v1525_v59 }
 0x1f3   : > { %5271 = vpow2.f32 %v4108_v53  ;;  %v6686_v40 = vadd.f32 %v5008_v52, %v6671_v49 }
 0x1f4   : > { %v6688_v54 = vpop.f32.mrb[36].mxu1  ;;  %5273 = vpow2.f32 %v4107_v60  ;;  %v6691_v15 = vadd.f32 %v5009_v21, %v6671_v49  ;;  %v4916_v62 = vpop.f32.mrb[4].mxu0 }
 0x1f5   : > { %v6693_v38 = vpop.f32.mrb[37].mxu1  ;;  %v4110_v18 = vmul.f32 -1.442695, %v6686_v40  ;;  %v5010_v46 = vadd.f32 %v4916_v62, %v4666_v2  ;;  %v2874_v25 = vpop.f32.mrb[5].mxu0 }
 0x1f6   : > { %v4109_v26 = vmul.f32 -1.442695, %v6691_v15  ;;  %v5011_v31 = vadd.f32 %v2874_v25, %v1535_v3 }
 0x1f7   : > { %5275 = vpow2.f32 %v4110_v18  ;;  %v6698_v32 = vadd.f32 %v5010_v46, %v6671_v49 }
 0x1f8   : > { %v6700_v42 = vpop.f32.mrb[38].mxu1  ;;  %5277 = vpow2.f32 %v4109_v26  ;;  %v6703_v34 = vadd.f32 %v5011_v31, %v6671_v49  ;;  %v4919_v11 = vpop.f32.mrb[6].mxu0 }
 0x1f9   : > { %v6705_v43 = vpop.f32.mrb[39].mxu1  ;;  %v4112_v50 = vmul.f32 -1.442695, %v6698_v32  ;;  %v5012_v51 = vadd.f32 %v4919_v11, %v6614_v17  ;;  %v2884_v58 = vpop.f32.mrb[7].mxu0 }
 0x1fa   : > { %v4111_v59 = vmul.f32 -1.442695, %v6703_v34  ;;  %v5013_v2 = vadd.f32 %v2884_v58, %v6616_v19  ;;  %v6724_v19 = vld [vmem:[%s7102_s5] ss:$0 sm:$0xff] }
 0x1fb   : > { %5279 = vpow2.f32 %v4112_v50  ;;  %v6712_v3 = vadd.f32 %v5012_v51, %v6671_v49  ;;  %v6736_v31 = vadd.f32 %v6666_v41, %v6724_v19  ;;  %v6739_v11 = vadd.f32 %v6724_v19, %v3510_v39 }
 0x1fc   : > { %v6714_v8 = vpop.f32.mrb[40].mxu1  ;;  %5281 = vpow2.f32 %v4111_v59  ;;  %v6717_v57 = vadd.f32 %v5013_v2, %v6671_v49  ;;  %v4922_v7 = vpop.f32.mrb[8].mxu0  ;;  %v6745_v2 = vadd.f32 %v6676_v9, %v6724_v19 }
 0x1fd   : > { %v3550_v1 = vpop.f32.mrb[41].mxu1  ;;  %v5272_v6 = vpop.eup %5271  ;;  %v4114_v17 = vmul.f32 -1.442695, %v6712_v3  ;;  %v5014_v53 = vadd.f32 %v4922_v7, %v6618_v30 }
 0x1fe   : > { %v2894_v52 = vpop.f32.mrb[9].mxu0  ;;  %v5274_v13 = vpop.eup %5273  ;;  %v3181_v60 = vadd.f32 1.0, %v5272_v6  ;;  %v4113_v21 = vmul.f32 -1.442695, %v6717_v57 }
 0x1ff   : > { %v5015_v62 = vadd.f32 %v2894_v52, %v6620_v37  ;;  %v3180_v18 = vadd.f32 1.0, %v5274_v13  ;;  %5283 = vpow2.f32 %v4114_v17  ;;  %v6729_v46 = vadd.f32 %v5014_v53, %v6671_v49 }
 0x200   : > { %v4975_v25 = vpop.f32.mrb[42].mxu1  ;;  %5285 = vrcp.f32 %v3181_v60  ;;  %v4925_v26 = vpop.f32.mrb[10].mxu0  ;;  %v6761_v60 = vadd.f32 %v6688_v54, %v6724_v19 }
 0x201   : > { %v6732_v30 = vadd.f32 %v5015_v62, %v6671_v49  ;;  %v3560_v50 = vpop.f32.mrb[43].mxu1  ;;  %v5276_v37 = vpop.eup %5275  ;;  %5287 = vrcp.f32 %v3180_v18  ;;  %v4116_v51 = vmul.f32 -1.442695, %v6729_v46  ;;  %v5016_v58 = vadd.f32 %v4925_v26, %v6622_v55 }
 0x202   : > { %v2904_v59 = vpop.f32.mrb[11].mxu0  ;;  %v5278_v7 = vpop.eup %5277  ;;  %v3183_v6 = vadd.f32 1.0, %v5276_v37  ;;  %5289 = vpow2.f32 %v4113_v21  ;;  %v6754_v55 = vadd.f32 %v6724_v19, %v6681_v33  ;;  %v6773_v37 = vadd.f32 %v6700_v42, %v6724_v19 }
 0x203   : > { %v4115_v41 = vmul.f32 -1.442695, %v6732_v30  ;;  %v5017_v39 = vadd.f32 %v2904_v59, %v6624_v56  ;;  %v3182_v17 = vadd.f32 1.0, %v5278_v7  ;;  %5291 = vpow2.f32 %v4116_v51 }
 0x204   : > { %v6750_v53 = vadd.f32 %v5016_v58, %v6671_v49  ;;  %v4978_v52 = vpop.f32.mrb[44].mxu1  ;;  %5293 = vrcp.f32 %v3183_v6  ;;  %v4928_v13 = vpop.f32.mrb[12].mxu0  ;;  %v6765_v56 = vadd.f32 %v6724_v19, %v6693_v38 }
 0x205   : > { %v6757_v9 = vadd.f32 %v5017_v39, %v6671_v49  ;;  %v6767_v21 = vpop.f32.mrb[45].mxu1  ;;  %v5280_v62 = vpop.eup %5279  ;;  %5295 = vrcp.f32 %v3182_v17  ;;  %v5018_v18 = vadd.f32 %v4928_v13, %v6626_v22  ;;  %v6782_v22 = vadd.f32 %v6724_v19, %v6705_v43 }
 0x206   : > { %v4118_v33 = vmul.f32 -1.442695, %v6750_v53  ;;  %v2914_v26 = vpop.f32.mrb[13].mxu0  ;;  %v5282_v51 = vpop.eup %5281  ;;  %v3185_v54 = vadd.f32 1.0, %v5280_v62  ;;  %5297 = vpow2.f32 %v4115_v41  ;;  %v6789_v41 = vadd.f32 %v6714_v8, %v6724_v19 }
 0x207   : > { %v4117_v58 = vmul.f32 -1.442695, %v6757_v9  ;;  %v5019_v38 = vadd.f32 %v2914_v26, %v6628_v24  ;;  %v3184_v59 = vadd.f32 1.0, %v5282_v51  ;;  %v6778_v7 = vadd.f32 %v5018_v18, %v6671_v49 }
 0x208   : > { %5299 = vpow2.f32 %v4118_v33  ;;  %v4981_v6 = vpop.f32.mrb[46].mxu1  ;;  %v4931_v39 = vpop.f32.mrb[14].mxu0  ;;  %v6792_v24 = vadd.f32 %v6724_v19, %v3550_v1  ;;  %v6799_v18 = vadd.f32 %v4975_v25, %v6724_v19 }
 0x209   : > { %5301 = vrcp.f32 %v3185_v54  ;;  %v6785_v42 = vadd.f32 %v5019_v38, %v6671_v49  ;;  %v6794_v17 = vpop.f32.mrb[47].mxu1  ;;  %v5284_v13 = vpop.eup %5283  ;;  %v4120_v43 = vmul.f32 -1.442695, %v6778_v7  ;;  %v5020_v62 = vadd.f32 %v4931_v39, %v6630_v45 }
 0x20a   : > { %5303 = vrcp.f32 %v3184_v59  ;;  %v2924_v33 = vpop.f32.mrb[15].mxu0  ;;  %v5286_v26 = vpop.eup %5285  ;;  %v3187_v51 = vadd.f32 1.0, %v5284_v13  ;;  %v6808_v45 = vadd.f32 %v6724_v19, %v3560_v50 }
 0x20b   : > { %5305 = vpow2.f32 %v4117_v58  ;;  %v4119_v8 = vmul.f32 -1.442695, %v6785_v42  ;;  %v5021_v1 = vadd.f32 %v2924_v33, %v6632_v4  ;;  %v5288_v54 = vpop.eup %5287  ;;  %v6804_v38 = vadd.f32 %v5020_v62, %v6671_v49 }
 0x20c   : > { %5307 = vpow2.f32 %v4120_v43  ;;  %v3277_v59 = vmul.f32 %v5286_v26, %v6674_v14  ;;  %v6810_v39 = vpop.f32.mrb[48].mxu1  ;;  %v5290_v25 = vpop.eup %5289  ;;  %v3276_v58 = vmul.f32 %v5288_v54, %v6679_v20  ;;  %v6824_v14 = vadd.f32 %v4978_v52, %v6724_v19 }
 0x20d   : > { %5309 = vrcp.f32 %v3187_v51  ;;  %v6820_v4 = vadd.f32 %v5021_v1, %v6671_v49  ;;  %v4934_v13 = vpop.f32.mrb[16].mxu0  ;;  %v6826_v50 = vpop.f32.mrb[49].mxu1  ;;  %v3186_v62 = vadd.f32 1.0, %v5290_v25  ;;  %v4122_v33 = vmul.f32 -1.442695, %v6804_v38 }
 0x20e   : > { %v5292_v43 = vpop.eup %5291  ;;  %5311 = vpow2.f32 %v4119_v8  ;;  %v3670_v26 = vadd.f32 %v6736_v31, %v3277_v59  ;;  %v2934_v51 = vpop.f32.mrb[17].mxu0  ;;  %v3669_v54 = vadd.f32 %v6739_v11, %v3276_v58  ;;  %v5022_v52 = vadd.f32 %v4934_v13, %v6634_v48 }
 0x20f   : > { %v5294_v1 = vpop.eup %5293  ;;  %v3189_v35 = vadd.f32 1.0, %v5292_v43  ;;  %v4121_v20 = vmul.f32 -1.442695, %v6820_v4  ;;  %5313 = vrcp.f32 %v3186_v62  ;;  %v5023_v8 = vadd.f32 %v2934_v51, %v6636_v0 }
 0x210   : > { %v5296_v27 = vpop.eup %5295  ;;  %3702 = vst.msk [vmem:[%s6817_s11 + $0x8] sm:$0xff] %vm458_vm1, %v3670_v26  ;;  %v3279_v25 = vmul.f32 %v5294_v1, %v6686_v40  ;;  %v6839_v31 = vadd.f32 %v6724_v19, %v6767_v21  ;;  %v6841_v59 = vpop.f32.mrb[50].mxu1  ;;  %3701 = vst.msk [vmem:[%s6817_s11] sm:$0xff] %vm458_vm1, %v3669_v54  ;;  %v6846_v48 = vadd.f32 %v5022_v52, %v6671_v49 }
 0x211   : > { %v5298_v43 = vpop.eup %5297  ;;  %5315 = vrcp.f32 %v3189_v35  ;;  %v3278_v11 = vmul.f32 %v5296_v27, %v6691_v15  ;;  %v4937_v58 = vpop.f32.mrb[18].mxu0  ;;  %v6850_v0 = vadd.f32 %v4981_v6, %v6724_v19  ;;  %v6855_v62 = vadd.f32 %v5023_v8, %v6671_v49 }
 0x212   : > { %v6852_v40 = vpop.f32.mrb[51].mxu1  ;;  %v5300_v21 = vpop.eup %5299  ;;  %v3188_v13 = vadd.f32 1.0, %v5298_v43  ;;  %5317 = vpow2.f32 %v4122_v33  ;;  %v3672_v35 = vadd.f32 %v6745_v2, %v3279_v25  ;;  %v4124_v27 = vmul.f32 -1.442695, %v6846_v48 }
 0x213   : > { %v2944_v26 = vpop.f32.mrb[19].mxu0  ;;  %v5302_v51 = vpop.eup %5301  ;;  %v3191_v1 = vadd.f32 1.0, %v5300_v21  ;;  %5319 = vpow2.f32 %v4121_v20  ;;  %v3671_v15 = vadd.f32 %v6754_v55, %v3278_v11  ;;  %v4123_v54 = vmul.f32 -1.442695, %v6855_v62 }
 0x214   : > { %v5304_v6 = vpop.eup %5303  ;;  %5321 = vrcp.f32 %v3188_v13  ;;  %3704 = vst.msk [vmem:[%s6817_s11 + $0x18] sm:$0xff] %vm458_vm1, %v3672_v35  ;;  %v5024_v33 = vadd.f32 %v4937_v58, %v6638_v29  ;;  %v5025_v52 = vadd.f32 %v2944_v26, %v6640_v61  ;;  %v6865_v2 = vpop.f32.mrb[52].mxu1  ;;  %v3281_v20 = vmul.f32 %v5302_v51, %v6698_v32 }
 0x215   : > { %v5306_v8 = vpop.eup %5305  ;;  %5323 = vrcp.f32 %v3191_v1  ;;  %3703 = vst.msk [vmem:[%s6817_s11 + $0x10] sm:$0xff] %vm458_vm1, %v3671_v15  ;;  %v3280_v55 = vmul.f32 %v5304_v6, %v6703_v34  ;;  %v4940_v25 = vpop.f32.mrb[20].mxu0  ;;  %v6873_v43 = vadd.f32 %v6724_v19, %v6794_v17 }
 0x216   : > { %v6875_v11 = vpop.f32.mrb[53].mxu1  ;;  %v5308_v29 = vpop.eup %5307  ;;  %v3190_v58 = vadd.f32 1.0, %v5306_v8  ;;  %5325 = vpow2.f32 %v4124_v27  ;;  %v6878_v61 = vadd.f32 %v5024_v33, %v6671_v49  ;;  %v6881_v21 = vadd.f32 %v5025_v52, %v6671_v49 }
 0x217   : > { %v2954_v32 = vpop.f32.mrb[21].mxu0  ;;  %v5310_v34 = vpop.eup %5309  ;;  %v3193_v13 = vadd.f32 1.0, %v5308_v29  ;;  %5327 = vpow2.f32 %v4123_v54  ;;  %v3674_v17 = vadd.f32 %v6761_v60, %v3281_v20  ;;  %v3673_v35 = vadd.f32 %v6765_v56, %v3280_v55 }
 0x218   : > { %v5312_v26 = vpop.eup %5311  ;;  %5329 = vrcp.f32 %v3190_v58  ;;  %v4126_v51 = vmul.f32 -1.442695, %v6878_v61  ;;  %v4125_v1 = vmul.f32 -1.442695, %v6881_v21  ;;  %v5026_v27 = vadd.f32 %v4940_v25, %v6642_v47  ;;  %v6888_v15 = vpop.f32.mrb[54].mxu1 }
 0x219   : > { %5331 = vrcp.f32 %v3193_v13  ;;  %v3192_v6 = vadd.f32 1.0, %v5312_v26  ;;  %3706 = vst.msk [vmem:[%s6817_s11 + $0x28] sm:$0xff] %vm458_vm1, %v3674_v17  ;;  %3705 = vst.msk [vmem:[%s6817_s11 + $0x20] sm:$0xff] %vm458_vm1, %v3673_v35  ;;  %v5027_v60 = vadd.f32 %v2954_v32, %v6644_v12  ;;  %v3283_v56 = vmul.f32 %v5310_v34, %v6712_v3  ;;  %v4943_v54 = vpop.f32.mrb[22].mxu0  ;;  %v6896_v33 = vpop.f32.mrb[55].mxu1 }
 0x21a   : > { %v5314_v52 = vpop.eup %5313  ;;  %5333 = vpow2.f32 %v4126_v51  ;;  %v6899_v8 = vadd.f32 %v5026_v27, %v6671_v49  ;;  %v5028_v47 = vadd.f32 %v4943_v54, %v6646_v63  ;;  %v2964_v20 = vpop.f32.mrb[23].mxu0  ;;  %v6904_v55 = vadd.f32 %v6810_v39, %v6724_v19 }
 0x21b   : > { %v5316_v25 = vpop.eup %5315  ;;  %5335 = vrcp.f32 %v3192_v6  ;;  %v6907_v12 = vadd.f32 %v5027_v60, %v6671_v49  ;;  %v3676_v3 = vadd.f32 %v6773_v37, %v3283_v56  ;;  %v3282_v29 = vmul.f32 %v5314_v52, %v6717_v57 }
 0x21c   : > { %v5318_v58 = vpop.eup %5317  ;;  %5337 = vpow2.f32 %v4125_v1  ;;  %v4128_v32 = vmul.f32 -1.442695, %v6899_v8  ;;  %v6913_v63 = vadd.f32 %v5028_v47, %v6671_v49  ;;  %v5029_v34 = vadd.f32 %v2964_v20, %v6648_v23  ;;  %v6916_v39 = vpop.f32.mrb[56].mxu1 }
 0x21d   : > { %v5320_v13 = vpop.eup %5319  ;;  %v3195_v17 = vadd.f32 1.0, %v5318_v58  ;;  %v4127_v35 = vmul.f32 -1.442695, %v6907_v12  ;;  %3708 = vst.msk [vmem:[%s6817_s11 + $0x38] sm:$0xff] %vm458_vm1, %v3676_v3  ;;  %v3675_v57 = vadd.f32 %v6782_v22, %v3282_v29  ;;  %v3285_v37 = vmul.f32 %v5316_v25, %v6729_v46  ;;  %v4946_v26 = vpop.f32.mrb[24].mxu0 }
 0x21e   : > { %v6923_v51 = vpop.f32.mrb[57].mxu1  ;;  %v5322_v1 = vpop.eup %5321  ;;  %v3194_v27 = vadd.f32 1.0, %v5320_v13  ;;  %5339 = vpow2.f32 %v4128_v32  ;;  %v4130_v23 = vmul.f32 -1.442695, %v6913_v63  ;;  %v6927_v6 = vadd.f32 %v5029_v34, %v6671_v49 }
 0x21f   : > { %v2974_v60 = vpop.f32.mrb[25].mxu0  ;;  %v5324_v56 = vpop.eup %5323  ;;  %5341 = vrcp.f32 %v3195_v17  ;;  %3707 = vst.msk [vmem:[%s6817_s11 + $0x30] sm:$0xff] %vm458_vm1, %v3675_v57  ;;  %v3678_v22 = vadd.f32 %v6789_v41, %v3285_v37  ;;  %v3284_v46 = vmul.f32 %v5322_v1, %v6732_v30  ;;  %v5030_v54 = vadd.f32 %v4946_v26, %v6650_v36 }
 0x220   : > { %v5326_v52 = vpop.eup %5325  ;;  %5343 = vrcp.f32 %v3194_v27  ;;  %v4129_v47 = vmul.f32 -1.442695, %v6927_v6  ;;  %v5031_v20 = vadd.f32 %v2974_v60, %v6652_v16  ;;  %v3287_v25 = vmul.f32 %v5324_v56, %v6750_v53  ;;  %v6937_v3 = vpop.f32.mrb[58].mxu1 }
 0x221   : > { %v5328_v29 = vpop.eup %5327  ;;  %v3197_v58 = vadd.f32 1.0, %v5326_v52  ;;  %5345 = vpow2.f32 %v4127_v35  ;;  %3710 = vst.msk [vmem:[%s6817_s11 + $0x48] sm:$0xff] %vm458_vm1, %v3678_v22  ;;  %v3677_v30 = vadd.f32 %v6792_v24, %v3284_v46  ;;  %v6943_v36 = vadd.f32 %v5030_v54, %v6671_v49  ;;  %v4949_v41 = vpop.f32.mrb[26].mxu0 }
 0x222   : > { %v6945_v32 = vpop.f32.mrb[59].mxu1  ;;  %v5330_v16 = vpop.eup %5329  ;;  %v3196_v34 = vadd.f32 1.0, %v5328_v29  ;;  %5347 = vpow2.f32 %v4130_v23  ;;  %v6948_v53 = vadd.f32 %v5031_v20, %v6671_v49  ;;  %v3680_v13 = vadd.f32 %v6799_v18, %v3287_v25 }
 0x223   : > { %v2984_v17 = vpop.f32.mrb[27].mxu0  ;;  %v5332_v35 = vpop.eup %5331  ;;  %5349 = vrcp.f32 %v3197_v58  ;;  %3709 = vst.msk [vmem:[%s6817_s11 + $0x40] sm:$0xff] %vm458_vm1, %v3677_v30  ;;  %v4132_v24 = vmul.f32 -1.442695, %v6943_v36  ;;  %v3286_v57 = vmul.f32 %v5330_v16, %v6757_v9  ;;  %v5032_v37 = vadd.f32 %v4949_v41, %v6654_v5 }
 0x224   : > { %v5334_v26 = vpop.eup %5333  ;;  %5351 = vrcp.f32 %v3196_v34  ;;  %v4131_v1 = vmul.f32 -1.442695, %v6948_v53  ;;  %3712 = vst.msk [vmem:[%s6817_s11 + $0x58] sm:$0xff] %vm458_vm1, %v3680_v13  ;;  %v5033_v27 = vadd.f32 %v2984_v17, %v6656_v28  ;;  %v3289_v18 = vmul.f32 %v5332_v35, %v6778_v7  ;;  %v6961_v23 = vpop.f32.mrb[60].mxu1 }
 0x225   : > { %v5336_v60 = vpop.eup %5335  ;;  %v3199_v56 = vadd.f32 1.0, %v5334_v26  ;;  %5353 = vpow2.f32 %v4129_v47  ;;  %v3679_v9 = vadd.f32 %v6808_v45, %v3286_v57  ;;  %v6965_v5 = vadd.f32 %v5032_v37, %v6671_v49  ;;  %v4952_v22 = vpop.f32.mrb[28].mxu0 }
 0x226   : > { %v6967_v46 = vpop.f32.mrb[61].mxu1  ;;  %v5338_v54 = vpop.eup %5337  ;;  %5355 = vpow2.f32 %v4132_v24  ;;  %v6970_v28 = vadd.f32 %v5033_v27, %v6671_v49  ;;  %v3682_v7 = vadd.f32 %v6824_v14, %v3289_v18  ;;  %v3288_v52 = vmul.f32 %v5336_v60, %v6785_v42  ;;  %v7262_v24 = vld [vmem:[#allocation37_spill] sm:$0xff]  ;;  %v7263_v27 = vld [vmem:[#allocation38_spill] sm:$0xff] }
 0x227   : > { %v2994_v20 = vpop.f32.mrb[29].mxu0  ;;  %5357 = vrcp.f32 %v3199_v56  ;;  %v3198_v47 = vadd.f32 1.0, %v5338_v54  ;;  %3711 = vst.msk [vmem:[%s6817_s11 + $0x50] sm:$0xff] %vm458_vm1, %v3679_v9  ;;  %v4134_v45 = vmul.f32 -1.442695, %v6965_v5  ;;  %v5034_v25 = vadd.f32 %v4952_v22, %v6658_v10 }
 0x228   : > { %v5340_v29 = vpop.eup %5339  ;;  %5359 = vpow2.f32 %v4131_v1  ;;  %v4133_v58 = vmul.f32 -1.442695, %v6970_v28  ;;  %3714 = vst.msk [vmem:[%s6817_s11 + $0x68] sm:$0xff] %vm458_vm1, %v3682_v7  ;;  %v3681_v14 = vadd.f32 %v6839_v31, %v3288_v52  ;;  %v5035_v42 = vadd.f32 %v2994_v20, %v6660_v44  ;;  %v6983_v30 = vpop.f32.mrb[62].mxu1 }
 0x229   : > { %v5342_v41 = vpop.eup %5341  ;;  %5361 = vrcp.f32 %v3198_v47  ;;  %v3201_v16 = vadd.f32 1.0, %v5340_v29  ;;  %v6986_v34 = vadd.f32 %v5034_v25, %v6671_v49  ;;  %v4955_v10 = vpop.f32.mrb[30].mxu0  ;;  %v3591_v13 = vadd.f32 %v6724_v19, %v6826_v50 }
 0x22a   : > { %v3660_v17 = vpop.f32.mrb[63].mxu1  ;;  %v5344_v35 = vpop.eup %5343  ;;  %5363 = vpow2.f32 %v4134_v45  ;;  %3713 = vst.msk [vmem:[%s6817_s11 + $0x60] sm:$0xff] %vm458_vm1, %v3681_v14  ;;  %v6993_v31 = vadd.f32 %v5035_v42, %v6671_v49  ;;  %v3291_v44 = vmul.f32 %v5342_v41, %v6804_v38  ;;  %v5036_v57 = vadd.f32 %v4955_v10, %v7262_v24 }
 0x22b   : > { %v3004_v37 = vpop.f32.mrb[31].mxu0  ;;  %v5346_v26 = vpop.eup %5345  ;;  %5365 = vrcp.f32 %v3201_v16  ;;  %v4136_v1 = vmul.f32 -1.442695, %v6986_v34  ;;  %v3290_v50 = vmul.f32 %v5344_v35, %v6820_v4  ;;  %v3606_v25 = vadd.f32 %v6841_v59, %v6724_v19 }
 0x22c   : > { %v5037_v18 = vadd.f32 %v3004_v37, %v7263_v27  ;;  %v5348_v60 = vpop.eup %5347  ;;  %v3200_v56 = vadd.f32 1.0, %v5346_v26  ;;  %5367 = vpow2.f32 %v4133_v58  ;;  %v4135_v9 = vmul.f32 -1.442695, %v6993_v31 }
 0x22d   : > { %v3684_v38 = vadd.f32 %v6850_v0, %v3291_v44  ;;  %v5350_v22 = vpop.eup %5349  ;;  %v3203_v54 = vadd.f32 1.0, %v5348_v60  ;;  %5369 = vpow2.f32 %v4136_v1  ;;  %v3683_v7 = vadd.f32 %v6873_v43, %v3290_v50 }
 0x22e   : > { %v7004_v52 = vadd.f32 %v5036_v57, %v6671_v49  ;;  %v5352_v20 = vpop.eup %5351  ;;  %5371 = vrcp.f32 %v3200_v56  ;;  %v7009_v4 = vadd.f32 %v5037_v18, %v6671_v49  ;;  %v3293_v47 = vmul.f32 %v5350_v22, %v6846_v48 }
 0x22f   : > { %3716 = vst.msk [vmem:[%s6817_s11 + $0x78] sm:$0xff] %vm458_vm1, %v3684_v38  ;;  %v5354_v45 = vpop.eup %5353  ;;  %5373 = vrcp.f32 %v3203_v54  ;;  %3715 = vst.msk [vmem:[%s6817_s11 + $0x70] sm:$0xff] %vm458_vm1, %v3683_v7  ;;  %v3292_v43 = vmul.f32 %v5352_v20, %v6855_v62  ;;  %v3601_v59 = vadd.f32 %v6724_v19, %v6852_v40  ;;  %v3616_v24 = vadd.f32 %v6865_v2, %v6724_v19 }
 0x230   : > { %v4138_v0 = vmul.f32 -1.442695, %v7004_v52  ;;  %v5356_v29 = vpop.eup %5355  ;;  %v3202_v58 = vadd.f32 1.0, %v5354_v45  ;;  %5375 = vpow2.f32 %v4135_v9  ;;  %v4137_v49 = vmul.f32 -1.442695, %v7009_v4 }
 0x231   : > { %v3686_v48 = vadd.f32 %v6904_v55, %v3293_v47  ;;  %v5358_v14 = vpop.eup %5357  ;;  %v3205_v42 = vadd.f32 1.0, %v5356_v29  ;;  %v3685_v41 = vadd.f32 %v3591_v13, %v3292_v43  ;;  %v7031_v37 = vadd.f32 %v6724_v19, %v3660_v17 }
 0x232   : > { %5377 = vpow2.f32 %v4138_v0  ;;  %v5360_v16 = vpop.eup %5359  ;;  %v3295_v62 = vmul.f32 %v5358_v14, %v6878_v61  ;;  %v3611_v27 = vadd.f32 %v6724_v19, %v6875_v11  ;;  %v3626_v17 = vadd.f32 %v6888_v15, %v6724_v19 }
 0x233   : > { %5379 = vrcp.f32 %v3202_v58  ;;  %3718 = vst.msk [vmem:[%s6817_s11 + $0x88] sm:$0xff] %vm458_vm1, %v3686_v48  ;;  %v5362_v10 = vpop.eup %5361  ;;  %v3204_v35 = vadd.f32 1.0, %v5360_v16  ;;  %3717 = vst.msk [vmem:[%s6817_s11 + $0x80] sm:$0xff] %vm458_vm1, %v3685_v41  ;;  %v3621_v7 = vadd.f32 %v6724_v19, %v6896_v33  ;;  %v3636_v45 = vadd.f32 %v6916_v39, %v6724_v19 }
 0x234   : > { %5381 = vrcp.f32 %v3205_v42  ;;  %v5364_v55 = vpop.eup %5363  ;;  %v3688_v44 = vadd.f32 %v3606_v25, %v3295_v62  ;;  %v3294_v13 = vmul.f32 %v5362_v10, %v6881_v21  ;;  %v3631_v43 = vadd.f32 %v6724_v19, %v6923_v51 }
 0x235   : > { %5383 = vpow2.f32 %v4137_v49  ;;  %v5366_v57 = vpop.eup %5365  ;;  %v3207_v61 = vadd.f32 1.0, %v5364_v55  ;;  %v3641_v14 = vadd.f32 %v6724_v19, %v6945_v32  ;;  %v3651_v32 = vadd.f32 %v6724_v19, %v6967_v46 }
 0x236   : > { %5385 = vrcp.f32 %v3204_v35  ;;  %v5368_v40 = vpop.eup %5367  ;;  %3720 = vst.msk [vmem:[%s6817_s11 + $0x98] sm:$0xff] %vm458_vm1, %v3688_v44  ;;  %v3687_v26 = vadd.f32 %v3601_v59, %v3294_v13  ;;  %v3297_v1 = vmul.f32 %v5366_v57, %v6899_v8 }
 0x237   : > { %v5370_v50 = vpop.eup %5369  ;;  %5387 = vrcp.f32 %v3207_v61  ;;  %v3206_v21 = vadd.f32 1.0, %v5368_v40 }
 0x238   : > { %v5372_v2 = vpop.eup %5371  ;;  %v3209_v18 = vadd.f32 1.0, %v5370_v50  ;;  %3719 = vst.msk [vmem:[%s6817_s11 + $0x90] sm:$0xff] %vm458_vm1, %v3687_v26  ;;  %v3690_v60 = vadd.f32 %v3616_v24, %v3297_v1 }
 0x239   : > { %v5374_v56 = vpop.eup %5373  ;;  %5389 = vrcp.f32 %v3206_v21  ;;  %v3296_v9 = vmul.f32 %v5372_v2, %v6907_v12 }
 0x23a   : > { %v5376_v8 = vpop.eup %5375  ;;  %5391 = vrcp.f32 %v3209_v18  ;;  %3722 = vst.msk [vmem:[%s6817_s11 + $0xa8] sm:$0xff] %vm458_vm1, %v3690_v60  ;;  %v3299_v11 = vmul.f32 %v5374_v56, %v6913_v63 }
 0x23b   : > { %v3208_v22 = vadd.f32 1.0, %v5376_v8  ;;  %v3689_v54 = vadd.f32 %v3611_v27, %v3296_v9 }
 0x23c   : > { %v5378_v38 = vpop.eup %5377  ;;  %v3692_v47 = vadd.f32 %v3626_v17, %v3299_v11 }
 0x23d   : > { %v5380_v20 = vpop.eup %5379  ;;  %v3211_v15 = vadd.f32 1.0, %v5378_v38  ;;  %5393 = vrcp.f32 %v3208_v22  ;;  %3721 = vst.msk [vmem:[%s6817_s11 + $0xa0] sm:$0xff] %vm458_vm1, %v3689_v54 }
 0x23e   : > { %v5382_v12 = vpop.eup %5381  ;;  %v3298_v63 = vmul.f32 %v5380_v20, %v6927_v6  ;;  %3724 = vst.msk [vmem:[%s6817_s11 + $0xb8] sm:$0xff] %vm458_vm1, %v3692_v47  ;;  %v3646_v6 = vadd.f32 %v6937_v3, %v6724_v19 }
 0x23f   : > { %v5384_v0 = vpop.eup %5383  ;;  %5395 = vrcp.f32 %v3211_v15  ;;  %v3301_v33 = vmul.f32 %v5382_v12, %v6943_v36 }
 0x240   : > { %v5386_v25 = vpop.eup %5385  ;;  %v3210_v39 = vadd.f32 1.0, %v5384_v0  ;;  %v3691_v29 = vadd.f32 %v3621_v7, %v3298_v63 }
 0x241   : > { %v3694_v58 = vadd.f32 %v3636_v45, %v3301_v33  ;;  %v3300_v49 = vmul.f32 %v5386_v25, %v6948_v53  ;;  %v5388_v48 = vpop.eup %5387  ;;  %v3656_v53 = vadd.f32 %v6961_v23, %v6724_v19  ;;  %v3666_v23 = vadd.f32 %v6983_v30, %v6724_v19 }
 0x242   : > { %5397 = vrcp.f32 %v3210_v39  ;;  %3723 = vst.msk [vmem:[%s6817_s11 + $0xb0] sm:$0xff] %vm458_vm1, %v3691_v29  ;;  %v3303_v51 = vmul.f32 %v5388_v48, %v6965_v5 }
 0x243   : > { %3726 = vst.msk [vmem:[%s6817_s11 + $0xc8] sm:$0xff] %vm458_vm1, %v3694_v58  ;;  %v3693_v36 = vadd.f32 %v3631_v43, %v3300_v49  ;;  %v5390_v42 = vpop.eup %5389 }
 0x244   : > { %v5392_v41 = vpop.eup %5391  ;;  %v3696_v3 = vadd.f32 %v3646_v6, %v3303_v51  ;;  %v3302_v16 = vmul.f32 %v5390_v42, %v6970_v28 }
 0x245   : > { %3725 = vst.msk [vmem:[%s6817_s11 + $0xc0] sm:$0xff] %vm458_vm1, %v3693_v36  ;;  %v3305_v62 = vmul.f32 %v5392_v41, %v6986_v34 }
 0x246   : > { %3728 = vst.msk [vmem:[%s6817_s11 + $0xd8] sm:$0xff] %vm458_vm1, %v3696_v3  ;;  %v3695_v5 = vadd.f32 %v3641_v14, %v3302_v16 }
 0x247   : > { %v5394_v59 = vpop.eup %5393  ;;  %v3698_v10 = vadd.f32 %v3656_v53, %v3305_v62 }
 0x248   : > { %3727 = vst.msk [vmem:[%s6817_s11 + $0xd0] sm:$0xff] %vm458_vm1, %v3695_v5  ;;  %v3304_v28 = vmul.f32 %v5394_v59, %v6993_v31 }
 0x249   : > { %v5396_v35 = vpop.eup %5395  ;;  %3730 = vst.msk [vmem:[%s6817_s11 + $0xe8] sm:$0xff] %vm458_vm1, %v3698_v10 }
 0x24a   : > { %v3307_v34 = vmul.f32 %v5396_v35, %v7004_v52  ;;  %v3697_v55 = vadd.f32 %v3651_v32, %v3304_v28 }
 0x24c   : > { %v5398_v44 = vpop.eup %5397  ;;  %v3700_v13 = vadd.f32 %v3666_v23, %v3307_v34  ;;  %3729 = vst.msk [vmem:[%s6817_s11 + $0xe0] sm:$0xff] %vm458_vm1, %v3697_v55 }
 0x24d   : > { %v3306_v46 = vmul.f32 %v5398_v44, %v7009_v4 }
 0x24e   : > { %3732 = vst.msk [vmem:[%s6817_s11 + $0xf8] sm:$0xff] %vm458_vm1, %v3700_v13 }
 0x24f   : > { %v3699_v19 = vadd.f32 %v7031_v37, %v3306_v46 }
 0x251   : > { %3731 = vst.msk [vmem:[%s6817_s11 + $0xf0] sm:$0xff] %vm458_vm1, %v3699_v19 }
 0x252 PF: > { %s16_s21 = sadd.s32 1, %s5405_s21  }
 0x253   : > { %p13_p4 = scmp.ge.s32.totalorder %s16_s21, 4  }
 0x255   :  { %15 = sbr.rel (!%p13_p4) target bundleno = 1 (0x1), region = 85 }

// kernel: down_block_forward.9
= control target key start
LH: loop header
LB: loop body
LE: loop exit
PB: predicated region body
PF: predicated region fallthrough
CT: control target
= control target key end

     0   :  { %s3150_s12 = smov 0   ;;  %s3821_s0 = inlined_call_operand.vmem [shape: f32[2,36,9,8], index: 0, kind: input, shape index: {}]   ;;  %s3822_s1 = inlined_call_operand.vmem [shape: f32[16,8,8], index: 1, kind: input, shape index: {}]   ;;  %s3823_s2 = inlined_call_operand.vmem [shape: f32[1,8], index: 2, kind: input, shape index: {}]   ;;  %s3824_s3 = inlined_call_operand.vmem [shape: f32[2,8,8,8], index: 3, kind: output, shape index: {}]  }
   0x1 LB: > { %s2470_s13 = sadd.s32 4294967295, %s3128_s12   ;;  %p2474_p0 = scmp.ge.s32.totalorder %s3128_s12, 1  ;;  %s3128_s12 = sphi %s3150_s12, %s13_s12  }
   0x2   : > { %p137_p1 = scmp.lt.s32.totalorder %s3128_s12, 3 }
   0x4   : > { %p138_p2 = pnand %p2474_p0, %p137_p1 }
   0x6   : > { %141 = sbr.rel (%p138_p2) target bundleno = 367 (0x16f), region = 32 }
   0xd   : > { %v2549_v0 = vld [vmem:[%s3822_s1 + $0x40] sm:$0xff]  ;;  %p161_p3 = scmp.lt.s32.totalorder %s2470_s13, 1  ;;  %v2478_v1 = vld [vmem:[%s3822_s1 + $0x8] sm:$0xff]  ;;  %vm287_vm0 = vcmask 64512   ;;  %vm260_vm1 = vcmask 1046528   ;;  %v3197_v10 = vld [vmem:[%s3822_s1 + $0x50] sm:$0xff] }
   0xe   : > { %v243_v2 = vld [vmem:[%s3822_s1] sm:$0xff]  ;;  %2881 = vmatprep.subr.mxu0 %v2549_v0  ;;  %2769 = vmatprep.subr.mxu1 %v2478_v1  ;;  %v2558_v3 = vld [vmem:[%s3822_s1 + $0x48] sm:$0xff]  ;;  %v3224_v24 = vld [vmem:[%s3822_s1 + $0x10] sm:$0xff] }
   0xf   : > { %2882 = vmatpush3.msra.mxu0 %v2549_v0  ;;  %s3873_s13 = smov (!%p161_p3, %s2470_s13), 1  ;;  %2770 = vmatpush3.msra.mxu1 %v2478_v1 }
  0x10   : > { %2783 = vmatprep.subr.mxu1 %v243_v2  ;;  %2895 = vmatprep.subr.mxu0 %v2558_v3  ;;  %s3113_s22 = smul.u32 576, %s3873_s13 }
  0x12   : > { %s3176_s25 = scalar_lea.vmem %s3821_s0, %s3113_s22 }
  0x13   : > { %v3179_v4 = vld [vmem:[%s3176_s25 + $0x120] sm:$0xff]  ;;  %v3182_v5 = vld [vmem:[%s3176_s25 + $0x130] sm:$0xff]  ;;  %v172_v7 = vld [vmem:[%s3176_s25 + $0x8] sm:$0x1] }
  0x14   : > { %v3185_v6 = vld [vmem:[%s3176_s25] sm:$0xff]  ;;  %2883 = vmatprep.mubr.msk.f32.mxu0 %vm287_vm0, %v3179_v4  ;;  %v3192_v9 = vld [vmem:[%s3176_s25 + $0x10] sm:$0xff]  ;;  %v262_v11 = vrot.slane %v172_v7, 1  ;;  %v174_v12 = vld [vmem:[%s3176_s25 + $0x18] sm:$0x1]  ;;  %v1457_v31 = vrot.slane %v3179_v4, 1 }
  0x15   : > { %v261_v8 = vrot.slane %v3185_v6, 1  ;;  %2884 = vmatmul.mubr.msk.f32.vlgmr.msra.gmra.mrb[0].mxu0 %vm287_vm0, %v3182_v5  ;;  %v264_v13 = vrot.slane %v3192_v9, 1  ;;  %v3204_v14 = vld [vmem:[%s3176_s25 + $0x140] sm:$0xff]  ;;  %v265_v15 = vrot.slane %v174_v12, 1  ;;  %v3209_v16 = vld [vmem:[%s3176_s25 + $0x150] sm:$0xff]  ;;  %v1460_v42 = vrot.slane %v3182_v5, 1 }
  0x16   : > { %2886 = vmatprep.mubr.msk.f32.mxu0 %vm287_vm0, %v3204_v14  ;;  %2896 = vmatpush3.msra.mxu0 %v2558_v3  ;;  %v3212_v17 = vld [vmem:[%s3176_s25 + $0x20] sm:$0xff]  ;;  %v176_v18 = vld [vmem:[%s3176_s25 + $0x28] sm:$0x1]  ;;  %v3218_v22 = vld [vmem:[%s3176_s25 + $0x30] sm:$0xff]  ;;  %v1463_v56 = vrot.slane %v3204_v14, 1  ;;  %v1466_v3 = vrot.slane %v3209_v16, 1 }
  0x17   : > { %v263_v19 = vsel %vm260_vm1, %v261_v8, %v262_v11  ;;  %v267_v20 = vrot.slane %v3212_v17, 1  ;;  %v268_v21 = vrot.slane %v176_v18, 1  ;;  %v178_v23 = vld [vmem:[%s3176_s25 + $0x38] sm:$0x1]  ;;  %2909 = vmatprep.subr.mxu0 %v3197_v10  ;;  %v3229_v25 = vsel %vm260_vm1, %v264_v13, %v265_v15  ;;  %v3233_v28 = vld [vmem:[%s3176_s25 + $0x160] sm:$0xff]  ;;  %v3239_v30 = vld [vmem:[%s3176_s25 + $0x50] sm:$0xff] }
  0x18   : > { %2771 = vmatprep.mubr.msk.f32.mxu1 %vm287_vm0, %v263_v19  ;;  %v270_v26 = vrot.slane %v3218_v22, 1  ;;  %v271_v27 = vrot.slane %v178_v23, 1  ;;  %v3236_v29 = vld [vmem:[%s3176_s25 + $0x40] sm:$0xff]  ;;  %v180_v33 = vld [vmem:[%s3176_s25 + $0x48] sm:$0x1]  ;;  %v3258_v37 = vld [vmem:[%s3176_s25 + $0x170] sm:$0xff] }
  0x19   : > { %2772 = vmatmul.mubr.msk.f32.vlgmr.msra.gmra.mrb[0].mxu1 %vm287_vm0, %v3229_v25  ;;  %2887 = vmatmul.mubr.msk.f32.gmra.mrb[2].mxu0 %vm287_vm0, %v3209_v16  ;;  %v3247_v32 = vsel %vm260_vm1, %v267_v20, %v268_v21  ;;  %v273_v34 = vrot.slane %v3236_v29, 1  ;;  %v182_v35 = vld [vmem:[%s3176_s25 + $0x58] sm:$0x1]  ;;  %v274_v38 = vrot.slane %v180_v33, 1  ;;  %v276_v39 = vrot.slane %v3239_v30, 1  ;;  %v3262_v41 = vld [vmem:[%s3176_s25 + $0x60] sm:$0xff] }
  0x1a   : > { %2784 = vmatpush3.msra.mxu1 %v243_v2  ;;  %2774 = vmatprep.mubr.msk.f32.mxu1 %vm287_vm0, %v3247_v32  ;;  %v3255_v36 = vsel %vm260_vm1, %v270_v26, %v271_v27  ;;  %v277_v40 = vrot.slane %v182_v35, 1  ;;  %v3268_v43 = vld [vmem:[%s3176_s25 + $0x180] sm:$0xff]  ;;  %v184_v44 = vld [vmem:[%s3176_s25 + $0x68] sm:$0x1]  ;;  %v279_v45 = vrot.slane %v3262_v41, 1  ;;  %v3273_v46 = vld [vmem:[%s3176_s25 + $0x70] sm:$0xff] }
  0x1b   : > { %2889 = vmatprep.mubr.msk.f32.mxu0 %vm287_vm0, %v3233_v28  ;;  %2797 = vmatprep.subr.mxu1 %v3224_v24  ;;  %v3277_v47 = vsel %vm260_vm1, %v273_v34, %v274_v38  ;;  %v280_v48 = vrot.slane %v184_v44, 1  ;;  %v186_v49 = vld [vmem:[%s3176_s25 + $0x78] sm:$0x1]  ;;  %v282_v50 = vrot.slane %v3273_v46, 1  ;;  %v208_v51 = vld [vmem:[%s3176_s25 + $0x128] sm:$0x1] }
  0x1c   : > { %v283_v52 = vrot.slane %v186_v49, 1  ;;  %v1458_v53 = vrot.slane %v208_v51, 1  ;;  %v210_v54 = vld [vmem:[%s3176_s25 + $0x138] sm:$0x1]  ;;  %v212_v55 = vld [vmem:[%s3176_s25 + $0x148] sm:$0x1]  ;;  %v3292_v57 = vsel %vm260_vm1, %v276_v39, %v277_v40 }
  0x1d   : > { %2775 = vmatmul.mubr.msk.f32.gmra.mrb[2].mxu1 %vm287_vm0, %v3255_v36  ;;  %2890 = vmatmul.mubr.msk.f32.gmra.mrb[4].mxu0 %vm287_vm0, %v3258_v37  ;;  %v3297_v58 = vld [vmem:[%s3176_s25 + $0x190] sm:$0xff]  ;;  %v1461_v59 = vrot.slane %v210_v54, 1  ;;  %v1464_v60 = vrot.slane %v212_v55, 1  ;;  %v214_v61 = vld [vmem:[%s3176_s25 + $0x158] sm:$0x1]  ;;  %v3301_v62 = vsel %vm260_vm1, %v279_v45, %v280_v48  ;;  %v1469_v4 = vrot.slane %v3233_v28, 1 }
  0x1e   : > { %2777 = vmatprep.mubr.msk.f32.mxu1 %vm287_vm0, %v3277_v47  ;;  %2892 = vmatprep.mubr.msk.f32.mxu0 %vm287_vm0, %v3268_v43  ;;  %v1459_v63 = vsel %vm260_vm1, %v1457_v31, %v1458_v53  ;;  %v216_v0 = vld [vmem:[%s3176_s25 + $0x168] sm:$0x1]  ;;  %v3306_v1 = vld [vmem:[%s3176_s25 + $0x178] sm:$0x1]  ;;  %v1472_v7 = vrot.slane %v3258_v37, 1  ;;  %v1475_v11 = vrot.slane %v3268_v43, 1  ;;  %v3324_v13 = vsel %vm260_vm1, %v282_v50, %v283_v52 }
  0x1f   : > { %v3309_v2 = vld [vmem:[%s3176_s25 + $0x188] sm:$0x1]  ;;  %v3315_v8 = vld [vmem:[%s3176_s25 + $0x198] sm:$0x1]  ;;  %v1467_v15 = vrot.slane %v214_v61, 1  ;;  %v3330_v18 = vsel %vm260_vm1, %v1460_v42, %v1461_v59  ;;  %v1470_v19 = vrot.slane %v216_v0, 1  ;;  %v3344_v31 = vsel %vm260_vm1, %v1463_v56, %v1464_v60 }
  0x20   : > { %v1473_v20 = vrot.slane %v3306_v1, 1  ;;  %v1476_v21 = vrot.slane %v3309_v2, 1  ;;  %v3335_v23 = vld [vmem:[%s3176_s25 + $0x1b0] sm:$0xff]  ;;  %v3338_v26 = vld [vmem:[%s3176_s25 + $0x1c0] sm:$0xff]  ;;  %v1479_v33 = vrot.slane %v3315_v8, 1  ;;  %v3350_v34 = vld [vmem:[%s3822_s1 + $0x58] sm:$0xff] }
  0x21   : > { %2778 = vmatmul.mubr.msk.f32.gmra.mrb[4].mxu1 %vm287_vm0, %v3292_v57  ;;  %2893 = vmatmul.mubr.msk.f32.gmra.mrb[6].mxu0 %vm287_vm0, %v3297_v58  ;;  %v3341_v27 = vld [vmem:[%s3176_s25 + $0x90] sm:$0xff]  ;;  %v1998_v35 = vrot.slane %v3335_v23, 1  ;;  %v2001_v38 = vrot.slane %v3338_v26, 1  ;;  %v3355_v39 = vld [vmem:[%s3176_s25 + $0xa0] sm:$0xff]  ;;  %v3380_v52 = vsel %vm260_vm1, %v1466_v3, %v1467_v15  ;;  %v3401_v61 = vld [vmem:[%s3822_s1 + $0x18] sm:$0xff]  ;;  %v3424_v55 = vsel %vm260_vm1, %v1469_v4, %v1470_v19 }
  0x22   : > { %2780 = vmatprep.mubr.msk.f32.mxu1 %vm287_vm0, %v3301_v62  ;;  %2897 = vmatprep.mubr.msk.f32.mxu0 %vm287_vm0, %v1459_v63  ;;  %3837 = vst [vmem:[#allocation2_spill] sm:$0xff] %v3341_v27  ;;  %3838 = vst [vmem:[#allocation3_spill] sm:$0xff] %v3355_v39  ;;  %v3358_v40 = vld [vmem:[%s3176_s25 + $0x1d0] sm:$0xff]  ;;  %v3361_v42 = vld [vmem:[%s3176_s25 + $0x1e0] sm:$0xff]  ;;  %v916_v44 = vrot.slane %v3341_v27, 1  ;;  %v919_v45 = vrot.slane %v3355_v39, 1  ;;  %v3440_v4 = vsel %vm260_vm1, %v1472_v7, %v1473_v20 }
  0x23   : > { %3839 = vst [vmem:[#allocation4_spill] sm:$0xff] %v3361_v42  ;;  %v3367_v49 = vld [vmem:[%s3176_s25 + $0xb0] sm:$0xff]  ;;  %v3370_v50 = vld [vmem:[%s3176_s25 + $0xc0] sm:$0xff]  ;;  %v2007_v53 = vrot.slane %v3361_v42, 1  ;;  %v226_v1 = vld [vmem:[%s3176_s25 + $0x1b8] sm:$0x1]  ;;  %v3451_v48 = vsel %vm260_vm1, %v1475_v11, %v1476_v21 }
  0x24   : > { %v3373_v51 = vld [vmem:[%s3176_s25 + $0x1f0] sm:$0xff]  ;;  %v3386_v56 = vld [vmem:[%s3176_s25 + $0x200] sm:$0xff]  ;;  %v1999_v54 = vrot.slane %v226_v1, 1  ;;  %v228_v8 = vld [vmem:[%s3176_s25 + $0x1c8] sm:$0x1] }
  0x25   : > { %2781 = vmatmul.mubr.msk.f32.gmra.mrb[6].mxu1 %vm287_vm0, %v3324_v13  ;;  %2898 = vmatmul.mubr.msk.f32.vlgmr.msra.gmra.mrb[0].mxu0 %vm287_vm0, %v3330_v18  ;;  %v3389_v59 = vld [vmem:[%s3176_s25 + $0xd0] sm:$0xff]  ;;  %v3392_v60 = vld [vmem:[%s3176_s25 + $0xe0] sm:$0xff]  ;;  %v2002_v19 = vrot.slane %v228_v8, 1  ;;  %v190_v2 = vld [vmem:[%s3176_s25 + $0x98] sm:$0x1] }
  0x26   : > { %2785 = vmatprep.mubr.msk.f32.mxu1 %vm287_vm0, %v3185_v6  ;;  %2900 = vmatprep.mubr.msk.f32.mxu0 %vm287_vm0, %v3344_v31  ;;  %v3408_v3 = vld [vmem:[%s3176_s25 + $0x210] sm:$0xff]  ;;  %v3411_v6 = vld [vmem:[%s3176_s25 + $0x220] sm:$0xff]  ;;  %v3454_v7 = vsel %vm260_vm1, %v1998_v35, %v1999_v54  ;;  %v917_v20 = vrot.slane %v190_v2, 1  ;;  %v230_v12 = vld [vmem:[%s3176_s25 + $0x1d8] sm:$0x1] }
  0x27   : > { %2910 = vmatpush3.msra.mxu0 %v3197_v10  ;;  %v3417_v63 = vld [vmem:[%s3176_s25 + $0xf0] sm:$0xff]  ;;  %v3420_v0 = vld [vmem:[%s3176_s25 + $0x100] sm:$0xff]  ;;  %v192_v10 = vld [vmem:[%s3176_s25 + $0xa8] sm:$0x1]  ;;  %3840 = vst [vmem:[#allocation5_spill] sm:$0xff] %v3454_v7  ;;  %v3467_v11 = vsel %vm260_vm1, %v2001_v38, %v2002_v19  ;;  %v2005_v21 = vrot.slane %v230_v12, 1 }
  0x28   : > { %2923 = vmatprep.subr.mxu0 %v3350_v34  ;;  %v3431_v15 = vld [vmem:[%s3176_s25 + $0x230] sm:$0xff]  ;;  %v920_v8 = vrot.slane %v192_v10, 1  ;;  %v232_v1 = vld [vmem:[%s3176_s25 + $0x1e8] sm:$0x1]  ;;  %v194_v54 = vld [vmem:[%s3176_s25 + $0xb8] sm:$0x1]  ;;  %v3472_v10 = vsel %vm260_vm1, %v916_v44, %v917_v20 }
  0x29   : > { %2786 = vmatmul.mubr.msk.f32.vlgmr.msra.gmra.mrb[0].mxu1 %vm287_vm0, %v3192_v9  ;;  %2901 = vmatmul.mubr.msk.f32.gmra.mrb[2].mxu0 %vm287_vm0, %v3380_v52  ;;  %v2008_v35 = vrot.slane %v232_v1, 1  ;;  %v196_v2 = vld [vmem:[%s3176_s25 + $0xc8] sm:$0x1]  ;;  %v923_v39 = vrot.slane %v194_v54, 1  ;;  %v3843_v12 = vrot.slane %v3358_v40, 1 }
  0x2a   : > { %2798 = vmatpush3.msra.mxu1 %v3224_v24  ;;  %2788 = vmatprep.mubr.msk.f32.mxu1 %vm287_vm0, %v3212_v17  ;;  %v3841_v24 = vrot.slane %v3297_v58, 1  ;;  %v3475_v7 = vsel %vm260_vm1, %v919_v45, %v920_v8  ;;  %v236_v27 = vld [vmem:[%s3176_s25 + $0x208] sm:$0x1]  ;;  %v198_v1 = vld [vmem:[%s3176_s25 + $0xd8] sm:$0x1]  ;;  %v3846_v8 = vrot.slane %v3367_v49, 1 }
  0x2b   : > { %2903 = vmatprep.mubr.msk.f32.mxu0 %vm287_vm0, %v3424_v55  ;;  %2811 = vmatprep.subr.mxu1 %v3401_v61  ;;  %3842 = vst [vmem:[#allocation6_spill] sm:$0xff] %v3475_v7  ;;  %v3486_v38 = vsel %vm260_vm1, %v3843_v12, %v2005_v21  ;;  %v3489_v44 = vsel %vm260_vm1, %v2007_v53, %v2008_v35  ;;  %v2014_v19 = vrot.slane %v236_v27, 1  ;;  %v200_v20 = vld [vmem:[%s3176_s25 + $0xe8] sm:$0x1]  ;;  %v3848_v53 = vrot.slane %v3370_v50, 1 }
  0x2c   : > { %v3463_v42 = vsel %vm260_vm1, %v3841_v24, %v1479_v33  ;;  %v926_v33 = vrot.slane %v196_v2, 1  ;;  %v234_v24 = vld [vmem:[%s3176_s25 + $0x1f8] sm:$0x1]  ;;  %3844 = vst [vmem:[#allocation7_spill] sm:$0xff] %v3486_v38  ;;  %3845 = vst [vmem:[#allocation8_spill] sm:$0xff] %v3489_v44  ;;  %v3500_v21 = vsel %vm260_vm1, %v3846_v8, %v923_v39  ;;  %v929_v27 = vrot.slane %v198_v1, 1 }
  0x2d   : > { %2789 = vmatmul.mubr.msk.f32.gmra.mrb[2].mxu1 %vm287_vm0, %v3218_v22  ;;  %2904 = vmatmul.mubr.msk.f32.gmra.mrb[4].mxu0 %vm287_vm0, %v3440_v4  ;;  %v2011_v45 = vrot.slane %v234_v24, 1  ;;  %3847 = vst [vmem:[#allocation9_spill] sm:$0xff] %v3500_v21  ;;  %v932_v54 = vrot.slane %v200_v20, 1  ;;  %v238_v2 = vld [vmem:[%s3176_s25 + $0x218] sm:$0x1]  ;;  %v3850_v12 = vrot.slane %v3373_v51, 1 }
  0x2e   : > { %2791 = vmatprep.mubr.msk.f32.mxu1 %vm287_vm0, %v3236_v29  ;;  %2906 = vmatprep.mubr.msk.f32.mxu0 %vm287_vm0, %v3451_v48  ;;  %v3505_v35 = vsel %vm260_vm1, %v3848_v53, %v926_v33  ;;  %v240_v24 = vld [vmem:[%s3176_s25 + $0x228] sm:$0x1]  ;;  %v3852_v7 = vrot.slane %v3386_v56, 1  ;;  %v2017_v8 = vrot.slane %v238_v2, 1  ;;  %v202_v33 = vld [vmem:[%s3176_s25 + $0xf8] sm:$0x1] }
  0x2f   : > { %3849 = vst [vmem:[#allocation10_spill] sm:$0xff] %v3505_v35  ;;  %v3512_v44 = vsel %vm260_vm1, %v3850_v12, %v2011_v45  ;;  %v2020_v21 = vrot.slane %v240_v24, 1  ;;  %v204_v53 = vld [vmem:[%s3176_s25 + $0x108] sm:$0x1]  ;;  %v3853_v1 = vrot.slane %v3389_v59, 1  ;;  %v3854_v35 = vrot.slane %v3392_v60, 1 }
  0x30   : > { %3851 = vst [vmem:[#allocation11_spill] sm:$0xff] %v3512_v44  ;;  %v3517_v39 = vsel %vm260_vm1, %v3852_v7, %v2014_v19  ;;  %v935_v12 = vrot.slane %v202_v33, 1  ;;  %v938_v44 = vrot.slane %v204_v53, 1  ;;  %v3532_v38 = vld [vmem:[%s3176_s25 + $0x110] sm:$0xff]  ;;  %v242_v7 = vld [vmem:[%s3176_s25 + $0x238] sm:$0x1] }
  0x31   : > { %v3524_v20 = vsel %vm260_vm1, %v3853_v1, %v929_v27  ;;  %v3529_v45 = vsel %vm260_vm1, %v3854_v35, %v932_v54  ;;  %3855 = vst [vmem:[#allocation12_spill] sm:$0xff] %v3532_v38  ;;  %2792 = vmatmul.mubr.msk.f32.gmra.mrb[4].mxu1 %vm287_vm0, %v3239_v30  ;;  %2907 = vmatmul.mubr.msk.f32.gmra.mrb[6].mxu0 %vm287_vm0, %v3463_v42  ;;  %v3856_v19 = vrot.slane %v3408_v3, 1  ;;  %v3857_v2 = vrot.slane %v3411_v6, 1  ;;  %v206_v33 = vld [vmem:[%s3176_s25 + $0x118] sm:$0x1] }
  0x32   : > { %v1190_v54 = vrot.slane %v3532_v38, 1  ;;  %v2273_v24 = vrot.slane %v242_v7, 1  ;;  %2794 = vmatprep.mubr.msk.f32.mxu1 %vm287_vm0, %v3262_v41  ;;  %2911 = vmatprep.mubr.msk.f32.mxu0 %vm287_vm0, %v3182_v5  ;;  %v3858_v53 = vrot.slane %v3417_v63, 1  ;;  %v3859_v1 = vrot.slane %v3420_v0, 1  ;;  %v2585_v5 = vld [vmem:[%s3822_s1 + $0x60] sm:$0xff] }
  0x33   : > { %v3542_v27 = vsel %vm260_vm1, %v3856_v19, %v2017_v8  ;;  %v3547_v35 = vsel %vm260_vm1, %v3857_v2, %v2020_v21  ;;  %v1191_v19 = vrot.slane %v206_v33, 1  ;;  %v3860_v7 = vrot.slane %v3431_v15, 1 }
  0x34   : > { %v3558_v8 = vsel %vm260_vm1, %v3858_v53, %v935_v12  ;;  %v3563_v21 = vsel %vm260_vm1, %v3859_v1, %v938_v44  ;;  %v2513_v44 = vld [vmem:[%s3822_s1 + $0x20] sm:$0xff] }
  0x35   : > { %v3568_v2 = vsel %vm260_vm1, %v3860_v7, %v2273_v24  ;;  %v3571_v38 = vsel %vm260_vm1, %v1190_v54, %v1191_v19  ;;  %2795 = vmatmul.mubr.msk.f32.gmra.mrb[6].mxu1 %vm287_vm0, %v3273_v46  ;;  %2912 = vmatmul.mubr.msk.f32.vlgmr.msra.gmra.mrb[0].mxu0 %vm287_vm0, %v3204_v14  ;;  %v187_v14 = vld [vmem:[%s3176_s25 + $0x80] sm:$0xff] }
  0x36   : > { %2799 = vmatprep.mubr.msk.f32.mxu1 %vm287_vm0, %v3192_v9  ;;  %2914 = vmatprep.mubr.msk.f32.mxu0 %vm287_vm0, %v3209_v16  ;;  %v223_v9 = vld [vmem:[%s3176_s25 + $0x1a0] sm:$0xff]  ;;  %v2594_v16 = vld [vmem:[%s3822_s1 + $0x68] sm:$0xff] }
  0x37   : > { %2924 = vmatpush3.msra.mxu0 %v3350_v34  ;;  %v3868_v34 = vld [vmem:[#allocation9_spill] sm:$0xff] }
  0x38   : > { %2937 = vmatprep.subr.mxu0 %v2585_v5 }
  0x39   : > { %2800 = vmatmul.mubr.msk.f32.vlgmr.msra.gmra.mrb[0].mxu1 %vm287_vm0, %v3212_v17  ;;  %2915 = vmatmul.mubr.msk.f32.gmra.mrb[2].mxu0 %vm287_vm0, %v3233_v28  ;;  %v224_v17 = vld [vmem:[%s3176_s25 + $0x1a8] sm:$0x1]  ;;  %v1731_v28 = vrot.slane %v223_v9, 1 }
  0x3a   : > { %2812 = vmatpush3.msra.mxu1 %v3401_v61  ;;  %2802 = vmatprep.mubr.msk.f32.mxu1 %vm287_vm0, %v3218_v22  ;;  %v2522_v22 = vld [vmem:[%s3822_s1 + $0x28] sm:$0xff] }
  0x3b   : > { %2917 = vmatprep.mubr.msk.f32.mxu0 %vm287_vm0, %v3258_v37  ;;  %2825 = vmatprep.subr.mxu1 %v2513_v44 }
  0x3d   : > { %2803 = vmatmul.mubr.msk.f32.gmra.mrb[2].mxu1 %vm287_vm0, %v3236_v29  ;;  %2918 = vmatmul.mubr.msk.f32.gmra.mrb[4].mxu0 %vm287_vm0, %v3268_v43  ;;  %v188_v29 = vld [vmem:[%s3176_s25 + $0x88] sm:$0x1]  ;;  %v3861_v43 = vld [vmem:[#allocation2_spill] sm:$0xff]  ;;  %s2624_s25 = sshll.u32 %s3873_s13, 6 }
  0x3e   : > { %2805 = vmatprep.mubr.msk.f32.mxu1 %vm287_vm0, %v3239_v30  ;;  %2920 = vmatprep.mubr.msk.f32.mxu0 %vm287_vm0, %v3297_v58  ;;  %v649_v30 = vrot.slane %v187_v14, 1  ;;  %v3864_v58 = vld [vmem:[#allocation5_spill] sm:$0xff]  ;;  %s3800_s30 = scalar_lea.vmem %s3824_s3, %s2624_s25 }
  0x41   : > { %2806 = vmatmul.mubr.msk.f32.gmra.mrb[4].mxu1 %vm287_vm0, %v3262_v41  ;;  %2921 = vmatmul.mubr.msk.f32.gmra.mrb[6].mxu0 %vm287_vm0, %v223_v9  ;;  %v2603_v41 = vld [vmem:[%s3822_s1 + $0x70] sm:$0xff] }
  0x42   : > { %2808 = vmatprep.mubr.msk.f32.mxu1 %vm287_vm0, %v3273_v46  ;;  %2925 = vmatprep.mubr.msk.f32.mxu0 %vm287_vm0, %v3330_v18  ;;  %v2531_v46 = vld [vmem:[%s3822_s1 + $0x30] sm:$0xff]  ;;  %v2540_v18 = vld [vmem:[%s3822_s1 + $0x38] sm:$0xff] }
  0x45   : > { %2809 = vmatmul.mubr.msk.f32.gmra.mrb[6].mxu1 %vm287_vm0, %v187_v14  ;;  %2926 = vmatmul.mubr.msk.f32.vlgmr.msra.gmra.mrb[0].mxu0 %vm287_vm0, %v3344_v31  ;;  %v3867_v31 = vld [vmem:[#allocation8_spill] sm:$0xff] }
  0x46   : > { %2813 = vmatprep.mubr.msk.f32.mxu1 %vm287_vm0, %v3229_v25  ;;  %2928 = vmatprep.mubr.msk.f32.mxu0 %vm287_vm0, %v3380_v52  ;;  %v1732_v25 = vrot.slane %v224_v17, 1 }
  0x47   : > { %2938 = vmatpush3.msra.mxu0 %v2585_v5 }
  0x48   : > { %2951 = vmatprep.subr.mxu0 %v2594_v16 }
  0x49   : > { %2814 = vmatmul.mubr.msk.f32.vlgmr.msra.gmra.mrb[0].mxu1 %vm287_vm0, %v3247_v32  ;;  %2929 = vmatmul.mubr.msk.f32.gmra.mrb[2].mxu0 %vm287_vm0, %v3424_v55  ;;  %v1733_v32 = vsel %vm260_vm1, %v1731_v28, %v1732_v25 }
  0x4a   : > { %2826 = vmatpush3.msra.mxu1 %v2513_v44  ;;  %2816 = vmatprep.mubr.msk.f32.mxu1 %vm287_vm0, %v3255_v36  ;;  %v650_v36 = vrot.slane %v188_v29, 1 }
  0x4b   : > { %2931 = vmatprep.mubr.msk.f32.mxu0 %vm287_vm0, %v3440_v4  ;;  %2839 = vmatprep.subr.mxu1 %v2522_v22 }
  0x4c   : > { %v651_v37 = vsel %vm260_vm1, %v649_v30, %v650_v36 }
  0x4d   : > { %2817 = vmatmul.mubr.msk.f32.gmra.mrb[2].mxu1 %vm287_vm0, %v3277_v47  ;;  %2932 = vmatmul.mubr.msk.f32.gmra.mrb[4].mxu0 %vm287_vm0, %v3451_v48  ;;  %v3862_v47 = vld [vmem:[#allocation3_spill] sm:$0xff]  ;;  %v3870_v48 = vld [vmem:[#allocation10_spill] sm:$0xff] }
  0x4e   : > { %2819 = vmatprep.mubr.msk.f32.mxu1 %vm287_vm0, %v3292_v57  ;;  %2934 = vmatprep.mubr.msk.f32.mxu0 %vm287_vm0, %v3463_v42  ;;  %v3863_v57 = vld [vmem:[#allocation4_spill] sm:$0xff]  ;;  %v3869_v42 = vld [vmem:[#allocation11_spill] sm:$0xff] }
  0x51   : > { %2820 = vmatmul.mubr.msk.f32.gmra.mrb[4].mxu1 %vm287_vm0, %v3301_v62  ;;  %2935 = vmatmul.mubr.msk.f32.gmra.mrb[6].mxu0 %vm287_vm0, %v1733_v32  ;;  %v2612_v62 = vld [vmem:[%s3822_s1 + $0x78] sm:$0xff] }
  0x52   : > { %2822 = vmatprep.mubr.msk.f32.mxu1 %vm287_vm0, %v3324_v13  ;;  %2939 = vmatprep.mubr.msk.f32.mxu0 %vm287_vm0, %v3335_v23  ;;  %v3865_v13 = vld [vmem:[#allocation7_spill] sm:$0xff]  ;;  %v3866_v23 = vld [vmem:[#allocation6_spill] sm:$0xff] }
  0x55   : > { %2823 = vmatmul.mubr.msk.f32.gmra.mrb[6].mxu1 %vm287_vm0, %v651_v37  ;;  %2940 = vmatmul.mubr.msk.f32.vlgmr.msra.gmra.mrb[0].mxu0 %vm287_vm0, %v3338_v26 }
  0x56   : > { %2827 = vmatprep.mubr.msk.f32.mxu1 %vm287_vm0, %v3861_v43  ;;  %2942 = vmatprep.mubr.msk.f32.mxu0 %vm287_vm0, %v3358_v40 }
  0x57   : > { %2952 = vmatpush3.msra.mxu0 %v2594_v16 }
  0x58   : > { %2965 = vmatprep.subr.mxu0 %v2603_v41 }
  0x59   : > { %2828 = vmatmul.mubr.msk.f32.vlgmr.msra.gmra.mrb[0].mxu1 %vm287_vm0, %v3862_v47  ;;  %2943 = vmatmul.mubr.msk.f32.gmra.mrb[2].mxu0 %vm287_vm0, %v3863_v57 }
  0x5a   : > { %2840 = vmatpush3.msra.mxu1 %v2522_v22  ;;  %2830 = vmatprep.mubr.msk.f32.mxu1 %vm287_vm0, %v3367_v49 }
  0x5b   : > { %2945 = vmatprep.mubr.msk.f32.mxu0 %vm287_vm0, %v3373_v51  ;;  %2853 = vmatprep.subr.mxu1 %v2531_v46 }
  0x5d   : > { %2831 = vmatmul.mubr.msk.f32.gmra.mrb[2].mxu1 %vm287_vm0, %v3370_v50  ;;  %2946 = vmatmul.mubr.msk.f32.gmra.mrb[4].mxu0 %vm287_vm0, %v3386_v56 }
  0x5e   : > { %2833 = vmatprep.mubr.msk.f32.mxu1 %vm287_vm0, %v3389_v59  ;;  %2948 = vmatprep.mubr.msk.f32.mxu0 %vm287_vm0, %v3408_v3 }
  0x61   : > { %2834 = vmatmul.mubr.msk.f32.gmra.mrb[4].mxu1 %vm287_vm0, %v3392_v60  ;;  %2949 = vmatmul.mubr.msk.f32.gmra.mrb[6].mxu0 %vm287_vm0, %v3411_v6 }
  0x62   : > { %2836 = vmatprep.mubr.msk.f32.mxu1 %vm287_vm0, %v3417_v63  ;;  %2953 = vmatprep.mubr.msk.f32.mxu0 %vm287_vm0, %v3864_v58 }
  0x65   : > { %2837 = vmatmul.mubr.msk.f32.gmra.mrb[6].mxu1 %vm287_vm0, %v3420_v0  ;;  %2954 = vmatmul.mubr.msk.f32.vlgmr.msra.gmra.mrb[0].mxu0 %vm287_vm0, %v3467_v11 }
  0x66   : > { %2841 = vmatprep.mubr.msk.f32.mxu1 %vm287_vm0, %v3472_v10  ;;  %2956 = vmatprep.mubr.msk.f32.mxu0 %vm287_vm0, %v3865_v13 }
  0x67   : > { %2966 = vmatpush3.msra.mxu0 %v2603_v41 }
  0x68   : > { %2979 = vmatprep.subr.mxu0 %v2612_v62 }
  0x69   : > { %2842 = vmatmul.mubr.msk.f32.vlgmr.msra.gmra.mrb[0].mxu1 %vm287_vm0, %v3866_v23  ;;  %2957 = vmatmul.mubr.msk.f32.gmra.mrb[2].mxu0 %vm287_vm0, %v3867_v31 }
  0x6a   : > { %2854 = vmatpush3.msra.mxu1 %v2531_v46  ;;  %2844 = vmatprep.mubr.msk.f32.mxu1 %vm287_vm0, %v3868_v34 }
  0x6b   : > { %2959 = vmatprep.mubr.msk.f32.mxu0 %vm287_vm0, %v3869_v42  ;;  %2867 = vmatprep.subr.mxu1 %v2540_v18 }
  0x6d   : > { %2845 = vmatmul.mubr.msk.f32.gmra.mrb[2].mxu1 %vm287_vm0, %v3870_v48  ;;  %2960 = vmatmul.mubr.msk.f32.gmra.mrb[4].mxu0 %vm287_vm0, %v3517_v39 }
  0x6e   : > { %2847 = vmatprep.mubr.msk.f32.mxu1 %vm287_vm0, %v3524_v20  ;;  %2962 = vmatprep.mubr.msk.f32.mxu0 %vm287_vm0, %v3542_v27 }
  0x71   : > { %2848 = vmatmul.mubr.msk.f32.gmra.mrb[4].mxu1 %vm287_vm0, %v3529_v45  ;;  %2963 = vmatmul.mubr.msk.f32.gmra.mrb[6].mxu0 %vm287_vm0, %v3547_v35 }
  0x72   : > { %2850 = vmatprep.mubr.msk.f32.mxu1 %vm287_vm0, %v3558_v8  ;;  %2967 = vmatprep.mubr.msk.f32.mxu0 %vm287_vm0, %v3338_v26  ;;  %v3871_v26 = vld [vmem:[#allocation12_spill] sm:$0xff] }
  0x75   : > { %2851 = vmatmul.mubr.msk.f32.gmra.mrb[6].mxu1 %vm287_vm0, %v3563_v21  ;;  %2968 = vmatmul.mubr.msk.f32.vlgmr.msra.gmra.mrb[0].mxu0 %vm287_vm0, %v3358_v40 }
  0x76   : > { %2855 = vmatprep.mubr.msk.f32.mxu1 %vm287_vm0, %v3862_v47  ;;  %2970 = vmatprep.mubr.msk.f32.mxu0 %vm287_vm0, %v3863_v57 }
  0x77   : > { %2980 = vmatpush3.msra.mxu0 %v2612_v62 }
  0x79   : > { %2856 = vmatmul.mubr.msk.f32.vlgmr.msra.gmra.mrb[0].mxu1 %vm287_vm0, %v3367_v49  ;;  %2971 = vmatmul.mubr.msk.f32.gmra.mrb[2].mxu0 %vm287_vm0, %v3373_v51  ;;  %v2621_v51 = vld [vmem:[%s3823_s2] ss:$0 sm:$0xff] }
  0x7a   : > { %2868 = vmatpush3.msra.mxu1 %v2540_v18  ;;  %2858 = vmatprep.mubr.msk.f32.mxu1 %vm287_vm0, %v3370_v50 }
  0x7b   : > { %2973 = vmatprep.mubr.msk.f32.mxu0 %vm287_vm0, %v3386_v56 }
  0x7d   : > { %2859 = vmatmul.mubr.msk.f32.gmra.mrb[2].mxu1 %vm287_vm0, %v3389_v59  ;;  %2974 = vmatmul.mubr.msk.f32.gmra.mrb[4].mxu0 %vm287_vm0, %v3408_v3 }
  0x7e   : > { %2861 = vmatprep.mubr.msk.f32.mxu1 %vm287_vm0, %v3392_v60  ;;  %2976 = vmatprep.mubr.msk.f32.mxu0 %vm287_vm0, %v3411_v6 }
  0x81   : > { %2862 = vmatmul.mubr.msk.f32.gmra.mrb[4].mxu1 %vm287_vm0, %v3417_v63  ;;  %2977 = vmatmul.mubr.msk.f32.gmra.mrb[6].mxu0 %vm287_vm0, %v3431_v15 }
  0x82   : > { %2864 = vmatprep.mubr.msk.f32.mxu1 %vm287_vm0, %v3420_v0  ;;  %2981 = vmatprep.mubr.msk.f32.mxu0 %vm287_vm0, %v3467_v11 }
  0x85   : > { %2865 = vmatmul.mubr.msk.f32.gmra.mrb[6].mxu1 %vm287_vm0, %v3871_v26  ;;  %2982 = vmatmul.mubr.msk.f32.vlgmr.msra.gmra.mrb[0].mxu0 %vm287_vm0, %v3865_v13 }
  0x86   : > { %2869 = vmatprep.mubr.msk.f32.mxu1 %vm287_vm0, %v3866_v23  ;;  %2984 = vmatprep.mubr.msk.f32.mxu0 %vm287_vm0, %v3867_v31 }
  0x89   : > { %2870 = vmatmul.mubr.msk.f32.vlgmr.msra.gmra.mrb[0].mxu1 %vm287_vm0, %v3868_v34  ;;  %2985 = vmatmul.mubr.msk.f32.gmra.mrb[2].mxu0 %vm287_vm0, %v3869_v42 }
  0x8a   : > { %2872 = vmatprep.mubr.msk.f32.mxu1 %vm287_vm0, %v3870_v48  ;;  %2987 = vmatprep.mubr.msk.f32.mxu0 %vm287_vm0, %v3517_v39 }
  0x8d   : > { %2873 = vmatmul.mubr.msk.f32.gmra.mrb[2].mxu1 %vm287_vm0, %v3524_v20  ;;  %2988 = vmatmul.mubr.msk.f32.gmra.mrb[4].mxu0 %vm287_vm0, %v3542_v27 }
  0x8e   : > { %2875 = vmatprep.mubr.msk.f32.mxu1 %vm287_vm0, %v3529_v45  ;;  %2990 = vmatprep.mubr.msk.f32.mxu0 %vm287_vm0, %v3547_v35 }
  0x91   : > { %2876 = vmatmul.mubr.msk.f32.gmra.mrb[4].mxu1 %vm287_vm0, %v3558_v8  ;;  %2991 = vmatmul.mubr.msk.f32.gmra.mrb[6].mxu0 %vm287_vm0, %v3568_v2 }
  0x92   : > { %2878 = vmatprep.mubr.msk.f32.mxu1 %vm287_vm0, %v3563_v21 }
  0x95   : > { %2879 = vmatmul.mubr.msk.f32.gmra.mrb[6].mxu1 %vm287_vm0, %v3571_v38 }
 0x158   : > { %v2983_v40 = vpop.f32.mrb[0].mxu0 }
 0x159   : > { %v2345_v49 = vpop.f32.mrb[1].mxu0 }
 0x15c   : > { %v2871_v50 = vpop.f32.mrb[0].mxu1  ;;  %v2986_v52 = vpop.f32.mrb[2].mxu0 }
 0x15d   : > { %v2993_v55 = vadd.f32 %v2983_v40, %v2871_v50  ;;  %v1263_v56 = vpop.f32.mrb[1].mxu1  ;;  %v2355_v59 = vpop.f32.mrb[3].mxu0 }
 0x15e   : > { %v2994_v60 = vadd.f32 %v2345_v49, %v1263_v56 }
 0x15f   : > { %v2400_v61 = vadd.f32 %v2993_v55, %v2621_v51 }
 0x160   : > { %v2399_v63 = vadd.f32 %v2994_v60, %v2621_v51  ;;  %v2874_v0 = vpop.f32.mrb[2].mxu1  ;;  %v2989_v3 = vpop.f32.mrb[4].mxu0 }
 0x161   : > { %2408 = vst.msk [vmem:[%s3800_s30 + $0x8] sm:$0xff] %vm287_vm0, %v2400_v61  ;;  %v2995_v6 = vadd.f32 %v2986_v52, %v2874_v0  ;;  %v1273_v15 = vpop.f32.mrb[3].mxu1  ;;  %v2365_v4 = vpop.f32.mrb[5].mxu0 }
 0x162   : > { %2407 = vst.msk [vmem:[%s3800_s30] sm:$0xff] %vm287_vm0, %v2399_v63  ;;  %v2996_v11 = vadd.f32 %v2355_v59, %v1273_v15 }
 0x163   : > { %v2402_v10 = vadd.f32 %v2995_v6, %v2621_v51 }
 0x164   : > { %v2401_v38 = vadd.f32 %v2996_v11, %v2621_v51  ;;  %v2877_v39 = vpop.f32.mrb[4].mxu1  ;;  %v2992_v20 = vpop.f32.mrb[6].mxu0 }
 0x165   : > { %2410 = vst.msk [vmem:[%s3800_s30 + $0x18] sm:$0xff] %vm287_vm0, %v2402_v10  ;;  %v2997_v45 = vadd.f32 %v2989_v3, %v2877_v39  ;;  %v1283_v12 = vpop.f32.mrb[5].mxu1  ;;  %v2375_v27 = vpop.f32.mrb[7].mxu0 }
 0x166   : > { %2409 = vst.msk [vmem:[%s3800_s30 + $0x10] sm:$0xff] %vm287_vm0, %v2401_v38  ;;  %v2998_v35 = vadd.f32 %v2365_v4, %v1283_v12 }
 0x167   : > { %v2404_v54 = vadd.f32 %v2997_v45, %v2621_v51 }
 0x168   : > { %v2403_v24 = vadd.f32 %v2998_v35, %v2621_v51  ;;  %v2880_v33 = vpop.f32.mrb[6].mxu1 }
 0x169   : > { %2412 = vst.msk [vmem:[%s3800_s30 + $0x28] sm:$0xff] %vm287_vm0, %v2404_v54  ;;  %v2999_v53 = vadd.f32 %v2992_v20, %v2880_v33  ;;  %v1293_v8 = vpop.f32.mrb[7].mxu1 }
 0x16a   : > { %2411 = vst.msk [vmem:[%s3800_s30 + $0x20] sm:$0xff] %vm287_vm0, %v2403_v24  ;;  %v3000_v1 = vadd.f32 %v2375_v27, %v1293_v8 }
 0x16b   : > { %v2406_v21 = vadd.f32 %v2999_v53, %v2621_v51 }
 0x16c   : > { %v2405_v19 = vadd.f32 %v3000_v1, %v2621_v51 }
 0x16d   : > { %2414 = vst.msk [vmem:[%s3800_s30 + $0x38] sm:$0xff] %vm287_vm0, %v2406_v21 }
 0x16e   : > { %2413 = vst.msk [vmem:[%s3800_s30 + $0x30] sm:$0xff] %vm287_vm0, %v2405_v19 }
 0x16f PF: > { %s13_s12 = sadd.s32 1, %s3128_s12  }
 0x170   : > { %p10_p4 = scmp.ge.s32.totalorder %s13_s12, 4  }
 0x172   :  { %12 = sbr.rel (!%p10_p4) target bundleno = 1 (0x1), region = 77 }

</bundles_post_ra>
